<compile_context>
chip_gen: v6e
topology: v6e:2x2x1
jax: 0.10.0
libtpu: 0.0.40
codegen_flags: <defaults>
</compile_context>

<pallas_src>
import functools

import numpy as np
import jax
import jax.numpy as jnp
from jax import lax
from jax.experimental import pallas as pl
from jax.experimental.pallas import tpu as pltpu

_HIGHEST = jax.lax.Precision.HIGHEST


# ---------------------------------------------------------------------------
# Fused kernel
# ---------------------------------------------------------------------------
def _encoder_block_kernel(*refs, B, H, eps, neg_slope, pool):
    if pool:
        (x_ref, w1_ref, b1_ref, g1_ref, be1_ref,
         w2_ref, b2_ref, g2_ref, be2_ref,
         prow_ref, pcol_ref, mtop_ref, mbot_ref,
         pa_ref, pb_ref, o_ref) = refs
    else:
        (x_ref, w1_ref, b1_ref, g1_ref, be1_ref,
         w2_ref, b2_ref, g2_ref, be2_ref,
         prow_ref, pcol_ref, mtop_ref, mbot_ref, o_ref) = refs

    BH = B * H
    x = x_ref[0].astype(jnp.float32)      # (B*H, W*Cin): B images stacked on M
    mtop = mtop_ref[...]                  # (B*H, 1): 0 on each image's row 0
    mbot = mbot_ref[...]                  # (B*H, 1): 0 on each image's row H-1
    prow = prow_ref[...]                  # (B*H, B*H) block-diag row averager
    pcol = pcol_ref[...]                  # (W*C, W*C) 0/1 group membership

    def mm(a, b):
        return jnp.dot(a, b, preferred_element_type=jnp.float32,
                       precision=_HIGHEST)

    def conv3x3(a, w_ref, b_ref):
        # Banded weights fold the kx shift + left/right 'same' padding into
        # the (W*Cin, W*Cout) matrices; the ky shift is a sublane roll of the
        # per-tap matmul result, with the per-image halo masks reproducing
        # the top/bottom zero padding (and blocking cross-image leakage).
        p0 = mm(a, w_ref[0])
        p1 = mm(a, w_ref[1])
        p2 = mm(a, w_ref[2])
        out = pltpu.roll(p0, 1, 0) * mtop              # contribution of row h-1
        out = out + p1                                 # contribution of row h
        out = out + pltpu.roll(p2, BH - 1, 0) * mbot   # contribution of row h+1
        return out + b_ref[...]

    def lrelu(a):
        return jnp.where(a >= 0, a, neg_slope * a)

    def groupnorm(a, gamma, beta):
        # prow entries are 1/(H*W*Cg) inside each image block, so
        # prow @ a @ pcol is the per-(image, group) mean broadcast back to
        # every element; same for the (biased) variance of the centred data.
        mean = mm(mm(prow, a), pcol)
        cent = a - mean
        var = mm(mm(prow, cent * cent), pcol)
        return cent * lax.rsqrt(var + eps) * gamma + beta

    a1 = groupnorm(lrelu(conv3x3(x, w1_ref, b1_ref)), g1_ref[...], be1_ref[...])
    a2 = groupnorm(lrelu(conv3x3(a1, w2_ref, b2_ref)), g2_ref[...], be2_ref[...])

    if pool:
        # AvgPool2d(4, 2) = (block-diag row-pool) @ a2 @ (col-pool); the 1/16
        # scale is folded into pa/pb on the host.
        a2 = mm(mm(pa_ref[...], a2), pb_ref[...])

    o_ref[...] = a2.reshape(o_ref.shape).astype(o_ref.dtype)


# ---------------------------------------------------------------------------
# One-time host-side packing (hoisted out of the call path)
# ---------------------------------------------------------------------------
def _pack_conv_weights(w, W):
    """(3, 3, Cin, Cout) HWIO -> (3, W*Cin, W*Cout) block-banded matrices.

    bd[ky, u*Cin+ci, v*Cout+co] = w[ky, u-v+1, ci, co] when the kx tap is in
    [0, 3), else 0 -- folding the kx shift and the left/right 'same' padding.
    """
    w = np.asarray(w, dtype=np.float32)
    kh, kw, Cin, Cout = w.shape
    u = np.arange(W)[:, None]            # input column
    v = np.arange(W)[None, :]            # output column
    dx = u - v + 1                       # kx tap index
    valid = ((dx >= 0) & (dx < kw)).astype(np.float32)
    dxc = np.clip(dx, 0, kw - 1)
    bd = w[:, dxc, :, :]                                  # (3, W, W, Cin, Cout)
    bd = bd * valid[None, :, :, None, None]
    bd = bd.transpose(0, 1, 3, 2, 4).reshape(kh, W * Cin, W * Cout)
    return jnp.asarray(bd)


def _gn_matrices(B, H, W, C, G):
    Cg = C // G
    member = (np.arange(C)[:, None] // Cg ==
              np.arange(G)[None, :]).astype(np.float32)          # (C, G)
    mg = np.tile(member, (W, 1))                                  # (W*C, G)
    pcol = mg @ mg.T                                              # (W*C, W*C)
    prow = np.kron(np.eye(B, dtype=np.float32),
                   np.ones((H, H), np.float32)) / float(H * W * Cg)
    return jnp.asarray(prow), jnp.asarray(pcol)


def _halo_masks(B, H):
    h = np.tile(np.arange(H), B)
    mtop = (h != 0).astype(np.float32)[:, None]                   # (B*H, 1)
    mbot = (h != H - 1).astype(np.float32)[:, None]
    return jnp.asarray(mtop), jnp.asarray(mbot)


def _pool_matrices(B, H, W, C, K=4, S=2):
    """AvgPool(K, S) as Y = pa @ X @ pb with the 1/K^2 scale folded in."""
    OH = (H - K) // S + 1
    OW = (W - K) // S + 1
    h = np.arange(H)[None, :]
    oh = np.arange(OH)[:, None]
    rowp = ((h >= S * oh) & (h < S * oh + K)).astype(np.float32)  # (OH, H)
    pa = np.kron(np.eye(B, dtype=np.float32), rowp) / float(K)    # (B*OH, B*H)
    wcol = np.arange(W)[:, None]
    ow = np.arange(OW)[None, :]
    colp = ((wcol >= S * ow) & (wcol < S * ow + K)).astype(np.float32)
    pb = np.kron(colp, np.eye(C, dtype=np.float32)) / float(K)    # (W*C, OW*C)
    return jnp.asarray(pa), jnp.asarray(pb), OH, OW


def pack_encoder_block(params, *, H, W, num_groups, is_down_sample,
                       block_batch):
    """Precompute (once, at parameter-init time) all packed kernel constants."""
    Cin = params['w1'].shape[2]
    Cout = params['w1'].shape[3]
    B = int(block_batch)

    def tile_row(v):
        return jnp.asarray(np.tile(np.asarray(v, np.float32), W)[None, :])

    prow, pcol = _gn_matrices(B, H, W, Cout, num_groups)
    mtop, mbot = _halo_masks(B, H)
    packed = {
        'w1': _pack_conv_weights(params['w1'], W),
        'w2': _pack_conv_weights(params['w2'], W),
        'b1': tile_row(params['b1']), 'g1': tile_row(params['g1']),
        'be1': tile_row(params['be1']),
        'b2': tile_row(params['b2']), 'g2': tile_row(params['g2']),
        'be2': tile_row(params['be2']),
        'prow': prow, 'pcol': pcol, 'mtop': mtop, 'mbot': mbot,
    }
    if is_down_sample:
        pa, pb, OH, OW = _pool_matrices(B, H, W, Cout)
        packed['pa'], packed['pb'] = pa, pb
    else:
        OH, OW = H, W
    packed['meta'] = dict(B=B, H=H, W=W, Cin=Cin, Cout=Cout, G=num_groups,
                          OH=OH, OW=OW, pool=bool(is_down_sample))
    return packed


# ---------------------------------------------------------------------------
# Wrappers
# ---------------------------------------------------------------------------
def encoder_block_forward_packed(x_slab, packed):
    """x_slab: (Nb, B*H, W*Cin) slabs.  Returns (Nb, B*OH, OW*Cout) slabs."""
    m = packed['meta']
    B, H, W, Cin, Cout = m['B'], m['H'], m['W'], m['Cin'], m['Cout']
    OH, OW, pool = m['OH'], m['OW'], m['pool']
    Nb = x_slab.shape[0]
    BH, WCin, WCout = B * H, W * Cin, W * Cout
    orows, ocols = (B * OH, OW * Cout) if pool else (B * H, W * Cout)

    def const2d(shape):
        return pl.BlockSpec(shape, lambda n: (0, 0))

    inputs = [x_slab, packed['w1'], packed['b1'], packed['g1'], packed['be1'],
              packed['w2'], packed['b2'], packed['g2'], packed['be2'],
              packed['prow'], packed['pcol'], packed['mtop'], packed['mbot']]
    in_specs = [
        pl.BlockSpec((1, BH, WCin), lambda n: (n, 0, 0)),
        pl.BlockSpec((3, WCin, WCout), lambda n: (0, 0, 0)),
        const2d((1, WCout)), const2d((1, WCout)), const2d((1, WCout)),
        pl.BlockSpec((3, WCout, WCout), lambda n: (0, 0, 0)),
        const2d((1, WCout)), const2d((1, WCout)), const2d((1, WCout)),
        const2d((BH, BH)), const2d((WCout, WCout)),
        const2d((BH, 1)), const2d((BH, 1)),
    ]
    if pool:
        inputs += [packed['pa'], packed['pb']]
        in_specs += [const2d((orows, BH)), const2d((WCout, ocols))]

    kernel = functools.partial(_encoder_block_kernel, B=B, H=H, eps=1e-5,
                               neg_slope=0.01, pool=pool)
    return pl.pallas_call(
        kernel,
        out_shape=jax.ShapeDtypeStruct((Nb, orows, ocols), x_slab.dtype),
        grid=(Nb,),
        in_specs=in_specs,
        out_specs=pl.BlockSpec((1, orows, ocols), lambda n: (n, 0, 0)),
        compiler_params=pltpu.CompilerParams(
            dimension_semantics=("parallel",)),
    )(*inputs)


def encoder_block_forward(x_nchw, packed):
    """NCHW in / NCHW out, matching the PyTorch module.

    When chaining several encoder blocks, keep activations in the packed
    slab layout and call encoder_block_forward_packed directly.
    """
    m = packed['meta']
    B, H, W, Cin, Cout, OH, OW = (m['B'], m['H'], m['W'], m['Cin'], m['Cout'],
                                  m['OH'], m['OW'])
    N = x_nchw.shape[0]
    Nb = -(-N // B)
    x = jnp.transpose(x_nchw, (0, 2, 3, 1))                      # NHWC
    if Nb * B != N:
        pad = jnp.zeros((Nb * B - N, H, W, Cin), x.dtype)
        x = jnp.concatenate([x, pad], axis=0)
    x_slab = x.reshape(Nb, B * H, W * Cin)
    y = encoder_block_forward_packed(x_slab, packed)
    y = y.reshape(Nb * B, OH, OW, Cout)[:N]
    return jnp.transpose(y, (0, 3, 1, 2))


# ---------------------------------------------------------------------------
# Pure-JAX reference (for correctness check only)
# ---------------------------------------------------------------------------
def _ref_forward(x_nchw, p, num_groups, is_down_sample):
    def conv(x, w, b):
        return lax.conv_general_dilated(
            x, w, window_strides=(1, 1), padding=((1, 1), (1, 1)),
            dimension_numbers=('NCHW', 'HWIO', 'NCHW'),
            precision=lax.Precision.HIGHEST) + b[None, :, None, None]

    def lrelu(x):
        return jnp.where(x >= 0, x, 0.01 * x)

    def gn(x, gamma, beta):
        N, C, H, W = x.shape
        G = num_groups
        xg = x.reshape(N, G, C // G, H, W)
        mean = xg.mean(axis=(2, 3, 4), keepdims=True)
        var = ((xg - mean) ** 2).mean(axis=(2, 3, 4), keepdims=True)
        xn = ((xg - mean) / jnp.sqrt(var + 1e-5)).reshape(N, C, H, W)
        return xn * gamma[None, :, None, None] + beta[None, :, None, None]

    y = gn(lrelu(conv(x_nchw, p['w1'], p['b1'])), p['g1'], p['be1'])
    y = gn(lrelu(conv(y, p['w2'], p['b2'])), p['g2'], p['be2'])
    if is_down_sample:
        y = lax.reduce_window(y, 0.0, lax.add,
                              (1, 1, 4, 4), (1, 1, 2, 2), 'VALID') / 16.0
    return y


if __name__ == "__main__":
    # batch=2, in_channels=4, out_channels=8, spatial=16x16, num_groups=2.
    N, Cin, Cout, H, W = 2, 4, 8, 16, 16
    num_groups = 2
    # Images stacked per grid step.  Production sweet spot is 8-32 (so that
    # the matmul M dimension reaches 128-256); capped by the batch here.
    block_batch = max(1, min(N, 256 // H))

    key = jax.random.PRNGKey(0)
    k1, k2, k3, k4, kx = jax.random.split(key, 5)
    fan1 = 3 * 3 * Cin
    fan2 = 3 * 3 * Cout
    params = {
        # conv weights in HWIO layout: (3, 3, Cin, Cout)
        'w1': jax.random.normal(k1, (3, 3, Cin, Cout), jnp.float32) * np.sqrt(2.0 / fan1),
        'b1': jax.random.normal(k2, (Cout,), jnp.float32) * 0.05,
        'w2': jax.random.normal(k3, (3, 3, Cout, Cout), jnp.float32) * np.sqrt(2.0 / fan2),
        'b2': jax.random.normal(k4, (Cout,), jnp.float32) * 0.05,
        # GroupNorm affine params (PyTorch default init: weight=1, bias=0)
        'g1': jnp.ones((Cout,), jnp.float32),
        'be1': jnp.zeros((Cout,), jnp.float32),
        'g2': jnp.ones((Cout,), jnp.float32),
        'be2': jnp.zeros((Cout,), jnp.float32),
    }

    x = jax.random.normal(kx, (N, Cin, H, W), jnp.float32)

    # One-time packing (init-time), then the kernel is reused per call.
    packed_ds = pack_encoder_block(params, H=H, W=W, num_groups=num_groups,
                                   is_down_sample=True, block_batch=block_batch)
    packed_nd = pack_encoder_block(params, H=H, W=W, num_groups=num_groups,
                                   is_down_sample=False, block_batch=block_batch)

    # Down-sampling variant (conv -> lrelu -> gn -> conv -> lrelu -> gn -> pool)
    out_ds = jax.block_until_ready(encoder_block_forward(x, packed_ds))
    ref_ds = jax.block_until_ready(_ref_forward(x, params, num_groups, True))
    assert out_ds.shape == ref_ds.shape, (out_ds.shape, ref_ds.shape)
    np.testing.assert_allclose(np.asarray(out_ds), np.asarray(ref_ds),
                               rtol=1e-4, atol=1e-4)

    # Non-down-sampling variant (no AvgPool)
    out_nd = jax.block_until_ready(encoder_block_forward(x, packed_nd))
    ref_nd = jax.block_until_ready(_ref_forward(x, params, num_groups, False))
    assert out_nd.shape == ref_nd.shape, (out_nd.shape, ref_nd.shape)
    np.testing.assert_allclose(np.asarray(out_nd), np.asarray(ref_nd),
                               rtol=1e-4, atol=1e-4)

    print("KERNEL_OK")
</pallas_src>

<mosaic_0001>
module attributes {stable_mosaic.version = 11 : i64} {
  func.func @_encoder_block_kernel(%arg0: i32, %arg1: memref<1x32x64xf32, #tpu.memory_space<vmem>>, %arg2: memref<3x64x128xf32, #tpu.memory_space<vmem>>, %arg3: memref<1x128xf32, #tpu.memory_space<vmem>>, %arg4: memref<1x128xf32, #tpu.memory_space<vmem>>, %arg5: memref<1x128xf32, #tpu.memory_space<vmem>>, %arg6: memref<3x128x128xf32, #tpu.memory_space<vmem>>, %arg7: memref<1x128xf32, #tpu.memory_space<vmem>>, %arg8: memref<1x128xf32, #tpu.memory_space<vmem>>, %arg9: memref<1x128xf32, #tpu.memory_space<vmem>>, %arg10: memref<32x32xf32, #tpu.memory_space<vmem>>, %arg11: memref<128x128xf32, #tpu.memory_space<vmem>>, %arg12: memref<32x1xf32, #tpu.memory_space<vmem>>, %arg13: memref<32x1xf32, #tpu.memory_space<vmem>>, %arg14: memref<14x32xf32, #tpu.memory_space<vmem>>, %arg15: memref<128x56xf32, #tpu.memory_space<vmem>>, %arg16: memref<1x14x56xf32, #tpu.memory_space<vmem>>) attributes {dimension_semantics = [#tpu.dimension_semantics<parallel>], iteration_bounds = array<i64: 1>, scalar_prefetch = 0 : i64, scratch_operands = 0 : i64, tpu.core_type = #tpu.core_type<tc>, window_params = [{transform_indices = @transform_0, window_bounds = array<i64: 1, 32, 64>}, {pipeline_mode = #tpu.pipeline_mode<synchronous>, transform_indices = @transform_1, window_bounds = array<i64: 3, 64, 128>}, {pipeline_mode = #tpu.pipeline_mode<synchronous>, transform_indices = @transform_2, window_bounds = array<i64: 1, 128>}, {pipeline_mode = #tpu.pipeline_mode<synchronous>, transform_indices = @transform_3, window_bounds = array<i64: 1, 128>}, {pipeline_mode = #tpu.pipeline_mode<synchronous>, transform_indices = @transform_4, window_bounds = array<i64: 1, 128>}, {pipeline_mode = #tpu.pipeline_mode<synchronous>, transform_indices = @transform_5, window_bounds = array<i64: 3, 128, 128>}, {pipeline_mode = #tpu.pipeline_mode<synchronous>, transform_indices = @transform_6, window_bounds = array<i64: 1, 128>}, {pipeline_mode = #tpu.pipeline_mode<synchronous>, transform_indices = @transform_7, window_bounds = array<i64: 1, 128>}, {pipeline_mode = #tpu.pipeline_mode<synchronous>, transform_indices = @transform_8, window_bounds = array<i64: 1, 128>}, {pipeline_mode = #tpu.pipeline_mode<synchronous>, transform_indices = @transform_9, window_bounds = array<i64: 32, 32>}, {pipeline_mode = #tpu.pipeline_mode<synchronous>, transform_indices = @transform_10, window_bounds = array<i64: 128, 128>}, {pipeline_mode = #tpu.pipeline_mode<synchronous>, transform_indices = @transform_11, window_bounds = array<i64: 32, 1>}, {pipeline_mode = #tpu.pipeline_mode<synchronous>, transform_indices = @transform_12, window_bounds = array<i64: 32, 1>}, {pipeline_mode = #tpu.pipeline_mode<synchronous>, transform_indices = @transform_13, window_bounds = array<i64: 14, 32>}, {pipeline_mode = #tpu.pipeline_mode<synchronous>, transform_indices = @transform_14, window_bounds = array<i64: 128, 56>}, {transform_indices = @transform_15, window_bounds = array<i64: 1, 14, 56>}]} {
    %c0 = arith.constant 0 : index
    %c0_0 = arith.constant 0 : index
    %c0_1 = arith.constant 0 : index
    %0 = vector.load %arg1[%c0, %c0_0, %c0_1] : memref<1x32x64xf32, #tpu.memory_space<vmem>>, vector<1x32x64xf32>
    %1 = vector.shape_cast %0 : vector<1x32x64xf32> to vector<32x64xf32>
    %c0_2 = arith.constant 0 : index
    %c0_3 = arith.constant 0 : index
    %2 = vector.load %arg12[%c0_2, %c0_3] : memref<32x1xf32, #tpu.memory_space<vmem>>, vector<32x1xf32>
    %c0_4 = arith.constant 0 : index
    %c0_5 = arith.constant 0 : index
    %3 = vector.load %arg13[%c0_4, %c0_5] : memref<32x1xf32, #tpu.memory_space<vmem>>, vector<32x1xf32>
    %c0_6 = arith.constant 0 : index
    %c0_7 = arith.constant 0 : index
    %4 = vector.load %arg10[%c0_6, %c0_7] : memref<32x32xf32, #tpu.memory_space<vmem>>, vector<32x32xf32>
    %c0_8 = arith.constant 0 : index
    %c0_9 = arith.constant 0 : index
    %5 = vector.load %arg11[%c0_8, %c0_9] : memref<128x128xf32, #tpu.memory_space<vmem>>, vector<128x128xf32>
    %c0_10 = arith.constant 0 : index
    %c0_11 = arith.constant 0 : index
    %c0_12 = arith.constant 0 : index
    %6 = vector.load %arg2[%c0_10, %c0_11, %c0_12] : memref<3x64x128xf32, #tpu.memory_space<vmem>>, vector<1x64x128xf32>
    %7 = vector.shape_cast %6 : vector<1x64x128xf32> to vector<64x128xf32>
    %cst = arith.constant dense<0.000000e+00> : vector<32x128xf32>
    %8 = tpu.matmul %1, %7, %cst {dimension_numbers = #tpu.dot_dimension_numbers<[1], [0], [0], [1], [0, 0, 1, 1], [], []>, precision = #tpu.contract_precision<fp32>} : vector<32x64xf32>, vector<64x128xf32>, vector<32x128xf32> -> vector<32x128xf32>
    %c1 = arith.constant 1 : index
    %c0_13 = arith.constant 0 : index
    %c0_14 = arith.constant 0 : index
    %9 = vector.load %arg2[%c1, %c0_13, %c0_14] : memref<3x64x128xf32, #tpu.memory_space<vmem>>, vector<1x64x128xf32>
    %10 = vector.shape_cast %9 : vector<1x64x128xf32> to vector<64x128xf32>
    %cst_15 = arith.constant dense<0.000000e+00> : vector<32x128xf32>
    %11 = tpu.matmul %1, %10, %cst_15 {dimension_numbers = #tpu.dot_dimension_numbers<[1], [0], [0], [1], [0, 0, 1, 1], [], []>, precision = #tpu.contract_precision<fp32>} : vector<32x64xf32>, vector<64x128xf32>, vector<32x128xf32> -> vector<32x128xf32>
    %c2 = arith.constant 2 : index
    %c0_16 = arith.constant 0 : index
    %c0_17 = arith.constant 0 : index
    %12 = vector.load %arg2[%c2, %c0_16, %c0_17] : memref<3x64x128xf32, #tpu.memory_space<vmem>>, vector<1x64x128xf32>
    %13 = vector.shape_cast %12 : vector<1x64x128xf32> to vector<64x128xf32>
    %cst_18 = arith.constant dense<0.000000e+00> : vector<32x128xf32>
    %14 = tpu.matmul %1, %13, %cst_18 {dimension_numbers = #tpu.dot_dimension_numbers<[1], [0], [0], [1], [0, 0, 1, 1], [], []>, precision = #tpu.contract_precision<fp32>} : vector<32x64xf32>, vector<64x128xf32>, vector<32x128xf32> -> vector<32x128xf32>
    %c1_i32 = arith.constant 1 : i32
    %15 = tpu.dynamic_rotate %8 by %c1_i32 dim 0 : vector<32x128xf32>, i32 -> vector<32x128xf32>
    %16 = vector.broadcast %2 : vector<32x1xf32> to vector<32x128xf32>
    %17 = arith.mulf %15, %16 : vector<32x128xf32>
    %18 = arith.addf %17, %11 : vector<32x128xf32>
    %c31_i32 = arith.constant 31 : i32
    %19 = tpu.dynamic_rotate %14 by %c31_i32 dim 0 : vector<32x128xf32>, i32 -> vector<32x128xf32>
    %20 = vector.broadcast %3 : vector<32x1xf32> to vector<32x128xf32>
    %21 = arith.mulf %19, %20 : vector<32x128xf32>
    %22 = arith.addf %18, %21 : vector<32x128xf32>
    %c0_19 = arith.constant 0 : index
    %c0_20 = arith.constant 0 : index
    %23 = vector.load %arg3[%c0_19, %c0_20] : memref<1x128xf32, #tpu.memory_space<vmem>>, vector<1x128xf32>
    %24 = vector.broadcast %23 : vector<1x128xf32> to vector<32x128xf32>
    %25 = arith.addf %22, %24 : vector<32x128xf32>
    %cst_21 = arith.constant 0.000000e+00 : f32
    %26 = vector.broadcast %cst_21 : f32 to vector<32x128xf32>
    %27 = arith.cmpf oge, %25, %26 : vector<32x128xf32>
    %cst_22 = arith.constant 0.00999999977 : f32
    %28 = vector.broadcast %cst_22 : f32 to vector<32x128xf32>
    %29 = arith.mulf %28, %25 : vector<32x128xf32>
    %30 = arith.select %27, %25, %29 : vector<32x128xi1>, vector<32x128xf32>
    %c0_23 = arith.constant 0 : index
    %c0_24 = arith.constant 0 : index
    %31 = vector.load %arg4[%c0_23, %c0_24] : memref<1x128xf32, #tpu.memory_space<vmem>>, vector<1x128xf32>
    %c0_25 = arith.constant 0 : index
    %c0_26 = arith.constant 0 : index
    %32 = vector.load %arg5[%c0_25, %c0_26] : memref<1x128xf32, #tpu.memory_space<vmem>>, vector<1x128xf32>
    %cst_27 = arith.constant dense<0.000000e+00> : vector<32x128xf32>
    %33 = tpu.matmul %4, %30, %cst_27 {dimension_numbers = #tpu.dot_dimension_numbers<[1], [0], [0], [1], [0, 0, 1, 1], [], []>, precision = #tpu.contract_precision<fp32>} : vector<32x32xf32>, vector<32x128xf32>, vector<32x128xf32> -> vector<32x128xf32>
    %cst_28 = arith.constant dense<0.000000e+00> : vector<32x128xf32>
    %34 = tpu.matmul %33, %5, %cst_28 {dimension_numbers = #tpu.dot_dimension_numbers<[1], [0], [0], [1], [0, 0, 1, 1], [], []>, precision = #tpu.contract_precision<fp32>} : vector<32x128xf32>, vector<128x128xf32>, vector<32x128xf32> -> vector<32x128xf32>
    %35 = arith.subf %30, %34 : vector<32x128xf32>
    %36 = arith.mulf %35, %35 : vector<32x128xf32>
    %cst_29 = arith.constant dense<0.000000e+00> : vector<32x128xf32>
    %37 = tpu.matmul %4, %36, %cst_29 {dimension_numbers = #tpu.dot_dimension_numbers<[1], [0], [0], [1], [0, 0, 1, 1], [], []>, precision = #tpu.contract_precision<fp32>} : vector<32x32xf32>, vector<32x128xf32>, vector<32x128xf32> -> vector<32x128xf32>
    %cst_30 = arith.constant dense<0.000000e+00> : vector<32x128xf32>
    %38 = tpu.matmul %37, %5, %cst_30 {dimension_numbers = #tpu.dot_dimension_numbers<[1], [0], [0], [1], [0, 0, 1, 1], [], []>, precision = #tpu.contract_precision<fp32>} : vector<32x128xf32>, vector<128x128xf32>, vector<32x128xf32> -> vector<32x128xf32>
    %cst_31 = arith.constant 9.99999974E-6 : f32
    %39 = vector.broadcast %cst_31 : f32 to vector<32x128xf32>
    %40 = arith.addf %38, %39 : vector<32x128xf32>
    %41 = math.rsqrt %40 : vector<32x128xf32>
    %42 = arith.mulf %35, %41 : vector<32x128xf32>
    %43 = vector.broadcast %31 : vector<1x128xf32> to vector<32x128xf32>
    %44 = arith.mulf %42, %43 : vector<32x128xf32>
    %45 = vector.broadcast %32 : vector<1x128xf32> to vector<32x128xf32>
    %46 = arith.addf %44, %45 : vector<32x128xf32>
    %c0_32 = arith.constant 0 : index
    %c0_33 = arith.constant 0 : index
    %c0_34 = arith.constant 0 : index
    %47 = vector.load %arg6[%c0_32, %c0_33, %c0_34] : memref<3x128x128xf32, #tpu.memory_space<vmem>>, vector<1x128x128xf32>
    %48 = vector.shape_cast %47 : vector<1x128x128xf32> to vector<128x128xf32>
    %cst_35 = arith.constant dense<0.000000e+00> : vector<32x128xf32>
    %49 = tpu.matmul %46, %48, %cst_35 {dimension_numbers = #tpu.dot_dimension_numbers<[1], [0], [0], [1], [0, 0, 1, 1], [], []>, precision = #tpu.contract_precision<fp32>} : vector<32x128xf32>, vector<128x128xf32>, vector<32x128xf32> -> vector<32x128xf32>
    %c1_36 = arith.constant 1 : index
    %c0_37 = arith.constant 0 : index
    %c0_38 = arith.constant 0 : index
    %50 = vector.load %arg6[%c1_36, %c0_37, %c0_38] : memref<3x128x128xf32, #tpu.memory_space<vmem>>, vector<1x128x128xf32>
    %51 = vector.shape_cast %50 : vector<1x128x128xf32> to vector<128x128xf32>
    %cst_39 = arith.constant dense<0.000000e+00> : vector<32x128xf32>
    %52 = tpu.matmul %46, %51, %cst_39 {dimension_numbers = #tpu.dot_dimension_numbers<[1], [0], [0], [1], [0, 0, 1, 1], [], []>, precision = #tpu.contract_precision<fp32>} : vector<32x128xf32>, vector<128x128xf32>, vector<32x128xf32> -> vector<32x128xf32>
    %c2_40 = arith.constant 2 : index
    %c0_41 = arith.constant 0 : index
    %c0_42 = arith.constant 0 : index
    %53 = vector.load %arg6[%c2_40, %c0_41, %c0_42] : memref<3x128x128xf32, #tpu.memory_space<vmem>>, vector<1x128x128xf32>
    %54 = vector.shape_cast %53 : vector<1x128x128xf32> to vector<128x128xf32>
    %cst_43 = arith.constant dense<0.000000e+00> : vector<32x128xf32>
    %55 = tpu.matmul %46, %54, %cst_43 {dimension_numbers = #tpu.dot_dimension_numbers<[1], [0], [0], [1], [0, 0, 1, 1], [], []>, precision = #tpu.contract_precision<fp32>} : vector<32x128xf32>, vector<128x128xf32>, vector<32x128xf32> -> vector<32x128xf32>
    %c1_i32_44 = arith.constant 1 : i32
    %56 = tpu.dynamic_rotate %49 by %c1_i32_44 dim 0 : vector<32x128xf32>, i32 -> vector<32x128xf32>
    %57 = vector.broadcast %2 : vector<32x1xf32> to vector<32x128xf32>
    %58 = arith.mulf %56, %57 : vector<32x128xf32>
    %59 = arith.addf %58, %52 : vector<32x128xf32>
    %c31_i32_45 = arith.constant 31 : i32
    %60 = tpu.dynamic_rotate %55 by %c31_i32_45 dim 0 : vector<32x128xf32>, i32 -> vector<32x128xf32>
    %61 = vector.broadcast %3 : vector<32x1xf32> to vector<32x128xf32>
    %62 = arith.mulf %60, %61 : vector<32x128xf32>
    %63 = arith.addf %59, %62 : vector<32x128xf32>
    %c0_46 = arith.constant 0 : index
    %c0_47 = arith.constant 0 : index
    %64 = vector.load %arg7[%c0_46, %c0_47] : memref<1x128xf32, #tpu.memory_space<vmem>>, vector<1x128xf32>
    %65 = vector.broadcast %64 : vector<1x128xf32> to vector<32x128xf32>
    %66 = arith.addf %63, %65 : vector<32x128xf32>
    %cst_48 = arith.constant 0.000000e+00 : f32
    %67 = vector.broadcast %cst_48 : f32 to vector<32x128xf32>
    %68 = arith.cmpf oge, %66, %67 : vector<32x128xf32>
    %cst_49 = arith.constant 0.00999999977 : f32
    %69 = vector.broadcast %cst_49 : f32 to vector<32x128xf32>
    %70 = arith.mulf %69, %66 : vector<32x128xf32>
    %71 = arith.select %68, %66, %70 : vector<32x128xi1>, vector<32x128xf32>
    %c0_50 = arith.constant 0 : index
    %c0_51 = arith.constant 0 : index
    %72 = vector.load %arg8[%c0_50, %c0_51] : memref<1x128xf32, #tpu.memory_space<vmem>>, vector<1x128xf32>
    %c0_52 = arith.constant 0 : index
    %c0_53 = arith.constant 0 : index
    %73 = vector.load %arg9[%c0_52, %c0_53] : memref<1x128xf32, #tpu.memory_space<vmem>>, vector<1x128xf32>
    %cst_54 = arith.constant dense<0.000000e+00> : vector<32x128xf32>
    %74 = tpu.matmul %4, %71, %cst_54 {dimension_numbers = #tpu.dot_dimension_numbers<[1], [0], [0], [1], [0, 0, 1, 1], [], []>, precision = #tpu.contract_precision<fp32>} : vector<32x32xf32>, vector<32x128xf32>, vector<32x128xf32> -> vector<32x128xf32>
    %cst_55 = arith.constant dense<0.000000e+00> : vector<32x128xf32>
    %75 = tpu.matmul %74, %5, %cst_55 {dimension_numbers = #tpu.dot_dimension_numbers<[1], [0], [0], [1], [0, 0, 1, 1], [], []>, precision = #tpu.contract_precision<fp32>} : vector<32x128xf32>, vector<128x128xf32>, vector<32x128xf32> -> vector<32x128xf32>
    %76 = arith.subf %71, %75 : vector<32x128xf32>
    %77 = arith.mulf %76, %76 : vector<32x128xf32>
    %cst_56 = arith.constant dense<0.000000e+00> : vector<32x128xf32>
    %78 = tpu.matmul %4, %77, %cst_56 {dimension_numbers = #tpu.dot_dimension_numbers<[1], [0], [0], [1], [0, 0, 1, 1], [], []>, precision = #tpu.contract_precision<fp32>} : vector<32x32xf32>, vector<32x128xf32>, vector<32x128xf32> -> vector<32x128xf32>
    %cst_57 = arith.constant dense<0.000000e+00> : vector<32x128xf32>
    %79 = tpu.matmul %78, %5, %cst_57 {dimension_numbers = #tpu.dot_dimension_numbers<[1], [0], [0], [1], [0, 0, 1, 1], [], []>, precision = #tpu.contract_precision<fp32>} : vector<32x128xf32>, vector<128x128xf32>, vector<32x128xf32> -> vector<32x128xf32>
    %cst_58 = arith.constant 9.99999974E-6 : f32
    %80 = vector.broadcast %cst_58 : f32 to vector<32x128xf32>
    %81 = arith.addf %79, %80 : vector<32x128xf32>
    %82 = math.rsqrt %81 : vector<32x128xf32>
    %83 = arith.mulf %76, %82 : vector<32x128xf32>
    %84 = vector.broadcast %72 : vector<1x128xf32> to vector<32x128xf32>
    %85 = arith.mulf %83, %84 : vector<32x128xf32>
    %86 = vector.broadcast %73 : vector<1x128xf32> to vector<32x128xf32>
    %87 = arith.addf %85, %86 : vector<32x128xf32>
    %c0_59 = arith.constant 0 : index
    %c0_60 = arith.constant 0 : index
    %88 = vector.load %arg14[%c0_59, %c0_60] : memref<14x32xf32, #tpu.memory_space<vmem>>, vector<14x32xf32>
    %cst_61 = arith.constant dense<0.000000e+00> : vector<14x128xf32>
    %89 = tpu.matmul %88, %87, %cst_61 {dimension_numbers = #tpu.dot_dimension_numbers<[1], [0], [0], [1], [0, 0, 1, 1], [], []>, precision = #tpu.contract_precision<fp32>} : vector<14x32xf32>, vector<32x128xf32>, vector<14x128xf32> -> vector<14x128xf32>
    %c0_62 = arith.constant 0 : index
    %c0_63 = arith.constant 0 : index
    %90 = vector.load %arg15[%c0_62, %c0_63] : memref<128x56xf32, #tpu.memory_space<vmem>>, vector<128x56xf32>
    %cst_64 = arith.constant dense<0.000000e+00> : vector<14x56xf32>
    %91 = tpu.matmul %89, %90, %cst_64 {dimension_numbers = #tpu.dot_dimension_numbers<[1], [0], [0], [1], [0, 0, 1, 1], [], []>, precision = #tpu.contract_precision<fp32>} : vector<14x128xf32>, vector<128x56xf32>, vector<14x56xf32> -> vector<14x56xf32>
    %92 = vector.shape_cast %91 : vector<14x56xf32> to vector<1x14x56xf32>
    %c0_65 = arith.constant 0 : index
    %c0_66 = arith.constant 0 : index
    %c0_67 = arith.constant 0 : index
    %93 = vector.load %arg16[%c0_65, %c0_66, %c0_67] : memref<1x14x56xf32, #tpu.memory_space<vmem>>, vector<1x14x56xf32>
    tpu.vector_store %arg16[%c0_65, %c0_66, %c0_67], %92 {strides = array<i32>} : memref<1x14x56xf32, #tpu.memory_space<vmem>>, vector<1x14x56xf32>,
    return
  }
  func.func @transform_0(%arg0: i32) -> (i32, i32, i32) {
    %c0_i32 = arith.constant 0 : i32
    %c0_i32_0 = arith.constant 0 : i32
    %c0_i32_1 = arith.constant 0 : i32
    return %arg0, %c0_i32, %c0_i32_0 : i32, i32, i32
  }
  func.func @transform_1(%arg0: i32) -> (i32, i32, i32) {
    %c0_i32 = arith.constant 0 : i32
    %c0_i32_0 = arith.constant 0 : i32
    %c0_i32_1 = arith.constant 0 : i32
    %c0_i32_2 = arith.constant 0 : i32
    return %c0_i32, %c0_i32_0, %c0_i32_1 : i32, i32, i32
  }
  func.func @transform_2(%arg0: i32) -> (i32, i32) {
    %c0_i32 = arith.constant 0 : i32
    %c0_i32_0 = arith.constant 0 : i32
    %c0_i32_1 = arith.constant 0 : i32
    return %c0_i32, %c0_i32_0 : i32, i32
  }
  func.func @transform_3(%arg0: i32) -> (i32, i32) {
    %c0_i32 = arith.constant 0 : i32
    %c0_i32_0 = arith.constant 0 : i32
    %c0_i32_1 = arith.constant 0 : i32
    return %c0_i32, %c0_i32_0 : i32, i32
  }
  func.func @transform_4(%arg0: i32) -> (i32, i32) {
    %c0_i32 = arith.constant 0 : i32
    %c0_i32_0 = arith.constant 0 : i32
    %c0_i32_1 = arith.constant 0 : i32
    return %c0_i32, %c0_i32_0 : i32, i32
  }
  func.func @transform_5(%arg0: i32) -> (i32, i32, i32) {
    %c0_i32 = arith.constant 0 : i32
    %c0_i32_0 = arith.constant 0 : i32
    %c0_i32_1 = arith.constant 0 : i32
    %c0_i32_2 = arith.constant 0 : i32
    return %c0_i32, %c0_i32_0, %c0_i32_1 : i32, i32, i32
  }
  func.func @transform_6(%arg0: i32) -> (i32, i32) {
    %c0_i32 = arith.constant 0 : i32
    %c0_i32_0 = arith.constant 0 : i32
    %c0_i32_1 = arith.constant 0 : i32
    return %c0_i32, %c0_i32_0 : i32, i32
  }
  func.func @transform_7(%arg0: i32) -> (i32, i32) {
    %c0_i32 = arith.constant 0 : i32
    %c0_i32_0 = arith.constant 0 : i32
    %c0_i32_1 = arith.constant 0 : i32
    return %c0_i32, %c0_i32_0 : i32, i32
  }
  func.func @transform_8(%arg0: i32) -> (i32, i32) {
    %c0_i32 = arith.constant 0 : i32
    %c0_i32_0 = arith.constant 0 : i32
    %c0_i32_1 = arith.constant 0 : i32
    return %c0_i32, %c0_i32_0 : i32, i32
  }
  func.func @transform_9(%arg0: i32) -> (i32, i32) {
    %c0_i32 = arith.constant 0 : i32
    %c0_i32_0 = arith.constant 0 : i32
    %c0_i32_1 = arith.constant 0 : i32
    return %c0_i32, %c0_i32_0 : i32, i32
  }
  func.func @transform_10(%arg0: i32) -> (i32, i32) {
    %c0_i32 = arith.constant 0 : i32
    %c0_i32_0 = arith.constant 0 : i32
    %c0_i32_1 = arith.constant 0 : i32
    return %c0_i32, %c0_i32_0 : i32, i32
  }
  func.func @transform_11(%arg0: i32) -> (i32, i32) {
    %c0_i32 = arith.constant 0 : i32
    %c0_i32_0 = arith.constant 0 : i32
    %c0_i32_1 = arith.constant 0 : i32
    return %c0_i32, %c0_i32_0 : i32, i32
  }
  func.func @transform_12(%arg0: i32) -> (i32, i32) {
    %c0_i32 = arith.constant 0 : i32
    %c0_i32_0 = arith.constant 0 : i32
    %c0_i32_1 = arith.constant 0 : i32
    return %c0_i32, %c0_i32_0 : i32, i32
  }
  func.func @transform_13(%arg0: i32) -> (i32, i32) {
    %c0_i32 = arith.constant 0 : i32
    %c0_i32_0 = arith.constant 0 : i32
    %c0_i32_1 = arith.constant 0 : i32
    return %c0_i32, %c0_i32_0 : i32, i32
  }
  func.func @transform_14(%arg0: i32) -> (i32, i32) {
    %c0_i32 = arith.constant 0 : i32
    %c0_i32_0 = arith.constant 0 : i32
    %c0_i32_1 = arith.constant 0 : i32
    return %c0_i32, %c0_i32_0 : i32, i32
  }
  func.func @transform_15(%arg0: i32) -> (i32, i32, i32) {
    %c0_i32 = arith.constant 0 : i32
    %c0_i32_0 = arith.constant 0 : i32
    %c0_i32_1 = arith.constant 0 : i32
    return %arg0, %c0_i32, %c0_i32_0 : i32, i32, i32
  }
}

</mosaic_0001>

<bundles_post_ra>
// kernel: tpu_custom_call.1
= control target key start
LH: loop header
LB: loop body
LE: loop exit
PB: predicated region body
PF: predicated region fallthrough
CT: control target
= control target key end

     0   :  { %20 = vsyncpa [#allocation3], 0  ;;  %s19824_s0 = inlined_call_operand.hbm [shape: f32[1,32,64], index: 0, kind: input, shape index: {}]   ;;  %s19825_s1 = inlined_call_operand.vmem [shape: f32[3,64,128], index: 1, kind: input, shape index: {}]   ;;  %s19826_s2 = inlined_call_operand.vmem [shape: f32[1,128], index: 2, kind: input, shape index: {}]   ;;  %s19827_s3 = inlined_call_operand.vmem [shape: f32[1,128], index: 3, kind: input, shape index: {}]   ;;  %s19828_s4 = inlined_call_operand.vmem [shape: f32[1,128], index: 4, kind: input, shape index: {}]   ;;  %s19829_s5 = inlined_call_operand.hbm [shape: f32[3,128,128], index: 5, kind: input, shape index: {}]   ;;  %s19830_s6 = inlined_call_operand.vmem [shape: f32[1,128], index: 6, kind: input, shape index: {}]   ;;  %s19831_s7 = inlined_call_operand.vmem [shape: f32[1,128], index: 7, kind: input, shape index: {}]   ;;  %s19832_s8 = inlined_call_operand.vmem [shape: f32[1,128], index: 8, kind: input, shape index: {}]   ;;  %s19833_s9 = inlined_call_operand.hbm [shape: f32[32,32], index: 9, kind: input, shape index: {}]   ;;  %s19834_s10 = inlined_call_operand.hbm [shape: f32[128,128], index: 10, kind: input, shape index: {}]   ;;  %s19835_s11 = inlined_call_operand.vmem [shape: f32[32,1], index: 11, kind: input, shape index: {}]   ;;  %s19836_s12 = inlined_call_operand.vmem [shape: f32[32,1], index: 12, kind: input, shape index: {}]   ;;  %s19837_s13 = inlined_call_operand.vmem [shape: f32[14,32], index: 13, kind: input, shape index: {}]   ;;  %s19838_s14 = inlined_call_operand.vmem [shape: f32[128,56], index: 14, kind: input, shape index: {}]   ;;  %s19839_s15 = inlined_call_operand.vmem [shape: f32[1,14,56], index: 15, kind: output, shape index: {}]  }
   0x1   :  { %21 = vsyncpa [#allocation5], 0 }
   0x2   :  { %22 = vsyncpa [#allocation8], 0  ;;  %s15689_s18 = smov [#allocation4]   ;;  %s15690_s20 = smov [#allocation2]  }
   0x3   :  { %s48_s19 = sshll.u32 %s15689_s18, 4  ;;  %s28_s21 = sshll.u32 %s15690_s20, 4  ;;  %s49_s19 = int_to_ptr.vmem [resolvable:$true] %s48_s19  ;;  %s29_s21 = int_to_ptr.vmem [resolvable:$true] %s28_s21 }
   0x4   :  { %s15611_s22 = scalar_lea.vmem %s49_s19, 6144  ;;  %p15616_p1 = scmp.lt.s32.totalorder %s49_s19, %s49_s19 }
   0x5   :  { %p15612_p0 = scmp.ne.s32.totalorder %s49_s19, %s15611_s22  ;;  %p15617_p2 = scmp.lt.s32.totalorder %s15611_s22, %s15611_s22 }
   0x7   :  { %p15618_p3 = por %p15617_p2, %p15616_p1 }
   0x9   :  { %p15619_p4 = pnand %p15618_p3, %p15612_p0 }
   0xb   :  { %15622 = shalt.err (!%p15619_p4)
}
   0xc   :  { %s15691_s23 = smov 128   ;;  %s15692_s24 = smov 8  }
   0xd   :  { %54 = dma.hbm_to_vmem [thread:$0]  %s19829_s5, 6144, %s49_s19, [#allocation5], %s15691_s23, %s15691_s23, %s15692_s24  }
   0xe   :  { %s15631_s27 = scalar_lea.vmem %s29_s21, 512  ;;  %p15636_p6 = scmp.lt.s32.totalorder %s29_s21, %s29_s21 }
   0xf   :  { %p15632_p5 = scmp.ne.s32.totalorder %s29_s21, %s15631_s27  ;;  %p15637_p7 = scmp.lt.s32.totalorder %s15631_s27, %s15631_s27 }
  0x11   :  { %p15638_p8 = por %p15637_p7, %p15636_p6 }
  0x13   :  { %p15639_p9 = pnand %p15638_p8, %p15632_p5 }
  0x15   :  { %15642 = shalt.err (!%p15639_p9)
}
  0x16   :  { %34 = dma.hbm_to_vmem [thread:$0]  %s19824_s0, 512, %s29_s21, [#allocation3], %s15691_s23, %s15691_s23, %s15692_s24  }
  0x17   :  { %s15693_s30 = smov [#allocation6]   ;;  %s15694_s17 = smov [#allocation7]  }
  0x18   :  { %s66_s16 = sshll.u32 %s15693_s30, 4  ;;  %s78_s18 = sshll.u32 %s15694_s17, 4  ;;  %s67_s16 = int_to_ptr.vmem [resolvable:$true] %s66_s16  ;;  %s79_s18 = int_to_ptr.vmem [resolvable:$true] %s78_s18 }
  0x19   :  { %s15651_s5 = scalar_lea.vmem %s67_s16, 512  ;;  %p15656_p11 = scmp.lt.s32.totalorder %s67_s16, %s67_s16 }
  0x1a   :  { %p15652_p10 = scmp.ne.s32.totalorder %s67_s16, %s15651_s5  ;;  %p15657_p12 = scmp.lt.s32.totalorder %s15651_s5, %s15651_s5 }
  0x1c   :  { %p15658_p13 = por %p15657_p12, %p15656_p11 }
  0x1e   :  { %p15659_p0 = pnand %p15658_p13, %p15652_p10 }
  0x20   :  { %15662 = shalt.err (!%p15659_p0)
}
  0x21   :  { %72 = dma.hbm_to_vmem [thread:$0]  %s19833_s9, 512, %s67_s16, [#allocation5], %s15691_s23, %s15691_s23, %s15692_s24  }
  0x22   :  { %s15671_s0 = scalar_lea.vmem %s79_s18, 2048  ;;  %p15676_p2 = scmp.lt.s32.totalorder %s79_s18, %s79_s18 }
  0x23   :  { %p15672_p1 = scmp.ne.s32.totalorder %s79_s18, %s15671_s0  ;;  %p15677_p3 = scmp.lt.s32.totalorder %s15671_s0, %s15671_s0 }
  0x25   :  { %p15678_p4 = por %p15677_p3, %p15676_p2 }
  0x27   :  { %p15679_p5 = pnand %p15678_p4, %p15672_p1 }
  0x29   :  { %15682 = shalt.err (!%p15679_p5)
}
  0x2a   :  { %84 = dma.hbm_to_vmem [thread:$0]  %s19834_s10, 2048, %s79_s18, [#allocation8], %s15691_s23, %s15691_s23, %s15692_s24  }
  0x2b   :  { %15683 = dma.done.wait [#allocation3], 512  }
  0x2c   :  { %15684 = vsyncadd [#allocation3], 4294966784 }
  0x2d   :  { %15685 = dma.done.wait [#allocation5], 6656  }
  0x2e   :  { %15686 = vsyncadd [#allocation5], 4294960640 }
  0x2f   :  { %15687 = dma.done.wait [#allocation8], 2048  }
  0x30   :  { %15688 = vsyncadd [#allocation8], 4294965248  ;;  %v144_v0 = vld [vmem:[%s19825_s1 + $0x38] sm:$0xff]  ;;  %v143_v1 = vld [vmem:[%s19825_s1 + $0x30] sm:$0xff]  ;;  %vm145_vm0 = vcmask 523264   ;;  %vm2275_vm1 = vcmask 261120  }
  0x31   :  { %v142_v2 = vld [vmem:[%s19825_s1 + $0x28] sm:$0xff]  ;;  %v15809_v3 = vand.u32 4294901760, %v144_v0  ;;  %v15811_v4 = vand.u32 4294901760, %v143_v1  ;;  %v141_v6 = vld [vmem:[%s19825_s1 + $0x20] sm:$0xff]  ;;  %v140_v7 = vld [vmem:[%s19825_s1 + $0x18] sm:$0xff]  ;;  %vm11551_vm12 = vcmask 455680  }
  0x32   :  { %v15813_v5 = vand.u32 4294901760, %v142_v2  ;;  %v139_v8 = vld [vmem:[%s19825_s1 + $0x10] sm:$0xff]  ;;  %v15824_v9 = vand.u32 4294901760, %v141_v6  ;;  %v15826_v10 = vand.u32 4294901760, %v140_v7  ;;  %v138_v12 = vld [vmem:[%s19825_s1 + $0x8] sm:$0xff]  ;;  %v137_v13 = vld [vmem:[%s19825_s1] sm:$0xff] }
  0x33   :  { %v15828_v11 = vand.u32 4294901760, %v139_v8  ;;  %v105_v14 = vld [vmem:[#allocation2] sm:$0xff]  ;;  %12974 = vmatprep.subr.mxu0 %v15809_v3  ;;  %v15838_v15 = vsub.f32 %v144_v0, %v15809_v3  ;;  %v15841_v16 = vsub.f32 %v143_v1, %v15811_v4  ;;  %v15843_v17 = vand.u32 4294901760, %v138_v12  ;;  %v106_v19 = vld [vmem:[#allocation2 + $0x8] sm:$0xff]  ;;  %v107_v37 = vld [vmem:[#allocation2 + $0x10] sm:$0xff] }
  0x34   :  { %v15846_v18 = vsub.f32 %v142_v2, %v15813_v5  ;;  %12975 = vmatpush3.msra.mxu0 %v15809_v3  ;;  %v15849_v20 = vand.u32 4294901760, %v137_v13  ;;  %v15852_v21 = vsub.f32 %v141_v6, %v15824_v9  ;;  %v147_v22 = vsel %vm145_vm0, %v105_v14, 0  ;;  %v108_v42 = vld [vmem:[#allocation2 + $0x18] sm:$0xff] }
  0x35   :  { %v15856_v23 = vsub.f32 %v140_v7, %v15826_v10  ;;  %12976 = vmatprep.subr.mxu0 %v15811_v4  ;;  %v15860_v24 = vand.u32 4294901760, %v15838_v15  ;;  %v15863_v25 = vand.u32 4294901760, %v15841_v16  ;;  %v15868_v27 = vand.u32 4294901760, %v147_v22 }
  0x36   :  { %v15866_v26 = vand.u32 4294901760, %v15846_v18  ;;  %12977 = vmatpush3.msra.mxu0 %v15811_v4  ;;  %v15872_v28 = vand.u32 4294901760, %v15852_v21  ;;  %v150_v30 = vsel %vm145_vm0, %v106_v19, 0  ;;  %v15879_v31 = vsub.f32 %v139_v8, %v15828_v11 }
  0x37   :  { %v15875_v29 = vand.u32 4294901760, %v15856_v23  ;;  %12978 = vmatprep.subr.mxu0 %v15813_v5  ;;  %v291_v32 = vsub.f32 %v15838_v15, %v15860_v24  ;;  %v298_v33 = vsub.f32 %v15841_v16, %v15863_v25  ;;  %v15889_v35 = vsub.f32 %v147_v22, %v15868_v27  ;;  %13012 = vmatprep.mubr.f32.mxu1 %v15868_v27 }
  0x38   :  { %v305_v34 = vsub.f32 %v15846_v18, %v15866_v26  ;;  %12979 = vmatpush3.msra.mxu0 %v15813_v5  ;;  %v15892_v36 = vand.u32 4294901760, %v150_v30  ;;  %v312_v40 = vsub.f32 %v15852_v21, %v15872_v28  ;;  %v15908_v46 = vand.u32 4294901760, %v15879_v31 }
  0x39   :  { %12980 = vmatprep.subr.mxu0 %v15824_v9  ;;  %v292_v38 = vand.u32 4294901760, %v291_v32  ;;  %v299_v39 = vand.u32 4294901760, %v298_v33  ;;  %v15899_v41 = vand.u32 4294901760, %v15889_v35  ;;  %v319_v44 = vsub.f32 %v15856_v23, %v15875_v29  ;;  %v11561_v33 = vld [vmem:[%s19825_s1 + $0x48] sm:$0xff] }
  0x3a   :  { %12981 = vmatpush3.msra.mxu0 %v15824_v9  ;;  %v306_v43 = vand.u32 4294901760, %v305_v34  ;;  %v15905_v45 = vsub.f32 %v150_v30, %v15892_v36  ;;  %v15914_v48 = vsub.f32 %v138_v12, %v15843_v17  ;;  %v15917_v49 = vsub.f32 %v137_v13, %v15849_v20  ;;  %v11562_v30 = vld [vmem:[%s19825_s1 + $0x50] sm:$0xff] }
  0x3b   :  { %12982 = vmatprep.subr.mxu0 %v15826_v10  ;;  %12996 = vmatprep.subr.mxu1 %v292_v38  ;;  %v234_v47 = vsub.f32 %v15889_v35, %v15899_v41  ;;  %v153_v50 = vsel %vm145_vm0, %v107_v37, 0  ;;  %v156_v53 = vsel %vm145_vm0, %v108_v42, 0  ;;  %v313_v54 = vand.u32 4294901760, %v312_v40 }
  0x3c   :  { %12983 = vmatpush3.msra.mxu0 %v15826_v10  ;;  %12997 = vmatpush3.msra.mxu1 %v292_v38  ;;  %v15922_v51 = vand.u32 4294901760, %v15905_v45  ;;  %v15924_v52 = vand.u32 4294901760, %v153_v50  ;;  %v15929_v55 = vand.u32 4294901760, %v15914_v48  ;;  %v15931_v56 = vand.u32 4294901760, %v156_v53  ;;  %v11560_v38 = vld [vmem:[%s19825_s1 + $0x40] sm:$0xff] }
  0x3d   :  { %12984 = vmatprep.subr.mxu0 %v15828_v11  ;;  %12998 = vmatprep.subr.mxu1 %v299_v39  ;;  %v326_v58 = vsub.f32 %v15879_v31, %v15908_v46  ;;  %v15939_v59 = vand.u32 4294901760, %v15917_v49  ;;  %v15942_v60 = vand.u32 4294901760, %v234_v47  ;;  %v320_v61 = vand.u32 4294901760, %v319_v44 }
  0x3e   :  { %12985 = vmatpush3.msra.mxu0 %v15828_v11  ;;  %12999 = vmatpush3.msra.mxu1 %v299_v39  ;;  %v244_v57 = vsub.f32 %v15905_v45, %v15922_v51  ;;  %v15945_v62 = vsub.f32 %v153_v50, %v15924_v52  ;;  %v333_v0 = vsub.f32 %v15914_v48, %v15929_v55  ;;  %v16097_v34 = vand.u32 4294901760, %v11562_v30 }
  0x3f   :  { %12986 = vmatprep.subr.mxu0 %v15843_v17  ;;  %13000 = vmatprep.subr.mxu1 %v306_v43  ;;  %v15954_v1 = vsub.f32 %v156_v53, %v15931_v56  ;;  %v327_v2 = vand.u32 4294901760, %v326_v58  ;;  %v340_v6 = vsub.f32 %v15917_v49, %v15939_v59  ;;  %v16111_v39 = vand.u32 4294901760, %v11561_v33 }
  0x40   :  { %12987 = vmatpush3.msra.mxu0 %v15843_v17  ;;  %13001 = vmatpush3.msra.mxu1 %v306_v43  ;;  %v15948_v63 = vand.u32 4294901760, %v244_v57  ;;  %v15961_v7 = vand.u32 4294901760, %v15945_v62  ;;  %v334_v8 = vand.u32 4294901760, %v333_v0  ;;  %vm11549_vm13 = vcmask 457728  }
  0x41   :  { %12988 = vmatprep.subr.mxu0 %v15849_v20  ;;  %13002 = vmatprep.subr.mxu1 %v313_v54  ;;  %v15967_v12 = vand.u32 4294901760, %v15954_v1  ;;  %v341_v13 = vand.u32 4294901760, %v340_v6 }
  0x42   :  { %12989 = vmatpush3.msra.mxu0 %v15849_v20  ;;  %13003 = vmatpush3.msra.mxu1 %v313_v54  ;;  %v254_v14 = vsub.f32 %v15945_v62, %v15961_v7 }
  0x43   :  { %12990 = vmatprep.mubr.f32.mxu0 %v15942_v60  ;;  %13004 = vmatprep.subr.mxu1 %v320_v61 }
  0x44   :  { %13018 = vmatprep.subr.mxu0 %v15838_v15  ;;  %12991 = vmatmul.mubr.f32.vlgmr.msra.gmra.mxu0 %v15948_v63  ;;  %v15979_v19 = vand.u32 4294901760, %v254_v14 }
  0x45   :  { %13005 = vmatpush3.msra.mxu1 %v320_v61  ;;  %13019 = vmatpush3.msra.mxu0 %v15838_v15  ;;  %v264_v15 = vsub.f32 %v15954_v1, %v15967_v12 }
  0x46   :  { %13006 = vmatprep.subr.mxu1 %v327_v2  ;;  %13020 = vmatprep.subr.mxu0 %v15841_v16 }
  0x47   :  { %13007 = vmatpush3.msra.mxu1 %v327_v2  ;;  %13021 = vmatpush3.msra.mxu0 %v15841_v16  ;;  %v15985_v16 = vand.u32 4294901760, %v264_v15 }
  0x48   :  { %13008 = vmatprep.subr.mxu1 %v334_v8  ;;  %13022 = vmatprep.subr.mxu0 %v15846_v18 }
  0x49   :  { %13009 = vmatpush3.msra.mxu1 %v334_v8  ;;  %13023 = vmatpush3.msra.mxu0 %v15846_v18  ;;  %v11567_v18 = vld [vmem:[%s19825_s1 + $0x78] sm:$0xff] }
  0x4a   :  { %13010 = vmatprep.subr.mxu1 %v341_v13  ;;  %13024 = vmatprep.subr.mxu0 %v15852_v21  ;;  %v16035_v22 = vand.u32 4294901760, %v11567_v18 }
  0x4b   :  { %13011 = vmatpush3.msra.mxu1 %v341_v13  ;;  %13025 = vmatpush3.msra.mxu0 %v15852_v21  ;;  %v11566_v21 = vld [vmem:[%s19825_s1 + $0x70] sm:$0xff] }
  0x4c   :  { %13013 = vmatmul.mubr.f32.vlgmr.msra.gmra.mxu1 %v15892_v36  ;;  %13026 = vmatprep.subr.mxu0 %v15856_v23 }
  0x4d   :  { %13040 = vmatprep.subr.mxu1 %v15809_v3  ;;  %13027 = vmatpush3.msra.mxu0 %v15856_v23  ;;  %v16041_v23 = vand.u32 4294901760, %v11566_v21 }
  0x4e   :  { %13041 = vmatpush3.msra.mxu1 %v15809_v3  ;;  %13028 = vmatprep.subr.mxu0 %v15879_v31 }
  0x4f   :  { %13042 = vmatprep.subr.mxu1 %v15811_v4  ;;  %12993 = vmatprep.mubr.f32.mxu0 %v15979_v19 }
  0x50   :  { %13029 = vmatpush3.msra.mxu0 %v15879_v31  ;;  %13043 = vmatpush3.msra.mxu1 %v15811_v4 }
  0x51   :  { %12994 = vmatmul.mubr.f32.gmra.mxu0 %v15985_v16  ;;  %13030 = vmatprep.subr.mxu0 %v15914_v48 }
  0x52   :  { %13044 = vmatprep.subr.mxu1 %v15813_v5  ;;  %13031 = vmatpush3.msra.mxu0 %v15914_v48 }
  0x53   :  { %13045 = vmatpush3.msra.mxu1 %v15813_v5  ;;  %13032 = vmatprep.subr.mxu0 %v15917_v49 }
  0x54   :  { %13046 = vmatprep.subr.mxu1 %v15824_v9  ;;  %13033 = vmatpush3.msra.mxu0 %v15917_v49  ;;  %v16143_v49 = vsub.f32 %v11561_v33, %v16111_v39 }
  0x55   :  { %13034 = vmatprep.mubr.f32.mxu0 %v15889_v35  ;;  %13047 = vmatpush3.msra.mxu1 %v15824_v9 }
  0x56   :  { %13015 = vmatprep.mubr.f32.mxu1 %v15924_v52  ;;  %13035 = vmatmul.mubr.f32.vlgmr.msra.gmra.mxu0 %v15905_v45  ;;  %v16162_v58 = vand.u32 4294901760, %v16143_v49 }
  0x57   :  { %13048 = vmatprep.subr.mxu1 %v15826_v10  ;;  %13062 = vmatprep.subr.mxu0 %v15860_v24 }
  0x58   :  { %13016 = vmatmul.mubr.f32.gmra.mxu1 %v15931_v56  ;;  %13063 = vmatpush3.msra.mxu0 %v15860_v24  ;;  %v11565_v24 = vld [vmem:[%s19825_s1 + $0x68] sm:$0xff]  ;;  %v1008_v6 = vsub.f32 %v16143_v49, %v16162_v58 }
  0x59   :  { %13049 = vmatpush3.msra.mxu1 %v15826_v10  ;;  %13064 = vmatprep.subr.mxu0 %v15863_v25 }
  0x5a   :  { %13050 = vmatprep.subr.mxu1 %v15828_v11  ;;  %13037 = vmatprep.mubr.f32.mxu0 %v15945_v62  ;;  %v1009_v14 = vand.u32 4294901760, %v1008_v6 }
  0x5b   :  { %13051 = vmatpush3.msra.mxu1 %v15828_v11  ;;  %13065 = vmatpush3.msra.mxu0 %v15863_v25  ;;  %v16054_v25 = vsub.f32 %v11567_v18, %v16035_v22  ;;  %v11575_v18 = vld [vmem:[%s19825_s1 + $0xb8] sm:$0xff] }
  0x5c   :  { %13038 = vmatmul.mubr.f32.gmra.mxu0 %v15954_v1  ;;  %13052 = vmatprep.subr.mxu1 %v15843_v17 }
  0x5d   :  { %13066 = vmatprep.subr.mxu0 %v15866_v26  ;;  %13053 = vmatpush3.msra.mxu1 %v15843_v17 }
  0x5e   :  { %13067 = vmatpush3.msra.mxu0 %v15866_v26  ;;  %13054 = vmatprep.subr.mxu1 %v15849_v20  ;;  %v16058_v26 = vand.u32 4294901760, %v11565_v24 }
  0x5f   :  { %13068 = vmatprep.subr.mxu0 %v15872_v28  ;;  %13055 = vmatpush3.msra.mxu1 %v15849_v20 }
  0x60   :  { %13056 = vmatprep.mubr.f32.mxu1 %v15899_v41  ;;  %13069 = vmatpush3.msra.mxu0 %v15872_v28  ;;  %v16066_v28 = vsub.f32 %v11566_v21, %v16041_v23  ;;  %v16085_v32 = vsub.f32 %v11565_v24, %v16058_v26  ;;  %v11574_v21 = vld [vmem:[%s19825_s1 + $0xb0] sm:$0xff]  ;;  %v16243_v24 = vand.u32 4294901760, %v11575_v18 }
  0x61   :  { %13057 = vmatmul.mubr.f32.vlgmr.msra.gmra.mxu1 %v15922_v51  ;;  %13070 = vmatprep.subr.mxu0 %v15875_v29 }
  0x62   :  { %13084 = vmatprep.subr.mxu1 %v15809_v3  ;;  %13071 = vmatpush3.msra.mxu0 %v15875_v29  ;;  %v16114_v40 = vand.u32 4294901760, %v16085_v32 }
  0x63   :  { %13085 = vmatpush3.msra.mxu1 %v15809_v3  ;;  %13072 = vmatprep.subr.mxu0 %v15908_v46  ;;  %v11564_v3 = vld [vmem:[%s19825_s1 + $0x60] sm:$0xff] }
  0x64   :  { %13086 = vmatprep.subr.mxu1 %v15811_v4  ;;  %13059 = vmatprep.mubr.f32.mxu1 %v15961_v7  ;;  %v16070_v29 = vand.u32 4294901760, %v11564_v3 }
  0x65   :  { %13073 = vmatpush3.msra.mxu0 %v15908_v46  ;;  %13087 = vmatpush3.msra.mxu1 %v15811_v4  ;;  %v11563_v4 = vld [vmem:[%s19825_s1 + $0x58] sm:$0xff]  ;;  %v16131_v46 = vsub.f32 %v11562_v30, %v16097_v34 }
  0x66   :  { %13060 = vmatmul.mubr.f32.gmra.mxu1 %v15967_v12  ;;  %13074 = vmatprep.subr.mxu0 %v15929_v55  ;;  %v16082_v31 = vand.u32 4294901760, %v11563_v4  ;;  %v16100_v37 = vsub.f32 %v11564_v3, %v16070_v29  ;;  %v16249_v3 = vand.u32 4294901760, %v11574_v21 }
  0x67   :  { %13088 = vmatprep.subr.mxu1 %v15813_v5  ;;  %13075 = vmatpush3.msra.mxu0 %v15929_v55  ;;  %v16152_v53 = vand.u32 4294901760, %v16131_v46 }
  0x68   :  { %13089 = vmatpush3.msra.mxu1 %v15813_v5  ;;  %13076 = vmatprep.subr.mxu0 %v15939_v59  ;;  %v16075_v5 = vand.u32 4294901760, %v16054_v25  ;;  %v16117_v42 = vsub.f32 %v11563_v4, %v16082_v31  ;;  %v16128_v44 = vand.u32 4294901760, %v16100_v37  ;;  %v16262_v4 = vsub.f32 %v11575_v18, %v16243_v24  ;;  %v117_v18 = vld [vmem:[#allocation6] sm:$0xff] }
  0x69   :  { %13090 = vmatprep.subr.mxu1 %v15824_v9  ;;  %13077 = vmatpush3.msra.mxu0 %v15939_v59  ;;  %v1001_v61 = vsub.f32 %v16131_v46, %v16152_v53 }
  0x6a   :  { %13078 = vmatprep.mubr.f32.mxu0 %v15868_v27  ;;  %13091 = vmatpush3.msra.mxu1 %v15824_v9  ;;  %v16090_v9 = vand.u32 4294901760, %v16066_v28  ;;  %v16140_v48 = vand.u32 4294901760, %v16117_v42 }
  0x6b   :  { %13079 = vmatmul.mubr.f32.vlgmr.msra.gmra.mxu0 %v15892_v36  ;;  %13092 = vmatprep.subr.mxu1 %v15826_v10  ;;  %v1002_v8 = vand.u32 4294901760, %v1001_v61 }
  0x6c   :  { %13106 = vmatprep.subr.mxu0 %v16035_v22  ;;  %13093 = vmatpush3.msra.mxu1 %v15826_v10  ;;  %v966_v10 = vsub.f32 %v16054_v25, %v16075_v5  ;;  %v973_v43 = vsub.f32 %v16066_v28, %v16090_v9  ;;  %v994_v57 = vsub.f32 %v16117_v42, %v16140_v48 }
  0x6d   :  { %13107 = vmatpush3.msra.mxu0 %v16035_v22  ;;  %13094 = vmatprep.subr.mxu1 %v15828_v11 }
  0x6e   :  { %13108 = vmatprep.subr.mxu0 %v16041_v23  ;;  %13081 = vmatprep.mubr.f32.mxu0 %v15924_v52  ;;  %v967_v47 = vand.u32 4294901760, %v966_v10  ;;  %v974_v50 = vand.u32 4294901760, %v973_v43  ;;  %v995_v2 = vand.u32 4294901760, %v994_v57 }
  0x6f   :  { %13095 = vmatpush3.msra.mxu1 %v15828_v11  ;;  %13109 = vmatpush3.msra.mxu0 %v16041_v23  ;;  %v16125_v11 = vand.u32 4294901760, %v11560_v38 }
  0x70   :  { %13082 = vmatmul.mubr.f32.gmra.mxu0 %v15931_v56  ;;  %13096 = vmatprep.subr.mxu1 %v15843_v17 }
  0x71   :  { %13110 = vmatprep.subr.mxu0 %v16058_v26  ;;  %13097 = vmatpush3.msra.mxu1 %v15843_v17  ;;  %v980_v17 = vsub.f32 %v16085_v32, %v16114_v40  ;;  %v16155_v54 = vsub.f32 %v11560_v38, %v16125_v11 }
  0x72   :  { %13111 = vmatpush3.msra.mxu0 %v16058_v26  ;;  %13098 = vmatprep.subr.mxu1 %v15849_v20 }
  0x73   :  { %13112 = vmatprep.subr.mxu0 %v16070_v29  ;;  %13099 = vmatpush3.msra.mxu1 %v15849_v20  ;;  %v987_v20 = vsub.f32 %v16100_v37, %v16128_v44  ;;  %v981_v55 = vand.u32 4294901760, %v980_v17  ;;  %v16169_v0 = vand.u32 4294901760, %v16155_v54 }
  0x74   :  { %13100 = vmatprep.mubr.f32.mxu1 %v15868_v27  ;;  %13113 = vmatpush3.msra.mxu0 %v16070_v29 }
  0x75   :  { %13101 = vmatmul.mubr.f32.vlgmr.msra.gmra.mxu1 %v15892_v36  ;;  %13114 = vmatprep.subr.mxu0 %v16082_v31  ;;  %v988_v59 = vand.u32 4294901760, %v987_v20  ;;  %v1015_v13 = vsub.f32 %v16155_v54, %v16169_v0 }
  0x76   :  { %13128 = vmatprep.subr.mxu1 %v967_v47  ;;  %13115 = vmatpush3.msra.mxu0 %v16082_v31 }
  0x77   :  { %13129 = vmatpush3.msra.mxu1 %v967_v47  ;;  %13116 = vmatprep.subr.mxu0 %v16097_v34  ;;  %v1016_v15 = vand.u32 4294901760, %v1015_v13 }
  0x78   :  { %13130 = vmatprep.subr.mxu1 %v974_v50  ;;  %13103 = vmatprep.mubr.f32.mxu1 %v15924_v52 }
  0x79   :  { %13117 = vmatpush3.msra.mxu0 %v16097_v34  ;;  %13131 = vmatpush3.msra.mxu1 %v974_v50 }
  0x7a   :  { %13104 = vmatmul.mubr.f32.gmra.mxu1 %v15931_v56  ;;  %13118 = vmatprep.subr.mxu0 %v16111_v39 }
  0x7b   :  { %13132 = vmatprep.subr.mxu1 %v981_v55  ;;  %13119 = vmatpush3.msra.mxu0 %v16111_v39 }
  0x7c   :  { %13133 = vmatpush3.msra.mxu1 %v981_v55  ;;  %13120 = vmatprep.subr.mxu0 %v16125_v11 }
  0x7d   :  { %13134 = vmatprep.subr.mxu1 %v988_v59  ;;  %13121 = vmatpush3.msra.mxu0 %v16125_v11 }
  0x7e   :  { %13135 = vmatpush3.msra.mxu1 %v988_v59  ;;  %13122 = vmatprep.mubr.f32.mxu0 %v15942_v60 }
  0x7f   :  { %13136 = vmatprep.subr.mxu1 %v995_v2  ;;  %13150 = vmatprep.subr.mxu0 %v16054_v25 }
  0x80   :  { %13123 = vmatmul.mubr.f32.vlgmr.msra.gmra.mxu0 %v15948_v63  ;;  %13137 = vmatpush3.msra.mxu1 %v995_v2 }
  0x81   :  { %13151 = vmatpush3.msra.mxu0 %v16054_v25  ;;  %13138 = vmatprep.subr.mxu1 %v1002_v8  ;;  %v11573_v25 = vld [vmem:[%s19825_s1 + $0xa8] sm:$0xff] }
  0x82   :  { %13152 = vmatprep.subr.mxu0 %v16066_v28  ;;  %13139 = vmatpush3.msra.mxu1 %v1002_v8 }
  0x83   :  { %13153 = vmatpush3.msra.mxu0 %v16066_v28  ;;  %13140 = vmatprep.subr.mxu1 %v1009_v14  ;;  %v16266_v28 = vand.u32 4294901760, %v11573_v25 }
  0x84   :  { %13154 = vmatprep.subr.mxu0 %v16085_v32  ;;  %13141 = vmatpush3.msra.mxu1 %v1009_v14 }
  0x85   :  { %13155 = vmatpush3.msra.mxu0 %v16085_v32  ;;  %13142 = vmatprep.subr.mxu1 %v1016_v15  ;;  %v11570_v32 = vld [vmem:[%s19825_s1 + $0x90] sm:$0xff]  ;;  %v16293_v33 = vsub.f32 %v11573_v25, %v16266_v28 }
  0x86   :  { %13156 = vmatprep.subr.mxu0 %v16100_v37  ;;  %13143 = vmatpush3.msra.mxu1 %v1016_v15  ;;  %v16305_v10 = vand.u32 4294901760, %v11570_v32 }
  0x87   :  { %13144 = vmatprep.mubr.f32.mxu1 %v15868_v27  ;;  %13157 = vmatpush3.msra.mxu0 %v16100_v37  ;;  %v11569_v37 = vld [vmem:[%s19825_s1 + $0x88] sm:$0xff]  ;;  %v16322_v43 = vand.u32 4294901760, %v16293_v33 }
  0x88   :  { %13145 = vmatmul.mubr.f32.vlgmr.msra.gmra.mxu1 %v15892_v36  ;;  %13158 = vmatprep.subr.mxu0 %v16117_v42  ;;  %v16339_v17 = vsub.f32 %v11570_v32, %v16305_v10 }
  0x89   :  { %13172 = vmatprep.subr.mxu1 %v16035_v22  ;;  %13159 = vmatpush3.msra.mxu0 %v16117_v42  ;;  %v16319_v42 = vand.u32 4294901760, %v11569_v37 }
  0x8a   :  { %13173 = vmatpush3.msra.mxu1 %v16035_v22  ;;  %13160 = vmatprep.subr.mxu0 %v16131_v46 }
  0x8b   :  { %13174 = vmatprep.subr.mxu1 %v16041_v23  ;;  %13125 = vmatprep.mubr.f32.mxu0 %v15979_v19  ;;  %v16351_v50 = vsub.f32 %v11569_v37, %v16319_v42 }
  0x8c   :  { %13161 = vmatpush3.msra.mxu0 %v16131_v46  ;;  %13175 = vmatpush3.msra.mxu1 %v16041_v23 }
  0x8d   :  { %13126 = vmatmul.mubr.f32.gmra.mxu0 %v15985_v16  ;;  %13162 = vmatprep.subr.mxu0 %v16143_v49 }
  0x8e   :  { %13176 = vmatprep.subr.mxu1 %v16058_v26  ;;  %13163 = vmatpush3.msra.mxu0 %v16143_v49 }
  0x8f   :  { %13177 = vmatpush3.msra.mxu1 %v16058_v26  ;;  %13164 = vmatprep.subr.mxu0 %v16155_v54 }
  0x90   :  { %13178 = vmatprep.subr.mxu1 %v16070_v29  ;;  %13165 = vmatpush3.msra.mxu0 %v16155_v54 }
  0x91   :  { %13166 = vmatprep.mubr.f32.mxu0 %v15889_v35  ;;  %13179 = vmatpush3.msra.mxu1 %v16070_v29 }
  0x92   :  { %13147 = vmatprep.mubr.f32.mxu1 %v15924_v52  ;;  %13167 = vmatmul.mubr.f32.vlgmr.msra.gmra.mxu0 %v15905_v45 }
  0x93   :  { %13180 = vmatprep.subr.mxu1 %v16082_v31  ;;  %13194 = vmatprep.subr.mxu0 %v16075_v5 }
  0x94   :  { %13148 = vmatmul.mubr.f32.gmra.mxu1 %v15931_v56  ;;  %13195 = vmatpush3.msra.mxu0 %v16075_v5  ;;  %v16274_v5 = vsub.f32 %v11574_v21, %v16249_v3  ;;  %v2277_v21 = vsel %vm2275_vm1, %v117_v18, 0 }
  0x95   :  { %13181 = vmatpush3.msra.mxu1 %v16082_v31  ;;  %13196 = vmatprep.subr.mxu0 %v16090_v9 }
  0x96   :  { %13182 = vmatprep.subr.mxu1 %v16097_v34  ;;  %13169 = vmatprep.mubr.f32.mxu0 %v15945_v62 }
  0x97   :  { %13183 = vmatpush3.msra.mxu1 %v16097_v34  ;;  %13197 = vmatpush3.msra.mxu0 %v16090_v9 }
  0x98   :  { %13170 = vmatmul.mubr.f32.gmra.mxu0 %v15954_v1  ;;  %13184 = vmatprep.subr.mxu1 %v16111_v39 }
  0x99   :  { %13198 = vmatprep.subr.mxu0 %v16114_v40  ;;  %13185 = vmatpush3.msra.mxu1 %v16111_v39 }
  0x9a   :  { %13199 = vmatpush3.msra.mxu0 %v16114_v40  ;;  %13186 = vmatprep.subr.mxu1 %v16125_v11  ;;  %v11568_v40 = vld [vmem:[%s19825_s1 + $0x80] sm:$0xff] }
  0x9b   :  { %13200 = vmatprep.subr.mxu0 %v16128_v44  ;;  %13187 = vmatpush3.msra.mxu1 %v16125_v11 }
  0x9c   :  { %13188 = vmatprep.mubr.f32.mxu1 %v15899_v41  ;;  %13201 = vmatpush3.msra.mxu0 %v16128_v44 }
  0x9d   :  { %13189 = vmatmul.mubr.f32.vlgmr.msra.gmra.mxu1 %v15922_v51  ;;  %13202 = vmatprep.subr.mxu0 %v16140_v48 }
  0x9e   :  { %13216 = vmatprep.subr.mxu1 %v16035_v22  ;;  %13203 = vmatpush3.msra.mxu0 %v16140_v48 }
  0x9f   :  { %13217 = vmatpush3.msra.mxu1 %v16035_v22  ;;  %13204 = vmatprep.subr.mxu0 %v16152_v53  ;;  %v11572_v22 = vld [vmem:[%s19825_s1 + $0xa0] sm:$0xff] }
  0xa0   :  { %13218 = vmatprep.subr.mxu1 %v16041_v23  ;;  %13191 = vmatprep.mubr.f32.mxu1 %v15961_v7  ;;  %v16278_v30 = vand.u32 4294901760, %v11572_v22 }
  0xa1   :  { %13205 = vmatpush3.msra.mxu0 %v16152_v53  ;;  %13219 = vmatpush3.msra.mxu1 %v16041_v23  ;;  %v11571_v23 = vld [vmem:[%s19825_s1 + $0x98] sm:$0xff]  ;;  %v16360_v53 = vand.u32 4294901760, %v16339_v17 }
  0xa2   :  { %13192 = vmatmul.mubr.f32.gmra.mxu1 %v15967_v12  ;;  %13206 = vmatprep.subr.mxu0 %v16162_v58  ;;  %v16290_v9 = vand.u32 4294901760, %v11571_v23  ;;  %v16308_v38 = vsub.f32 %v11572_v22, %v16278_v30 }
  0xa3   :  { %13220 = vmatprep.subr.mxu1 %v16058_v26  ;;  %13207 = vmatpush3.msra.mxu0 %v16162_v58  ;;  %v16370_v58 = vand.u32 4294901760, %v16351_v50  ;;  %v1676_v61 = vsub.f32 %v16339_v17, %v16360_v53 }
  0xa4   :  { %13221 = vmatpush3.msra.mxu1 %v16058_v26  ;;  %13208 = vmatprep.subr.mxu0 %v16169_v0  ;;  %v16283_v26 = vand.u32 4294901760, %v16262_v4  ;;  %v16325_v44 = vsub.f32 %v11571_v23, %v16290_v9  ;;  %v16336_v47 = vand.u32 4294901760, %v16308_v38 }
  0xa5   :  { %13222 = vmatprep.subr.mxu1 %v16070_v29  ;;  %13209 = vmatpush3.msra.mxu0 %v16169_v0  ;;  %v1683_v6 = vsub.f32 %v16351_v50, %v16370_v58  ;;  %v1677_v8 = vand.u32 4294901760, %v1676_v61 }
  0xa6   :  { %13210 = vmatprep.mubr.f32.mxu0 %v15868_v27  ;;  %13223 = vmatpush3.msra.mxu1 %v16070_v29  ;;  %v16298_v29 = vand.u32 4294901760, %v16274_v5  ;;  %v16348_v49 = vand.u32 4294901760, %v16325_v44 }
  0xa7   :  { %13211 = vmatmul.mubr.f32.vlgmr.msra.gmra.mxu0 %v15892_v36  ;;  %13224 = vmatprep.subr.mxu1 %v16082_v31  ;;  %v1684_v14 = vand.u32 4294901760, %v1683_v6 }
  0xa8   :  { %13238 = vmatprep.subr.mxu0 %v16243_v24  ;;  %13225 = vmatpush3.msra.mxu1 %v16082_v31  ;;  %v1641_v31 = vsub.f32 %v16262_v4, %v16283_v26  ;;  %v1648_v46 = vsub.f32 %v16274_v5, %v16298_v29  ;;  %v1669_v57 = vsub.f32 %v16325_v44, %v16348_v49 }
  0xa9   :  { %13239 = vmatpush3.msra.mxu0 %v16243_v24  ;;  %13226 = vmatprep.subr.mxu1 %v16097_v34 }
  0xaa   :  { %13240 = vmatprep.subr.mxu0 %v16249_v3  ;;  %13213 = vmatprep.mubr.f32.mxu0 %v15924_v52  ;;  %v1642_v48 = vand.u32 4294901760, %v1641_v31  ;;  %v1649_v20 = vand.u32 4294901760, %v1648_v46  ;;  %v1670_v2 = vand.u32 4294901760, %v1669_v57 }
  0xab   :  { %13227 = vmatpush3.msra.mxu1 %v16097_v34  ;;  %13241 = vmatpush3.msra.mxu0 %v16249_v3  ;;  %v16333_v34 = vand.u32 4294901760, %v11568_v40 }
  0xac   :  { %13214 = vmatmul.mubr.f32.gmra.mxu0 %v15931_v56  ;;  %13228 = vmatprep.subr.mxu1 %v16111_v39 }
  0xad   :  { %13242 = vmatprep.subr.mxu0 %v16266_v28  ;;  %13229 = vmatpush3.msra.mxu1 %v16111_v39  ;;  %v1655_v39 = vsub.f32 %v16293_v33, %v16322_v43  ;;  %v16363_v54 = vsub.f32 %v11568_v40, %v16333_v34 }
  0xae   :  { %13243 = vmatpush3.msra.mxu0 %v16266_v28  ;;  %13230 = vmatprep.subr.mxu1 %v16125_v11 }
  0xaf   :  { %13244 = vmatprep.subr.mxu0 %v16278_v30  ;;  %13231 = vmatpush3.msra.mxu1 %v16125_v11  ;;  %v1662_v11 = vsub.f32 %v16308_v38, %v16336_v47  ;;  %v1656_v55 = vand.u32 4294901760, %v1655_v39  ;;  %v16377_v0 = vand.u32 4294901760, %v16363_v54 }
  0xb0   :  { %13232 = vmatprep.mubr.f32.mxu1 %v15868_v27  ;;  %13245 = vmatpush3.msra.mxu0 %v16278_v30 }
  0xb1   :  { %13233 = vmatmul.mubr.f32.vlgmr.msra.gmra.mxu1 %v15892_v36  ;;  %13246 = vmatprep.subr.mxu0 %v16290_v9  ;;  %v1663_v59 = vand.u32 4294901760, %v1662_v11  ;;  %v1690_v13 = vsub.f32 %v16363_v54, %v16377_v0 }
  0xb2   :  { %13260 = vmatprep.subr.mxu1 %v1642_v48  ;;  %13247 = vmatpush3.msra.mxu0 %v16290_v9 }
  0xb3   :  { %13261 = vmatpush3.msra.mxu1 %v1642_v48  ;;  %13248 = vmatprep.subr.mxu0 %v16305_v10  ;;  %v1691_v15 = vand.u32 4294901760, %v1690_v13 }
  0xb4   :  { %13262 = vmatprep.subr.mxu1 %v1649_v20  ;;  %13235 = vmatprep.mubr.f32.mxu1 %v15924_v52 }
  0xb5   :  { %13249 = vmatpush3.msra.mxu0 %v16305_v10  ;;  %13263 = vmatpush3.msra.mxu1 %v1649_v20 }
  0xb6   :  { %13236 = vmatmul.mubr.f32.gmra.mxu1 %v15931_v56  ;;  %13250 = vmatprep.subr.mxu0 %v16319_v42 }
  0xb7   :  { %13264 = vmatprep.subr.mxu1 %v1656_v55  ;;  %13251 = vmatpush3.msra.mxu0 %v16319_v42 }
  0xb8   :  { %13265 = vmatpush3.msra.mxu1 %v1656_v55  ;;  %13252 = vmatprep.subr.mxu0 %v16333_v34 }
  0xb9   :  { %13266 = vmatprep.subr.mxu1 %v1663_v59  ;;  %13253 = vmatpush3.msra.mxu0 %v16333_v34 }
  0xba   :  { %13267 = vmatpush3.msra.mxu1 %v1663_v59  ;;  %13254 = vmatprep.mubr.f32.mxu0 %v15942_v60  ;;  %v116_v60 = vld [vmem:[%s19836_s12 + $0x18] sm:$0xff] }
  0xbb   :  { %13268 = vmatprep.subr.mxu1 %v1670_v2  ;;  %13282 = vmatprep.subr.mxu0 %v16262_v4 }
  0xbc   :  { %13255 = vmatmul.mubr.f32.vlgmr.msra.gmra.mxu0 %v15948_v63  ;;  %13269 = vmatpush3.msra.mxu1 %v1670_v2  ;;  %v15695_v63 = vmov 0  }
  0xbd   :  { %13283 = vmatpush3.msra.mxu0 %v16262_v4  ;;  %13270 = vmatprep.subr.mxu1 %v1677_v8 }
  0xbe   :  { %13284 = vmatprep.subr.mxu0 %v16274_v5  ;;  %13271 = vmatpush3.msra.mxu1 %v1677_v8 }
  0xbf   :  { %13285 = vmatpush3.msra.mxu0 %v16274_v5  ;;  %13272 = vmatprep.subr.mxu1 %v1684_v14 }
  0xc0   :  { %13286 = vmatprep.subr.mxu0 %v16293_v33  ;;  %13273 = vmatpush3.msra.mxu1 %v1684_v14 }
  0xc1   :  { %13287 = vmatpush3.msra.mxu0 %v16293_v33  ;;  %13274 = vmatprep.subr.mxu1 %v1691_v15 }
  0xc2   :  { %13288 = vmatprep.subr.mxu0 %v16308_v38  ;;  %13275 = vmatpush3.msra.mxu1 %v1691_v15 }
  0xc3   :  { %13276 = vmatprep.mubr.f32.mxu1 %v15868_v27  ;;  %13289 = vmatpush3.msra.mxu0 %v16308_v38 }
  0xc4   :  { %13277 = vmatmul.mubr.f32.vlgmr.msra.gmra.mxu1 %v15892_v36  ;;  %13290 = vmatprep.subr.mxu0 %v16325_v44 }
  0xc5   :  { %13304 = vmatprep.subr.mxu1 %v16243_v24  ;;  %13291 = vmatpush3.msra.mxu0 %v16325_v44 }
  0xc6   :  { %13305 = vmatpush3.msra.mxu1 %v16243_v24  ;;  %13292 = vmatprep.subr.mxu0 %v16339_v17 }
  0xc7   :  { %13306 = vmatprep.subr.mxu1 %v16249_v3  ;;  %13257 = vmatprep.mubr.f32.mxu0 %v15979_v19  ;;  %v110_v19 = vld [vmem:[%s19835_s11 + $0x8] sm:$0xff] }
  0xc8   :  { %13293 = vmatpush3.msra.mxu0 %v16339_v17  ;;  %13307 = vmatpush3.msra.mxu1 %v16249_v3 }
  0xc9   :  { %13258 = vmatmul.mubr.f32.gmra.mxu0 %v15985_v16  ;;  %13294 = vmatprep.subr.mxu0 %v16351_v50 }
  0xca   :  { %13308 = vmatprep.subr.mxu1 %v16266_v28  ;;  %15586 = vset.pattern.permute.xlu1 %v15695_v63 }
  0xcb   :  { %13295 = vmatpush3.msra.mxu0 %v16351_v50  ;;  %13309 = vmatpush3.msra.mxu1 %v16266_v28 }
  0xcc   :  { %2239 = vperm.xlu1 %15586, %v116_v60   ;;  %13296 = vmatprep.subr.mxu0 %v16363_v54 }
  0xcd   :  { %13310 = vmatprep.subr.mxu1 %v16278_v30  ;;  %13297 = vmatpush3.msra.mxu0 %v16363_v54 }
  0xce   :  { %13298 = vmatprep.mubr.f32.mxu0 %v15889_v35  ;;  %13311 = vmatpush3.msra.mxu1 %v16278_v30  ;;  %v112_v35 = vld [vmem:[%s19835_s11 + $0x18] sm:$0xff] }
  0xcf   :  { %13279 = vmatprep.mubr.f32.mxu1 %v15924_v52  ;;  %13299 = vmatmul.mubr.f32.vlgmr.msra.gmra.mxu0 %v15905_v45  ;;  %v109_v45 = vld [vmem:[%s19835_s11] sm:$0xff] }
  0xd0   :  { %13312 = vmatprep.subr.mxu1 %v16290_v9  ;;  %13326 = vmatprep.subr.mxu0 %v16283_v26 }
  0xd1   :  { %13280 = vmatmul.mubr.f32.gmra.mxu1 %v15931_v56  ;;  %13327 = vmatpush3.msra.mxu0 %v16283_v26 }
  0xd2   :  { %13313 = vmatpush3.msra.mxu1 %v16290_v9  ;;  %2192 = vperm.xlu1 %15586, %v110_v19  }
  0xd3   :  { %13314 = vmatprep.subr.mxu1 %v16305_v10  ;;  %13328 = vmatprep.subr.mxu0 %v16298_v29 }
  0xd4   :  { %15585 = vset.pattern.permute.xlu0 %v15695_v63  ;;  %13301 = vmatprep.mubr.f32.mxu0 %v15945_v62  ;;  %v111_v62 = vld [vmem:[%s19835_s11 + $0x10] sm:$0xff] }
  0xd5   :  { %13315 = vmatpush3.msra.mxu1 %v16305_v10  ;;  %13329 = vmatpush3.msra.mxu0 %v16298_v29 }
  0xd6   :  { %2202 = vperm.xlu0 %15585, %v112_v35   ;;  %13302 = vmatmul.mubr.f32.gmra.mxu0 %v15954_v1  ;;  %v114_v1 = vld [vmem:[%s19836_s12 + $0x8] sm:$0xff] }
  0xd7   :  { %13316 = vmatprep.subr.mxu1 %v16319_v42  ;;  %13330 = vmatprep.subr.mxu0 %v16322_v43 }
  0xd8   :  { %13317 = vmatpush3.msra.mxu1 %v16319_v42  ;;  %13331 = vmatpush3.msra.mxu0 %v16322_v43 }
  0xd9   :  { %2187 = vperm.xlu1 %15586, %v109_v45   ;;  %13318 = vmatprep.subr.mxu1 %v16333_v34 }
  0xda   :  { %13332 = vmatprep.subr.mxu0 %v16336_v47  ;;  %13319 = vmatpush3.msra.mxu1 %v16333_v34 }
  0xdb   :  { %13320 = vmatprep.mubr.f32.mxu1 %v15899_v41  ;;  %13333 = vmatpush3.msra.mxu0 %v16336_v47  ;;  %v115_v41 = vld [vmem:[%s19836_s12 + $0x10] sm:$0xff] }
  0xdc   :  { %2197 = vperm.xlu0 %15585, %v111_v62   ;;  %13321 = vmatmul.mubr.f32.vlgmr.msra.gmra.mxu1 %v15922_v51  ;;  %v113_v51 = vld [vmem:[%s19836_s12] sm:$0xff] }
  0xdd   :  { %13334 = vmatprep.subr.mxu0 %v16348_v49  ;;  %13348 = vmatprep.subr.mxu1 %v16243_v24 }
  0xde   :  { %13335 = vmatpush3.msra.mxu0 %v16348_v49  ;;  %13349 = vmatpush3.msra.mxu1 %v16243_v24  ;;  %v16509_v24 = vand.u32 4294901760, %v2277_v21 }
  0xdf   :  { %13336 = vmatprep.subr.mxu0 %v16360_v53  ;;  %13350 = vmatprep.subr.mxu1 %v16249_v3 }
  0xe0   :  { %13323 = vmatprep.mubr.f32.mxu1 %v15961_v7  ;;  %13337 = vmatpush3.msra.mxu0 %v16360_v53  ;;  %20210 = vst [vmem:[#allocation12_spill] sm:$0xff] %v16509_v24 }
  0xe1   :  { %13351 = vmatpush3.msra.mxu1 %v16249_v3  ;;  %13338 = vmatprep.subr.mxu0 %v16370_v58 }
  0xe2   :  { %13324 = vmatmul.mubr.f32.gmra.mxu1 %v15967_v12  ;;  %13352 = vmatprep.subr.mxu1 %v16266_v28 }
  0xe3   :  { %13339 = vmatpush3.msra.mxu0 %v16370_v58  ;;  %13353 = vmatpush3.msra.mxu1 %v16266_v28 }
  0xe4   :  { %13340 = vmatprep.subr.mxu0 %v16377_v0  ;;  %13354 = vmatprep.subr.mxu1 %v16278_v30 }
  0xe5   :  { %13341 = vmatpush3.msra.mxu0 %v16377_v0  ;;  %13342 = vmatprep.mubr.f32.mxu0 %v15868_v27 }
  0xe6   :  { %13355 = vmatpush3.msra.mxu1 %v16278_v30  ;;  %13343 = vmatmul.mubr.f32.vlgmr.msra.gmra.mxu0 %v15892_v36 }
  0xe7   :  { %13356 = vmatprep.subr.mxu1 %v16290_v9  ;;  %13345 = vmatprep.mubr.f32.mxu0 %v15924_v52 }
  0xe8   :  { %13357 = vmatpush3.msra.mxu1 %v16290_v9  ;;  %13364 = vmatprep.mubr.f32.mxu1 %v15868_v27 }
  0xe9   :  { %13358 = vmatprep.subr.mxu1 %v16305_v10  ;;  %2234 = vperm.xlu0 %15585, %v115_v41  }
  0xea   :  { %13359 = vmatpush3.msra.mxu1 %v16305_v10  ;;  %13346 = vmatmul.mubr.f32.gmra.mxu0 %v15931_v56 }
  0xeb   :  { %13360 = vmatprep.subr.mxu1 %v16319_v42  ;;  %2224 = vperm.xlu1 %15586, %v113_v51  }
  0xec   :  { %13361 = vmatpush3.msra.mxu1 %v16319_v42 }
  0xed   :  { %13362 = vmatprep.subr.mxu1 %v16333_v34  ;;  %2229 = vperm.xlu0 %15585, %v114_v1  }
  0xee   :  { %13363 = vmatpush3.msra.mxu1 %v16333_v34 }
  0xef   :  { %13365 = vmatmul.mubr.f32.vlgmr.msra.gmra.mxu1 %v15892_v36 }
  0xf0   :  { %13367 = vmatprep.mubr.f32.mxu1 %v15924_v52  ;;  %v16514_v52 = vsub.f32 %v2277_v21, %v16509_v24 }
  0xf2   :  { %20211 = vst [vmem:[#allocation13_spill] sm:$0xff] %v16514_v52 }
  0xf3   :  { %13368 = vmatmul.mubr.f32.gmra.mxu1 %v15931_v56  ;;  %v16518_v56 = vand.u32 4294901760, %v16514_v52 }
  0xf4   :  { %13392 = vmatprep.mubr.f32.mxu1 %v16509_v24 }
  0xf5   :  { %20212 = vst [vmem:[#allocation14_spill] sm:$0xff] %v16518_v56  ;;  %v2360_v4 = vsub.f32 %v16514_v52, %v16518_v56 }
  0xf7   :  { %v16522_v23 = vand.u32 4294901760, %v2360_v4 }
  0xf9   :  { %20213 = vst [vmem:[#allocation15_spill] sm:$0xff] %v16522_v23  ;;  %13378 = vmatprep.mubr.f32.mxu0 %v16522_v23 }
 0x104   :  { %v16500_v27 = vpop.f32.mrf.mxu0 }
 0x106   :  { %v16502_v7 = vpop.f32.mrf.mxu0 }
 0x10c   :  { %v13014_v36 = vpop.f32.mrf.mxu1 }
 0x10d   :  { %v385_v23 = vadd.f32 %v13014_v36, %v16500_v27 }
 0x10e   :  { %v378_v22 = vpop.f32.mrf.mxu1 }
 0x10f   :  { %v379_v18 = vadd.f32 %v378_v22, %v16502_v7 }
 0x111   :  { %v16504_v12 = vpop.f32.mrf.mxu0 }
 0x113   :  { %v16506_v16 = vpop.f32.mrf.mxu0 }
 0x116   :  { %v16511_v3 = vpop.f32.mrf.mxu0 }
 0x117   :  { %v492_v56 = vadd.f32 %v16511_v3, %v385_v23 }
 0x118   :  { %v484_v25 = vpop.f32.mrf.mxu0  ;;  %v13017_v28 = vpop.f32.mrf.mxu1 }
 0x119   :  { %v397_v51 = vadd.f32 %v13017_v28, %v16504_v12  ;;  %v485_v24 = vadd.f32 %v484_v25, %v379_v18 }
 0x11a   :  { %v390_v30 = vpop.f32.mrf.mxu1 }
 0x11b   :  { %v391_v21 = vadd.f32 %v390_v30, %v16506_v16 }
 0x11c   :  { %v13039_v5 = vpop.f32.mrf.mxu0 }
 0x11d   :  { %v506_v52 = vadd.f32 %v13039_v5, %v397_v51 }
 0x11e   :  { %v498_v26 = vpop.f32.mrf.mxu0 }
 0x121   :  { %v13058_v32 = vpop.f32.mrf.mxu1 }
 0x123   :  { %v586_v33 = vpop.f32.mrf.mxu1 }
 0x126   :  { %v13061_v37 = vpop.f32.mrf.mxu1 }
 0x128   :  { %v602_v38 = vpop.f32.mrf.mxu1 }
 0x12b   :  { %v13080_v9 = vpop.f32.mrf.mxu0 }
 0x12d   :  { %v705_v29 = vpop.f32.mrf.mxu0 }
 0x130   :  { %v13083_v10 = vpop.f32.mrf.mxu0 }
 0x132   :  { %v717_v31 = vpop.f32.mrf.mxu0 }
 0x135   :  { %v13102_v40 = vpop.f32.mrf.mxu1 }
 0x137   :  { %v802_v43 = vpop.f32.mrf.mxu1 }
 0x13a   :  { %v13105_v34 = vpop.f32.mrf.mxu1 }
 0x13c   :  { %v814_v17 = vpop.f32.mrf.mxu1 }
 0x140   :  { %v16525_v42 = vpop.f32.mrf.mxu0 }
 0x142   :  { %v16527_v44 = vpop.f32.mrf.mxu0 }
 0x147   :  { %v16580_v23 = vpop.permute.xlu1 %2239 }
 0x148   :  { %v16533_v48 = vpop.f32.mrf.mxu1  ;;  %20224 = vst [vmem:[#allocation26_spill] sm:$0xff] %v16580_v23 }
 0x14a   :  { %v16537_v49 = vpop.f32.mrf.mxu1 }
 0x14d   :  { %v16529_v46 = vpop.f32.mrf.mxu0 }
 0x14f   :  { %v16531_v47 = vpop.f32.mrf.mxu0 }
 0x152   :  { %v16535_v39 = vpop.f32.mrf.mxu0 }
 0x154   :  { %v16539_v50 = vpop.f32.mrf.mxu0  ;;  %v16541_v20 = vpop.f32.mrf.mxu1 }
 0x156   :  { %v16545_v53 = vpop.f32.mrf.mxu1 }
 0x158   :  { %v16543_v11 = vpop.f32.mrf.mxu0 }
 0x15a   :  { %v16549_v55 = vpop.f32.mrf.mxu0 }
 0x15d   :  { %v16547_v54 = vpop.f32.mrf.mxu1 }
 0x15f   :  { %v16553_v58 = vpop.f32.mrf.mxu1 }
 0x162   :  { %v16557_v61 = vpop.f32.mrf.mxu1 }
 0x164   :  { %v16561_v2 = vpop.f32.mrf.mxu1 }
 0x165   :  { %20217 = vst [vmem:[#allocation19_spill] sm:$0xff] %v16561_v2 }
 0x167   :  { %v16551_v57 = vpop.f32.mrf.mxu0 }
 0x168   :  { %20214 = vst [vmem:[#allocation16_spill] sm:$0xff] %v16551_v57  ;;  %v2178_v57 = vlaneseq }
 0x169   :  { %v16555_v59 = vpop.f32.mrf.mxu0 }
 0x16a   :  { %20215 = vst [vmem:[#allocation17_spill] sm:$0xff] %v16555_v59  ;;  %v16578_v25 = vshrl.u32 %v2178_v57, 7 }
 0x16c   :  { %v16559_v0 = vpop.f32.mrf.mxu0  ;;  %20223 = vst [vmem:[#allocation25_spill] sm:$0xff] %v16578_v25  ;;  %vm2180_vm2 = vcmp.lt.s32.totalorder %v16578_v25, 1  ;;  %vm2217_vm3 = vcmp.lt.s32.totalorder %v16578_v25, 7 }
 0x16d   :  { %20216 = vst [vmem:[#allocation18_spill] sm:$0xff] %v16559_v0  ;;  %v611_v0 = vadd.f32 %v13061_v37, %v506_v52  ;;  %v16583_v37 = vpop.permute.xlu0 %2202 }
 0x16e   :  { %v16565_v8 = vpop.f32.mrf.mxu0  ;;  %20225 = vst [vmem:[#allocation27_spill] sm:$0xff] %v16583_v37 }
 0x16f   :  { %20219 = vst [vmem:[#allocation21_spill] sm:$0xff] %v16565_v8  ;;  %v724_v22 = vadd.f32 %v13083_v10, %v611_v0 }
 0x171   :  { %v16563_v6 = vpop.f32.mrf.mxu1  ;;  %v821_v36 = vadd.f32 %v13105_v34, %v724_v22  ;;  %v16590_v34 = vpop.permute.xlu1 %2192  ;;  %v20230_v22 = vld [vmem:[#allocation19_spill] sm:$0xff] }
 0x172   :  { %20218 = vst [vmem:[#allocation20_spill] sm:$0xff] %v16563_v6  ;;  %20226 = vst [vmem:[#allocation28_spill] sm:$0xff] %v16590_v34 }
 0x173   :  { %v16567_v14 = vpop.f32.mrf.mxu1 }
 0x174   :  { %20220 = vst [vmem:[#allocation22_spill] sm:$0xff] %v16567_v14  ;;  %v595_v14 = vadd.f32 %v13058_v32, %v492_v56  ;;  %v2177_v32 = vrot.slane %v821_v36, 7 }
 0x176   :  { %v16569_v60 = vpop.f32.mrf.mxu1  ;;  %v712_v7 = vadd.f32 %v13080_v9, %v595_v14  ;;  %v1060_v14 = vadd.f32 %v16533_v48, %v16525_v42 }
 0x177   :  { %20221 = vst [vmem:[#allocation23_spill] sm:$0xff] %v16569_v60  ;;  %v587_v60 = vadd.f32 %v586_v33, %v485_v24 }
 0x178   :  { %v16571_v19 = vpop.f32.mrf.mxu1  ;;  %v809_v27 = vadd.f32 %v13102_v40, %v712_v7  ;;  %v1054_v40 = vadd.f32 %v16537_v49, %v16527_v44 }
 0x179   :  { %20222 = vst [vmem:[#allocation24_spill] sm:$0xff] %v16571_v19  ;;  %v499_v19 = vadd.f32 %v498_v26, %v391_v21  ;;  %v706_v2 = vadd.f32 %v705_v29, %v587_v60  ;;  %v20228_v21 = vld [vmem:[#allocation17_spill] sm:$0xff] }
 0x17a   :  { %v2175_v26 = vrot.slane %v809_v27, 7  ;;  %v1160_v44 = vadd.f32 %v16539_v50, %v1054_v40 }
 0x17b   :  { %v603_v28 = vadd.f32 %v602_v38, %v499_v19  ;;  %v803_v30 = vadd.f32 %v802_v43, %v706_v2  ;;  %v1072_v43 = vadd.f32 %v16541_v20, %v16529_v46  ;;  %v1066_v46 = vadd.f32 %v16545_v53, %v16531_v47  ;;  %v16608_v47 = vpop.permute.xlu0 %2197 }
 0x17c   :  { %v13256_v13 = vpop.f32.mrf.mxu0  ;;  %v1262_v48 = vadd.f32 %v16553_v58, %v1160_v44  ;;  %20227 = vst [vmem:[#allocation29_spill] sm:$0xff] %v16608_v47 }
 0x17d   :  { %v718_v16 = vadd.f32 %v717_v31, %v603_v28  ;;  %v2174_v56 = vrot.slane %v803_v30, 7  ;;  %v1181_v42 = vadd.f32 %v16543_v11, %v1072_v43  ;;  %v20231_v30 = vld [vmem:[#allocation16_spill] sm:$0xff] }
 0x17e   :  { %v1587_v15 = vpop.f32.mrf.mxu0  ;;  %v20238_v43 = vld [vmem:[#allocation20_spill] sm:$0xff] }
 0x17f   :  { %v815_v24 = vadd.f32 %v814_v17, %v718_v16  ;;  %v2183_v17 = vsel %vm2180_vm2, %v2174_v56, %v2175_v26  ;;  %v1286_v18 = vadd.f32 %v16557_v61, %v1181_v42  ;;  %v11576_v42 = vld [vmem:[%s19826_s2] ss:$0 sm:$0xff] }
 0x181   :  { %v2176_v29 = vrot.slane %v815_v24, 7  ;;  %v16621_v24 = vpop.permute.xlu0 %2234 }
 0x182   :  { %20234 = vst [vmem:[#allocation19_spill] sm:$0xff] %v16621_v24 }
 0x183   :  { %v2182_v19 = vsel %vm2180_vm2, %v2175_v26, %v2176_v29 }
 0x184   :  { %v13278_v45 = vpop.f32.mrf.mxu1 }
 0x185   :  { %v1735_v52 = vadd.f32 %v13278_v45, %v13256_v13  ;;  %v2184_v13 = vsel %vm2180_vm2, %v2177_v32, %v2174_v56  ;;  %v118_v45 = vld [vmem:[#allocation6 + $0x8] sm:$0xff] }
 0x186   :  { %v1728_v41 = vpop.f32.mrf.mxu1 }
 0x187   :  { %v1729_v10 = vadd.f32 %v1728_v41, %v1587_v15  ;;  %v2181_v15 = vsel %vm2180_vm2, %v2176_v29, %v2177_v32  ;;  %v119_v32 = vld [vmem:[#allocation6 + $0x10] sm:$0xff] }
 0x189   :  { %v13259_v63 = vpop.f32.mrf.mxu0 }
 0x18b   :  { %v1607_v35 = vpop.f32.mrf.mxu0 }
 0x18f   :  { %v13300_v62 = vpop.f32.mrf.mxu0 }
 0x190   :  { %v1842_v38 = vadd.f32 %v13300_v62, %v1735_v52 }
 0x191   :  { %v13281_v1 = vpop.f32.mrf.mxu1  ;;  %v1834_v4 = vpop.f32.mrf.mxu0 }
 0x192   :  { %v1747_v31 = vadd.f32 %v13281_v1, %v13259_v63  ;;  %v1835_v57 = vadd.f32 %v1834_v4, %v1729_v10  ;;  %v20236_v10 = vld [vmem:[#allocation23_spill] sm:$0xff] }
 0x193   :  { %v1740_v6 = vpop.f32.mrf.mxu1 }
 0x194   :  { %v1741_v0 = vadd.f32 %v1740_v6, %v1607_v35  ;;  %v1167_v35 = vadd.f32 %v16535_v39, %v1060_v14  ;;  %v1381_v39 = vadd.f32 %v20228_v21, %v1262_v48 }
 0x196   :  { %v13303_v8 = vpop.f32.mrf.mxu0  ;;  %v1270_v1 = vadd.f32 %v16547_v54, %v1167_v35  ;;  %v20233_v54 = vld [vmem:[#allocation22_spill] sm:$0xff] }
 0x197   :  { %v1856_v60 = vadd.f32 %v13303_v8, %v1747_v31  ;;  %v1174_v8 = vadd.f32 %v16549_v55, %v1066_v46  ;;  %v20232_v55 = vld [vmem:[#allocation18_spill] sm:$0xff]  ;;  %v120_v46 = vld [vmem:[#allocation6 + $0x18] sm:$0xff] }
 0x198   :  { %v1848_v59 = vpop.f32.mrf.mxu0  ;;  %v1387_v27 = vadd.f32 %v20231_v30, %v1270_v1  ;;  %v1399_v36 = vadd.f32 %v20232_v55, %v1286_v18 }
 0x199   :  { %v1849_v53 = vadd.f32 %v1848_v59, %v1741_v0  ;;  %v2280_v59 = vsel %vm2275_vm1, %v118_v45, 0  ;;  %v1278_v16 = vadd.f32 %v20230_v22, %v1174_v8 }
 0x19a   :  { %v16626_v40 = vand.u32 4294901760, %v2280_v59 }
 0x19c   :  { %v13322_v12 = vpop.f32.mrf.mxu1  ;;  %20237 = vst [vmem:[#allocation16_spill] sm:$0xff] %v16626_v40 }
 0x19d   :  { %v1945_v2 = vadd.f32 %v13322_v12, %v1842_v38  ;;  %v16614_v12 = vpop.permute.xlu1 %2187  ;;  %v1496_v38 = vadd.f32 %v20236_v10, %v1399_v36 }
 0x19e   :  { %v1936_v3 = vpop.f32.mrf.mxu1  ;;  %20229 = vst [vmem:[#allocation17_spill] sm:$0xff] %v16614_v12 }
 0x19f   :  { %v1937_v63 = vadd.f32 %v1936_v3, %v1835_v57  ;;  %v1478_v3 = vadd.f32 %v20233_v54, %v1381_v39  ;;  %v1484_v57 = vadd.f32 %v20238_v43, %v1387_v27 }
 0x1a1   :  { %v16629_v0 = vpop.permute.xlu1 %2224 }
 0x1a2   :  { %v13325_v9 = vpop.f32.mrf.mxu1  ;;  %20239 = vst [vmem:[#allocation18_spill] sm:$0xff] %v16629_v0 }
 0x1a3   :  { %v1961_v62 = vadd.f32 %v13325_v9, %v1856_v60  ;;  %v2205_v9 = vmul.f32 %v16614_v12, %v2184_v13  ;;  %v2283_v60 = vsel %vm2275_vm1, %v119_v32, 0 }
 0x1a4   :  { %v1952_v49 = vpop.f32.mrf.mxu1 }
 0x1a5   :  { %v1953_v58 = vadd.f32 %v1952_v49, %v1849_v53  ;;  %v2208_v49 = vmul.f32 %v16583_v37, %v2181_v15  ;;  %v2209_v13 = vadd.f32 %v2205_v9, %v1478_v3 }
 0x1a6   :  { %v13344_v5 = vpop.f32.mrf.mxu0 }
 0x1a7   :  { %v2062_v6 = vadd.f32 %v13344_v5, %v1945_v2  ;;  %v2212_v45 = vadd.f32 %v2208_v49, %v1496_v38 }
 0x1a8   :  { %v2055_v33 = vpop.f32.mrf.mxu0 }
 0x1a9   :  { %v2056_v41 = vadd.f32 %v2055_v33, %v1937_v63  ;;  %v20235_v33 = vld [vmem:[#allocation21_spill] sm:$0xff]  ;;  %v2206_v63 = vmul.f32 %v16590_v34, %v2183_v17  ;;  %v16646_v17 = vpop.permute.xlu0 %2229 }
 0x1aa   :  { %v13347_v20 = vpop.f32.mrf.mxu0  ;;  %v1393_v29 = vadd.f32 %v20235_v33, %v1278_v16  ;;  %20241 = vst [vmem:[#allocation22_spill] sm:$0xff] %v16646_v17 }
 0x1ab   :  { %v2074_v28 = vadd.f32 %v13347_v20, %v1961_v62  ;;  %v2286_v62 = vsel %vm2275_vm1, %v120_v46, 0 }
 0x1ac   :  { %v2067_v4 = vpop.f32.mrf.mxu0 }
 0x1ad   :  { %v2068_v5 = vadd.f32 %v2067_v4, %v1953_v58  ;;  %v16655_v58 = vsub.f32 %v2280_v59, %v16626_v40 }
 0x1af   :  { %v13366_v50 = vpop.f32.mrf.mxu1  ;;  %20242 = vst [vmem:[#allocation21_spill] sm:$0xff] %v16655_v58  ;;  %v16664_v3 = vand.u32 4294901760, %v16655_v58 }
 0x1b0   :  { %v2159_v51 = vadd.f32 %v13366_v50, %v2062_v6  ;;  %v20240_v6 = vld [vmem:[#allocation24_spill] sm:$0xff] }
 0x1b1   :  { %v2152_v11 = vpop.f32.mrf.mxu1  ;;  %v1490_v35 = vadd.f32 %v20240_v6, %v1393_v29  ;;  %20246 = vst [vmem:[#allocation30_spill] sm:$0xff] %v16664_v3 }
 0x1b2   :  { %v2153_v7 = vadd.f32 %v2152_v11, %v2056_v41  ;;  %v2214_v56 = vrot.slane %v2159_v51, 1  ;;  %v2207_v41 = vmul.f32 %v16608_v47, %v2182_v19  ;;  %v2210_v51 = vadd.f32 %v2206_v63, %v1484_v57 }
 0x1b3   :  { %v13369_v61 = vpop.f32.mrf.mxu1  ;;  %v16657_v19 = vand.u32 4294901760, %v2283_v60 }
 0x1b4   :  { %v2213_v52 = vrot.slane %v2153_v7, 1  ;;  %v2171_v26 = vadd.f32 %v13369_v61, %v2074_v28  ;;  %v2211_v11 = vadd.f32 %v2207_v41, %v1490_v35  ;;  %v16659_v28 = vand.u32 4294901760, %v2286_v62 }
 0x1b5   :  { %v2164_v31 = vpop.f32.mrf.mxu1  ;;  %20243 = vst [vmem:[#allocation23_spill] sm:$0xff] %v16657_v19  ;;  %v16667_v59 = vsub.f32 %v2283_v60, %v16657_v19 }
 0x1b6   :  { %v2220_v2 = vsel %vm2217_vm3, %v2213_v52, %v2214_v56  ;;  %v2216_v14 = vrot.slane %v2171_v26, 1  ;;  %v2165_v44 = vadd.f32 %v2164_v31, %v2068_v5  ;;  %20244 = vst [vmem:[#allocation20_spill] sm:$0xff] %v16659_v28  ;;  %v2370_v31 = vsub.f32 %v16655_v58, %v16664_v3 }
 0x1b7   :  { %v2242_v20 = vmul.f32 %v16629_v0, %v2220_v2  ;;  %20247 = vst [vmem:[#allocation31_spill] sm:$0xff] %v16667_v59  ;;  %v16697_v43 = vand.u32 4294901760, %v16667_v59  ;;  %v125_v0 = vld [vmem:[#allocation7 + $0x20] sm:$0xff] }
 0x1b8   :  { %v2221_v48 = vsel %vm2217_vm3, %v2216_v14, %v2213_v52  ;;  %v2215_v50 = vrot.slane %v2165_v44, 1 }
 0x1b9   :  { %v2246_v53 = vadd.f32 %v2242_v20, %v2209_v13  ;;  %v2245_v15 = vmul.f32 %v16580_v23, %v2221_v48  ;;  %20252 = vst [vmem:[#allocation36_spill] sm:$0xff] %v16697_v43  ;;  %v16711_v20 = vand.u32 4294901760, %v2370_v31  ;;  %v2380_v63 = vsub.f32 %v16667_v59, %v16697_v43 }
 0x1ba   :  { %v2218_v8 = vsel %vm2217_vm3, %v2215_v50, %v2216_v14  ;;  %v2219_v1 = vsel %vm2217_vm3, %v2214_v56, %v2215_v50  ;;  %v16672_v56 = vsub.f32 %v2286_v62, %v16659_v28 }
 0x1bb   :  { %v2257_v18 = vadd.f32 %v11576_v42, %v2246_v53  ;;  %v2249_v21 = vadd.f32 %v2245_v15, %v2212_v45  ;;  %v2243_v39 = vmul.f32 %v16646_v17, %v2219_v1  ;;  %v2244_v4 = vmul.f32 %v16621_v24, %v2218_v8  ;;  %20254 = vst [vmem:[#allocation38_spill] sm:$0xff] %v16711_v20  ;;  %v136_v8 = vld [vmem:[#allocation7 + $0x78] sm:$0xff]  ;;  %v135_v1 = vld [vmem:[#allocation7 + $0x70] sm:$0xff]  ;;  %v126_v17 = vld [vmem:[#allocation7 + $0x28] sm:$0xff] }
 0x1bc   :  { %20249 = vst [vmem:[#allocation33_spill] sm:$0xff] %v16672_v56  ;;  %v16704_v44 = vand.u32 4294901760, %v16672_v56  ;;  %v16721_v53 = vand.u32 4294901760, %v2380_v63  ;;  %v130_v63 = vld [vmem:[#allocation7 + $0x48] sm:$0xff]  ;;  %v16895_v23 = vand.u32 4294901760, %v126_v17 }
 0x1bd   :  { %vm2261_vm4 = vcmp.ge.f32.partialorder %v2257_v18, 0.0  ;;  %v2265_v7 = vmul.f32 0.01, %v2257_v18  ;;  %v2260_v22 = vadd.f32 %v11576_v42, %v2249_v21  ;;  %v2247_v16 = vadd.f32 %v2243_v39, %v2210_v51 }
 0x1be   :  { %v2248_v30 = vadd.f32 %v2244_v4, %v2211_v11  ;;  %20253 = vst [vmem:[#allocation37_spill] sm:$0xff] %v16704_v44  ;;  %v2390_v35 = vsub.f32 %v16672_v56, %v16704_v44  ;;  %20255 = vst [vmem:[#allocation39_spill] sm:$0xff] %v16721_v53  ;;  %v16729_v21 = vand.u32 4294901760, %v136_v8  ;;  %v16734_v39 = vand.u32 4294901760, %v135_v1 }
 0x1bf   :  { %v16661_v27 = vsel %vm2261_vm4, %v2257_v18, %v2265_v7  ;;  %vm2264_vm5 = vcmp.ge.f32.partialorder %v2260_v22, 0.0  ;;  %v2268_v55 = vmul.f32 0.01, %v2260_v22  ;;  %v2258_v36 = vadd.f32 %v11576_v42, %v2247_v16  ;;  %v20257_v18 = vld [vmem:[#allocation13_spill] sm:$0xff]  ;;  %v20264_v16 = vld [vmem:[#allocation14_spill] sm:$0xff]  ;;  %20295 = vst [vmem:[#allocation76_spill] sm:$0xff] %v16895_v23 }
 0x1c0   :  { %20245 = vst [vmem:[#allocation24_spill] sm:$0xff] %v16661_v27  ;;  %v2259_v54 = vadd.f32 %v11576_v42, %v2248_v30  ;;  %v16675_v52 = vand.u32 4294901760, %v16661_v27  ;;  %v16723_v15 = vand.u32 4294901760, %v2390_v35  ;;  %20258 = vst [vmem:[#allocation41_spill] sm:$0xff] %v16729_v21  ;;  %v16739_v4 = vsub.f32 %v136_v8, %v16729_v21 }
 0x1c1   :  { %v16669_v61 = vsel %vm2264_vm5, %v2260_v22, %v2268_v55  ;;  %vm2262_vm6 = vcmp.ge.f32.partialorder %v2258_v36, 0.0  ;;  %v2266_v5 = vmul.f32 0.01, %v2258_v36  ;;  %20259 = vst [vmem:[#allocation42_spill] sm:$0xff] %v16734_v39  ;;  %v16745_v11 = vsub.f32 %v135_v1, %v16734_v39  ;;  %v20265_v55 = vld [vmem:[#allocation12_spill] sm:$0xff] }
 0x1c2   :  { %20248 = vst [vmem:[#allocation32_spill] sm:$0xff] %v16669_v61  ;;  %v16678_v26 = vand.u32 4294901760, %v16669_v61  ;;  %vm2263_vm7 = vcmp.ge.f32.partialorder %v2259_v54, 0.0  ;;  %v2267_v32 = vmul.f32 0.01, %v2259_v54  ;;  %v2444_v57 = vsub.f32 %v16661_v27, %v16675_v52  ;;  %20256 = vst [vmem:[#allocation40_spill] sm:$0xff] %v16723_v15 }
 0x1c3   :  { %v16680_v9 = vsel %vm2262_vm6, %v2258_v36, %v2266_v5  ;;  %20260 = vst [vmem:[#allocation43_spill] sm:$0xff] %v16739_v4  ;;  %20261 = vst [vmem:[#allocation44_spill] sm:$0xff] %v16745_v11  ;;  %v16750_v7 = vand.u32 4294901760, %v16739_v4  ;;  %v16756_v22 = vand.u32 4294901760, %v16745_v11 }
 0x1c4   :  { %20250 = vst [vmem:[#allocation34_spill] sm:$0xff] %v16680_v9  ;;  %v16682_v33 = vsel %vm2263_vm7, %v2259_v54, %v2267_v32  ;;  %v16685_v29 = vand.u32 4294901760, %v16680_v9  ;;  %13370 = vmatprep.subr.mxu0 %v16678_v26  ;;  %v2423_v10 = vsub.f32 %v16669_v61, %v16678_v26  ;;  %v2445_v42 = vand.u32 4294901760, %v2444_v57  ;;  %v133_v32 = vld [vmem:[#allocation7 + $0x60] sm:$0xff] }
 0x1c5   :  { %20251 = vst [vmem:[#allocation35_spill] sm:$0xff] %v16682_v33  ;;  %v16691_v38 = vand.u32 4294901760, %v16682_v33  ;;  %13371 = vmatpush3.msra.mxu0 %v16678_v26  ;;  %20262 = vst [vmem:[#allocation45_spill] sm:$0xff] %v16750_v7  ;;  %v3027_v30 = vsub.f32 %v16739_v4, %v16750_v7  ;;  %v3034_v36 = vsub.f32 %v16745_v11, %v16756_v22 }
 0x1c6   :  { %v2424_v2 = vand.u32 4294901760, %v2423_v10  ;;  %v2437_v14 = vsub.f32 %v16680_v9, %v16685_v29  ;;  %v2446_v62 = vsub.f32 %v2444_v57, %v2445_v42  ;;  %20263 = vst [vmem:[#allocation46_spill] sm:$0xff] %v16756_v22 }
 0x1c7   :  { %13372 = vmatprep.subr.mxu0 %v16691_v38  ;;  %v2430_v46 = vsub.f32 %v16682_v33, %v16691_v38  ;;  %v16773_v54 = vand.u32 4294901760, %v3027_v30  ;;  %v16779_v5 = vand.u32 4294901760, %v3034_v36  ;;  %v128_v30 = vld [vmem:[#allocation7 + $0x38] sm:$0xff] }
 0x1c8   :  { %13373 = vmatpush3.msra.mxu0 %v16691_v38  ;;  %v2425_v49 = vsub.f32 %v2423_v10, %v2424_v2  ;;  %v2438_v13 = vand.u32 4294901760, %v2437_v14  ;;  %v2447_v51 = vand.u32 4294901760, %v2446_v62 }
 0x1c9   :  { %13374 = vmatprep.subr.mxu0 %v16685_v29  ;;  %v2431_v60 = vand.u32 4294901760, %v2430_v46  ;;  %20266 = vst [vmem:[#allocation47_spill] sm:$0xff] %v16773_v54  ;;  %20267 = vst [vmem:[#allocation48_spill] sm:$0xff] %v16779_v5 }
 0x1ca   :  { %13375 = vmatpush3.msra.mxu0 %v16685_v29  ;;  %v2426_v6 = vand.u32 4294901760, %v2425_v49  ;;  %v2439_v50 = vsub.f32 %v2437_v14, %v2438_v13 }
 0x1cb   :  { %13376 = vmatprep.subr.mxu0 %v16675_v52  ;;  %v2432_v48 = vsub.f32 %v2430_v46, %v2431_v60 }
 0x1cc   :  { %13377 = vmatpush3.msra.mxu0 %v16675_v52  ;;  %13384 = vmatprep.subr.mxu1 %v2426_v6  ;;  %v2440_v41 = vand.u32 4294901760, %v2439_v50  ;;  %v16836_v50 = vand.u32 4294901760, %v130_v63 }
 0x1cd   :  { %13398 = vmatprep.subr.mxu0 %v2423_v10  ;;  %13379 = vmatmul.mubr.f32.vlgmr.msra.gmra.mxu0 %v16711_v20  ;;  %v2433_v45 = vand.u32 4294901760, %v2432_v48 }
 0x1ce   :  { %13385 = vmatpush3.msra.mxu1 %v2426_v6  ;;  %13399 = vmatpush3.msra.mxu0 %v2423_v10  ;;  %v16799_v10 = vand.u32 4294901760, %v133_v32  ;;  %20280 = vst [vmem:[#allocation61_spill] sm:$0xff] %v16836_v50  ;;  %v16851_v1 = vsub.f32 %v130_v63, %v16836_v50 }
 0x1cf   :  { %13386 = vmatprep.subr.mxu1 %v2433_v45  ;;  %13400 = vmatprep.subr.mxu0 %v2430_v46 }
 0x1d0   :  { %13387 = vmatpush3.msra.mxu1 %v2433_v45  ;;  %13401 = vmatpush3.msra.mxu0 %v2430_v46  ;;  %20270 = vst [vmem:[#allocation51_spill] sm:$0xff] %v16799_v10  ;;  %v129_v45 = vld [vmem:[#allocation7 + $0x40] sm:$0xff]  ;;  %20284 = vst [vmem:[#allocation65_spill] sm:$0xff] %v16851_v1 }
 0x1d1   :  { %13381 = vmatprep.mubr.f32.mxu0 %v16721_v53  ;;  %13388 = vmatprep.subr.mxu1 %v2440_v41  ;;  %v16847_v8 = vand.u32 4294901760, %v129_v45 }
 0x1d2   :  { %13402 = vmatprep.subr.mxu0 %v2437_v14  ;;  %13382 = vmatmul.mubr.f32.gmra.mxu0 %v16723_v15 }
 0x1d3   :  { %13389 = vmatpush3.msra.mxu1 %v2440_v41  ;;  %13403 = vmatpush3.msra.mxu0 %v2437_v14  ;;  %v131_v14 = vld [vmem:[#allocation7 + $0x50] sm:$0xff]  ;;  %20283 = vst [vmem:[#allocation64_spill] sm:$0xff] %v16847_v8 }
 0x1d4   :  { %13390 = vmatprep.subr.mxu1 %v2447_v51  ;;  %13404 = vmatprep.subr.mxu0 %v2444_v57 }
 0x1d5   :  { %13391 = vmatpush3.msra.mxu1 %v2447_v51  ;;  %13405 = vmatpush3.msra.mxu0 %v2444_v57  ;;  %v16807_v57 = vsub.f32 %v133_v32, %v16799_v10  ;;  %v16860_v32 = vsub.f32 %v129_v45, %v16847_v8 }
 0x1d6   :  { %13393 = vmatmul.mubr.f32.vlgmr.msra.gmra.mxu1 %v16626_v40  ;;  %13406 = vmatprep.mubr.f32.mxu0 %v20257_v18 }
 0x1d7   :  { %13412 = vmatprep.subr.mxu1 %v16678_v26  ;;  %13426 = vmatprep.subr.mxu0 %v2424_v2  ;;  %20272 = vst [vmem:[#allocation53_spill] sm:$0xff] %v16807_v57  ;;  %v16816_v49 = vand.u32 4294901760, %v16807_v57  ;;  %20286 = vst [vmem:[#allocation67_spill] sm:$0xff] %v16860_v32 }
 0x1d8   :  { %13407 = vmatmul.mubr.f32.vlgmr.msra.gmra.mxu0 %v16655_v58  ;;  %13413 = vmatpush3.msra.mxu1 %v16678_v26 }
 0x1d9   :  { %13427 = vmatpush3.msra.mxu0 %v2424_v2  ;;  %13414 = vmatprep.subr.mxu1 %v16691_v38  ;;  %20274 = vst [vmem:[#allocation55_spill] sm:$0xff] %v16816_v49  ;;  %v3048_v35 = vsub.f32 %v16807_v57, %v16816_v49 }
 0x1da   :  { %13428 = vmatprep.subr.mxu0 %v2431_v60  ;;  %13395 = vmatprep.mubr.f32.mxu1 %v16657_v19 }
 0x1db   :  { %13415 = vmatpush3.msra.mxu1 %v16691_v38  ;;  %13429 = vmatpush3.msra.mxu0 %v2431_v60  ;;  %v16821_v60 = vand.u32 4294901760, %v131_v14  ;;  %v16840_v62 = vand.u32 4294901760, %v3048_v35  ;;  %v16874_v35 = vand.u32 4294901760, %v16860_v32 }
 0x1dc   :  { %13396 = vmatmul.mubr.f32.gmra.mxu1 %v16659_v28  ;;  %13416 = vmatprep.subr.mxu1 %v16685_v29 }
 0x1dd   :  { %13430 = vmatprep.subr.mxu0 %v2438_v13  ;;  %13409 = vmatprep.mubr.f32.mxu0 %v16667_v59  ;;  %20276 = vst [vmem:[#allocation57_spill] sm:$0xff] %v16821_v60  ;;  %v16833_v48 = vsub.f32 %v131_v14, %v16821_v60  ;;  %20281 = vst [vmem:[#allocation62_spill] sm:$0xff] %v16840_v62  ;;  %v16867_v14 = vand.u32 4294901760, %v16851_v1 }
 0x1de   :  { %13417 = vmatpush3.msra.mxu1 %v16685_v29  ;;  %13431 = vmatpush3.msra.mxu0 %v2438_v13  ;;  %20290 = vst [vmem:[#allocation71_spill] sm:$0xff] %v16874_v35 }
 0x1df   :  { %13410 = vmatmul.mubr.f32.gmra.mxu0 %v16672_v56  ;;  %13418 = vmatprep.subr.mxu1 %v16675_v52  ;;  %20279 = vst [vmem:[#allocation60_spill] sm:$0xff] %v16833_v48  ;;  %v16845_v51 = vand.u32 4294901760, %v16833_v48  ;;  %20288 = vst [vmem:[#allocation69_spill] sm:$0xff] %v16867_v14  ;;  %v3069_v24 = vsub.f32 %v16851_v1, %v16867_v14  ;;  %v121_v56 = vld [vmem:[#allocation7] sm:$0xff] }
 0x1e0   :  { %13432 = vmatprep.subr.mxu0 %v2445_v42  ;;  %13419 = vmatpush3.msra.mxu1 %v16675_v52  ;;  %v16974_v59 = vand.u32 4294901760, %v121_v56 }
 0x1e1   :  { %13420 = vmatprep.mubr.f32.mxu1 %v20264_v16  ;;  %13433 = vmatpush3.msra.mxu0 %v2445_v42  ;;  %20282 = vst [vmem:[#allocation63_spill] sm:$0xff] %v16845_v51  ;;  %v16899_v34 = vand.u32 4294901760, %v3069_v24  ;;  %v16914_v24 = vand.u32 4294901760, %v125_v0 }
 0x1e2   :  { %13421 = vmatmul.mubr.f32.vlgmr.msra.gmra.mxu1 %v16664_v3  ;;  %13440 = vmatprep.subr.mxu1 %v16678_v26  ;;  %20315 = vst [vmem:[#allocation96_spill] sm:$0xff] %v16974_v59  ;;  %v16990_v58 = vsub.f32 %v121_v56, %v16974_v59 }
 0x1e3   :  { %13434 = vmatprep.mubr.f32.mxu0 %v20265_v55  ;;  %13441 = vmatpush3.msra.mxu1 %v16678_v26  ;;  %20296 = vst [vmem:[#allocation77_spill] sm:$0xff] %v16899_v34  ;;  %20300 = vst [vmem:[#allocation81_spill] sm:$0xff] %v16914_v24 }
 0x1e4   :  { %13435 = vmatmul.mubr.f32.vlgmr.msra.gmra.mxu0 %v16626_v40  ;;  %13442 = vmatprep.subr.mxu1 %v16691_v38  ;;  %20319 = vst [vmem:[#allocation100_spill] sm:$0xff] %v16990_v58 }
 0x1e5   :  { %13423 = vmatprep.mubr.f32.mxu1 %v16697_v43  ;;  %13443 = vmatpush3.msra.mxu1 %v16691_v38  ;;  %v132_v38 = vld [vmem:[#allocation7 + $0x58] sm:$0xff]  ;;  %v122_v43 = vld [vmem:[#allocation7 + $0x8] sm:$0xff] }
 0x1e6   :  { %13424 = vmatmul.mubr.f32.gmra.mxu1 %v16704_v44  ;;  %13444 = vmatprep.subr.mxu1 %v16685_v29  ;;  %v16809_v2 = vand.u32 4294901760, %v132_v38  ;;  %v16958_v3 = vand.u32 4294901760, %v122_v43 }
 0x1e7   :  { %13437 = vmatprep.mubr.f32.mxu0 %v16657_v19  ;;  %13445 = vmatpush3.msra.mxu1 %v16685_v29 }
 0x1e8   :  { %13438 = vmatmul.mubr.f32.gmra.mxu0 %v16659_v28  ;;  %13446 = vmatprep.subr.mxu1 %v16675_v52  ;;  %20273 = vst [vmem:[#allocation54_spill] sm:$0xff] %v16809_v2  ;;  %v16819_v13 = vsub.f32 %v132_v38, %v16809_v2  ;;  %v16862_v38 = vand.u32 4294901760, %v128_v30  ;;  %20312 = vst [vmem:[#allocation93_spill] sm:$0xff] %v16958_v3 }
 0x1e9   :  { %13447 = vmatpush3.msra.mxu1 %v16675_v52  ;;  %13448 = vmatprep.mubr.f32.mxu1 %v20265_v55  ;;  %v134_v52 = vld [vmem:[#allocation7 + $0x68] sm:$0xff] }
 0x1ea   :  { %13449 = vmatmul.mubr.f32.vlgmr.msra.gmra.mxu1 %v16626_v40  ;;  %13492 = vmatprep.subr.mxu1 %v16773_v54  ;;  %v16794_v26 = vand.u32 4294901760, %v134_v52  ;;  %20275 = vst [vmem:[#allocation56_spill] sm:$0xff] %v16819_v13  ;;  %v16830_v42 = vand.u32 4294901760, %v16819_v13  ;;  %20287 = vst [vmem:[#allocation68_spill] sm:$0xff] %v16862_v38  ;;  %v16877_v45 = vsub.f32 %v128_v30, %v16862_v38 }
 0x1eb   :  { %13451 = vmatprep.mubr.f32.mxu1 %v16657_v19  ;;  %13493 = vmatpush3.msra.mxu1 %v16773_v54 }
 0x1ec   :  { %13494 = vmatprep.subr.mxu1 %v16779_v5  ;;  %13454 = vmatprep.subr.mxu0 %v16729_v21  ;;  %20268 = vst [vmem:[#allocation49_spill] sm:$0xff] %v16794_v26  ;;  %v16797_v29 = vsub.f32 %v134_v52, %v16794_v26  ;;  %20278 = vst [vmem:[#allocation59_spill] sm:$0xff] %v16830_v42  ;;  %v3055_v41 = vsub.f32 %v16819_v13, %v16830_v42  ;;  %v16890_v30 = vand.u32 4294901760, %v16877_v45 }
 0x1ed   :  { %13495 = vmatpush3.msra.mxu1 %v16779_v5  ;;  %13455 = vmatpush3.msra.mxu0 %v16729_v21  ;;  %v3062_v52 = vsub.f32 %v16833_v48, %v16845_v51  ;;  %20291 = vst [vmem:[#allocation72_spill] sm:$0xff] %v16877_v45  ;;  %v123_v5 = vld [vmem:[#allocation7 + $0x10] sm:$0xff] }
 0x1ee   :  { %13452 = vmatmul.mubr.f32.gmra.mxu1 %v16659_v28  ;;  %13456 = vmatprep.subr.mxu0 %v16734_v39  ;;  %20269 = vst [vmem:[#allocation50_spill] sm:$0xff] %v16797_v29  ;;  %v16804_v31 = vand.u32 4294901760, %v16797_v29  ;;  %v16855_v36 = vand.u32 4294901760, %v3055_v41  ;;  %20293 = vst [vmem:[#allocation74_spill] sm:$0xff] %v16890_v30  ;;  %v3083_v12 = vsub.f32 %v16877_v45, %v16890_v30  ;;  %v16941_v44 = vand.u32 4294901760, %v123_v5 }
 0x1ef   :  { %13457 = vmatpush3.msra.mxu0 %v16734_v39  ;;  %v16871_v63 = vand.u32 4294901760, %v3062_v52  ;;  %v3076_v52 = vsub.f32 %v16860_v32, %v16874_v35 }
 0x1f0   :  { %13458 = vmatprep.subr.mxu0 %v16794_v26  ;;  %20271 = vst [vmem:[#allocation52_spill] sm:$0xff] %v16804_v31  ;;  %v3041_v46 = vsub.f32 %v16797_v29, %v16804_v31  ;;  %20285 = vst [vmem:[#allocation66_spill] sm:$0xff] %v16855_v36 }
 0x1f1   :  { %13459 = vmatpush3.msra.mxu0 %v16794_v26  ;;  %20289 = vst [vmem:[#allocation70_spill] sm:$0xff] %v16871_v63  ;;  %v16902_v37 = vand.u32 4294901760, %v3076_v52  ;;  %v16918_v52 = vand.u32 4294901760, %v3083_v12  ;;  %20307 = vst [vmem:[#allocation88_spill] sm:$0xff] %v16941_v44 }
 0x1f2   :  { %13460 = vmatprep.subr.mxu0 %v16799_v10  ;;  %v16825_v6 = vand.u32 4294901760, %v3041_v46  ;;  %v127_v46 = vld [vmem:[#allocation7 + $0x30] sm:$0xff] }
 0x1f3   :  { %13461 = vmatpush3.msra.mxu0 %v16799_v10  ;;  %v16879_v41 = vand.u32 4294901760, %v127_v46  ;;  %20297 = vst [vmem:[#allocation78_spill] sm:$0xff] %v16902_v37  ;;  %20301 = vst [vmem:[#allocation82_spill] sm:$0xff] %v16918_v52 }
 0x1f4   :  { %13462 = vmatprep.subr.mxu0 %v16809_v2  ;;  %20277 = vst [vmem:[#allocation58_spill] sm:$0xff] %v16825_v6  ;;  %13496 = vmatprep.subr.mxu1 %v16825_v6 }
 0x1f5   :  { %13463 = vmatpush3.msra.mxu0 %v16809_v2  ;;  %13497 = vmatpush3.msra.mxu1 %v16825_v6  ;;  %20292 = vst [vmem:[#allocation73_spill] sm:$0xff] %v16879_v41  ;;  %v16893_v47 = vsub.f32 %v127_v46, %v16879_v41  ;;  %v16910_v46 = vsub.f32 %v126_v17, %v16895_v23 }
 0x1f6   :  { %13464 = vmatprep.subr.mxu0 %v16821_v60  ;;  %13498 = vmatprep.subr.mxu1 %v16840_v62  ;;  %v16930_v6 = vsub.f32 %v125_v0, %v16914_v24 }
 0x1f7   :  { %13465 = vmatpush3.msra.mxu0 %v16821_v60  ;;  %13499 = vmatpush3.msra.mxu1 %v16840_v62  ;;  %20294 = vst [vmem:[#allocation75_spill] sm:$0xff] %v16893_v47  ;;  %v16907_v25 = vand.u32 4294901760, %v16893_v47  ;;  %20299 = vst [vmem:[#allocation80_spill] sm:$0xff] %v16910_v46  ;;  %v16923_v62 = vand.u32 4294901760, %v16910_v46 }
 0x1f8   :  { %13466 = vmatprep.subr.mxu0 %v16836_v50  ;;  %13500 = vmatprep.subr.mxu1 %v16855_v36  ;;  %20304 = vst [vmem:[#allocation85_spill] sm:$0xff] %v16930_v6  ;;  %v16946_v0 = vand.u32 4294901760, %v16930_v6 }
 0x1f9   :  { %13467 = vmatpush3.msra.mxu0 %v16836_v50  ;;  %13501 = vmatpush3.msra.mxu1 %v16855_v36  ;;  %20298 = vst [vmem:[#allocation79_spill] sm:$0xff] %v16907_v25  ;;  %v3090_v36 = vsub.f32 %v16893_v47, %v16907_v25  ;;  %20302 = vst [vmem:[#allocation83_spill] sm:$0xff] %v16923_v62 }
 0x1fa   :  { %13468 = vmatprep.subr.mxu0 %v16847_v8  ;;  %13502 = vmatprep.subr.mxu1 %v16871_v63  ;;  %20308 = vst [vmem:[#allocation89_spill] sm:$0xff] %v16946_v0  ;;  %v3104_v16 = vsub.f32 %v16930_v6, %v16946_v0 }
 0x1fb   :  { %13469 = vmatpush3.msra.mxu0 %v16847_v8  ;;  %13503 = vmatpush3.msra.mxu1 %v16871_v63  ;;  %v124_v63 = vld [vmem:[#allocation7 + $0x18] sm:$0xff]  ;;  %v16934_v12 = vand.u32 4294901760, %v3090_v36 }
 0x1fc   :  { %13470 = vmatprep.subr.mxu0 %v16862_v38  ;;  %13504 = vmatprep.subr.mxu1 %v16899_v34  ;;  %v16925_v17 = vand.u32 4294901760, %v124_v63  ;;  %v16978_v28 = vand.u32 4294901760, %v3104_v16 }
 0x1fd   :  { %13471 = vmatpush3.msra.mxu0 %v16862_v38  ;;  %13505 = vmatpush3.msra.mxu1 %v16899_v34  ;;  %20305 = vst [vmem:[#allocation86_spill] sm:$0xff] %v16934_v12  ;;  %v3097_v34 = vsub.f32 %v16910_v46, %v16923_v62 }
 0x1fe   :  { %13472 = vmatprep.subr.mxu0 %v16879_v41  ;;  %20303 = vst [vmem:[#allocation84_spill] sm:$0xff] %v16925_v17  ;;  %13506 = vmatprep.subr.mxu1 %v16902_v37  ;;  %v16939_v54 = vsub.f32 %v124_v63, %v16925_v17  ;;  %v16956_v63 = vsub.f32 %v123_v5, %v16941_v44  ;;  %20316 = vst [vmem:[#allocation97_spill] sm:$0xff] %v16978_v28 }
 0x1ff   :  { %13473 = vmatpush3.msra.mxu0 %v16879_v41  ;;  %13507 = vmatpush3.msra.mxu1 %v16902_v37  ;;  %v16950_v36 = vand.u32 4294901760, %v3097_v34 }
 0x200   :  { %13474 = vmatprep.subr.mxu0 %v16895_v23  ;;  %20306 = vst [vmem:[#allocation87_spill] sm:$0xff] %v16939_v54  ;;  %13508 = vmatprep.subr.mxu1 %v16918_v52  ;;  %v16953_v37 = vand.u32 4294901760, %v16939_v54  ;;  %20311 = vst [vmem:[#allocation92_spill] sm:$0xff] %v16956_v63  ;;  %v16969_v5 = vand.u32 4294901760, %v16956_v63 }
 0x201   :  { %13475 = vmatpush3.msra.mxu0 %v16895_v23  ;;  %13509 = vmatpush3.msra.mxu1 %v16918_v52  ;;  %20309 = vst [vmem:[#allocation90_spill] sm:$0xff] %v16950_v36  ;;  %v16972_v52 = vsub.f32 %v122_v43, %v16958_v3 }
 0x202   :  { %13476 = vmatprep.subr.mxu0 %v16914_v24  ;;  %20310 = vst [vmem:[#allocation91_spill] sm:$0xff] %v16953_v37  ;;  %13510 = vmatprep.subr.mxu1 %v16934_v12  ;;  %v3111_v34 = vsub.f32 %v16939_v54, %v16953_v37  ;;  %20313 = vst [vmem:[#allocation94_spill] sm:$0xff] %v16969_v5  ;;  %v3118_v19 = vsub.f32 %v16956_v63, %v16969_v5 }
 0x203   :  { %13477 = vmatpush3.msra.mxu0 %v16914_v24  ;;  %13511 = vmatpush3.msra.mxu1 %v16934_v12  ;;  %20314 = vst [vmem:[#allocation95_spill] sm:$0xff] %v16972_v52  ;;  %v16987_v43 = vand.u32 4294901760, %v16972_v52 }
 0x204   :  { %13478 = vmatprep.subr.mxu0 %v16925_v17  ;;  %13512 = vmatprep.subr.mxu1 %v16950_v36  ;;  %v16982_v12 = vand.u32 4294901760, %v3111_v34  ;;  %v16996_v16 = vand.u32 4294901760, %v3118_v19 }
 0x205   :  { %13479 = vmatpush3.msra.mxu0 %v16925_v17  ;;  %13513 = vmatpush3.msra.mxu1 %v16950_v36  ;;  %20318 = vst [vmem:[#allocation99_spill] sm:$0xff] %v16987_v43  ;;  %v3125_v34 = vsub.f32 %v16972_v52, %v16987_v43  ;;  %v17001_v36 = vand.u32 4294901760, %v16990_v58 }
 0x206   :  { %13480 = vmatprep.subr.mxu0 %v16941_v44  ;;  %20317 = vst [vmem:[#allocation98_spill] sm:$0xff] %v16982_v12  ;;  %13514 = vmatprep.subr.mxu1 %v16978_v28  ;;  %20320 = vst [vmem:[#allocation101_spill] sm:$0xff] %v16996_v16 }
 0x207   :  { %13481 = vmatpush3.msra.mxu0 %v16941_v44  ;;  %13515 = vmatpush3.msra.mxu1 %v16978_v28  ;;  %20321 = vst [vmem:[#allocation102_spill] sm:$0xff] %v17001_v36  ;;  %v17007_v56 = vand.u32 4294901760, %v3125_v34  ;;  %v3132_v19 = vsub.f32 %v16990_v58, %v17001_v36 }
 0x208   :  { %13482 = vmatprep.subr.mxu0 %v16958_v3  ;;  %13516 = vmatprep.subr.mxu1 %v16982_v12 }
 0x209   :  { %13483 = vmatpush3.msra.mxu0 %v16958_v3  ;;  %13517 = vmatpush3.msra.mxu1 %v16982_v12  ;;  %20322 = vst [vmem:[#allocation103_spill] sm:$0xff] %v17007_v56  ;;  %v17013_v28 = vand.u32 4294901760, %v3132_v19 }
 0x20a   :  { %13484 = vmatprep.subr.mxu0 %v16974_v59  ;;  %13518 = vmatprep.subr.mxu1 %v16996_v16 }
 0x20b   :  { %13485 = vmatpush3.msra.mxu0 %v16974_v59  ;;  %13519 = vmatpush3.msra.mxu1 %v16996_v16  ;;  %20323 = vst [vmem:[#allocation104_spill] sm:$0xff] %v17013_v28 }
 0x20c   :  { %13530 = vmatprep.subr.mxu0 %v16739_v4  ;;  %13520 = vmatprep.subr.mxu1 %v17007_v56 }
 0x20d   :  { %13521 = vmatpush3.msra.mxu1 %v17007_v56 }
 0x20e   :  { %13522 = vmatprep.subr.mxu1 %v17013_v28 }
 0x20f   :  { %13523 = vmatpush3.msra.mxu1 %v17013_v28 }
 0x210   :  { %13568 = vmatprep.subr.mxu1 %v16729_v21 }
 0x28d   :  { %v13380_v34 = vpop.f32.mrf.mxu0 }
 0x28f   :  { %v2363_v12 = vpop.f32.mrf.mxu0 }
 0x292   :  { %v13383_v18 = vpop.f32.mrf.mxu0 }
 0x294   :  { %v2383_v40 = vpop.f32.mrf.mxu0 }
 0x296   :  { %v13394_v15 = vpop.f32.mrf.mxu1 }
 0x297   :  { %v2491_v61 = vadd.f32 %v13394_v15, %v13380_v34 }
 0x298   :  { %v2484_v53 = vpop.f32.mrf.mxu1  ;;  %v13408_v20 = vpop.f32.mrf.mxu0 }
 0x299   :  { %v2485_v9 = vadd.f32 %v2484_v53, %v2363_v12  ;;  %v2590_v36 = vadd.f32 %v13408_v20, %v2491_v61 }
 0x29a   :  { %v2582_v16 = vpop.f32.mrf.mxu0 }
 0x29b   :  { %v2583_v37 = vadd.f32 %v2582_v16, %v2485_v9 }
 0x29c   :  { %v13397_v19 = vpop.f32.mrf.mxu1 }
 0x29d   :  { %v2503_v43 = vadd.f32 %v13397_v19, %v13383_v18 }
 0x29e   :  { %v2496_v33 = vpop.f32.mrf.mxu1 }
 0x29f   :  { %v13411_v27 = vpop.f32.mrf.mxu0  ;;  %v2497_v0 = vadd.f32 %v2496_v33, %v2383_v40 }
 0x2a0   :  { %v2604_v35 = vadd.f32 %v13411_v27, %v2503_v43 }
 0x2a1   :  { %v2596_v56 = vpop.f32.mrf.mxu0 }
 0x2a2   :  { %v13422_v55 = vpop.f32.mrf.mxu1  ;;  %v2597_v49 = vadd.f32 %v2596_v56, %v2497_v0 }
 0x2a3   :  { %v2689_v62 = vadd.f32 %v13422_v55, %v2590_v36 }
 0x2a4   :  { %v2680_v28 = vpop.f32.mrf.mxu1  ;;  %v13436_v5 = vpop.f32.mrf.mxu0 }
 0x2a5   :  { %v2681_v14 = vadd.f32 %v2680_v28, %v2583_v37  ;;  %v2794_v31 = vadd.f32 %v13436_v5, %v2689_v62 }
 0x2a6   :  { %v13425_v25 = vpop.f32.mrf.mxu1  ;;  %v2787_v30 = vpop.f32.mrf.mxu0 }
 0x2a7   :  { %v2705_v15 = vadd.f32 %v13425_v25, %v2604_v35  ;;  %v2788_v53 = vadd.f32 %v2787_v30, %v2681_v14 }
 0x2a8   :  { %v2696_v51 = vpop.f32.mrf.mxu1  ;;  %v13439_v42 = vpop.f32.mrf.mxu0 }
 0x2a9   :  { %v2697_v12 = vadd.f32 %v2696_v51, %v2597_v49  ;;  %v2806_v18 = vadd.f32 %v13439_v42, %v2705_v15 }
 0x2aa   :  { %v13450_v34 = vpop.f32.mrf.mxu1  ;;  %v2799_v61 = vpop.f32.mrf.mxu0 }
 0x2ab   :  { %v2887_v22 = vadd.f32 %v13450_v34, %v2794_v31  ;;  %v2800_v33 = vadd.f32 %v2799_v61, %v2697_v12  ;;  %v20325_v12 = vld [vmem:[#allocation52_spill] sm:$0xff]  ;;  %v20326_v61 = vld [vmem:[#allocation55_spill] sm:$0xff] }
 0x2ac   :  { %v2880_v20 = vpop.f32.mrf.mxu1 }
 0x2ad   :  { %v17020_v19 = vand.u32 4294901760, %v2887_v22  ;;  %v2881_v40 = vadd.f32 %v2880_v20, %v2788_v53  ;;  %v20324_v53 = vld [vmem:[#allocation46_spill] sm:$0xff]  ;;  %v20327_v20 = vld [vmem:[#allocation59_spill] sm:$0xff] }
 0x2ae   :  { %v13453_v9 = vpop.f32.mrf.mxu1 }
 0x2af   :  { %v17023_v27 = vsub.f32 %v2887_v22, %v17020_v19  ;;  %v17025_v37 = vand.u32 4294901760, %v2881_v40  ;;  %v2899_v28 = vadd.f32 %v13453_v9, %v2806_v18  ;;  %v20328_v18 = vld [vmem:[#allocation63_spill] sm:$0xff] }
 0x2b0   :  { %v2892_v55 = vpop.f32.mrf.mxu1  ;;  %v20330_v9 = vld [vmem:[#allocation71_spill] sm:$0xff] }
 0x2b1   :  { %v2995_v25 = vand.u32 4294901760, %v17023_v27  ;;  %v2984_v49 = vsub.f32 %v2881_v40, %v17025_v37  ;;  %v17029_v31 = vand.u32 4294901760, %v2899_v28  ;;  %v2893_v62 = vadd.f32 %v2892_v55, %v2800_v33  ;;  %13524 = vmatprep.mubr.f32.mxu1 %v17025_v37  ;;  %v20329_v40 = vld [vmem:[#allocation69_spill] sm:$0xff]  ;;  %v20331_v33 = vld [vmem:[#allocation74_spill] sm:$0xff]  ;;  %v20335_v55 = vld [vmem:[#allocation91_spill] sm:$0xff] }
 0x2b2   :  { %13525 = vmatmul.mubr.f32.vlgmr.msra.gmra.mxu1 %v17020_v19 }
 0x2b3   :  { %v17034_v42 = vsub.f32 %v2899_v28, %v17029_v31  ;;  %v17036_v22 = vand.u32 4294901760, %v2893_v62  ;;  %13569 = vmatpush3.msra.mxu1 %v16729_v21  ;;  %v2985_v51 = vand.u32 4294901760, %v2984_v49  ;;  %v2996_v14 = vsub.f32 %v17023_v27, %v2995_v25  ;;  %v20334_v28 = vld [vmem:[#allocation89_spill] sm:$0xff] }
 0x2b4   :  { %13570 = vmatprep.subr.mxu1 %v16734_v39 }
 0x2b5   :  { %v17044_v35 = vsub.f32 %v2893_v62, %v17036_v22  ;;  %13571 = vmatpush3.msra.mxu1 %v16734_v39  ;;  %13527 = vmatprep.mubr.f32.mxu1 %v17036_v22  ;;  %v2986_v30 = vsub.f32 %v2984_v49, %v2985_v51  ;;  %v3015_v0 = vand.u32 4294901760, %v17034_v42  ;;  %v2997_v43 = vand.u32 4294901760, %v2996_v14  ;;  %v20338_v62 = vld [vmem:[#allocation102_spill] sm:$0xff] }
 0x2b6   :  { %13572 = vmatprep.subr.mxu1 %v16794_v26  ;;  %13528 = vmatmul.mubr.f32.gmra.mxu1 %v17029_v31 }
 0x2b7   :  { %13573 = vmatpush3.msra.mxu1 %v16794_v26  ;;  %13600 = vmatprep.mubr.f32.mxu1 %v2985_v51  ;;  %v2987_v36 = vand.u32 4294901760, %v2986_v30  ;;  %v3005_v5 = vand.u32 4294901760, %v17044_v35  ;;  %v3016_v56 = vsub.f32 %v17034_v42, %v3015_v0  ;;  %v20340_v51 = vld [vmem:[#allocation15_spill] sm:$0xff] }
 0x2b8   :  { %13574 = vmatprep.subr.mxu1 %v16799_v10 }
 0x2b9   :  { %13575 = vmatpush3.msra.mxu1 %v16799_v10  ;;  %13486 = vmatprep.mubr.f32.mxu0 %v2987_v36  ;;  %v3006_v16 = vsub.f32 %v17044_v35, %v3005_v5  ;;  %v3017_v34 = vand.u32 4294901760, %v3016_v56 }
 0x2ba   :  { %13576 = vmatprep.subr.mxu1 %v16809_v2  ;;  %13487 = vmatmul.mubr.f32.vlgmr.msra.gmra.mxu0 %v2997_v43 }
 0x2bb   :  { %13531 = vmatpush3.msra.mxu0 %v16739_v4  ;;  %13577 = vmatpush3.msra.mxu1 %v16809_v2  ;;  %v3007_v15 = vand.u32 4294901760, %v3006_v16 }
 0x2bc   :  { %13532 = vmatprep.subr.mxu0 %v16745_v11  ;;  %13578 = vmatprep.subr.mxu1 %v16821_v60 }
 0x2bd   :  { %13533 = vmatpush3.msra.mxu0 %v16745_v11  ;;  %13579 = vmatpush3.msra.mxu1 %v16821_v60 }
 0x2be   :  { %13489 = vmatprep.mubr.f32.mxu0 %v3007_v15  ;;  %13534 = vmatprep.subr.mxu0 %v16797_v29 }
 0x2bf   :  { %13580 = vmatprep.subr.mxu1 %v16836_v50  ;;  %13490 = vmatmul.mubr.f32.gmra.mxu0 %v3017_v34 }
 0x2c0   :  { %13535 = vmatpush3.msra.mxu0 %v16797_v29  ;;  %13581 = vmatpush3.msra.mxu1 %v16836_v50 }
 0x2c1   :  { %13536 = vmatprep.subr.mxu0 %v16807_v57  ;;  %13562 = vmatprep.mubr.f32.mxu0 %v2984_v49  ;;  %v20337_v49 = vld [vmem:[#allocation99_spill] sm:$0xff] }
 0x2c2   :  { %13582 = vmatprep.subr.mxu1 %v16847_v8  ;;  %13537 = vmatpush3.msra.mxu0 %v16807_v57 }
 0x2c3   :  { %13583 = vmatpush3.msra.mxu1 %v16847_v8  ;;  %13538 = vmatprep.subr.mxu0 %v16819_v13 }
 0x2c4   :  { %13584 = vmatprep.subr.mxu1 %v16862_v38  ;;  %13539 = vmatpush3.msra.mxu0 %v16819_v13 }
 0x2c5   :  { %13585 = vmatpush3.msra.mxu1 %v16862_v38  ;;  %13540 = vmatprep.subr.mxu0 %v16833_v48 }
 0x2c6   :  { %13586 = vmatprep.subr.mxu1 %v16879_v41  ;;  %13541 = vmatpush3.msra.mxu0 %v16833_v48 }
 0x2c7   :  { %13587 = vmatpush3.msra.mxu1 %v16879_v41  ;;  %13542 = vmatprep.subr.mxu0 %v16851_v1 }
 0x2c8   :  { %13588 = vmatprep.subr.mxu1 %v16895_v23  ;;  %13543 = vmatpush3.msra.mxu0 %v16851_v1 }
 0x2c9   :  { %13589 = vmatpush3.msra.mxu1 %v16895_v23  ;;  %13544 = vmatprep.subr.mxu0 %v16860_v32 }
 0x2ca   :  { %13590 = vmatprep.subr.mxu1 %v16914_v24  ;;  %13545 = vmatpush3.msra.mxu0 %v16860_v32 }
 0x2cb   :  { %13591 = vmatpush3.msra.mxu1 %v16914_v24  ;;  %13546 = vmatprep.subr.mxu0 %v16877_v45 }
 0x2cc   :  { %13592 = vmatprep.subr.mxu1 %v16925_v17  ;;  %13547 = vmatpush3.msra.mxu0 %v16877_v45 }
 0x2cd   :  { %13593 = vmatpush3.msra.mxu1 %v16925_v17  ;;  %13548 = vmatprep.subr.mxu0 %v16893_v47 }
 0x2ce   :  { %13594 = vmatprep.subr.mxu1 %v16941_v44  ;;  %13549 = vmatpush3.msra.mxu0 %v16893_v47 }
 0x2cf   :  { %13595 = vmatpush3.msra.mxu1 %v16941_v44  ;;  %13550 = vmatprep.subr.mxu0 %v16910_v46 }
 0x2d0   :  { %13596 = vmatprep.subr.mxu1 %v16958_v3  ;;  %13551 = vmatpush3.msra.mxu0 %v16910_v46 }
 0x2d1   :  { %13597 = vmatpush3.msra.mxu1 %v16958_v3  ;;  %13552 = vmatprep.subr.mxu0 %v16930_v6 }
 0x2d2   :  { %13598 = vmatprep.subr.mxu1 %v16974_v59  ;;  %13553 = vmatpush3.msra.mxu0 %v16930_v6 }
 0x2d3   :  { %13599 = vmatpush3.msra.mxu1 %v16974_v59  ;;  %13554 = vmatprep.subr.mxu0 %v16939_v54 }
 0x2d4   :  { %13601 = vmatmul.mubr.f32.vlgmr.msra.gmra.mxu1 %v2995_v25  ;;  %13644 = vmatprep.subr.mxu1 %v16729_v21  ;;  %v20336_v25 = vld [vmem:[#allocation94_spill] sm:$0xff] }
 0x2d5   :  { %13555 = vmatpush3.msra.mxu0 %v16939_v54  ;;  %13603 = vmatprep.mubr.f32.mxu1 %v3005_v5 }
 0x2d6   :  { %13645 = vmatpush3.msra.mxu1 %v16729_v21  ;;  %13556 = vmatprep.subr.mxu0 %v16956_v63 }
 0x2d7   :  { %13646 = vmatprep.subr.mxu1 %v16734_v39  ;;  %13557 = vmatpush3.msra.mxu0 %v16956_v63 }
 0x2d8   :  { %13647 = vmatpush3.msra.mxu1 %v16734_v39  ;;  %13558 = vmatprep.subr.mxu0 %v16972_v52 }
 0x2d9   :  { %13604 = vmatmul.mubr.f32.gmra.mxu1 %v3015_v0  ;;  %13648 = vmatprep.subr.mxu1 %v16794_v26 }
 0x2da   :  { %13559 = vmatpush3.msra.mxu0 %v16972_v52  ;;  %13649 = vmatpush3.msra.mxu1 %v16794_v26 }
 0x2db   :  { %13676 = vmatprep.mubr.f32.mxu1 %v17025_v37  ;;  %13560 = vmatprep.subr.mxu0 %v16990_v58 }
 0x2dc   :  { %13650 = vmatprep.subr.mxu1 %v16799_v10  ;;  %13561 = vmatpush3.msra.mxu0 %v16990_v58 }
 0x2dd   :  { %13651 = vmatpush3.msra.mxu1 %v16799_v10  ;;  %13563 = vmatmul.mubr.f32.vlgmr.msra.gmra.mxu0 %v17023_v27  ;;  %v20332_v27 = vld [vmem:[#allocation79_spill] sm:$0xff] }
 0x2de   :  { %13606 = vmatprep.subr.mxu0 %v16750_v7  ;;  %13652 = vmatprep.subr.mxu1 %v16809_v2 }
 0x2df   :  { %13565 = vmatprep.mubr.f32.mxu0 %v17044_v35  ;;  %13607 = vmatpush3.msra.mxu0 %v16750_v7 }
 0x2e0   :  { %13653 = vmatpush3.msra.mxu1 %v16809_v2  ;;  %13608 = vmatprep.subr.mxu0 %v20324_v53 }
 0x2e1   :  { %13654 = vmatprep.subr.mxu1 %v16821_v60  ;;  %13609 = vmatpush3.msra.mxu0 %v20324_v53 }
 0x2e2   :  { %13655 = vmatpush3.msra.mxu1 %v16821_v60  ;;  %13566 = vmatmul.mubr.f32.gmra.mxu0 %v17034_v42  ;;  %v20339_v42 = vld [vmem:[#allocation12_spill] sm:$0xff] }
 0x2e3   :  { %13610 = vmatprep.subr.mxu0 %v20325_v12  ;;  %13656 = vmatprep.subr.mxu1 %v16836_v50 }
 0x2e4   :  { %13611 = vmatpush3.msra.mxu0 %v20325_v12  ;;  %13638 = vmatprep.mubr.f32.mxu0 %v17025_v37  ;;  %v20333_v37 = vld [vmem:[#allocation83_spill] sm:$0xff] }
 0x2e5   :  { %13657 = vmatpush3.msra.mxu1 %v16836_v50  ;;  %13612 = vmatprep.subr.mxu0 %v20326_v61 }
 0x2e6   :  { %13658 = vmatprep.subr.mxu1 %v16847_v8  ;;  %13613 = vmatpush3.msra.mxu0 %v20326_v61 }
 0x2e7   :  { %13659 = vmatpush3.msra.mxu1 %v16847_v8  ;;  %13614 = vmatprep.subr.mxu0 %v20327_v20 }
 0x2e8   :  { %13660 = vmatprep.subr.mxu1 %v16862_v38  ;;  %13615 = vmatpush3.msra.mxu0 %v20327_v20 }
 0x2e9   :  { %13661 = vmatpush3.msra.mxu1 %v16862_v38  ;;  %13616 = vmatprep.subr.mxu0 %v20328_v18 }
 0x2ea   :  { %13662 = vmatprep.subr.mxu1 %v16879_v41  ;;  %13617 = vmatpush3.msra.mxu0 %v20328_v18 }
 0x2eb   :  { %13663 = vmatpush3.msra.mxu1 %v16879_v41  ;;  %13618 = vmatprep.subr.mxu0 %v20329_v40 }
 0x2ec   :  { %13664 = vmatprep.subr.mxu1 %v16895_v23  ;;  %13619 = vmatpush3.msra.mxu0 %v20329_v40 }
 0x2ed   :  { %13665 = vmatpush3.msra.mxu1 %v16895_v23  ;;  %13620 = vmatprep.subr.mxu0 %v20330_v9 }
 0x2ee   :  { %13666 = vmatprep.subr.mxu1 %v16914_v24  ;;  %13621 = vmatpush3.msra.mxu0 %v20330_v9 }
 0x2ef   :  { %13667 = vmatpush3.msra.mxu1 %v16914_v24  ;;  %13622 = vmatprep.subr.mxu0 %v20331_v33 }
 0x2f0   :  { %13668 = vmatprep.subr.mxu1 %v16925_v17  ;;  %13623 = vmatpush3.msra.mxu0 %v20331_v33 }
 0x2f1   :  { %13669 = vmatpush3.msra.mxu1 %v16925_v17  ;;  %13624 = vmatprep.subr.mxu0 %v20332_v27 }
 0x2f2   :  { %13670 = vmatprep.subr.mxu1 %v16941_v44  ;;  %13625 = vmatpush3.msra.mxu0 %v20332_v27 }
 0x2f3   :  { %13671 = vmatpush3.msra.mxu1 %v16941_v44  ;;  %13626 = vmatprep.subr.mxu0 %v20333_v37 }
 0x2f4   :  { %13672 = vmatprep.subr.mxu1 %v16958_v3  ;;  %13627 = vmatpush3.msra.mxu0 %v20333_v37 }
 0x2f5   :  { %13673 = vmatpush3.msra.mxu1 %v16958_v3  ;;  %13628 = vmatprep.subr.mxu0 %v20334_v28 }
 0x2f6   :  { %13674 = vmatprep.subr.mxu1 %v16974_v59  ;;  %13629 = vmatpush3.msra.mxu0 %v20334_v28 }
 0x2f7   :  { %13675 = vmatpush3.msra.mxu1 %v16974_v59  ;;  %13630 = vmatprep.subr.mxu0 %v20335_v55 }
 0x2f8   :  { %13677 = vmatmul.mubr.f32.vlgmr.msra.gmra.mxu1 %v17020_v19  ;;  %13631 = vmatpush3.msra.mxu0 %v20335_v55 }
 0x2f9   :  { %13679 = vmatprep.mubr.f32.mxu1 %v17036_v22  ;;  %13632 = vmatprep.subr.mxu0 %v20336_v25 }
 0x2fa   :  { %13633 = vmatpush3.msra.mxu0 %v20336_v25 }
 0x2fb   :  { %13634 = vmatprep.subr.mxu0 %v20337_v49 }
 0x2fc   :  { %13680 = vmatmul.mubr.f32.gmra.mxu1 %v17029_v31  ;;  %13635 = vmatpush3.msra.mxu0 %v20337_v49 }
 0x2fd   :  { %13636 = vmatprep.subr.mxu0 %v20338_v62  ;;  %13704 = vmatprep.mubr.f32.mxu1 %v20339_v42 }
 0x2fe   :  { %13637 = vmatpush3.msra.mxu0 %v20338_v62 }
 0x2ff   :  { %13639 = vmatmul.mubr.f32.vlgmr.msra.gmra.mxu0 %v17020_v19 }
 0x300   :  { %13641 = vmatprep.mubr.f32.mxu0 %v17036_v22 }
 0x303   :  { %13642 = vmatmul.mubr.f32.gmra.mxu0 %v17029_v31 }
 0x304   :  { %13690 = vmatprep.mubr.f32.mxu0 %v20340_v51 }
 0x372   :  { %v13526_v14 = vpop.f32.mrf.mxu1 }
 0x374   :  { %v3170_v35 = vpop.f32.mrf.mxu1 }
 0x376   :  { %v13529_v0 = vpop.f32.mrf.mxu1 }
 0x378   :  { %v3182_v5 = vpop.f32.mrf.mxu1 }
 0x37a   :  { %v13488_v30 = vpop.f32.mrf.mxu0 }
 0x37b   :  { %v3177_v19 = vadd.f32 %v13526_v14, %v13488_v30 }
 0x37c   :  { %v2989_v36 = vpop.f32.mrf.mxu0 }
 0x37d   :  { %v3171_v55 = vadd.f32 %v3170_v35, %v2989_v36  ;;  %v20341_v35 = vld [vmem:[#allocation34_spill] sm:$0xff] }
 0x37f   :  { %v13491_v43 = vpop.f32.mrf.mxu0 }
 0x380   :  { %v3189_v51 = vadd.f32 %v13529_v0, %v13491_v43  ;;  %v20342_v43 = vld [vmem:[#allocation24_spill] sm:$0xff] }
 0x381   :  { %v3009_v56 = vpop.f32.mrf.mxu0 }
 0x382   :  { %v3183_v33 = vadd.f32 %v3182_v5, %v3009_v56 }
 0x394   :  { %v13602_v16 = vpop.f32.mrf.mxu1 }
 0x396   :  { %v3402_v15 = vpop.f32.mrf.mxu1 }
 0x399   :  { %v13605_v62 = vpop.f32.mrf.mxu1 }
 0x39b   :  { %v3418_v25 = vpop.f32.mrf.mxu1 }
 0x39d   :  { %v13564_v34 = vpop.f32.mrf.mxu0 }
 0x39e   :  { %v3300_v31 = vadd.f32 %v13564_v34, %v3177_v19 }
 0x39f   :  { %v3292_v49 = vpop.f32.mrf.mxu0 }
 0x3a0   :  { %v3293_v37 = vadd.f32 %v3292_v49, %v3171_v55  ;;  %v3411_v40 = vadd.f32 %v13602_v16, %v3300_v31 }
 0x3a2   :  { %v13567_v22 = vpop.f32.mrf.mxu0  ;;  %v3403_v53 = vadd.f32 %v3402_v15, %v3293_v37 }
 0x3a3   :  { %v3314_v9 = vadd.f32 %v13567_v22, %v3189_v51 }
 0x3a4   :  { %v3306_v27 = vpop.f32.mrf.mxu0 }
 0x3a5   :  { %v3307_v61 = vadd.f32 %v3306_v27, %v3183_v33  ;;  %v3427_v14 = vadd.f32 %v13605_v62, %v3314_v9 }
 0x3a7   :  { %v3419_v49 = vadd.f32 %v3418_v25, %v3307_v61  ;;  %v20344_v61 = vld [vmem:[#allocation35_spill] sm:$0xff] }
 0x3b8   :  { %v13678_v28 = vpop.f32.mrf.mxu1 }
 0x3ba   :  { %v3650_v18 = vpop.f32.mrf.mxu1 }
 0x3bc   :  { %v13681_v30 = vpop.f32.mrf.mxu1 }
 0x3bf   :  { %v13640_v20 = vpop.f32.mrf.mxu0 }
 0x3c0   :  { %v3552_v12 = vadd.f32 %v13640_v20, %v3411_v40 }
 0x3c1   :  { %v3545_v7 = vpop.f32.mrf.mxu0 }
 0x3c2   :  { %v3657_v58 = vadd.f32 %v13678_v28, %v3552_v12  ;;  %v3546_v52 = vadd.f32 %v3545_v7, %v3403_v53  ;;  %v3662_v12 = vpop.f32.mrf.mxu1  ;;  %v20343_v53 = vld [vmem:[#allocation32_spill] sm:$0xff] }
 0x3c3   :  { %v13643_v63 = vpop.f32.mrf.mxu0 }
 0x3c4   :  { %v17200_v36 = vsub.f32 %v20341_v35, %v3657_v58  ;;  %v3651_v0 = vadd.f32 %v3650_v18, %v3546_v52  ;;  %v3564_v55 = vadd.f32 %v13643_v63, %v3427_v14 }
 0x3c5   :  { %v3557_v5 = vpop.f32.mrf.mxu0 }
 0x3c6   :  { %v3677_v51 = vmul.f32 %v17200_v36, %v17200_v36  ;;  %v17205_v33 = vsub.f32 %v20342_v43, %v3651_v0  ;;  %v3669_v20 = vadd.f32 %v13681_v30, %v3564_v55  ;;  %v3558_v40 = vadd.f32 %v3557_v5, %v3419_v49  ;;  %v20345_v49 = vld [vmem:[#allocation38_spill] sm:$0xff]  ;;  %v20346_v43 = vld [vmem:[#allocation39_spill] sm:$0xff] }
 0x3c8   :  { %v3676_v7 = vmul.f32 %v17205_v33, %v17205_v33  ;;  %v17210_v9 = vsub.f32 %v20343_v53, %v3669_v20  ;;  %v3663_v58 = vadd.f32 %v3662_v12, %v3558_v40  ;;  %v17212_v52 = vand.u32 4294901760, %v3677_v51  ;;  %v20347_v40 = vld [vmem:[#allocation40_spill] sm:$0xff]  ;;  %v20350_v53 = vld [vmem:[#allocation21_spill] sm:$0xff] }
 0x3c9   :  { %v20348_v12 = vld [vmem:[#allocation16_spill] sm:$0xff] }
 0x3ca   :  { %v3679_v63 = vmul.f32 %v17210_v9, %v17210_v9  ;;  %v17217_v18 = vsub.f32 %v20344_v61, %v3663_v58  ;;  %v17219_v27 = vand.u32 4294901760, %v3676_v7  ;;  %v3829_v25 = vsub.f32 %v3677_v51, %v17212_v52  ;;  %v20351_v58 = vld [vmem:[#allocation23_spill] sm:$0xff] }
 0x3cb   :  { %v20353_v61 = vld [vmem:[#allocation31_spill] sm:$0xff] }
 0x3cc   :  { %v17221_v37 = vand.u32 4294901760, %v3679_v63  ;;  %v3678_v28 = vmul.f32 %v17217_v18, %v17217_v18  ;;  %v3836_v56 = vsub.f32 %v3676_v7, %v17219_v27  ;;  %v3830_v19 = vand.u32 4294901760, %v3829_v25  ;;  %v20349_v7 = vld [vmem:[#allocation13_spill] sm:$0xff] }
 0x3ce   :  { %v3815_v62 = vsub.f32 %v3679_v63, %v17221_v37  ;;  %v17227_v16 = vand.u32 4294901760, %v3678_v28  ;;  %13682 = vmatprep.subr.mxu0 %v17221_v37  ;;  %v3837_v14 = vand.u32 4294901760, %v3836_v56  ;;  %v3831_v0 = vsub.f32 %v3829_v25, %v3830_v19  ;;  %v20352_v63 = vld [vmem:[#allocation20_spill] sm:$0xff] }
 0x3cf   :  { %13683 = vmatpush3.msra.mxu0 %v17221_v37 }
 0x3d0   :  { %v3822_v15 = vsub.f32 %v3678_v28, %v17227_v16  ;;  %13684 = vmatprep.subr.mxu0 %v17227_v16  ;;  %v3816_v34 = vand.u32 4294901760, %v3815_v62  ;;  %v3838_v5 = vsub.f32 %v3836_v56, %v3837_v14  ;;  %v3832_v51 = vand.u32 4294901760, %v3831_v0  ;;  %v20354_v28 = vld [vmem:[#allocation33_spill] sm:$0xff] }
 0x3d1   :  { %13685 = vmatpush3.msra.mxu0 %v17227_v16  ;;  %v20370_v0 = vld [vmem:[#allocation97_spill] sm:$0xff] }
 0x3d2   :  { %13686 = vmatprep.subr.mxu0 %v17212_v52  ;;  %v3817_v22 = vsub.f32 %v3815_v62, %v3816_v34  ;;  %v3823_v31 = vand.u32 4294901760, %v3822_v15  ;;  %v3839_v20 = vand.u32 4294901760, %v3838_v5  ;;  %v20372_v5 = vld [vmem:[#allocation101_spill] sm:$0xff] }
 0x3d3   :  { %13687 = vmatpush3.msra.mxu0 %v17212_v52 }
 0x3d4   :  { %13688 = vmatprep.subr.mxu0 %v17219_v27  ;;  %v3818_v30 = vand.u32 4294901760, %v3817_v22  ;;  %v3824_v35 = vsub.f32 %v3822_v15, %v3823_v31  ;;  %v20365_v22 = vld [vmem:[#allocation77_spill] sm:$0xff] }
 0x3d5   :  { %13689 = vmatpush3.msra.mxu0 %v17219_v27 }
 0x3d6   :  { %13696 = vmatprep.subr.mxu1 %v3818_v30  ;;  %13710 = vmatprep.subr.mxu0 %v3815_v62  ;;  %v3825_v55 = vand.u32 4294901760, %v3824_v35  ;;  %v20369_v35 = vld [vmem:[#allocation90_spill] sm:$0xff] }
 0x3d7   :  { %13691 = vmatmul.mubr.f32.vlgmr.msra.gmra.mxu0 %v20345_v49  ;;  %13697 = vmatpush3.msra.mxu1 %v3818_v30  ;;  %v20368_v30 = vld [vmem:[#allocation86_spill] sm:$0xff] }
 0x3d8   :  { %13711 = vmatpush3.msra.mxu0 %v3815_v62  ;;  %13698 = vmatprep.subr.mxu1 %v3825_v55  ;;  %v20356_v62 = vld [vmem:[#allocation30_spill] sm:$0xff] }
 0x3d9   :  { %13712 = vmatprep.subr.mxu0 %v3822_v15  ;;  %13699 = vmatpush3.msra.mxu1 %v3825_v55  ;;  %v20371_v55 = vld [vmem:[#allocation98_spill] sm:$0xff] }
 0x3da   :  { %13713 = vmatpush3.msra.mxu0 %v3822_v15  ;;  %13693 = vmatprep.mubr.f32.mxu0 %v20346_v43  ;;  %v20358_v15 = vld [vmem:[#allocation37_spill] sm:$0xff] }
 0x3db   :  { %13700 = vmatprep.subr.mxu1 %v3832_v51  ;;  %13714 = vmatprep.subr.mxu0 %v3829_v25 }
 0x3dc   :  { %13694 = vmatmul.mubr.f32.gmra.mxu0 %v20347_v40  ;;  %13701 = vmatpush3.msra.mxu1 %v3832_v51  ;;  %v20373_v51 = vld [vmem:[#allocation103_spill] sm:$0xff] }
 0x3dd   :  { %13715 = vmatpush3.msra.mxu0 %v3829_v25  ;;  %13702 = vmatprep.subr.mxu1 %v3839_v20  ;;  %v20355_v25 = vld [vmem:[#allocation14_spill] sm:$0xff] }
 0x3de   :  { %13716 = vmatprep.subr.mxu0 %v3836_v56  ;;  %13703 = vmatpush3.msra.mxu1 %v3839_v20  ;;  %v20374_v20 = vld [vmem:[#allocation104_spill] sm:$0xff] }
 0x3df   :  { %13717 = vmatpush3.msra.mxu0 %v3836_v56  ;;  %13705 = vmatmul.mubr.f32.vlgmr.msra.gmra.mxu1 %v20348_v12  ;;  %v20357_v56 = vld [vmem:[#allocation36_spill] sm:$0xff] }
 0x3e0   :  { %13718 = vmatprep.mubr.f32.mxu0 %v20349_v7  ;;  %13724 = vmatprep.subr.mxu1 %v17221_v37 }
 0x3e1   :  { %13738 = vmatprep.subr.mxu0 %v3816_v34  ;;  %13719 = vmatmul.mubr.f32.vlgmr.msra.gmra.mxu0 %v20350_v53 }
 0x3e2   :  { %13725 = vmatpush3.msra.mxu1 %v17221_v37  ;;  %13739 = vmatpush3.msra.mxu0 %v3816_v34  ;;  %v20363_v34 = vld [vmem:[#allocation66_spill] sm:$0xff] }
 0x3e3   :  { %13726 = vmatprep.subr.mxu1 %v17227_v16  ;;  %13740 = vmatprep.subr.mxu0 %v3823_v31 }
 0x3e4   :  { %13707 = vmatprep.mubr.f32.mxu1 %v20351_v58  ;;  %13727 = vmatpush3.msra.mxu1 %v17227_v16 }
 0x3e5   :  { %13741 = vmatpush3.msra.mxu0 %v3823_v31  ;;  %13708 = vmatmul.mubr.f32.gmra.mxu1 %v20352_v63  ;;  %v20366_v31 = vld [vmem:[#allocation78_spill] sm:$0xff] }
 0x3e6   :  { %13728 = vmatprep.subr.mxu1 %v17212_v52  ;;  %13742 = vmatprep.subr.mxu0 %v3830_v19 }
 0x3e7   :  { %13721 = vmatprep.mubr.f32.mxu0 %v20353_v61  ;;  %13729 = vmatpush3.msra.mxu1 %v17212_v52 }
 0x3e8   :  { %13743 = vmatpush3.msra.mxu0 %v3830_v19  ;;  %13730 = vmatprep.subr.mxu1 %v17219_v27  ;;  %v20364_v19 = vld [vmem:[#allocation70_spill] sm:$0xff] }
 0x3e9   :  { %13722 = vmatmul.mubr.f32.gmra.mxu0 %v20354_v28  ;;  %13744 = vmatprep.subr.mxu0 %v3837_v14 }
 0x3ea   :  { %13731 = vmatpush3.msra.mxu1 %v17219_v27  ;;  %13732 = vmatprep.mubr.f32.mxu1 %v20355_v25 }
 0x3eb   :  { %13745 = vmatpush3.msra.mxu0 %v3837_v14  ;;  %13733 = vmatmul.mubr.f32.vlgmr.msra.gmra.mxu1 %v20356_v62  ;;  %v20367_v14 = vld [vmem:[#allocation82_spill] sm:$0xff] }
 0x3ec   :  { %13752 = vmatprep.subr.mxu1 %v17221_v37  ;;  %13746 = vmatprep.mubr.f32.mxu0 %v20339_v42 }
 0x3ed   :  { %13753 = vmatpush3.msra.mxu1 %v17221_v37  ;;  %13747 = vmatmul.mubr.f32.vlgmr.msra.gmra.mxu0 %v20348_v12  ;;  %v20359_v37 = vld [vmem:[#allocation47_spill] sm:$0xff] }
 0x3ee   :  { %13754 = vmatprep.subr.mxu1 %v17227_v16  ;;  %13735 = vmatprep.mubr.f32.mxu1 %v20357_v56 }
 0x3ef   :  { %13755 = vmatpush3.msra.mxu1 %v17227_v16  ;;  %13749 = vmatprep.mubr.f32.mxu0 %v20351_v58  ;;  %v20360_v16 = vld [vmem:[#allocation48_spill] sm:$0xff] }
 0x3f0   :  { %13736 = vmatmul.mubr.f32.gmra.mxu1 %v20358_v15  ;;  %13756 = vmatprep.subr.mxu1 %v17212_v52 }
 0x3f1   :  { %13757 = vmatpush3.msra.mxu1 %v17212_v52  ;;  %13750 = vmatmul.mubr.f32.gmra.mxu0 %v20352_v63  ;;  %v20361_v52 = vld [vmem:[#allocation58_spill] sm:$0xff] }
 0x3f2   :  { %13758 = vmatprep.subr.mxu1 %v17219_v27  ;;  %13760 = vmatprep.mubr.f32.mxu1 %v20339_v42 }
 0x3f3   :  { %13759 = vmatpush3.msra.mxu1 %v17219_v27  ;;  %13766 = vmatprep.subr.mxu0 %v16729_v21  ;;  %v20362_v27 = vld [vmem:[#allocation62_spill] sm:$0xff] }
 0x3f4   :  { %13761 = vmatmul.mubr.f32.vlgmr.msra.gmra.mxu1 %v20348_v12  ;;  %13804 = vmatprep.subr.mxu1 %v20359_v37 }
 0x3f5   :  { %13763 = vmatprep.mubr.f32.mxu1 %v20351_v58  ;;  %13805 = vmatpush3.msra.mxu1 %v20359_v37 }
 0x3f6   :  { %13806 = vmatprep.subr.mxu1 %v20360_v16  ;;  %13767 = vmatpush3.msra.mxu0 %v16729_v21 }
 0x3f7   :  { %13807 = vmatpush3.msra.mxu1 %v20360_v16  ;;  %13768 = vmatprep.subr.mxu0 %v16734_v39 }
 0x3f8   :  { %13764 = vmatmul.mubr.f32.gmra.mxu1 %v20352_v63  ;;  %13808 = vmatprep.subr.mxu1 %v20361_v52 }
 0x3f9   :  { %13809 = vmatpush3.msra.mxu1 %v20361_v52  ;;  %13769 = vmatpush3.msra.mxu0 %v16734_v39 }
 0x3fa   :  { %13810 = vmatprep.subr.mxu1 %v20362_v27  ;;  %13770 = vmatprep.subr.mxu0 %v16794_v26 }
 0x3fb   :  { %13811 = vmatpush3.msra.mxu1 %v20362_v27  ;;  %13771 = vmatpush3.msra.mxu0 %v16794_v26 }
 0x3fc   :  { %13812 = vmatprep.subr.mxu1 %v20363_v34  ;;  %13772 = vmatprep.subr.mxu0 %v16799_v10 }
 0x3fd   :  { %13813 = vmatpush3.msra.mxu1 %v20363_v34  ;;  %13773 = vmatpush3.msra.mxu0 %v16799_v10 }
 0x3fe   :  { %13814 = vmatprep.subr.mxu1 %v20364_v19  ;;  %13774 = vmatprep.subr.mxu0 %v16809_v2 }
 0x3ff   :  { %13815 = vmatpush3.msra.mxu1 %v20364_v19  ;;  %13775 = vmatpush3.msra.mxu0 %v16809_v2 }
 0x400   :  { %13816 = vmatprep.subr.mxu1 %v20365_v22  ;;  %13776 = vmatprep.subr.mxu0 %v16821_v60 }
 0x401   :  { %13817 = vmatpush3.msra.mxu1 %v20365_v22  ;;  %13777 = vmatpush3.msra.mxu0 %v16821_v60 }
 0x402   :  { %13818 = vmatprep.subr.mxu1 %v20366_v31  ;;  %13778 = vmatprep.subr.mxu0 %v16836_v50 }
 0x403   :  { %13819 = vmatpush3.msra.mxu1 %v20366_v31  ;;  %13779 = vmatpush3.msra.mxu0 %v16836_v50 }
 0x404   :  { %13820 = vmatprep.subr.mxu1 %v20367_v14  ;;  %13780 = vmatprep.subr.mxu0 %v16847_v8 }
 0x405   :  { %13821 = vmatpush3.msra.mxu1 %v20367_v14  ;;  %13781 = vmatpush3.msra.mxu0 %v16847_v8 }
 0x406   :  { %13822 = vmatprep.subr.mxu1 %v20368_v30  ;;  %13782 = vmatprep.subr.mxu0 %v16862_v38 }
 0x407   :  { %13823 = vmatpush3.msra.mxu1 %v20368_v30  ;;  %13783 = vmatpush3.msra.mxu0 %v16862_v38 }
 0x408   :  { %13824 = vmatprep.subr.mxu1 %v20369_v35  ;;  %13784 = vmatprep.subr.mxu0 %v16879_v41 }
 0x409   :  { %13825 = vmatpush3.msra.mxu1 %v20369_v35  ;;  %13785 = vmatpush3.msra.mxu0 %v16879_v41 }
 0x40a   :  { %13826 = vmatprep.subr.mxu1 %v20370_v0  ;;  %13786 = vmatprep.subr.mxu0 %v16895_v23 }
 0x40b   :  { %13827 = vmatpush3.msra.mxu1 %v20370_v0  ;;  %13787 = vmatpush3.msra.mxu0 %v16895_v23 }
 0x40c   :  { %13828 = vmatprep.subr.mxu1 %v20371_v55  ;;  %13788 = vmatprep.subr.mxu0 %v16914_v24 }
 0x40d   :  { %13829 = vmatpush3.msra.mxu1 %v20371_v55  ;;  %13789 = vmatpush3.msra.mxu0 %v16914_v24 }
 0x40e   :  { %13830 = vmatprep.subr.mxu1 %v20372_v5  ;;  %13790 = vmatprep.subr.mxu0 %v16925_v17 }
 0x40f   :  { %13831 = vmatpush3.msra.mxu1 %v20372_v5  ;;  %13791 = vmatpush3.msra.mxu0 %v16925_v17 }
 0x410   :  { %13832 = vmatprep.subr.mxu1 %v20373_v51  ;;  %13792 = vmatprep.subr.mxu0 %v16941_v44 }
 0x411   :  { %13833 = vmatpush3.msra.mxu1 %v20373_v51  ;;  %13793 = vmatpush3.msra.mxu0 %v16941_v44 }
 0x412   :  { %13834 = vmatprep.subr.mxu1 %v20374_v20  ;;  %13794 = vmatprep.subr.mxu0 %v16958_v3 }
 0x413   :  { %13835 = vmatpush3.msra.mxu1 %v20374_v20  ;;  %13795 = vmatpush3.msra.mxu0 %v16958_v3 }
 0x414   :  { %13880 = vmatprep.subr.mxu1 %v16729_v21  ;;  %13796 = vmatprep.subr.mxu0 %v16974_v59 }
 0x415   :  { %13797 = vmatpush3.msra.mxu0 %v16974_v59 }
 0x416   :  { %13842 = vmatprep.subr.mxu0 %v16739_v4 }
 0x497   :  { %v13692_v5 = vpop.f32.mrf.mxu0 }
 0x499   :  { %v3755_v51 = vpop.f32.mrf.mxu0 }
 0x49c   :  { %v13695_v55 = vpop.f32.mrf.mxu0 }
 0x49e   :  { %v3775_v0 = vpop.f32.mrf.mxu0 }
 0x49f   :  { %v13706_v35 = vpop.f32.mrf.mxu1 }
 0x4a0   :  { %v3883_v19 = vadd.f32 %v13706_v35, %v13692_v5 }
 0x4a1   :  { %v3876_v30 = vpop.f32.mrf.mxu1  ;;  %v13720_v14 = vpop.f32.mrf.mxu0 }
 0x4a2   :  { %v3877_v27 = vadd.f32 %v3876_v30, %v3755_v51  ;;  %v3982_v37 = vadd.f32 %v13720_v14, %v3883_v19 }
 0x4a3   :  { %v3974_v22 = vpop.f32.mrf.mxu0 }
 0x4a4   :  { %v3975_v25 = vadd.f32 %v3974_v22, %v3877_v27 }
 0x4a5   :  { %v13709_v31 = vpop.f32.mrf.mxu1 }
 0x4a6   :  { %v3895_v15 = vadd.f32 %v13709_v31, %v13695_v55 }
 0x4a7   :  { %v3888_v20 = vpop.f32.mrf.mxu1 }
 0x4a8   :  { %v3889_v28 = vadd.f32 %v3888_v20, %v3775_v0 }
 0x4a9   :  { %v13723_v34 = vpop.f32.mrf.mxu0 }
 0x4aa   :  { %v3996_v53 = vadd.f32 %v13723_v34, %v3895_v15 }
 0x4ab   :  { %v3988_v52 = vpop.f32.mrf.mxu0  ;;  %v13734_v16 = vpop.f32.mrf.mxu1 }
 0x4ac   :  { %v4081_v61 = vadd.f32 %v13734_v16, %v3982_v37  ;;  %v3989_v43 = vadd.f32 %v3988_v52, %v3889_v28 }
 0x4ad   :  { %v4072_v56 = vpop.f32.mrf.mxu1  ;;  %v13748_v62 = vpop.f32.mrf.mxu0 }
 0x4ae   :  { %v4073_v7 = vadd.f32 %v4072_v56, %v3975_v25  ;;  %v4186_v49 = vadd.f32 %v13748_v62, %v4081_v61 }
 0x4af   :  { %v4179_v63 = vpop.f32.mrf.mxu0 }
 0x4b0   :  { %v13737_v58 = vpop.f32.mrf.mxu1  ;;  %v4180_v30 = vadd.f32 %v4179_v63, %v4073_v7 }
 0x4b1   :  { %v13751_v40 = vpop.f32.mrf.mxu0  ;;  %v4097_v35 = vadd.f32 %v13737_v58, %v3996_v53 }
 0x4b2   :  { %v4088_v12 = vpop.f32.mrf.mxu1 }
 0x4b3   :  { %v4089_v51 = vadd.f32 %v4088_v12, %v3989_v43  ;;  %v4191_v19 = vpop.f32.mrf.mxu0  ;;  %v4198_v14 = vadd.f32 %v13751_v40, %v4097_v35 }
 0x4b4   :  { %v13762_v5 = vpop.f32.mrf.mxu1 }
 0x4b5   :  { %v4279_v42 = vadd.f32 %v13762_v5, %v4186_v49  ;;  %v4192_v16 = vadd.f32 %v4191_v19, %v4089_v51  ;;  %v20376_v51 = vld [vmem:[#allocation95_spill] sm:$0xff]  ;;  %v20377_v19 = vld [vmem:[#allocation100_spill] sm:$0xff] }
 0x4b6   :  { %v4272_v31 = vpop.f32.mrf.mxu1 }
 0x4b7   :  { %v17343_v55 = vand.u32 4294901760, %v4279_v42  ;;  %v4273_v27 = vadd.f32 %v4272_v31, %v4180_v30  ;;  %v20375_v30 = vld [vmem:[#allocation92_spill] sm:$0xff]  ;;  %v20378_v31 = vld [vmem:[#allocation45_spill] sm:$0xff] }
 0x4b8   :  { %v13765_v37 = vpop.f32.mrf.mxu1 }
 0x4b9   :  { %v17346_v15 = vsub.f32 %v4279_v42, %v17343_v55  ;;  %v17348_v25 = vand.u32 4294901760, %v4273_v27  ;;  %v4291_v28 = vadd.f32 %v13765_v37, %v4198_v14  ;;  %v20379_v14 = vld [vmem:[#allocation46_spill] sm:$0xff]  ;;  %v20381_v37 = vld [vmem:[#allocation55_spill] sm:$0xff] }
 0x4ba   :  { %v4284_v61 = vpop.f32.mrf.mxu1 }
 0x4bb   :  { %v4387_v53 = vand.u32 4294901760, %v17346_v15  ;;  %v4376_v43 = vsub.f32 %v4273_v27, %v17348_v25  ;;  %v17352_v49 = vand.u32 4294901760, %v4291_v28  ;;  %v4285_v12 = vadd.f32 %v4284_v61, %v4192_v16  ;;  %13836 = vmatprep.mubr.f32.mxu1 %v17348_v25  ;;  %v20380_v27 = vld [vmem:[#allocation52_spill] sm:$0xff]  ;;  %v20382_v16 = vld [vmem:[#allocation59_spill] sm:$0xff]  ;;  %v20386_v61 = vld [vmem:[#allocation74_spill] sm:$0xff] }
 0x4bc   :  { %13837 = vmatmul.mubr.f32.vlgmr.msra.gmra.mxu1 %v17343_v55 }
 0x4bd   :  { %v17357_v40 = vsub.f32 %v4291_v28, %v17352_v49  ;;  %v17359_v42 = vand.u32 4294901760, %v4285_v12  ;;  %13881 = vmatpush3.msra.mxu1 %v16729_v21  ;;  %v4377_v7 = vand.u32 4294901760, %v4376_v43  ;;  %v4388_v58 = vsub.f32 %v17346_v15, %v4387_v53  ;;  %v20385_v28 = vld [vmem:[#allocation71_spill] sm:$0xff] }
 0x4be   :  { %13882 = vmatprep.subr.mxu1 %v16734_v39 }
 0x4bf   :  { %v17367_v63 = vsub.f32 %v4285_v12, %v17359_v42  ;;  %13883 = vmatpush3.msra.mxu1 %v16734_v39  ;;  %13839 = vmatprep.mubr.f32.mxu1 %v17359_v42  ;;  %v4378_v62 = vsub.f32 %v4376_v43, %v4377_v7  ;;  %v4407_v56 = vand.u32 4294901760, %v17357_v40  ;;  %v4389_v22 = vand.u32 4294901760, %v4388_v58  ;;  %v20389_v12 = vld [vmem:[#allocation89_spill] sm:$0xff]  ;;  %v20392_v58 = vld [vmem:[#allocation99_spill] sm:$0xff] }
 0x4c0   :  { %13884 = vmatprep.subr.mxu1 %v16794_v26  ;;  %13840 = vmatmul.mubr.f32.gmra.mxu1 %v17352_v49 }
 0x4c1   :  { %13885 = vmatpush3.msra.mxu1 %v16794_v26  ;;  %13912 = vmatprep.mubr.f32.mxu1 %v4377_v7  ;;  %v4379_v52 = vand.u32 4294901760, %v4378_v62  ;;  %v4397_v34 = vand.u32 4294901760, %v17367_v63  ;;  %v4408_v20 = vsub.f32 %v17357_v40, %v4407_v56  ;;  %v20391_v7 = vld [vmem:[#allocation94_spill] sm:$0xff]  ;;  %v5107_v62 = vld [vmem:[#allocation4 + $0x78] sm:$0xff] }
 0x4c2   :  { %13886 = vmatprep.subr.mxu1 %v16799_v10 }
 0x4c3   :  { %13887 = vmatpush3.msra.mxu1 %v16799_v10  ;;  %13798 = vmatprep.mubr.f32.mxu0 %v4379_v52  ;;  %v4398_v0 = vsub.f32 %v17367_v63, %v4397_v34  ;;  %v4409_v5 = vand.u32 4294901760, %v4408_v20  ;;  %v5106_v52 = vld [vmem:[#allocation4 + $0x70] sm:$0xff]  ;;  %v5104_v20 = vld [vmem:[#allocation4 + $0x60] sm:$0xff] }
 0x4c4   :  { %13888 = vmatprep.subr.mxu1 %v16809_v2  ;;  %13799 = vmatmul.mubr.f32.vlgmr.msra.gmra.mxu0 %v4389_v22  ;;  %v17525_v22 = vand.u32 4294901760, %v5106_v52 }
 0x4c5   :  { %13843 = vmatpush3.msra.mxu0 %v16739_v4  ;;  %13889 = vmatpush3.msra.mxu1 %v16809_v2  ;;  %v4399_v35 = vand.u32 4294901760, %v4398_v0  ;;  %v5105_v0 = vld [vmem:[#allocation4 + $0x68] sm:$0xff]  ;;  %v5094_v4 = vld [vmem:[#allocation4 + $0x10] sm:$0xff] }
 0x4c6   :  { %13844 = vmatprep.subr.mxu0 %v16745_v11  ;;  %13890 = vmatprep.subr.mxu1 %v16821_v60 }
 0x4c7   :  { %13845 = vmatpush3.msra.mxu0 %v16745_v11  ;;  %13891 = vmatpush3.msra.mxu1 %v16821_v60 }
 0x4c8   :  { %13801 = vmatprep.mubr.f32.mxu0 %v4399_v35  ;;  %13846 = vmatprep.subr.mxu0 %v16797_v29 }
 0x4c9   :  { %13892 = vmatprep.subr.mxu1 %v16836_v50  ;;  %13802 = vmatmul.mubr.f32.gmra.mxu0 %v4409_v5 }
 0x4ca   :  { %13847 = vmatpush3.msra.mxu0 %v16797_v29  ;;  %13893 = vmatpush3.msra.mxu1 %v16836_v50 }
 0x4cb   :  { %13848 = vmatprep.subr.mxu0 %v16807_v57  ;;  %13874 = vmatprep.mubr.f32.mxu0 %v4376_v43  ;;  %v20388_v43 = vld [vmem:[#allocation83_spill] sm:$0xff] }
 0x4cc   :  { %13894 = vmatprep.subr.mxu1 %v16847_v8  ;;  %13849 = vmatpush3.msra.mxu0 %v16807_v57 }
 0x4cd   :  { %13895 = vmatpush3.msra.mxu1 %v16847_v8  ;;  %13850 = vmatprep.subr.mxu0 %v16819_v13 }
 0x4ce   :  { %13896 = vmatprep.subr.mxu1 %v16862_v38  ;;  %13851 = vmatpush3.msra.mxu0 %v16819_v13 }
 0x4cf   :  { %13897 = vmatpush3.msra.mxu1 %v16862_v38  ;;  %13852 = vmatprep.subr.mxu0 %v16833_v48 }
 0x4d0   :  { %13898 = vmatprep.subr.mxu1 %v16879_v41  ;;  %13853 = vmatpush3.msra.mxu0 %v16833_v48 }
 0x4d1   :  { %13899 = vmatpush3.msra.mxu1 %v16879_v41  ;;  %13854 = vmatprep.subr.mxu0 %v16851_v1 }
 0x4d2   :  { %13900 = vmatprep.subr.mxu1 %v16895_v23  ;;  %13855 = vmatpush3.msra.mxu0 %v16851_v1  ;;  %v5096_v1 = vld [vmem:[#allocation4 + $0x20] sm:$0xff] }
 0x4d3   :  { %13901 = vmatpush3.msra.mxu1 %v16895_v23  ;;  %13856 = vmatprep.subr.mxu0 %v16860_v32  ;;  %v17639_v13 = vand.u32 4294901760, %v5096_v1 }
 0x4d4   :  { %13902 = vmatprep.subr.mxu1 %v16914_v24  ;;  %13857 = vmatpush3.msra.mxu0 %v16860_v32 }
 0x4d5   :  { %13903 = vmatpush3.msra.mxu1 %v16914_v24  ;;  %13858 = vmatprep.subr.mxu0 %v16877_v45  ;;  %v17650_v29 = vsub.f32 %v5096_v1, %v17639_v13 }
 0x4d6   :  { %13904 = vmatprep.subr.mxu1 %v16925_v17  ;;  %13859 = vmatpush3.msra.mxu0 %v16877_v45 }
 0x4d7   :  { %13905 = vmatpush3.msra.mxu1 %v16925_v17  ;;  %13860 = vmatprep.subr.mxu0 %v16893_v47  ;;  %20405 = vst [vmem:[#allocation112_spill] sm:$0xff] %v17650_v29 }
 0x4d8   :  { %13906 = vmatprep.subr.mxu1 %v16941_v44  ;;  %13861 = vmatpush3.msra.mxu0 %v16893_v47 }
 0x4d9   :  { %13907 = vmatpush3.msra.mxu1 %v16941_v44  ;;  %13862 = vmatprep.subr.mxu0 %v16910_v46 }
 0x4da   :  { %13908 = vmatprep.subr.mxu1 %v16958_v3  ;;  %13863 = vmatpush3.msra.mxu0 %v16910_v46 }
 0x4db   :  { %13909 = vmatpush3.msra.mxu1 %v16958_v3  ;;  %13864 = vmatprep.subr.mxu0 %v16930_v6 }
 0x4dc   :  { %13910 = vmatprep.subr.mxu1 %v16974_v59  ;;  %13865 = vmatpush3.msra.mxu0 %v16930_v6 }
 0x4dd   :  { %13911 = vmatpush3.msra.mxu1 %v16974_v59  ;;  %13866 = vmatprep.subr.mxu0 %v16939_v54 }
 0x4de   :  { %13913 = vmatmul.mubr.f32.vlgmr.msra.gmra.mxu1 %v4387_v53  ;;  %13956 = vmatprep.subr.mxu1 %v16729_v21  ;;  %v20387_v53 = vld [vmem:[#allocation79_spill] sm:$0xff] }
 0x4df   :  { %13867 = vmatpush3.msra.mxu0 %v16939_v54  ;;  %13915 = vmatprep.mubr.f32.mxu1 %v4397_v34 }
 0x4e0   :  { %13957 = vmatpush3.msra.mxu1 %v16729_v21  ;;  %13868 = vmatprep.subr.mxu0 %v20375_v30 }
 0x4e1   :  { %13958 = vmatprep.subr.mxu1 %v16734_v39  ;;  %13869 = vmatpush3.msra.mxu0 %v20375_v30  ;;  %v5098_v30 = vld [vmem:[#allocation4 + $0x30] sm:$0xff] }
 0x4e2   :  { %13959 = vmatpush3.msra.mxu1 %v16734_v39  ;;  %13870 = vmatprep.subr.mxu0 %v20376_v51 }
 0x4e3   :  { %13916 = vmatmul.mubr.f32.gmra.mxu1 %v4407_v56  ;;  %13960 = vmatprep.subr.mxu1 %v16794_v26  ;;  %v17520_v56 = vand.u32 4294901760, %v5107_v62 }
 0x4e4   :  { %13871 = vmatpush3.msra.mxu0 %v20376_v51  ;;  %13961 = vmatpush3.msra.mxu1 %v16794_v26 }
 0x4e5   :  { %13988 = vmatprep.mubr.f32.mxu1 %v17348_v25  ;;  %13872 = vmatprep.subr.mxu0 %v20377_v19  ;;  %v17523_v34 = vsub.f32 %v5107_v62, %v17520_v56 }
 0x4e6   :  { %13962 = vmatprep.subr.mxu1 %v16799_v10  ;;  %13873 = vmatpush3.msra.mxu0 %v20377_v19 }
 0x4e7   :  { %13963 = vmatpush3.msra.mxu1 %v16799_v10  ;;  %13875 = vmatmul.mubr.f32.vlgmr.msra.gmra.mxu0 %v17346_v15  ;;  %v20383_v15 = vld [vmem:[#allocation63_spill] sm:$0xff] }
 0x4e8   :  { %13918 = vmatprep.subr.mxu0 %v20378_v31  ;;  %13964 = vmatprep.subr.mxu1 %v16809_v2 }
 0x4e9   :  { %13877 = vmatprep.mubr.f32.mxu0 %v17367_v63  ;;  %13919 = vmatpush3.msra.mxu0 %v20378_v31  ;;  %v20393_v63 = vld [vmem:[#allocation102_spill] sm:$0xff]  ;;  %v5099_v31 = vld [vmem:[#allocation4 + $0x38] sm:$0xff] }
 0x4ea   :  { %13965 = vmatpush3.msra.mxu1 %v16809_v2  ;;  %13920 = vmatprep.subr.mxu0 %v20379_v14  ;;  %v17606_v51 = vand.u32 4294901760, %v5099_v31 }
 0x4eb   :  { %13966 = vmatprep.subr.mxu1 %v16821_v60  ;;  %13921 = vmatpush3.msra.mxu0 %v20379_v14 }
 0x4ec   :  { %13967 = vmatpush3.msra.mxu1 %v16821_v60  ;;  %13878 = vmatmul.mubr.f32.gmra.mxu0 %v17357_v40  ;;  %v20390_v40 = vld [vmem:[#allocation91_spill] sm:$0xff]  ;;  %v17616_v47 = vsub.f32 %v5099_v31, %v17606_v51 }
 0x4ed   :  { %13922 = vmatprep.subr.mxu0 %v20380_v27  ;;  %13968 = vmatprep.subr.mxu1 %v16836_v50 }
 0x4ee   :  { %13923 = vmatpush3.msra.mxu0 %v20380_v27  ;;  %13950 = vmatprep.mubr.f32.mxu0 %v17348_v25  ;;  %v20384_v25 = vld [vmem:[#allocation69_spill] sm:$0xff]  ;;  %v17625_v45 = vand.u32 4294901760, %v17616_v47 }
 0x4ef   :  { %13969 = vmatpush3.msra.mxu1 %v16836_v50  ;;  %13924 = vmatprep.subr.mxu0 %v20381_v37 }
 0x4f0   :  { %13970 = vmatprep.subr.mxu1 %v16847_v8  ;;  %13925 = vmatpush3.msra.mxu0 %v20381_v37  ;;  %20402 = vst [vmem:[#allocation109_spill] sm:$0xff] %v17625_v45 }
 0x4f1   :  { %13971 = vmatpush3.msra.mxu1 %v16847_v8  ;;  %13926 = vmatprep.subr.mxu0 %v20382_v16 }
 0x4f2   :  { %13972 = vmatprep.subr.mxu1 %v16862_v38  ;;  %13927 = vmatpush3.msra.mxu0 %v20382_v16 }
 0x4f3   :  { %13973 = vmatpush3.msra.mxu1 %v16862_v38  ;;  %13928 = vmatprep.subr.mxu0 %v20383_v15 }
 0x4f4   :  { %13974 = vmatprep.subr.mxu1 %v16879_v41  ;;  %13929 = vmatpush3.msra.mxu0 %v20383_v15 }
 0x4f5   :  { %13975 = vmatpush3.msra.mxu1 %v16879_v41  ;;  %13930 = vmatprep.subr.mxu0 %v20384_v25 }
 0x4f6   :  { %13976 = vmatprep.subr.mxu1 %v16895_v23  ;;  %13931 = vmatpush3.msra.mxu0 %v20384_v25  ;;  %v5101_v25 = vld [vmem:[#allocation4 + $0x48] sm:$0xff] }
 0x4f7   :  { %13977 = vmatpush3.msra.mxu1 %v16895_v23  ;;  %13932 = vmatprep.subr.mxu0 %v20385_v28  ;;  %v17579_v37 = vand.u32 4294901760, %v5101_v25 }
 0x4f8   :  { %13978 = vmatprep.subr.mxu1 %v16914_v24  ;;  %13933 = vmatpush3.msra.mxu0 %v20385_v28 }
 0x4f9   :  { %13979 = vmatpush3.msra.mxu1 %v16914_v24  ;;  %13934 = vmatprep.subr.mxu0 %v20386_v61  ;;  %v17590_v14 = vsub.f32 %v5101_v25, %v17579_v37 }
 0x4fa   :  { %13980 = vmatprep.subr.mxu1 %v16925_v17  ;;  %13935 = vmatpush3.msra.mxu0 %v20386_v61 }
 0x4fb   :  { %13981 = vmatpush3.msra.mxu1 %v16925_v17  ;;  %13936 = vmatprep.subr.mxu0 %v20387_v53  ;;  %v17601_v19 = vand.u32 4294901760, %v17590_v14 }
 0x4fc   :  { %13982 = vmatprep.subr.mxu1 %v16941_v44  ;;  %13937 = vmatpush3.msra.mxu0 %v20387_v53 }
 0x4fd   :  { %13983 = vmatpush3.msra.mxu1 %v16941_v44  ;;  %13938 = vmatprep.subr.mxu0 %v20388_v43  ;;  %20400 = vst [vmem:[#allocation107_spill] sm:$0xff] %v17601_v19  ;;  %v5275_v6 = vsub.f32 %v17590_v14, %v17601_v19  ;;  %v5093_v44 = vld [vmem:[#allocation4 + $0x8] sm:$0xff] }
 0x4fe   :  { %13984 = vmatprep.subr.mxu1 %v16958_v3  ;;  %13939 = vmatpush3.msra.mxu0 %v20388_v43  ;;  %v5102_v43 = vld [vmem:[#allocation4 + $0x50] sm:$0xff]  ;;  %v17679_v23 = vand.u32 4294901760, %v5093_v44 }
 0x4ff   :  { %13985 = vmatpush3.msra.mxu1 %v16958_v3  ;;  %13940 = vmatprep.subr.mxu0 %v20389_v12  ;;  %v17568_v28 = vand.u32 4294901760, %v5102_v43 }
 0x500   :  { %13986 = vmatprep.subr.mxu1 %v16974_v59  ;;  %13941 = vmatpush3.msra.mxu0 %v20389_v12 }
 0x501   :  { %13987 = vmatpush3.msra.mxu1 %v16974_v59  ;;  %13942 = vmatprep.subr.mxu0 %v20390_v40  ;;  %v17577_v16 = vsub.f32 %v5102_v43, %v17568_v28  ;;  %v17666_v59 = vand.u32 4294901760, %v5094_v4 }
 0x502   :  { %13989 = vmatmul.mubr.f32.vlgmr.msra.gmra.mxu1 %v17343_v55  ;;  %13943 = vmatpush3.msra.mxu0 %v20390_v40 }
 0x503   :  { %13991 = vmatprep.mubr.f32.mxu1 %v17359_v42  ;;  %13944 = vmatprep.subr.mxu0 %v20391_v7 }
 0x504   :  { %13945 = vmatpush3.msra.mxu0 %v20391_v7 }
 0x505   :  { %13946 = vmatprep.subr.mxu0 %v20392_v58 }
 0x506   :  { %13992 = vmatmul.mubr.f32.gmra.mxu1 %v17352_v49  ;;  %13947 = vmatpush3.msra.mxu0 %v20392_v58 }
 0x507   :  { %13948 = vmatprep.subr.mxu0 %v20393_v63 }
 0x508   :  { %13949 = vmatpush3.msra.mxu0 %v20393_v63  ;;  %v17547_v63 = vand.u32 4294901760, %v5104_v20 }
 0x509   :  { %13951 = vmatmul.mubr.f32.vlgmr.msra.gmra.mxu0 %v17343_v55  ;;  %13994 = vmatprep.subr.mxu0 %v17520_v56  ;;  %v17530_v55 = vand.u32 4294901760, %v17523_v34 }
 0x50a   :  { %13953 = vmatprep.mubr.f32.mxu0 %v17359_v42  ;;  %13995 = vmatpush3.msra.mxu0 %v17520_v56  ;;  %v17533_v42 = vsub.f32 %v5106_v52, %v17525_v22  ;;  %v5103_v52 = vld [vmem:[#allocation4 + $0x58] sm:$0xff]  ;;  %v17557_v12 = vsub.f32 %v5104_v20, %v17547_v63 }
 0x50b   :  { %20394 = vst [vmem:[#allocation34_spill] sm:$0xff] %v17530_v55  ;;  %13996 = vmatprep.subr.mxu0 %v17525_v22  ;;  %v5233_v35 = vsub.f32 %v17523_v34, %v17530_v55 }
 0x50c   :  { %13997 = vmatpush3.msra.mxu0 %v17525_v22  ;;  %v17542_v5 = vand.u32 4294901760, %v17533_v42  ;;  %v17566_v61 = vand.u32 4294901760, %v17557_v12 }
 0x50d   :  { %13954 = vmatmul.mubr.f32.gmra.mxu0 %v17352_v49  ;;  %v17535_v49 = vand.u32 4294901760, %v5105_v0  ;;  %v5234_v58 = vand.u32 4294901760, %v5233_v35 }
 0x50e   :  { %20395 = vst [vmem:[#allocation24_spill] sm:$0xff] %v17542_v5  ;;  %v5240_v7 = vsub.f32 %v17533_v42, %v17542_v5  ;;  %20397 = vst [vmem:[#allocation35_spill] sm:$0xff] %v17566_v61 }
 0x50f   :  { %v17545_v62 = vsub.f32 %v5105_v0, %v17535_v49  ;;  %13998 = vmatprep.subr.mxu0 %v17535_v49  ;;  %v17560_v0 = vand.u32 4294901760, %v5103_v52  ;;  %14032 = vmatprep.subr.mxu1 %v5234_v58 }
 0x510   :  { %13999 = vmatpush3.msra.mxu0 %v17535_v49  ;;  %v5241_v53 = vand.u32 4294901760, %v5240_v7  ;;  %14033 = vmatpush3.msra.mxu1 %v5234_v58  ;;  %v5254_v7 = vsub.f32 %v17557_v12, %v17566_v61 }
 0x511   :  { %v17554_v40 = vand.u32 4294901760, %v17545_v62  ;;  %14000 = vmatprep.subr.mxu0 %v17547_v63  ;;  %v17571_v20 = vsub.f32 %v5103_v52, %v17560_v0  ;;  %v5100_v52 = vld [vmem:[#allocation4 + $0x40] sm:$0xff] }
 0x512   :  { %14001 = vmatpush3.msra.mxu0 %v17547_v63  ;;  %14034 = vmatprep.subr.mxu1 %v5241_v53  ;;  %v5255_v27 = vand.u32 4294901760, %v5254_v7  ;;  %v17592_v43 = vand.u32 4294901760, %v5100_v52 }
 0x513   :  { %20396 = vst [vmem:[#allocation32_spill] sm:$0xff] %v17554_v40  ;;  %v5247_v35 = vsub.f32 %v17545_v62, %v17554_v40  ;;  %14002 = vmatprep.subr.mxu0 %v17560_v0  ;;  %14035 = vmatpush3.msra.mxu1 %v5241_v53  ;;  %v17583_v58 = vand.u32 4294901760, %v17571_v20 }
 0x514   :  { %14003 = vmatpush3.msra.mxu0 %v17560_v0  ;;  %v17604_v25 = vsub.f32 %v5100_v52, %v17592_v43  ;;  %v17619_v52 = vand.u32 4294901760, %v5098_v30 }
 0x515   :  { %v5248_v15 = vand.u32 4294901760, %v5247_v35  ;;  %20398 = vst [vmem:[#allocation105_spill] sm:$0xff] %v17583_v58  ;;  %14004 = vmatprep.subr.mxu0 %v17568_v28  ;;  %v17587_v35 = vand.u32 4294901760, %v17577_v16  ;;  %v5261_v53 = vsub.f32 %v17571_v20, %v17583_v58 }
 0x516   :  { %14005 = vmatpush3.msra.mxu0 %v17568_v28  ;;  %v17613_v46 = vand.u32 4294901760, %v17604_v25  ;;  %v17631_v31 = vsub.f32 %v5098_v30, %v17619_v52  ;;  %v5095_v30 = vld [vmem:[#allocation4 + $0x18] sm:$0xff] }
 0x517   :  { %14036 = vmatprep.subr.mxu1 %v5248_v15  ;;  %20399 = vst [vmem:[#allocation106_spill] sm:$0xff] %v17587_v35  ;;  %14006 = vmatprep.subr.mxu0 %v17579_v37  ;;  %v5268_v7 = vsub.f32 %v17577_v16, %v17587_v35 }
 0x518   :  { %14037 = vmatpush3.msra.mxu1 %v5248_v15  ;;  %14007 = vmatpush3.msra.mxu0 %v17579_v37  ;;  %v5262_v15 = vand.u32 4294901760, %v5261_v53  ;;  %20401 = vst [vmem:[#allocation108_spill] sm:$0xff] %v17613_v46  ;;  %v5276_v53 = vand.u32 4294901760, %v5275_v6  ;;  %v5289_v6 = vsub.f32 %v17616_v47, %v17625_v45  ;;  %v17643_v57 = vand.u32 4294901760, %v17631_v31 }
 0x519   :  { %14038 = vmatprep.subr.mxu1 %v5255_v27  ;;  %14008 = vmatprep.subr.mxu0 %v17592_v43  ;;  %v5269_v54 = vand.u32 4294901760, %v5268_v7  ;;  %v5282_v7 = vsub.f32 %v17604_v25, %v17613_v46 }
 0x51a   :  { %14039 = vmatpush3.msra.mxu1 %v5255_v27  ;;  %14009 = vmatpush3.msra.mxu0 %v17592_v43  ;;  %v5097_v27 = vld [vmem:[#allocation4 + $0x28] sm:$0xff]  ;;  %20403 = vst [vmem:[#allocation110_spill] sm:$0xff] %v17643_v57  ;;  %v5296_v11 = vsub.f32 %v17631_v31, %v17643_v57 }
 0x51b   :  { %14040 = vmatprep.subr.mxu1 %v5262_v15  ;;  %14010 = vmatprep.subr.mxu0 %v17606_v51  ;;  %v17627_v32 = vand.u32 4294901760, %v5097_v27 }
 0x51c   :  { %14041 = vmatpush3.msra.mxu1 %v5262_v15  ;;  %14011 = vmatpush3.msra.mxu0 %v17606_v51  ;;  %v5283_v15 = vand.u32 4294901760, %v5282_v7  ;;  %v5297_v3 = vand.u32 4294901760, %v5296_v11  ;;  %v5092_v11 = vld [vmem:[#allocation4] sm:$0xff] }
 0x51d   :  { %14042 = vmatprep.subr.mxu1 %v5269_v54  ;;  %14012 = vmatprep.subr.mxu0 %v17619_v52  ;;  %v17637_v48 = vsub.f32 %v5097_v27, %v17627_v32  ;;  %v17652_v27 = vand.u32 4294901760, %v5095_v30  ;;  %v17687_v38 = vand.u32 4294901760, %v5092_v11 }
 0x51e   :  { %14043 = vmatpush3.msra.mxu1 %v5269_v54  ;;  %14013 = vmatpush3.msra.mxu0 %v17619_v52  ;;  %v5290_v54 = vand.u32 4294901760, %v5289_v6  ;;  %v17661_v6 = vand.u32 4294901760, %v17650_v29 }
 0x51f   :  { %14044 = vmatprep.subr.mxu1 %v5276_v53  ;;  %14014 = vmatprep.subr.mxu0 %v17627_v32  ;;  %v17647_v7 = vand.u32 4294901760, %v17637_v48  ;;  %v17664_v1 = vsub.f32 %v5095_v30, %v17652_v27  ;;  %v17676_v30 = vsub.f32 %v5094_v4, %v17666_v59  ;;  %20411 = vst [vmem:[#allocation118_spill] sm:$0xff] %v17687_v38 }
 0x520   :  { %14045 = vmatpush3.msra.mxu1 %v5276_v53  ;;  %14015 = vmatpush3.msra.mxu0 %v17627_v32  ;;  %20406 = vst [vmem:[#allocation113_spill] sm:$0xff] %v17661_v6  ;;  %v5310_v17 = vsub.f32 %v17650_v29, %v17661_v6  ;;  %v17691_v4 = vsub.f32 %v5093_v44, %v17679_v23 }
 0x521   :  { %20404 = vst [vmem:[#allocation111_spill] sm:$0xff] %v17647_v7  ;;  %14046 = vmatprep.subr.mxu1 %v5283_v15  ;;  %14016 = vmatprep.subr.mxu0 %v17639_v13  ;;  %v5303_v53 = vsub.f32 %v17637_v48, %v17647_v7  ;;  %20407 = vst [vmem:[#allocation114_spill] sm:$0xff] %v17664_v1  ;;  %v17673_v24 = vand.u32 4294901760, %v17664_v1  ;;  %v17685_v41 = vand.u32 4294901760, %v17676_v30 }
 0x522   :  { %14047 = vmatpush3.msra.mxu1 %v5283_v15  ;;  %14017 = vmatpush3.msra.mxu0 %v17639_v13  ;;  %20409 = vst [vmem:[#allocation116_spill] sm:$0xff] %v17676_v30  ;;  %20412 = vst [vmem:[#allocation119_spill] sm:$0xff] %v17691_v4  ;;  %v17701_v50 = vand.u32 4294901760, %v17691_v4 }
 0x523   :  { %14048 = vmatprep.subr.mxu1 %v5290_v54  ;;  %14018 = vmatprep.subr.mxu0 %v17652_v27  ;;  %v5304_v15 = vand.u32 4294901760, %v5303_v53  ;;  %20408 = vst [vmem:[#allocation115_spill] sm:$0xff] %v17673_v24  ;;  %v5317_v53 = vsub.f32 %v17664_v1, %v17673_v24  ;;  %20410 = vst [vmem:[#allocation117_spill] sm:$0xff] %v17685_v41 }
 0x524   :  { %14049 = vmatpush3.msra.mxu1 %v5290_v54  ;;  %14019 = vmatpush3.msra.mxu0 %v17652_v27  ;;  %v5311_v54 = vand.u32 4294901760, %v5310_v17  ;;  %v17697_v17 = vsub.f32 %v5092_v11, %v17687_v38  ;;  %20414 = vst [vmem:[#allocation121_spill] sm:$0xff] %v17701_v50 }
 0x525   :  { %14050 = vmatprep.subr.mxu1 %v5297_v3  ;;  %14020 = vmatprep.subr.mxu0 %v17666_v59  ;;  %v5318_v8 = vand.u32 4294901760, %v5317_v53 }
 0x526   :  { %14051 = vmatpush3.msra.mxu1 %v5297_v3  ;;  %14021 = vmatpush3.msra.mxu0 %v17666_v59  ;;  %v5324_v3 = vsub.f32 %v17676_v30, %v17685_v41  ;;  %20413 = vst [vmem:[#allocation120_spill] sm:$0xff] %v17697_v17  ;;  %v17705_v60 = vand.u32 4294901760, %v17697_v17 }
 0x527   :  { %14052 = vmatprep.subr.mxu1 %v5304_v15  ;;  %14022 = vmatprep.subr.mxu0 %v17679_v23 }
 0x528   :  { %14053 = vmatpush3.msra.mxu1 %v5304_v15  ;;  %14023 = vmatpush3.msra.mxu0 %v17679_v23  ;;  %v5325_v44 = vand.u32 4294901760, %v5324_v3  ;;  %20415 = vst [vmem:[#allocation122_spill] sm:$0xff] %v17705_v60  ;;  %v5331_v15 = vsub.f32 %v17691_v4, %v17701_v50  ;;  %v5338_v11 = vsub.f32 %v17697_v17, %v17705_v60 }
 0x529   :  { %14054 = vmatprep.subr.mxu1 %v5311_v54  ;;  %14024 = vmatprep.subr.mxu0 %v17687_v38 }
 0x52a   :  { %14055 = vmatpush3.msra.mxu1 %v5311_v54  ;;  %14025 = vmatpush3.msra.mxu0 %v17687_v38  ;;  %v5332_v53 = vand.u32 4294901760, %v5331_v15  ;;  %v5339_v54 = vand.u32 4294901760, %v5338_v11 }
 0x52b   :  { %14056 = vmatprep.subr.mxu1 %v5318_v8  ;;  %14070 = vmatprep.subr.mxu0 %v17523_v34 }
 0x52c   :  { %14057 = vmatpush3.msra.mxu1 %v5318_v8 }
 0x52d   :  { %14058 = vmatprep.subr.mxu1 %v5325_v44 }
 0x52e   :  { %14059 = vmatpush3.msra.mxu1 %v5325_v44 }
 0x52f   :  { %14060 = vmatprep.subr.mxu1 %v5332_v53 }
 0x530   :  { %14061 = vmatpush3.msra.mxu1 %v5332_v53 }
 0x531   :  { %14062 = vmatprep.subr.mxu1 %v5339_v54 }
 0x532   :  { %14063 = vmatpush3.msra.mxu1 %v5339_v54 }
 0x533   :  { %14108 = vmatprep.subr.mxu1 %v17520_v56 }
 0x57c   :  { %v13838_v3 = vpop.f32.mrf.mxu1 }
 0x57e   :  { %v4562_v2 = vpop.f32.mrf.mxu1 }
 0x580   :  { %v13841_v26 = vpop.f32.mrf.mxu1 }
 0x582   :  { %v4574_v21 = vpop.f32.mrf.mxu1 }
 0x584   :  { %v13800_v10 = vpop.f32.mrf.mxu0 }
 0x585   :  { %v4392_v15 = vadd.f32 1e-05, %v13800_v10 }
 0x586   :  { %v4381_v39 = vpop.f32.mrf.mxu0 }
 0x587   :  { %v4382_v6 = vadd.f32 1e-05, %v4381_v39  ;;  %v4569_v7 = vadd.f32 %v13838_v3, %v4392_v15 }
 0x589   :  { %v13803_v8 = vpop.f32.mrf.mxu0  ;;  %v4563_v19 = vadd.f32 %v4562_v2, %v4382_v6 }
 0x58a   :  { %v4412_v53 = vadd.f32 1e-05, %v13803_v8 }
 0x58b   :  { %v4401_v41 = vpop.f32.mrf.mxu0 }
 0x58c   :  { %v4402_v45 = vadd.f32 1e-05, %v4401_v41  ;;  %v4581_v61 = vadd.f32 %v13841_v26, %v4412_v53 }
 0x58e   :  { %v4575_v55 = vadd.f32 %v4574_v21, %v4402_v45 }
 0x59e   :  { %v13914_v50 = vpop.f32.mrf.mxu1 }
 0x5a0   :  { %v4794_v60 = vpop.f32.mrf.mxu1 }
 0x5a3   :  { %v13917_v44 = vpop.f32.mrf.mxu1 }
 0x5a5   :  { %v4810_v54 = vpop.f32.mrf.mxu1 }
 0x5a7   :  { %v13876_v24 = vpop.f32.mrf.mxu0 }
 0x5a8   :  { %v4692_v46 = vadd.f32 %v13876_v24, %v4569_v7 }
 0x5a9   :  { %v4684_v11 = vpop.f32.mrf.mxu0 }
 0x5aa   :  { %v4685_v58 = vadd.f32 %v4684_v11, %v4563_v19  ;;  %v4803_v17 = vadd.f32 %v13914_v50, %v4692_v46 }
 0x5ac   :  { %v13879_v57 = vpop.f32.mrf.mxu0  ;;  %v4795_v38 = vadd.f32 %v4794_v60, %v4685_v58  ;;  %v11577_v60 = vld [vmem:[%s19827_s3] ss:$0 sm:$0xff] }
 0x5ad   :  { %v4706_v5 = vadd.f32 %v13879_v57, %v4581_v61 }
 0x5ae   :  { %v4698_v40 = vpop.f32.mrf.mxu0 }
 0x5af   :  { %v4699_v10 = vadd.f32 %v4698_v40, %v4575_v55  ;;  %v4819_v15 = vadd.f32 %v13917_v44, %v4706_v5  ;;  %v11578_v40 = vld [vmem:[%s19828_s4] ss:$0 sm:$0xff] }
 0x5b1   :  { %v4811_v19 = vadd.f32 %v4810_v54, %v4699_v10 }
 0x5c2   :  { %v13990_v35 = vpop.f32.mrf.mxu1 }
 0x5c4   :  { %v5042_v4 = vpop.f32.mrf.mxu1 }
 0x5c6   :  { %v13993_v29 = vpop.f32.mrf.mxu1 }
 0x5c8   :  { %v5054_v50 = vpop.f32.mrf.mxu1 }
 0x5c9   :  { %v13952_v30 = vpop.f32.mrf.mxu0 }
 0x5ca   :  { %v4944_v1 = vadd.f32 %v13952_v30, %v4803_v17 }
 0x5cb   :  { %v4937_v39 = vpop.f32.mrf.mxu0 }
 0x5cc   :  { %v5049_v8 = vadd.f32 %v13990_v35, %v4944_v1  ;;  %v4938_v3 = vadd.f32 %v4937_v39, %v4795_v38 }
 0x5cd   :  { %v13955_v41 = vpop.f32.mrf.mxu0 }
 0x5ce   :  { %15587 = vrsqrt.f32 %v5049_v8  ;;  %v5043_v2 = vadd.f32 %v5042_v4, %v4938_v3  ;;  %v4956_v24 = vadd.f32 %v13955_v41, %v4819_v15 }
 0x5cf   :  { %v4949_v26 = vpop.f32.mrf.mxu0 }
 0x5d0   :  { %15589 = vrsqrt.f32 %v5043_v2  ;;  %v5061_v57 = vadd.f32 %v13993_v29, %v4956_v24  ;;  %v4950_v21 = vadd.f32 %v4949_v26, %v4811_v19 }
 0x5d2   :  { %15591 = vrsqrt.f32 %v5061_v57  ;;  %v5055_v45 = vadd.f32 %v5054_v50, %v4950_v21 }
 0x5d4   :  { %15593 = vrsqrt.f32 %v5055_v45 }
 0x5db   :  { %v15588_v46 = vpop.eup %15587 }
 0x5dc   :  { %v5069_v38 = vmul.f32 %v15588_v46, %v17200_v36 }
 0x5dd   :  { %v15590_v61 = vpop.eup %15589 }
 0x5de   :  { %v5079_v55 = vmul.f32 %v11577_v60, %v5069_v38  ;;  %v5068_v29 = vmul.f32 %v15590_v61, %v17205_v33  ;;  %v5890_v61 = vld [vmem:[#allocation4 + $0xd8] sm:$0xff] }
 0x5df   :  { %v15592_v5 = vpop.eup %15591 }
 0x5e0   :  { %v5089_v58 = vadd.f32 %v11578_v40, %v5079_v55  ;;  %v5078_v35 = vmul.f32 %v11577_v60, %v5068_v29  ;;  %v5071_v7 = vmul.f32 %v15592_v5, %v17210_v9  ;;  %v20430_v55 = vld [vmem:[#allocation108_spill] sm:$0xff]  ;;  %v17911_v29 = vand.u32 4294901760, %v5890_v61  ;;  %v5889_v5 = vld [vmem:[#allocation4 + $0xd0] sm:$0xff] }
 0x5e1   :  { %v15594_v6 = vpop.eup %15593 }
 0x5e2   :  { %v17723_v1 = vand.u32 4294901760, %v5089_v58  ;;  %v5088_v30 = vadd.f32 %v11578_v40, %v5078_v35  ;;  %v5081_v4 = vmul.f32 %v11577_v60, %v5071_v7  ;;  %v5070_v36 = vmul.f32 %v15594_v6, %v17217_v18  ;;  %v5888_v6 = vld [vmem:[#allocation4 + $0xc8] sm:$0xff] }
 0x5e4   :  { %v17727_v17 = vsub.f32 %v5089_v58, %v17723_v1  ;;  %v17729_v44 = vand.u32 4294901760, %v5088_v30  ;;  %v5091_v11 = vadd.f32 %v11578_v40, %v5081_v4  ;;  %v5080_v53 = vmul.f32 %v11577_v60, %v5070_v36  ;;  %v5891_v60 = vld [vmem:[#allocation4 + $0xe0] sm:$0xff]  ;;  %v20431_v58 = vld [vmem:[#allocation109_spill] sm:$0xff] }
 0x5e5   :  { %v17930_v4 = vand.u32 4294901760, %v5889_v5  ;;  %v17935_v36 = vsub.f32 %v5890_v61, %v17911_v29  ;;  %v20439_v61 = vld [vmem:[#allocation121_spill] sm:$0xff] }
 0x5e6   :  { %v17731_v33 = vand.u32 4294901760, %v5091_v11  ;;  %v5090_v54 = vadd.f32 %v11578_v40, %v5080_v53  ;;  %14064 = vmatprep.mubr.f32.mxu1 %v17729_v44  ;;  %v17735_v9 = vsub.f32 %v5088_v30, %v17729_v44  ;;  %v17738_v10 = vand.u32 4294901760, %v17727_v17  ;;  %v20432_v30 = vld [vmem:[#allocation110_spill] sm:$0xff]  ;;  %v20433_v53 = vld [vmem:[#allocation111_spill] sm:$0xff] }
 0x5e7   :  { %14065 = vmatmul.mubr.f32.vlgmr.msra.gmra.mxu1 %v17723_v1  ;;  %v17902_v40 = vand.u32 4294901760, %v5891_v60 }
 0x5e8   :  { %v17741_v18 = vand.u32 4294901760, %v5090_v54  ;;  %14109 = vmatpush3.msra.mxu1 %v17520_v56  ;;  %v17745_v39 = vand.u32 4294901760, %v17735_v9  ;;  %v17748_v8 = vsub.f32 %v5091_v11, %v17731_v33  ;;  %v5202_v3 = vsub.f32 %v17727_v17, %v17738_v10  ;;  %v5887_v11 = vld [vmem:[#allocation4 + $0xc0] sm:$0xff] }
 0x5e9   :  { %14110 = vmatprep.subr.mxu1 %v17525_v22  ;;  %v17923_v7 = vsub.f32 %v5891_v60, %v17902_v40 }
 0x5ea   :  { %14111 = vmatpush3.msra.mxu1 %v17525_v22  ;;  %14067 = vmatprep.mubr.f32.mxu1 %v17741_v18  ;;  %v5192_v15 = vsub.f32 %v17735_v9, %v17745_v39  ;;  %v17758_v41 = vsub.f32 %v5090_v54, %v17741_v18  ;;  %v17761_v2 = vand.u32 4294901760, %v17748_v8  ;;  %v17773_v26 = vand.u32 4294901760, %v5202_v3 }
 0x5eb   :  { %14112 = vmatprep.subr.mxu1 %v17535_v49  ;;  %14068 = vmatmul.mubr.f32.gmra.mxu1 %v17731_v33  ;;  %v17941_v54 = vand.u32 4294901760, %v5888_v6 }
 0x5ec   :  { %14113 = vmatpush3.msra.mxu1 %v17535_v49  ;;  %14140 = vmatprep.mubr.f32.mxu1 %v17745_v39  ;;  %v17767_v24 = vand.u32 4294901760, %v5192_v15  ;;  %v17770_v19 = vand.u32 4294901760, %v17758_v41  ;;  %v5222_v21 = vsub.f32 %v17748_v8, %v17761_v2  ;;  %v17946_v15 = vand.u32 4294901760, %v17923_v7 }
 0x5ed   :  { %14114 = vmatprep.subr.mxu1 %v17547_v63 }
 0x5ee   :  { %20416 = vst [vmem:[#allocation123_spill] sm:$0xff] %v17767_v24  ;;  %14115 = vmatpush3.msra.mxu1 %v17547_v63  ;;  %14026 = vmatprep.mubr.f32.mxu0 %v17767_v24  ;;  %v5212_v57 = vsub.f32 %v17758_v41, %v17770_v19  ;;  %v17791_v45 = vand.u32 4294901760, %v5222_v21  ;;  %v17953_v21 = vsub.f32 %v5889_v5, %v17930_v4 }
 0x5ef   :  { %14116 = vmatprep.subr.mxu1 %v17560_v0  ;;  %14027 = vmatmul.mubr.f32.vlgmr.msra.gmra.mxu0 %v17773_v26 }
 0x5f0   :  { %14071 = vmatpush3.msra.mxu0 %v17523_v34  ;;  %14117 = vmatpush3.msra.mxu1 %v17560_v0  ;;  %v17785_v50 = vand.u32 4294901760, %v5212_v57  ;;  %v20423_v34 = vld [vmem:[#allocation34_spill] sm:$0xff]  ;;  %v20434_v57 = vld [vmem:[#allocation113_spill] sm:$0xff] }
 0x5f1   :  { %14072 = vmatprep.subr.mxu0 %v17533_v42  ;;  %14118 = vmatprep.subr.mxu1 %v17568_v28 }
 0x5f2   :  { %14073 = vmatpush3.msra.mxu0 %v17533_v42  ;;  %14119 = vmatpush3.msra.mxu1 %v17568_v28  ;;  %v5894_v42 = vld [vmem:[#allocation4 + $0xf8] sm:$0xff] }
 0x5f3   :  { %14029 = vmatprep.mubr.f32.mxu0 %v17785_v50  ;;  %14074 = vmatprep.subr.mxu0 %v17545_v62 }
 0x5f4   :  { %14120 = vmatprep.subr.mxu1 %v17579_v37  ;;  %14030 = vmatmul.mubr.f32.gmra.mxu0 %v17791_v45 }
 0x5f5   :  { %14075 = vmatpush3.msra.mxu0 %v17545_v62  ;;  %14121 = vmatpush3.msra.mxu1 %v17579_v37  ;;  %v5893_v62 = vld [vmem:[#allocation4 + $0xf0] sm:$0xff] }
 0x5f6   :  { %14076 = vmatprep.subr.mxu0 %v17557_v12  ;;  %14102 = vmatprep.mubr.f32.mxu0 %v17735_v9 }
 0x5f7   :  { %14122 = vmatprep.subr.mxu1 %v17592_v43  ;;  %14077 = vmatpush3.msra.mxu0 %v17557_v12  ;;  %v20421_v12 = vld [vmem:[#allocation119_spill] sm:$0xff] }
 0x5f8   :  { %14123 = vmatpush3.msra.mxu1 %v17592_v43  ;;  %14078 = vmatprep.subr.mxu0 %v17571_v20 }
 0x5f9   :  { %14124 = vmatprep.subr.mxu1 %v17606_v51  ;;  %14079 = vmatpush3.msra.mxu0 %v17571_v20  ;;  %v20427_v20 = vld [vmem:[#allocation105_spill] sm:$0xff] }
 0x5fa   :  { %14125 = vmatpush3.msra.mxu1 %v17606_v51  ;;  %14080 = vmatprep.subr.mxu0 %v17577_v16 }
 0x5fb   :  { %14126 = vmatprep.subr.mxu1 %v17619_v52  ;;  %14081 = vmatpush3.msra.mxu0 %v17577_v16  ;;  %v20419_v16 = vld [vmem:[#allocation114_spill] sm:$0xff] }
 0x5fc   :  { %14127 = vmatpush3.msra.mxu1 %v17619_v52  ;;  %14082 = vmatprep.subr.mxu0 %v17590_v14 }
 0x5fd   :  { %14128 = vmatprep.subr.mxu1 %v17627_v32  ;;  %14083 = vmatpush3.msra.mxu0 %v17590_v14  ;;  %v20417_v14 = vld [vmem:[#allocation112_spill] sm:$0xff] }
 0x5fe   :  { %14129 = vmatpush3.msra.mxu1 %v17627_v32  ;;  %14084 = vmatprep.subr.mxu0 %v17604_v25 }
 0x5ff   :  { %14130 = vmatprep.subr.mxu1 %v17639_v13  ;;  %14085 = vmatpush3.msra.mxu0 %v17604_v25  ;;  %v17879_v25 = vand.u32 4294901760, %v5893_v62 }
 0x600   :  { %14131 = vmatpush3.msra.mxu1 %v17639_v13  ;;  %14086 = vmatprep.subr.mxu0 %v17616_v47 }
 0x601   :  { %14132 = vmatprep.subr.mxu1 %v17652_v27  ;;  %14087 = vmatpush3.msra.mxu0 %v17616_v47  ;;  %v20418_v47 = vld [vmem:[#allocation118_spill] sm:$0xff]  ;;  %v17895_v38 = vsub.f32 %v5893_v62, %v17879_v25 }
 0x602   :  { %14133 = vmatpush3.msra.mxu1 %v17652_v27  ;;  %14088 = vmatprep.subr.mxu0 %v17631_v31 }
 0x603   :  { %14134 = vmatprep.subr.mxu1 %v17666_v59  ;;  %14089 = vmatpush3.msra.mxu0 %v17631_v31  ;;  %v17916_v35 = vand.u32 4294901760, %v17895_v38 }
 0x604   :  { %14135 = vmatpush3.msra.mxu1 %v17666_v59  ;;  %14090 = vmatprep.subr.mxu0 %v17637_v48 }
 0x605   :  { %14136 = vmatprep.subr.mxu1 %v17679_v23  ;;  %14091 = vmatpush3.msra.mxu0 %v17637_v48  ;;  %v20420_v48 = vld [vmem:[#allocation116_spill] sm:$0xff] }
 0x606   :  { %14137 = vmatpush3.msra.mxu1 %v17679_v23  ;;  %14092 = vmatprep.subr.mxu0 %v20417_v14 }
 0x607   :  { %14138 = vmatprep.subr.mxu1 %v20418_v47  ;;  %14093 = vmatpush3.msra.mxu0 %v20417_v14  ;;  %v17955_v14 = vand.u32 4294901760, %v5887_v11 }
 0x608   :  { %14139 = vmatpush3.msra.mxu1 %v20418_v47  ;;  %14094 = vmatprep.subr.mxu0 %v20419_v16 }
 0x609   :  { %14141 = vmatmul.mubr.f32.vlgmr.msra.gmra.mxu1 %v17738_v10  ;;  %14184 = vmatprep.subr.mxu1 %v17520_v56  ;;  %v17978_v62 = vsub.f32 %v5887_v11, %v17955_v14 }
 0x60a   :  { %14095 = vmatpush3.msra.mxu0 %v20419_v16  ;;  %14143 = vmatprep.mubr.f32.mxu1 %v17770_v19  ;;  %v5886_v16 = vld [vmem:[#allocation4 + $0xb8] sm:$0xff] }
 0x60b   :  { %14185 = vmatpush3.msra.mxu1 %v17520_v56  ;;  %14096 = vmatprep.subr.mxu0 %v20420_v48  ;;  %v20422_v56 = vld [vmem:[#allocation120_spill] sm:$0xff] }
 0x60c   :  { %14186 = vmatprep.subr.mxu1 %v17525_v22  ;;  %14097 = vmatpush3.msra.mxu0 %v20420_v48  ;;  %v17960_v48 = vand.u32 4294901760, %v17935_v36 }
 0x60d   :  { %14187 = vmatpush3.msra.mxu1 %v17525_v22  ;;  %14098 = vmatprep.subr.mxu0 %v20421_v12  ;;  %v20424_v22 = vld [vmem:[#allocation24_spill] sm:$0xff] }
 0x60e   :  { %14144 = vmatmul.mubr.f32.gmra.mxu1 %v17761_v2  ;;  %14188 = vmatprep.subr.mxu1 %v17535_v49 }
 0x60f   :  { %14099 = vmatpush3.msra.mxu0 %v20421_v12  ;;  %14189 = vmatpush3.msra.mxu1 %v17535_v49  ;;  %v17871_v49 = vand.u32 4294901760, %v5894_v42 }
 0x610   :  { %14216 = vmatprep.mubr.f32.mxu1 %v17729_v44  ;;  %14100 = vmatprep.subr.mxu0 %v20422_v56 }
 0x611   :  { %14190 = vmatprep.subr.mxu1 %v17547_v63  ;;  %14101 = vmatpush3.msra.mxu0 %v20422_v56  ;;  %v17884_v31 = vsub.f32 %v5894_v42, %v17871_v49  ;;  %v17965_v56 = vsub.f32 %v5888_v6, %v17941_v54  ;;  %v17970_v42 = vand.u32 4294901760, %v5886_v16  ;;  %v17999_v6 = vand.u32 4294901760, %v17978_v62 }
 0x612   :  { %14191 = vmatpush3.msra.mxu1 %v17547_v63  ;;  %14103 = vmatmul.mubr.f32.vlgmr.msra.gmra.mxu0 %v17727_v17  ;;  %v20425_v63 = vld [vmem:[#allocation32_spill] sm:$0xff] }
 0x613   :  { %14146 = vmatprep.subr.mxu0 %v20423_v34  ;;  %14192 = vmatprep.subr.mxu1 %v17560_v0  ;;  %v17987_v60 = vand.u32 4294901760, %v17965_v56  ;;  %v17991_v5 = vsub.f32 %v5886_v16, %v17970_v42  ;;  %20440 = vst [vmem:[#allocation114_spill] sm:$0xff] %v17999_v6 }
 0x614   :  { %14105 = vmatprep.mubr.f32.mxu0 %v17758_v41  ;;  %14147 = vmatpush3.msra.mxu0 %v20423_v34  ;;  %v5885_v34 = vld [vmem:[#allocation4 + $0xb0] sm:$0xff] }
 0x615   :  { %14193 = vmatpush3.msra.mxu1 %v17560_v0  ;;  %14148 = vmatprep.subr.mxu0 %v20424_v22  ;;  %v20426_v0 = vld [vmem:[#allocation35_spill] sm:$0xff]  ;;  %20438 = vst [vmem:[#allocation118_spill] sm:$0xff] %v17987_v60  ;;  %v18013_v16 = vand.u32 4294901760, %v17991_v5 }
 0x616   :  { %14194 = vmatprep.subr.mxu1 %v17568_v28  ;;  %14149 = vmatpush3.msra.mxu0 %v20424_v22  ;;  %v6041_v22 = vsub.f32 %v17923_v7, %v17946_v15 }
 0x617   :  { %14195 = vmatpush3.msra.mxu1 %v17568_v28  ;;  %14106 = vmatmul.mubr.f32.gmra.mxu0 %v17748_v8  ;;  %v5892_v28 = vld [vmem:[#allocation4 + $0xe8] sm:$0xff]  ;;  %20442 = vst [vmem:[#allocation116_spill] sm:$0xff] %v18013_v16 }
 0x618   :  { %14150 = vmatprep.subr.mxu0 %v20425_v63  ;;  %14196 = vmatprep.subr.mxu1 %v17579_v37  ;;  %v17888_v46 = vand.u32 4294901760, %v5892_v28 }
 0x619   :  { %14151 = vmatpush3.msra.mxu0 %v20425_v63  ;;  %14178 = vmatprep.mubr.f32.mxu0 %v17729_v44  ;;  %v17975_v63 = vand.u32 4294901760, %v17953_v21 }
 0x61a   :  { %14197 = vmatpush3.msra.mxu1 %v17579_v37  ;;  %14152 = vmatprep.subr.mxu0 %v20426_v0  ;;  %v20428_v37 = vld [vmem:[#allocation106_spill] sm:$0xff] }
 0x61b   :  { %14198 = vmatprep.subr.mxu1 %v17592_v43  ;;  %14153 = vmatpush3.msra.mxu0 %v20426_v0  ;;  %20436 = vst [vmem:[#allocation112_spill] sm:$0xff] %v17975_v63  ;;  %v5884_v0 = vld [vmem:[#allocation4 + $0xa8] sm:$0xff] }
 0x61c   :  { %14199 = vmatpush3.msra.mxu1 %v17592_v43  ;;  %14154 = vmatprep.subr.mxu0 %v20427_v20  ;;  %v20429_v43 = vld [vmem:[#allocation107_spill] sm:$0xff] }
 0x61d   :  { %14200 = vmatprep.subr.mxu1 %v17606_v51  ;;  %14155 = vmatpush3.msra.mxu0 %v20427_v20  ;;  %v6048_v20 = vsub.f32 %v17935_v36, %v17960_v48 }
 0x61e   :  { %14201 = vmatpush3.msra.mxu1 %v17606_v51  ;;  %14156 = vmatprep.subr.mxu0 %v20428_v37  ;;  %v17900_v51 = vand.u32 4294901760, %v17884_v31 }
 0x61f   :  { %14202 = vmatprep.subr.mxu1 %v17619_v52  ;;  %14157 = vmatpush3.msra.mxu0 %v20428_v37  ;;  %v17983_v37 = vand.u32 4294901760, %v5885_v34  ;;  %v6049_v11 = vand.u32 4294901760, %v6048_v20 }
 0x620   :  { %14203 = vmatpush3.msra.mxu1 %v17619_v52  ;;  %14158 = vmatprep.subr.mxu0 %v20429_v43  ;;  %v17907_v52 = vsub.f32 %v5892_v28, %v17888_v46  ;;  %v20437_v28 = vld [vmem:[#allocation117_spill] sm:$0xff] }
 0x621   :  { %14204 = vmatprep.subr.mxu1 %v17627_v32  ;;  %14159 = vmatpush3.msra.mxu0 %v20429_v43  ;;  %v5883_v43 = vld [vmem:[#allocation4 + $0xa0] sm:$0xff] }
 0x622   :  { %14205 = vmatpush3.msra.mxu1 %v17627_v32  ;;  %14160 = vmatprep.subr.mxu0 %v20430_v55  ;;  %v6020_v32 = vsub.f32 %v17884_v31, %v17900_v51 }
 0x623   :  { %14206 = vmatprep.subr.mxu1 %v17639_v13  ;;  %14161 = vmatpush3.msra.mxu0 %v20430_v55  ;;  %v6042_v55 = vand.u32 4294901760, %v6041_v22  ;;  %v6069_v22 = vsub.f32 %v17978_v62, %v17999_v6 }
 0x624   :  { %14207 = vmatpush3.msra.mxu1 %v17639_v13  ;;  %14162 = vmatprep.subr.mxu0 %v20431_v58  ;;  %v17928_v13 = vand.u32 4294901760, %v17907_v52  ;;  %v6021_v3 = vand.u32 4294901760, %v6020_v32  ;;  %v6055_v32 = vsub.f32 %v17953_v21, %v17975_v63 }
 0x625   :  { %14208 = vmatprep.subr.mxu1 %v17652_v27  ;;  %14163 = vmatpush3.msra.mxu0 %v20431_v58  ;;  %v17993_v58 = vand.u32 4294901760, %v5884_v0 }
 0x626   :  { %14209 = vmatpush3.msra.mxu1 %v17652_v27  ;;  %14164 = vmatprep.subr.mxu0 %v20432_v30  ;;  %v6027_v27 = vsub.f32 %v17895_v38, %v17916_v35 }
 0x627   :  { %14210 = vmatprep.subr.mxu1 %v17666_v59  ;;  %14165 = vmatpush3.msra.mxu0 %v20432_v30  ;;  %v5882_v30 = vld [vmem:[#allocation4 + $0x98] sm:$0xff] }
 0x628   :  { %14211 = vmatpush3.msra.mxu1 %v17666_v59  ;;  %14166 = vmatprep.subr.mxu0 %v20433_v53  ;;  %v6034_v59 = vsub.f32 %v17907_v52, %v17928_v13  ;;  %v6028_v12 = vand.u32 4294901760, %v6027_v27  ;;  %v18005_v27 = vand.u32 4294901760, %v5883_v43 }
 0x629   :  { %14212 = vmatprep.subr.mxu1 %v17679_v23  ;;  %14167 = vmatpush3.msra.mxu0 %v20433_v53  ;;  %v18003_v53 = vsub.f32 %v5885_v34, %v17983_v37  ;;  %v6056_v34 = vand.u32 4294901760, %v6055_v32  ;;  %v6076_v32 = vsub.f32 %v17991_v5, %v18013_v16 }
 0x62a   :  { %14213 = vmatpush3.msra.mxu1 %v17679_v23  ;;  %14168 = vmatprep.subr.mxu0 %v20434_v57  ;;  %v20435_v23 = vld [vmem:[#allocation115_spill] sm:$0xff]  ;;  %v18028_v20 = vsub.f32 %v5883_v43, %v18005_v27 }
 0x62b   :  { %14214 = vmatprep.subr.mxu1 %v20418_v47  ;;  %14169 = vmatpush3.msra.mxu0 %v20434_v57  ;;  %v6062_v57 = vsub.f32 %v17965_v56, %v17987_v60  ;;  %v6070_v60 = vand.u32 4294901760, %v6069_v22 }
 0x62c   :  { %14215 = vmatpush3.msra.mxu1 %v20418_v47  ;;  %14170 = vmatprep.subr.mxu0 %v20435_v23  ;;  %v6035_v47 = vand.u32 4294901760, %v6034_v59  ;;  %v5881_v59 = vld [vmem:[#allocation4 + $0x90] sm:$0xff] }
 0x62d   :  { %14217 = vmatmul.mubr.f32.vlgmr.msra.gmra.mxu1 %v17723_v1  ;;  %14260 = vmatprep.subr.mxu1 %v6021_v3 }
 0x62e   :  { %14171 = vmatpush3.msra.mxu0 %v20435_v23  ;;  %14219 = vmatprep.mubr.f32.mxu1 %v17741_v18  ;;  %v18016_v23 = vsub.f32 %v5884_v0, %v17993_v58  ;;  %v18030_v0 = vand.u32 4294901760, %v5881_v59 }
 0x62f   :  { %14261 = vmatpush3.msra.mxu1 %v6021_v3  ;;  %14172 = vmatprep.subr.mxu0 %v20437_v28  ;;  %v20441_v3 = vld [vmem:[#allocation122_spill] sm:$0xff] }
 0x630   :  { %14262 = vmatprep.subr.mxu1 %v6028_v12  ;;  %14173 = vmatpush3.msra.mxu0 %v20437_v28  ;;  %v18025_v28 = vand.u32 4294901760, %v18003_v53  ;;  %v18053_v16 = vsub.f32 %v5881_v59, %v18030_v0 }
 0x631   :  { %14263 = vmatpush3.msra.mxu1 %v6028_v12  ;;  %14174 = vmatprep.subr.mxu0 %v20439_v61  ;;  %v18018_v12 = vand.u32 4294901760, %v5882_v30 }
 0x632   :  { %14220 = vmatmul.mubr.f32.gmra.mxu1 %v17731_v33  ;;  %14264 = vmatprep.subr.mxu1 %v6035_v47  ;;  %20443 = vst [vmem:[#allocation119_spill] sm:$0xff] %v18025_v28 }
 0x633   :  { %14175 = vmatpush3.msra.mxu0 %v20439_v61  ;;  %14265 = vmatpush3.msra.mxu1 %v6035_v47  ;;  %v5880_v47 = vld [vmem:[#allocation4 + $0x88] sm:$0xff]  ;;  %v6063_v61 = vand.u32 4294901760, %v6062_v57  ;;  %v18041_v43 = vsub.f32 %v5882_v30, %v18018_v12  ;;  %v18050_v57 = vand.u32 4294901760, %v18028_v20 }
 0x634   :  { %14292 = vmatprep.mubr.f32.mxu1 %v17729_v44  ;;  %14176 = vmatprep.subr.mxu0 %v20441_v3  ;;  %v18043_v6 = vand.u32 4294901760, %v5880_v47 }
 0x635   :  { %14266 = vmatprep.subr.mxu1 %v6042_v55  ;;  %14177 = vmatpush3.msra.mxu0 %v20441_v3  ;;  %v18038_v3 = vand.u32 4294901760, %v18016_v23  ;;  %20445 = vst [vmem:[#allocation34_spill] sm:$0xff] %v18050_v57 }
 0x636   :  { %14267 = vmatpush3.msra.mxu1 %v6042_v55  ;;  %14179 = vmatmul.mubr.f32.vlgmr.msra.gmra.mxu0 %v17723_v1  ;;  %v5879_v55 = vld [vmem:[#allocation4 + $0x80] sm:$0xff]  ;;  %v18066_v63 = vsub.f32 %v5880_v47, %v18043_v6 }
 0x637   :  { %14222 = vmatprep.subr.mxu0 %v17871_v49  ;;  %14268 = vmatprep.subr.mxu1 %v6049_v11  ;;  %20444 = vst [vmem:[#allocation120_spill] sm:$0xff] %v18038_v3  ;;  %v18055_v30 = vand.u32 4294901760, %v5879_v55  ;;  %v6090_v22 = vsub.f32 %v18016_v23, %v18038_v3 }
 0x638   :  { %14181 = vmatprep.mubr.f32.mxu0 %v17741_v18  ;;  %14223 = vmatpush3.msra.mxu0 %v17871_v49 }
 0x639   :  { %14269 = vmatpush3.msra.mxu1 %v6049_v11  ;;  %14224 = vmatprep.subr.mxu0 %v17879_v25  ;;  %v6083_v11 = vsub.f32 %v18003_v53, %v18025_v28  ;;  %v18063_v28 = vand.u32 4294901760, %v18041_v43  ;;  %v18076_v3 = vsub.f32 %v5879_v55, %v18055_v30  ;;  %v6091_v47 = vand.u32 4294901760, %v6090_v22 }
 0x63a   :  { %14270 = vmatprep.subr.mxu1 %v6056_v34  ;;  %14225 = vmatpush3.msra.mxu0 %v17879_v25 }
 0x63b   :  { %14271 = vmatpush3.msra.mxu1 %v6056_v34  ;;  %14182 = vmatmul.mubr.f32.gmra.mxu0 %v17731_v33  ;;  %v6077_v34 = vand.u32 4294901760, %v6076_v32  ;;  %v6084_v59 = vand.u32 4294901760, %v6083_v11  ;;  %v18073_v32 = vand.u32 4294901760, %v18053_v16  ;;  %v18083_v11 = vand.u32 4294901760, %v18066_v63 }
 0x63c   :  { %14226 = vmatprep.subr.mxu0 %v17888_v46  ;;  %14272 = vmatprep.subr.mxu1 %v6063_v61 }
 0x63d   :  { %14227 = vmatpush3.msra.mxu0 %v17888_v46  ;;  %14254 = vmatprep.mubr.f32.mxu0 %v17767_v24  ;;  %v6097_v24 = vsub.f32 %v18028_v20, %v18050_v57  ;;  %20446 = vst [vmem:[#allocation24_spill] sm:$0xff] %v18073_v32  ;;  %v18090_v57 = vand.u32 4294901760, %v18076_v3 }
 0x63e   :  { %14273 = vmatpush3.msra.mxu1 %v6063_v61  ;;  %14228 = vmatprep.subr.mxu0 %v17902_v40  ;;  %v6104_v61 = vsub.f32 %v18041_v43, %v18063_v28 }
 0x63f   :  { %14274 = vmatprep.subr.mxu1 %v6070_v60  ;;  %14229 = vmatpush3.msra.mxu0 %v17902_v40  ;;  %v6098_v55 = vand.u32 4294901760, %v6097_v24 }
 0x640   :  { %14275 = vmatpush3.msra.mxu1 %v6070_v60  ;;  %14230 = vmatprep.subr.mxu0 %v17911_v29  ;;  %v6111_v60 = vsub.f32 %v18053_v16, %v18073_v32  ;;  %v6105_v22 = vand.u32 4294901760, %v6104_v61  ;;  %v6125_v32 = vsub.f32 %v18076_v3, %v18090_v57 }
 0x641   :  { %14276 = vmatprep.subr.mxu1 %v6077_v34  ;;  %14231 = vmatpush3.msra.mxu0 %v17911_v29 }
 0x642   :  { %14277 = vmatpush3.msra.mxu1 %v6077_v34  ;;  %14232 = vmatprep.subr.mxu0 %v17930_v4  ;;  %v6118_v34 = vsub.f32 %v18066_v63, %v18083_v11  ;;  %v6112_v24 = vand.u32 4294901760, %v6111_v60 }
 0x643   :  { %14278 = vmatprep.subr.mxu1 %v6084_v59  ;;  %14233 = vmatpush3.msra.mxu0 %v17930_v4 }
 0x644   :  { %14279 = vmatpush3.msra.mxu1 %v6084_v59  ;;  %14234 = vmatprep.subr.mxu0 %v17941_v54  ;;  %v6119_v59 = vand.u32 4294901760, %v6118_v34  ;;  %v6672_v34 = vld [vmem:[#allocation4 + $0x130] sm:$0xff] }
 0x645   :  { %14280 = vmatprep.subr.mxu1 %v6091_v47  ;;  %14235 = vmatpush3.msra.mxu0 %v17941_v54 }
 0x646   :  { %14281 = vmatpush3.msra.mxu1 %v6091_v47  ;;  %14236 = vmatprep.subr.mxu0 %v17955_v14  ;;  %v6126_v47 = vand.u32 4294901760, %v6125_v32 }
 0x647   :  { %14282 = vmatprep.subr.mxu1 %v6098_v55  ;;  %14237 = vmatpush3.msra.mxu0 %v17955_v14 }
 0x648   :  { %14283 = vmatpush3.msra.mxu1 %v6098_v55  ;;  %14238 = vmatprep.subr.mxu0 %v17970_v42  ;;  %v6673_v55 = vld [vmem:[#allocation4 + $0x138] sm:$0xff] }
 0x649   :  { %14284 = vmatprep.subr.mxu1 %v6105_v22  ;;  %14239 = vmatpush3.msra.mxu0 %v17970_v42 }
 0x64a   :  { %14285 = vmatpush3.msra.mxu1 %v6105_v22  ;;  %14240 = vmatprep.subr.mxu0 %v17983_v37 }
 0x64b   :  { %14286 = vmatprep.subr.mxu1 %v6112_v24  ;;  %14241 = vmatpush3.msra.mxu0 %v17983_v37 }
 0x64c   :  { %14287 = vmatpush3.msra.mxu1 %v6112_v24  ;;  %14242 = vmatprep.subr.mxu0 %v17993_v58 }
 0x64d   :  { %14288 = vmatprep.subr.mxu1 %v6119_v59  ;;  %14243 = vmatpush3.msra.mxu0 %v17993_v58 }
 0x64e   :  { %14289 = vmatpush3.msra.mxu1 %v6119_v59  ;;  %14244 = vmatprep.subr.mxu0 %v18005_v27  ;;  %v18314_v59 = vand.u32 4294901760, %v6673_v55 }
 0x64f   :  { %14290 = vmatprep.subr.mxu1 %v6126_v47  ;;  %14245 = vmatpush3.msra.mxu0 %v18005_v27 }
 0x650   :  { %14291 = vmatpush3.msra.mxu1 %v6126_v47  ;;  %14246 = vmatprep.subr.mxu0 %v18018_v12 }
 0x651   :  { %14293 = vmatmul.mubr.f32.vlgmr.msra.gmra.mxu1 %v17723_v1  ;;  %14336 = vmatprep.subr.mxu1 %v17871_v49 }
 0x652   :  { %14247 = vmatpush3.msra.mxu0 %v18018_v12  ;;  %14295 = vmatprep.mubr.f32.mxu1 %v17741_v18 }
 0x653   :  { %14337 = vmatpush3.msra.mxu1 %v17871_v49  ;;  %14248 = vmatprep.subr.mxu0 %v18030_v0 }
 0x654   :  { %14338 = vmatprep.subr.mxu1 %v17879_v25  ;;  %14249 = vmatpush3.msra.mxu0 %v18030_v0 }
 0x655   :  { %14339 = vmatpush3.msra.mxu1 %v17879_v25  ;;  %14250 = vmatprep.subr.mxu0 %v18043_v6 }
 0x656   :  { %14296 = vmatmul.mubr.f32.gmra.mxu1 %v17731_v33  ;;  %14340 = vmatprep.subr.mxu1 %v17888_v46 }
 0x657   :  { %14251 = vmatpush3.msra.mxu0 %v18043_v6  ;;  %14341 = vmatpush3.msra.mxu1 %v17888_v46 }
 0x658   :  { %14368 = vmatprep.mubr.f32.mxu1 %v17745_v39  ;;  %14252 = vmatprep.subr.mxu0 %v18055_v30 }
 0x659   :  { %14342 = vmatprep.subr.mxu1 %v17902_v40  ;;  %14253 = vmatpush3.msra.mxu0 %v18055_v30 }
 0x65a   :  { %14343 = vmatpush3.msra.mxu1 %v17902_v40  ;;  %14255 = vmatmul.mubr.f32.vlgmr.msra.gmra.mxu0 %v17773_v26 }
 0x65b   :  { %14298 = vmatprep.subr.mxu0 %v17884_v31  ;;  %14344 = vmatprep.subr.mxu1 %v17911_v29 }
 0x65c   :  { %14257 = vmatprep.mubr.f32.mxu0 %v17785_v50  ;;  %14299 = vmatpush3.msra.mxu0 %v17884_v31  ;;  %v6680_v31 = vld [vmem:[#allocation4 + $0x170] sm:$0xff] }
 0x65d   :  { %14345 = vmatpush3.msra.mxu1 %v17911_v29  ;;  %14300 = vmatprep.subr.mxu0 %v17895_v38 }
 0x65e   :  { %14346 = vmatprep.subr.mxu1 %v17930_v4  ;;  %14301 = vmatpush3.msra.mxu0 %v17895_v38  ;;  %v18223_v38 = vand.u32 4294901760, %v6680_v31 }
 0x65f   :  { %14347 = vmatpush3.msra.mxu1 %v17930_v4  ;;  %14258 = vmatmul.mubr.f32.gmra.mxu0 %v17791_v45 }
 0x660   :  { %14302 = vmatprep.subr.mxu0 %v17907_v52  ;;  %14348 = vmatprep.subr.mxu1 %v17941_v54 }
 0x661   :  { %14303 = vmatpush3.msra.mxu0 %v17907_v52  ;;  %14330 = vmatprep.mubr.f32.mxu0 %v17735_v9 }
 0x662   :  { %14349 = vmatpush3.msra.mxu1 %v17941_v54  ;;  %14304 = vmatprep.subr.mxu0 %v17923_v7 }
 0x663   :  { %14350 = vmatprep.subr.mxu1 %v17955_v14  ;;  %14305 = vmatpush3.msra.mxu0 %v17923_v7  ;;  %v18239_v7 = vsub.f32 %v6680_v31, %v18223_v38  ;;  %v6671_v31 = vld [vmem:[#allocation4 + $0x128] sm:$0xff] }
 0x664   :  { %14351 = vmatpush3.msra.mxu1 %v17955_v14  ;;  %14306 = vmatprep.subr.mxu0 %v17935_v36 }
 0x665   :  { %14352 = vmatprep.subr.mxu1 %v17970_v42  ;;  %14307 = vmatpush3.msra.mxu0 %v17935_v36 }
 0x666   :  { %14353 = vmatpush3.msra.mxu1 %v17970_v42  ;;  %14308 = vmatprep.subr.mxu0 %v17953_v21 }
 0x667   :  { %14354 = vmatprep.subr.mxu1 %v17983_v37  ;;  %14309 = vmatpush3.msra.mxu0 %v17953_v21 }
 0x668   :  { %14355 = vmatpush3.msra.mxu1 %v17983_v37  ;;  %14310 = vmatprep.subr.mxu0 %v17965_v56 }
 0x669   :  { %14356 = vmatprep.subr.mxu1 %v17993_v58  ;;  %14311 = vmatpush3.msra.mxu0 %v17965_v56  ;;  %v18260_v56 = vand.u32 4294901760, %v18239_v7 }
 0x66a   :  { %14357 = vmatpush3.msra.mxu1 %v17993_v58  ;;  %14312 = vmatprep.subr.mxu0 %v17978_v62 }
 0x66b   :  { %14358 = vmatprep.subr.mxu1 %v18005_v27  ;;  %14313 = vmatpush3.msra.mxu0 %v17978_v62  ;;  %v6675_v62 = vld [vmem:[#allocation4 + $0x148] sm:$0xff] }
 0x66c   :  { %14359 = vmatpush3.msra.mxu1 %v18005_v27  ;;  %14314 = vmatprep.subr.mxu0 %v17991_v5 }
 0x66d   :  { %14360 = vmatprep.subr.mxu1 %v18018_v12  ;;  %14315 = vmatpush3.msra.mxu0 %v17991_v5 }
 0x66e   :  { %14361 = vmatpush3.msra.mxu1 %v18018_v12  ;;  %14316 = vmatprep.subr.mxu0 %v18003_v53 }
 0x66f   :  { %14362 = vmatprep.subr.mxu1 %v18030_v0  ;;  %14317 = vmatpush3.msra.mxu0 %v18003_v53 }
 0x670   :  { %14363 = vmatpush3.msra.mxu1 %v18030_v0  ;;  %14318 = vmatprep.subr.mxu0 %v18016_v23 }
 0x671   :  { %14364 = vmatprep.subr.mxu1 %v18043_v6  ;;  %14319 = vmatpush3.msra.mxu0 %v18016_v23  ;;  %v6814_v23 = vsub.f32 %v18239_v7, %v18260_v56 }
 0x672   :  { %14365 = vmatpush3.msra.mxu1 %v18043_v6  ;;  %14320 = vmatprep.subr.mxu0 %v18028_v20 }
 0x673   :  { %14366 = vmatprep.subr.mxu1 %v18055_v30  ;;  %14321 = vmatpush3.msra.mxu0 %v18028_v20 }
 0x674   :  { %14367 = vmatpush3.msra.mxu1 %v18055_v30  ;;  %14322 = vmatprep.subr.mxu0 %v18041_v43 }
 0x675   :  { %14369 = vmatmul.mubr.f32.vlgmr.msra.gmra.mxu1 %v17738_v10  ;;  %14412 = vmatprep.subr.mxu1 %v17871_v49 }
 0x676   :  { %14323 = vmatpush3.msra.mxu0 %v18041_v43  ;;  %14371 = vmatprep.mubr.f32.mxu1 %v17770_v19  ;;  %v20453_v43 = vld [vmem:[#allocation34_spill] sm:$0xff] }
 0x677   :  { %14413 = vmatpush3.msra.mxu1 %v17871_v49  ;;  %14324 = vmatprep.subr.mxu0 %v18053_v16  ;;  %v6681_v49 = vld [vmem:[#allocation4 + $0x178] sm:$0xff] }
 0x678   :  { %14414 = vmatprep.subr.mxu1 %v17879_v25  ;;  %14325 = vmatpush3.msra.mxu0 %v18053_v16  ;;  %v20452_v16 = vld [vmem:[#allocation120_spill] sm:$0xff] }
 0x679   :  { %14415 = vmatpush3.msra.mxu1 %v17879_v25  ;;  %14326 = vmatprep.subr.mxu0 %v18066_v63  ;;  %v18215_v25 = vand.u32 4294901760, %v6681_v49 }
 0x67a   :  { %14372 = vmatmul.mubr.f32.gmra.mxu1 %v17761_v2  ;;  %14416 = vmatprep.subr.mxu1 %v17888_v46 }
 0x67b   :  { %14327 = vmatpush3.msra.mxu0 %v18066_v63  ;;  %14417 = vmatpush3.msra.mxu1 %v17888_v46  ;;  %v6679_v46 = vld [vmem:[#allocation4 + $0x168] sm:$0xff] }
 0x67c   :  { %14444 = vmatprep.mubr.f32.mxu1 %v17729_v44  ;;  %14328 = vmatprep.subr.mxu0 %v18076_v3  ;;  %v18232_v52 = vand.u32 4294901760, %v6679_v46 }
 0x67d   :  { %14418 = vmatprep.subr.mxu1 %v17902_v40  ;;  %14329 = vmatpush3.msra.mxu0 %v18076_v3 }
 0x67e   :  { %14419 = vmatpush3.msra.mxu1 %v17902_v40  ;;  %14331 = vmatmul.mubr.f32.vlgmr.msra.gmra.mxu0 %v17727_v17  ;;  %v20447_v40 = vld [vmem:[#allocation112_spill] sm:$0xff] }
 0x67f   :  { %14374 = vmatprep.subr.mxu0 %v17900_v51  ;;  %14420 = vmatprep.subr.mxu1 %v17911_v29 }
 0x680   :  { %14333 = vmatprep.mubr.f32.mxu0 %v17758_v41  ;;  %14375 = vmatpush3.msra.mxu0 %v17900_v51  ;;  %v18228_v51 = vsub.f32 %v6681_v49, %v18215_v25 }
 0x681   :  { %14421 = vmatpush3.msra.mxu1 %v17911_v29  ;;  %14376 = vmatprep.subr.mxu0 %v17916_v35  ;;  %v6678_v29 = vld [vmem:[#allocation4 + $0x160] sm:$0xff] }
 0x682   :  { %14422 = vmatprep.subr.mxu1 %v17930_v4  ;;  %14377 = vmatpush3.msra.mxu0 %v17916_v35  ;;  %v20448_v35 = vld [vmem:[#allocation118_spill] sm:$0xff]  ;;  %v18246_v36 = vand.u32 4294901760, %v6678_v29 }
 0x683   :  { %14423 = vmatpush3.msra.mxu1 %v17930_v4  ;;  %14334 = vmatmul.mubr.f32.gmra.mxu0 %v17748_v8  ;;  %v18244_v4 = vand.u32 4294901760, %v18228_v51 }
 0x684   :  { %14378 = vmatprep.subr.mxu0 %v17928_v13  ;;  %14424 = vmatprep.subr.mxu1 %v17941_v54  ;;  %v18267_v63 = vsub.f32 %v6678_v29, %v18246_v36  ;;  %v18327_v29 = vand.u32 4294901760, %v6672_v34 }
 0x685   :  { %14379 = vmatpush3.msra.mxu0 %v17928_v13  ;;  %14406 = vmatprep.mubr.f32.mxu0 %v17729_v44  ;;  %v6677_v13 = vld [vmem:[#allocation4 + $0x158] sm:$0xff] }
 0x686   :  { %14425 = vmatpush3.msra.mxu1 %v17941_v54  ;;  %14380 = vmatprep.subr.mxu0 %v17946_v15  ;;  %v20449_v54 = vld [vmem:[#allocation114_spill] sm:$0xff]  ;;  %v18255_v21 = vand.u32 4294901760, %v6677_v13  ;;  %v18290_v3 = vand.u32 4294901760, %v18267_v63 }
 0x687   :  { %14426 = vmatprep.subr.mxu1 %v17955_v14  ;;  %14381 = vmatpush3.msra.mxu0 %v17946_v15  ;;  %v18251_v15 = vsub.f32 %v6679_v46, %v18232_v52  ;;  %v20455_v46 = vld [vmem:[#allocation24_spill] sm:$0xff] }
 0x688   :  { %14427 = vmatpush3.msra.mxu1 %v17955_v14  ;;  %14382 = vmatprep.subr.mxu0 %v17960_v48  ;;  %v6676_v14 = vld [vmem:[#allocation4 + $0x150] sm:$0xff]  ;;  %v18279_v53 = vsub.f32 %v6677_v13, %v18255_v21  ;;  %v6828_v24 = vsub.f32 %v18267_v63, %v18290_v3 }
 0x689   :  { %14428 = vmatprep.subr.mxu1 %v17970_v42  ;;  %14383 = vmatpush3.msra.mxu0 %v17960_v48  ;;  %v20450_v48 = vld [vmem:[#allocation116_spill] sm:$0xff]  ;;  %v18272_v5 = vand.u32 4294901760, %v18251_v15 }
 0x68a   :  { %14429 = vmatpush3.msra.mxu1 %v17970_v42  ;;  %14384 = vmatprep.subr.mxu0 %v20447_v40  ;;  %v6807_v42 = vsub.f32 %v18228_v51, %v18244_v4  ;;  %v18304_v60 = vand.u32 4294901760, %v18279_v53  ;;  %v6829_v13 = vand.u32 4294901760, %v6828_v24 }
 0x68b   :  { %14430 = vmatprep.subr.mxu1 %v17983_v37  ;;  %14385 = vmatpush3.msra.mxu0 %v20447_v40 }
 0x68c   :  { %14431 = vmatpush3.msra.mxu1 %v17983_v37  ;;  %14386 = vmatprep.subr.mxu0 %v20448_v35  ;;  %v20451_v37 = vld [vmem:[#allocation119_spill] sm:$0xff]  ;;  %v6808_v20 = vand.u32 4294901760, %v6807_v42  ;;  %v6835_v40 = vsub.f32 %v18279_v53, %v18304_v60 }
 0x68d   :  { %14432 = vmatprep.subr.mxu1 %v17993_v58  ;;  %14387 = vmatpush3.msra.mxu0 %v20448_v35  ;;  %v6670_v35 = vld [vmem:[#allocation4 + $0x120] sm:$0xff] }
 0x68e   :  { %14433 = vmatpush3.msra.mxu1 %v17993_v58  ;;  %14388 = vmatprep.subr.mxu0 %v20449_v54  ;;  %v18274_v58 = vand.u32 4294901760, %v6676_v14 }
 0x68f   :  { %14434 = vmatprep.subr.mxu1 %v18005_v27  ;;  %14389 = vmatpush3.msra.mxu0 %v20449_v54  ;;  %v18335_v54 = vsub.f32 %v6673_v55, %v18314_v59 }
 0x690   :  { %14435 = vmatpush3.msra.mxu1 %v18005_v27  ;;  %14390 = vmatprep.subr.mxu0 %v20450_v48  ;;  %v6674_v27 = vld [vmem:[#allocation4 + $0x140] sm:$0xff]  ;;  %v18297_v32 = vsub.f32 %v6676_v14, %v18274_v58  ;;  %v18337_v14 = vand.u32 4294901760, %v6671_v31 }
 0x691   :  { %14436 = vmatprep.subr.mxu1 %v18018_v12  ;;  %14391 = vmatpush3.msra.mxu0 %v20450_v48  ;;  %v18299_v61 = vand.u32 4294901760, %v6674_v27 }
 0x692   :  { %14437 = vmatpush3.msra.mxu1 %v18018_v12  ;;  %14392 = vmatprep.subr.mxu0 %v20451_v37  ;;  %v18285_v12 = vand.u32 4294901760, %v6675_v62  ;;  %v18319_v47 = vand.u32 4294901760, %v18297_v32 }
 0x693   :  { %14438 = vmatprep.subr.mxu1 %v18030_v0  ;;  %14393 = vmatpush3.msra.mxu0 %v20451_v37  ;;  %v18322_v49 = vsub.f32 %v6674_v27, %v18299_v61  ;;  %v6836_v37 = vand.u32 4294901760, %v6835_v40  ;;  %v18347_v27 = vsub.f32 %v6672_v34, %v18327_v29  ;;  %v6667_v34 = vld [vmem:[#allocation4 + $0x108] sm:$0xff] }
 0x694   :  { %14439 = vmatpush3.msra.mxu1 %v18030_v0  ;;  %14394 = vmatprep.subr.mxu0 %v20452_v16  ;;  %v6821_v0 = vsub.f32 %v18251_v15, %v18272_v5  ;;  %v18309_v22 = vsub.f32 %v6675_v62, %v18285_v12  ;;  %20454 = vst [vmem:[#allocation32_spill] sm:$0xff] %v18319_v47  ;;  %v6669_v62 = vld [vmem:[#allocation4 + $0x118] sm:$0xff] }
 0x695   :  { %14440 = vmatprep.subr.mxu1 %v18043_v6  ;;  %14395 = vmatpush3.msra.mxu0 %v20452_v16  ;;  %v6842_v48 = vsub.f32 %v18297_v32, %v18319_v47  ;;  %v18343_v42 = vand.u32 4294901760, %v18322_v49  ;;  %v18349_v16 = vand.u32 4294901760, %v6670_v35 }
 0x696   :  { %14441 = vmatpush3.msra.mxu1 %v18043_v6  ;;  %14396 = vmatprep.subr.mxu0 %v20453_v43  ;;  %v6815_v6 = vand.u32 4294901760, %v6814_v23 }
 0x697   :  { %14442 = vmatprep.subr.mxu1 %v18055_v30  ;;  %14397 = vmatpush3.msra.mxu0 %v20453_v43  ;;  %20457 = vst [vmem:[#allocation105_spill] sm:$0xff] %v18343_v42  ;;  %v18360_v43 = vsub.f32 %v6671_v31, %v18337_v14  ;;  %v6843_v55 = vand.u32 4294901760, %v6842_v48  ;;  %v18372_v24 = vsub.f32 %v6670_v35, %v18349_v16  ;;  %v18387_v48 = vand.u32 4294901760, %v6667_v34 }
 0x698   :  { %14443 = vmatpush3.msra.mxu1 %v18055_v30  ;;  %14398 = vmatprep.subr.mxu0 %v18063_v28  ;;  %v6822_v30 = vand.u32 4294901760, %v6821_v0  ;;  %v18362_v0 = vand.u32 4294901760, %v6669_v62 }
 0x699   :  { %14445 = vmatmul.mubr.f32.vlgmr.msra.gmra.mxu1 %v17723_v1  ;;  %14488 = vmatprep.subr.mxu1 %v6808_v20  ;;  %v18410_v47 = vsub.f32 %v6667_v34, %v18387_v48 }
 0x69a   :  { %14399 = vmatpush3.msra.mxu0 %v18063_v28  ;;  %14447 = vmatprep.mubr.f32.mxu1 %v17741_v18  ;;  %v18331_v28 = vand.u32 4294901760, %v18309_v22  ;;  %v18385_v35 = vsub.f32 %v6669_v62, %v18362_v0 }
 0x69b   :  { %14489 = vmatpush3.msra.mxu1 %v6808_v20  ;;  %14400 = vmatprep.subr.mxu0 %v20455_v46  ;;  %v6668_v20 = vld [vmem:[#allocation4 + $0x110] sm:$0xff] }
 0x69c   :  { %14490 = vmatprep.subr.mxu1 %v6815_v6  ;;  %14401 = vmatpush3.msra.mxu0 %v20455_v46  ;;  %20456 = vst [vmem:[#allocation35_spill] sm:$0xff] %v18331_v28  ;;  %v6849_v23 = vsub.f32 %v18309_v22, %v18331_v28  ;;  %v6666_v46 = vld [vmem:[#allocation4 + $0x100] sm:$0xff] }
 0x69d   :  { %14491 = vmatpush3.msra.mxu1 %v6815_v6  ;;  %14402 = vmatprep.subr.mxu0 %v18083_v11  ;;  %v6856_v6 = vsub.f32 %v18322_v49, %v18343_v42  ;;  %v18399_v62 = vand.u32 4294901760, %v6666_v46 }
 0x69e   :  { %14448 = vmatmul.mubr.f32.gmra.mxu1 %v17731_v33  ;;  %14492 = vmatprep.subr.mxu1 %v6822_v30  ;;  %v6850_v31 = vand.u32 4294901760, %v6849_v23  ;;  %v18394_v23 = vand.u32 4294901760, %v18372_v24 }
 0x69f   :  { %14403 = vmatpush3.msra.mxu0 %v18083_v11  ;;  %14493 = vmatpush3.msra.mxu1 %v6822_v30  ;;  %v18357_v11 = vand.u32 4294901760, %v18335_v54  ;;  %v18374_v30 = vand.u32 4294901760, %v6668_v20  ;;  %v6857_v42 = vand.u32 4294901760, %v6856_v6  ;;  %v20462_v6 = vld [vmem:[#allocation123_spill] sm:$0xff] }
 0x6a0   :  { %14520 = vmatprep.mubr.f32.mxu1 %v17729_v44  ;;  %14404 = vmatprep.subr.mxu0 %v18090_v57  ;;  %20461 = vst [vmem:[#allocation109_spill] sm:$0xff] %v18394_v23 }
 0x6a1   :  { %14494 = vmatprep.subr.mxu1 %v6829_v13  ;;  %14405 = vmatpush3.msra.mxu0 %v18090_v57  ;;  %20458 = vst [vmem:[#allocation106_spill] sm:$0xff] %v18357_v11  ;;  %v18369_v57 = vand.u32 4294901760, %v18347_v27  ;;  %v6863_v40 = vsub.f32 %v18335_v54, %v18357_v11  ;;  %v18397_v11 = vsub.f32 %v6668_v20, %v18374_v30 }
 0x6a2   :  { %14495 = vmatpush3.msra.mxu1 %v6829_v13  ;;  %14407 = vmatmul.mubr.f32.vlgmr.msra.gmra.mxu0 %v17723_v1  ;;  %v18382_v13 = vand.u32 4294901760, %v18360_v43 }
 0x6a3   :  { %14450 = vmatprep.subr.mxu0 %v18215_v25  ;;  %14496 = vmatprep.subr.mxu1 %v6836_v37  ;;  %20459 = vst [vmem:[#allocation107_spill] sm:$0xff] %v18369_v57 }
 0x6a4   :  { %14409 = vmatprep.mubr.f32.mxu0 %v17741_v18  ;;  %14451 = vmatpush3.msra.mxu0 %v18215_v25  ;;  %20460 = vst [vmem:[#allocation108_spill] sm:$0xff] %v18382_v13  ;;  %v6877_v28 = vsub.f32 %v18360_v43, %v18382_v13  ;;  %v18420_v13 = vsub.f32 %v6666_v46, %v18399_v62 }
 0x6a5   :  { %14497 = vmatpush3.msra.mxu1 %v6836_v37  ;;  %14452 = vmatprep.subr.mxu0 %v18223_v38  ;;  %v6870_v37 = vsub.f32 %v18347_v27, %v18369_v57  ;;  %v18407_v57 = vand.u32 4294901760, %v18385_v35 }
 0x6a6   :  { %14498 = vmatprep.subr.mxu1 %v6843_v55  ;;  %14453 = vmatpush3.msra.mxu0 %v18223_v38  ;;  %v6878_v34 = vand.u32 4294901760, %v6877_v28 }
 0x6a7   :  { %14499 = vmatpush3.msra.mxu1 %v6843_v55  ;;  %14410 = vmatmul.mubr.f32.gmra.mxu0 %v17731_v33  ;;  %v6864_v55 = vand.u32 4294901760, %v6863_v40  ;;  %v6871_v20 = vand.u32 4294901760, %v6870_v37  ;;  %v18417_v40 = vand.u32 4294901760, %v18397_v11  ;;  %v18427_v37 = vand.u32 4294901760, %v18410_v47 }
 0x6a8   :  { %14454 = vmatprep.subr.mxu0 %v18232_v52  ;;  %14500 = vmatprep.subr.mxu1 %v6850_v31 }
 0x6a9   :  { %14455 = vmatpush3.msra.mxu0 %v18232_v52  ;;  %14482 = vmatprep.mubr.f32.mxu0 %v20462_v6  ;;  %v6884_v6 = vsub.f32 %v18372_v24, %v18394_v23  ;;  %20463 = vst [vmem:[#allocation110_spill] sm:$0xff] %v18417_v40  ;;  %v18434_v23 = vand.u32 4294901760, %v18420_v13 }
 0x6aa   :  { %14501 = vmatpush3.msra.mxu1 %v6850_v31  ;;  %14456 = vmatprep.subr.mxu0 %v18246_v36  ;;  %v6891_v31 = vsub.f32 %v18385_v35, %v18407_v57 }
 0x6ab   :  { %14502 = vmatprep.subr.mxu1 %v6857_v42  ;;  %14457 = vmatpush3.msra.mxu0 %v18246_v36  ;;  %v6885_v46 = vand.u32 4294901760, %v6884_v6 }
 0x6ac   :  { %14503 = vmatpush3.msra.mxu1 %v6857_v42  ;;  %14458 = vmatprep.subr.mxu0 %v18255_v21  ;;  %v6898_v42 = vsub.f32 %v18397_v11, %v18417_v40  ;;  %v6892_v28 = vand.u32 4294901760, %v6891_v31  ;;  %v6912_v40 = vsub.f32 %v18420_v13, %v18434_v23 }
 0x6ad   :  { %14504 = vmatprep.subr.mxu1 %v6864_v55  ;;  %14459 = vmatpush3.msra.mxu0 %v18255_v21 }
 0x6ae   :  { %14505 = vmatpush3.msra.mxu1 %v6864_v55  ;;  %14460 = vmatprep.subr.mxu0 %v18274_v58  ;;  %v6905_v55 = vsub.f32 %v18410_v47, %v18427_v37  ;;  %v6899_v6 = vand.u32 4294901760, %v6898_v42 }
 0x6af   :  { %14506 = vmatprep.subr.mxu1 %v6871_v20  ;;  %14461 = vmatpush3.msra.mxu0 %v18274_v58 }
 0x6b0   :  { %14507 = vmatpush3.msra.mxu1 %v6871_v20  ;;  %14462 = vmatprep.subr.mxu0 %v18285_v12  ;;  %v6906_v20 = vand.u32 4294901760, %v6905_v55 }
 0x6b1   :  { %14508 = vmatprep.subr.mxu1 %v6878_v34  ;;  %14463 = vmatpush3.msra.mxu0 %v18285_v12 }
 0x6b2   :  { %14509 = vmatpush3.msra.mxu1 %v6878_v34  ;;  %14464 = vmatprep.subr.mxu0 %v18299_v61  ;;  %v6913_v34 = vand.u32 4294901760, %v6912_v40 }
 0x6b3   :  { %14510 = vmatprep.subr.mxu1 %v6885_v46  ;;  %14465 = vmatpush3.msra.mxu0 %v18299_v61 }
 0x6b4   :  { %14511 = vmatpush3.msra.mxu1 %v6885_v46  ;;  %14466 = vmatprep.subr.mxu0 %v18314_v59 }
 0x6b5   :  { %14512 = vmatprep.subr.mxu1 %v6892_v28  ;;  %14467 = vmatpush3.msra.mxu0 %v18314_v59 }
 0x6b6   :  { %14513 = vmatpush3.msra.mxu1 %v6892_v28  ;;  %14468 = vmatprep.subr.mxu0 %v18327_v29 }
 0x6b7   :  { %14514 = vmatprep.subr.mxu1 %v6899_v6  ;;  %14469 = vmatpush3.msra.mxu0 %v18327_v29 }
 0x6b8   :  { %14515 = vmatpush3.msra.mxu1 %v6899_v6  ;;  %14470 = vmatprep.subr.mxu0 %v18337_v14 }
 0x6b9   :  { %14516 = vmatprep.subr.mxu1 %v6906_v20  ;;  %14471 = vmatpush3.msra.mxu0 %v18337_v14 }
 0x6ba   :  { %14517 = vmatpush3.msra.mxu1 %v6906_v20  ;;  %14472 = vmatprep.subr.mxu0 %v18349_v16 }
 0x6bb   :  { %14518 = vmatprep.subr.mxu1 %v6913_v34  ;;  %14473 = vmatpush3.msra.mxu0 %v18349_v16 }
 0x6bc   :  { %14519 = vmatpush3.msra.mxu1 %v6913_v34  ;;  %14474 = vmatprep.subr.mxu0 %v18362_v0 }
 0x6bd   :  { %14521 = vmatmul.mubr.f32.vlgmr.msra.gmra.mxu1 %v17723_v1  ;;  %14564 = vmatprep.subr.mxu1 %v18215_v25 }
 0x6be   :  { %14475 = vmatpush3.msra.mxu0 %v18362_v0  ;;  %14523 = vmatprep.mubr.f32.mxu1 %v17741_v18 }
 0x6bf   :  { %14565 = vmatpush3.msra.mxu1 %v18215_v25  ;;  %14476 = vmatprep.subr.mxu0 %v18374_v30 }
 0x6c0   :  { %14566 = vmatprep.subr.mxu1 %v18223_v38  ;;  %14477 = vmatpush3.msra.mxu0 %v18374_v30 }
 0x6c1   :  { %14567 = vmatpush3.msra.mxu1 %v18223_v38  ;;  %14478 = vmatprep.subr.mxu0 %v18387_v48 }
 0x6c2   :  { %14524 = vmatmul.mubr.f32.gmra.mxu1 %v17731_v33  ;;  %14568 = vmatprep.subr.mxu1 %v18232_v52 }
 0x6c3   :  { %14479 = vmatpush3.msra.mxu0 %v18387_v48  ;;  %14569 = vmatpush3.msra.mxu1 %v18232_v52 }
 0x6c4   :  { %14596 = vmatprep.mubr.f32.mxu1 %v17745_v39  ;;  %14480 = vmatprep.subr.mxu0 %v18399_v62  ;;  %v20468_v39 = vld [vmem:[#allocation107_spill] sm:$0xff] }
 0x6c5   :  { %14570 = vmatprep.subr.mxu1 %v18246_v36  ;;  %14481 = vmatpush3.msra.mxu0 %v18399_v62 }
 0x6c6   :  { %14571 = vmatpush3.msra.mxu1 %v18246_v36  ;;  %14483 = vmatmul.mubr.f32.vlgmr.msra.gmra.mxu0 %v17773_v26  ;;  %v20473_v26 = vld [vmem:[#allocation15_spill] sm:$0xff] }
 0x6c7   :  { %14526 = vmatprep.subr.mxu0 %v18228_v51  ;;  %14572 = vmatprep.subr.mxu1 %v18255_v21 }
 0x6c8   :  { %14485 = vmatprep.mubr.f32.mxu0 %v17785_v50  ;;  %14527 = vmatpush3.msra.mxu0 %v18228_v51  ;;  %v18612_v50 = vpop.f32.mrf.mxu1 }
 0x6c9   :  { %14573 = vmatpush3.msra.mxu1 %v18255_v21  ;;  %14528 = vmatprep.subr.mxu0 %v18239_v7 }
 0x6ca   :  { %14574 = vmatprep.subr.mxu1 %v18274_v58  ;;  %14529 = vmatpush3.msra.mxu0 %v18239_v7 }
 0x6cb   :  { %14575 = vmatpush3.msra.mxu1 %v18274_v58  ;;  %14486 = vmatmul.mubr.f32.gmra.mxu0 %v17791_v45  ;;  %v5376_v45 = vpop.f32.mrf.mxu1 }
 0x6cc   :  { %14530 = vmatprep.subr.mxu0 %v18251_v15  ;;  %14576 = vmatprep.subr.mxu1 %v18285_v12 }
 0x6cd   :  { %14531 = vmatpush3.msra.mxu0 %v18251_v15  ;;  %14558 = vmatprep.mubr.f32.mxu0 %v17735_v9  ;;  %v20466_v9 = vld [vmem:[#allocation105_spill] sm:$0xff] }
 0x6ce   :  { %14577 = vmatpush3.msra.mxu1 %v18285_v12  ;;  %14532 = vmatprep.subr.mxu0 %v18267_v63 }
 0x6cf   :  { %14578 = vmatprep.subr.mxu1 %v18299_v61  ;;  %14533 = vmatpush3.msra.mxu0 %v18267_v63 }
 0x6d0   :  { %14579 = vmatpush3.msra.mxu1 %v18299_v61  ;;  %14534 = vmatprep.subr.mxu0 %v18279_v53 }
 0x6d1   :  { %14580 = vmatprep.subr.mxu1 %v18314_v59  ;;  %14535 = vmatpush3.msra.mxu0 %v18279_v53 }
 0x6d2   :  { %14581 = vmatpush3.msra.mxu1 %v18314_v59  ;;  %14536 = vmatprep.subr.mxu0 %v18297_v32 }
 0x6d3   :  { %14582 = vmatprep.subr.mxu1 %v18327_v29  ;;  %14537 = vmatpush3.msra.mxu0 %v18297_v32 }
 0x6d4   :  { %14583 = vmatpush3.msra.mxu1 %v18327_v29  ;;  %14538 = vmatprep.subr.mxu0 %v18309_v22 }
 0x6d5   :  { %14584 = vmatprep.subr.mxu1 %v18337_v14  ;;  %14539 = vmatpush3.msra.mxu0 %v18309_v22 }
 0x6d6   :  { %14585 = vmatpush3.msra.mxu1 %v18337_v14  ;;  %14540 = vmatprep.subr.mxu0 %v18322_v49 }
 0x6d7   :  { %14586 = vmatprep.subr.mxu1 %v18349_v16  ;;  %14541 = vmatpush3.msra.mxu0 %v18322_v49 }
 0x6d8   :  { %14587 = vmatpush3.msra.mxu1 %v18349_v16  ;;  %14542 = vmatprep.subr.mxu0 %v18335_v54 }
 0x6d9   :  { %14588 = vmatprep.subr.mxu1 %v18362_v0  ;;  %14543 = vmatpush3.msra.mxu0 %v18335_v54 }
 0x6da   :  { %14589 = vmatpush3.msra.mxu1 %v18362_v0  ;;  %14544 = vmatprep.subr.mxu0 %v18347_v27 }
 0x6db   :  { %14590 = vmatprep.subr.mxu1 %v18374_v30  ;;  %14545 = vmatpush3.msra.mxu0 %v18347_v27 }
 0x6dc   :  { %14591 = vmatpush3.msra.mxu1 %v18374_v30  ;;  %14546 = vmatprep.subr.mxu0 %v18360_v43 }
 0x6dd   :  { %14592 = vmatprep.subr.mxu1 %v18387_v48  ;;  %14547 = vmatpush3.msra.mxu0 %v18360_v43 }
 0x6de   :  { %14593 = vmatpush3.msra.mxu1 %v18387_v48  ;;  %14548 = vmatprep.subr.mxu0 %v18372_v24 }
 0x6df   :  { %14594 = vmatprep.subr.mxu1 %v18399_v62  ;;  %14549 = vmatpush3.msra.mxu0 %v18372_v24 }
 0x6e0   :  { %14595 = vmatpush3.msra.mxu1 %v18399_v62  ;;  %14550 = vmatprep.subr.mxu0 %v18385_v35 }
 0x6e1   :  { %14597 = vmatmul.mubr.f32.vlgmr.msra.gmra.mxu1 %v17738_v10  ;;  %14640 = vmatprep.subr.mxu1 %v18215_v25  ;;  %v20467_v10 = vld [vmem:[#allocation106_spill] sm:$0xff] }
 0x6e2   :  { %14551 = vmatpush3.msra.mxu0 %v18385_v35  ;;  %14599 = vmatprep.mubr.f32.mxu1 %v17770_v19  ;;  %v20472_v19 = vld [vmem:[#allocation12_spill] sm:$0xff] }
 0x6e3   :  { %14641 = vmatpush3.msra.mxu1 %v18215_v25  ;;  %14552 = vmatprep.subr.mxu0 %v18397_v11  ;;  %v18614_v25 = vpop.f32.mrf.mxu0 }
 0x6e4   :  { %14642 = vmatprep.subr.mxu1 %v18223_v38  ;;  %14553 = vmatpush3.msra.mxu0 %v18397_v11 }
 0x6e5   :  { %14643 = vmatpush3.msra.mxu1 %v18223_v38  ;;  %14554 = vmatprep.subr.mxu0 %v18410_v47  ;;  %v14069_v38 = vpop.f32.mrf.mxu1  ;;  %v5195_v51 = vpop.f32.mrf.mxu0 }
 0x6e6   :  { %14600 = vmatmul.mubr.f32.gmra.mxu1 %v17761_v2  ;;  %14644 = vmatprep.subr.mxu1 %v18232_v52  ;;  %v20471_v2 = vld [vmem:[#allocation110_spill] sm:$0xff] }
 0x6e7   :  { %14555 = vmatpush3.msra.mxu0 %v18410_v47  ;;  %14645 = vmatpush3.msra.mxu1 %v18232_v52  ;;  %v5388_v52 = vpop.f32.mrf.mxu1  ;;  %v14031_v7 = vpop.f32.mrf.mxu0 }
 0x6e8   :  { %14672 = vmatprep.mubr.f32.mxu1 %v17729_v44  ;;  %14556 = vmatprep.subr.mxu0 %v18420_v13 }
 0x6e9   :  { %14646 = vmatprep.subr.mxu1 %v18246_v36  ;;  %14557 = vmatpush3.msra.mxu0 %v18420_v13 }
 0x6ea   :  { %14647 = vmatpush3.msra.mxu1 %v18246_v36  ;;  %14559 = vmatmul.mubr.f32.vlgmr.msra.gmra.mxu0 %v17727_v17  ;;  %v20464_v17 = vld [vmem:[#allocation32_spill] sm:$0xff]  ;;  %v5215_v36 = vpop.f32.mrf.mxu0 }
 0x6eb   :  { %14602 = vmatprep.subr.mxu0 %v18244_v4  ;;  %14648 = vmatprep.subr.mxu1 %v18255_v21 }
 0x6ec   :  { %14561 = vmatprep.mubr.f32.mxu0 %v17758_v41  ;;  %14603 = vmatpush3.msra.mxu0 %v18244_v4  ;;  %v20470_v41 = vld [vmem:[#allocation109_spill] sm:$0xff]  ;;  %v18616_v4 = vpop.f32.mrf.mxu1 }
 0x6ed   :  { %14649 = vmatpush3.msra.mxu1 %v18255_v21  ;;  %14604 = vmatprep.subr.mxu0 %v18260_v56 }
 0x6ee   :  { %14650 = vmatprep.subr.mxu1 %v18274_v58  ;;  %14605 = vmatpush3.msra.mxu0 %v18260_v56  ;;  %v5608_v15 = vpop.f32.mrf.mxu1 }
 0x6ef   :  { %14651 = vmatpush3.msra.mxu1 %v18274_v58  ;;  %14562 = vmatmul.mubr.f32.gmra.mxu0 %v17748_v8  ;;  %v20469_v8 = vld [vmem:[#allocation108_spill] sm:$0xff] }
 0x6f0   :  { %14606 = vmatprep.subr.mxu0 %v18272_v5  ;;  %14652 = vmatprep.subr.mxu1 %v18285_v12  ;;  %v14145_v21 = vpop.f32.mrf.mxu1 }
 0x6f1   :  { %14607 = vmatpush3.msra.mxu0 %v18272_v5  ;;  %14634 = vmatprep.mubr.f32.mxu0 %v17729_v44  ;;  %v20465_v44 = vld [vmem:[#allocation35_spill] sm:$0xff] }
 0x6f2   :  { %14653 = vmatpush3.msra.mxu1 %v18285_v12  ;;  %14608 = vmatprep.subr.mxu0 %v18290_v3  ;;  %v5624_v56 = vpop.f32.mrf.mxu1 }
 0x6f3   :  { %14654 = vmatprep.subr.mxu1 %v18299_v61  ;;  %14609 = vmatpush3.msra.mxu0 %v18290_v3 }
 0x6f4   :  { %14655 = vmatpush3.msra.mxu1 %v18299_v61  ;;  %14610 = vmatprep.subr.mxu0 %v18304_v60  ;;  %v18618_v63 = vpop.f32.mrf.mxu1 }
 0x6f5   :  { %14656 = vmatprep.subr.mxu1 %v18314_v59  ;;  %14611 = vmatpush3.msra.mxu0 %v18304_v60 }
 0x6f6   :  { %14657 = vmatpush3.msra.mxu1 %v18314_v59  ;;  %14612 = vmatprep.subr.mxu0 %v20464_v17  ;;  %v18620_v58 = vpop.f32.mrf.mxu1 }
 0x6f7   :  { %14658 = vmatprep.subr.mxu1 %v18327_v29  ;;  %14613 = vmatpush3.msra.mxu0 %v20464_v17 }
 0x6f8   :  { %14659 = vmatpush3.msra.mxu1 %v18327_v29  ;;  %14614 = vmatprep.subr.mxu0 %v20465_v44  ;;  %v18624_v12 = vpop.f32.mrf.mxu1 }
 0x6f9   :  { %14660 = vmatprep.subr.mxu1 %v18337_v14  ;;  %14615 = vmatpush3.msra.mxu0 %v20465_v44 }
 0x6fa   :  { %14661 = vmatpush3.msra.mxu1 %v18337_v14  ;;  %14616 = vmatprep.subr.mxu0 %v20466_v9  ;;  %v18626_v32 = vpop.f32.mrf.mxu1 }
 0x6fb   :  { %14662 = vmatprep.subr.mxu1 %v18349_v16  ;;  %14617 = vmatpush3.msra.mxu0 %v20466_v9  ;;  %v5395_v9 = vadd.f32 %v14069_v38, %v14031_v7 }
 0x6fc   :  { %14663 = vmatpush3.msra.mxu1 %v18349_v16  ;;  %14618 = vmatprep.subr.mxu0 %v20467_v10 }
 0x6fd   :  { %14664 = vmatprep.subr.mxu1 %v18362_v0  ;;  %14619 = vmatpush3.msra.mxu0 %v20467_v10 }
 0x6fe   :  { %14665 = vmatpush3.msra.mxu1 %v18362_v0  ;;  %14620 = vmatprep.subr.mxu0 %v20468_v39 }
 0x6ff   :  { %14666 = vmatprep.subr.mxu1 %v18374_v30  ;;  %14621 = vmatpush3.msra.mxu0 %v20468_v39  ;;  %v5377_v39 = vadd.f32 %v5376_v45, %v5195_v51 }
 0x700   :  { %14667 = vmatpush3.msra.mxu1 %v18374_v30  ;;  %14622 = vmatprep.subr.mxu0 %v20469_v8 }
 0x701   :  { %14668 = vmatprep.subr.mxu1 %v18387_v48  ;;  %14623 = vmatpush3.msra.mxu0 %v20469_v8  ;;  %v5389_v8 = vadd.f32 %v5388_v52, %v5215_v36 }
 0x702   :  { %14669 = vmatpush3.msra.mxu1 %v18387_v48  ;;  %14624 = vmatprep.subr.mxu0 %v20470_v41 }
 0x703   :  { %14670 = vmatprep.subr.mxu1 %v18399_v62  ;;  %14625 = vmatpush3.msra.mxu0 %v20470_v41 }
 0x704   :  { %14671 = vmatpush3.msra.mxu1 %v18399_v62  ;;  %14626 = vmatprep.subr.mxu0 %v18407_v57 }
 0x705   :  { %14673 = vmatmul.mubr.f32.vlgmr.msra.gmra.mxu1 %v17723_v1  ;;  %14627 = vmatpush3.msra.mxu0 %v18407_v57 }
 0x706   :  { %14675 = vmatprep.mubr.f32.mxu1 %v17741_v18  ;;  %14628 = vmatprep.subr.mxu0 %v20471_v2 }
 0x707   :  { %14629 = vmatpush3.msra.mxu0 %v20471_v2 }
 0x708   :  { %14630 = vmatprep.subr.mxu0 %v18427_v37 }
 0x709   :  { %14676 = vmatmul.mubr.f32.gmra.mxu1 %v17731_v33  ;;  %14631 = vmatpush3.msra.mxu0 %v18427_v37 }
 0x70a   :  { %14632 = vmatprep.subr.mxu0 %v18434_v23  ;;  %14700 = vmatprep.mubr.f32.mxu1 %v20472_v19 }
 0x70b   :  { %14633 = vmatpush3.msra.mxu0 %v18434_v23 }
 0x70c   :  { %14635 = vmatmul.mubr.f32.vlgmr.msra.gmra.mxu0 %v17723_v1  ;;  %v14104_v1 = vpop.f32.mrf.mxu0 }
 0x70d   :  { %14637 = vmatprep.mubr.f32.mxu0 %v17741_v18 }
 0x70e   :  { %v5498_v18 = vpop.f32.mrf.mxu0 }
 0x70f   :  { %v5499_v19 = vadd.f32 %v5498_v18, %v5377_v39 }
 0x710   :  { %14638 = vmatmul.mubr.f32.gmra.mxu0 %v17731_v33  ;;  %v14107_v33 = vpop.f32.mrf.mxu0 }
 0x711   :  { %14686 = vmatprep.mubr.f32.mxu0 %v20473_v26  ;;  %v18628_v60 = vpop.f32.mrf.mxu1  ;;  %v5520_v41 = vadd.f32 %v14107_v33, %v5395_v9 }
 0x712   :  { %v5512_v5 = vpop.f32.mrf.mxu0 }
 0x713   :  { %v6163_v59 = vpop.f32.mrf.mxu1 }
 0x714   :  { %v18622_v53 = vpop.f32.mrf.mxu0 }
 0x716   :  { %v5751_v3 = vpop.f32.mrf.mxu0  ;;  %v14297_v49 = vpop.f32.mrf.mxu1 }
 0x718   :  { %v14183_v61 = vpop.f32.mrf.mxu0  ;;  %v18630_v54 = vpop.f32.mrf.mxu1 }
 0x71a   :  { %v5763_v22 = vpop.f32.mrf.mxu0 }
 0x71c   :  { %v14256_v47 = vpop.f32.mrf.mxu0 }
 0x71e   :  { %v5982_v29 = vpop.f32.mrf.mxu0 }
 0x71f   :  { %v6164_v45 = vadd.f32 %v6163_v59, %v5982_v29 }
 0x720   :  { %v14259_v14 = vpop.f32.mrf.mxu0 }
 0x722   :  { %v6002_v16 = vpop.f32.mrf.mxu0 }
 0x735   :  { %v18632_v27 = vpop.f32.mrf.mxu1 }
 0x736   :  { %20474 = vst [vmem:[#allocation111_spill] sm:$0xff] %v18632_v27 }
 0x737   :  { %v18634_v11 = vpop.f32.mrf.mxu1 }
 0x73a   :  { %v18636_v0 = vpop.f32.mrf.mxu1 }
 0x73b   :  { %20475 = vst [vmem:[#allocation113_spill] sm:$0xff] %v18636_v0 }
 0x73c   :  { %v18638_v24 = vpop.f32.mrf.mxu1 }
 0x73d   :  { %20476 = vst [vmem:[#allocation115_spill] sm:$0xff] %v18638_v24  ;;  %v5609_v24 = vadd.f32 %v5608_v15, %v5499_v19  ;;  %v6170_v19 = vadd.f32 %v18628_v60, %v14256_v47 }
 0x73e   :  { %v14332_v43 = vpop.f32.mrf.mxu0 }
 0x73f   :  { %v5752_v38 = vadd.f32 %v5751_v3, %v5609_v24 }
 0x740   :  { %v6285_v57 = vpop.f32.mrf.mxu0 }
 0x741   :  { %v5857_v3 = vadd.f32 %v18620_v58, %v5752_v38 }
 0x743   :  { %v14335_v30 = vpop.f32.mrf.mxu0 }
 0x745   :  { %v6299_v35 = vpop.f32.mrf.mxu0 }
 0x759   :  { %v18640_v13 = vpop.f32.mrf.mxu1 }
 0x75a   :  { %20477 = vst [vmem:[#allocation117_spill] sm:$0xff] %v18640_v13  ;;  %v5383_v13 = vadd.f32 %v18612_v50, %v18614_v25  ;;  %v6182_v50 = vadd.f32 %v14297_v49, %v14259_v14  ;;  %v6286_v25 = vadd.f32 %v6285_v57, %v6164_v45 }
 0x75b   :  { %v18642_v48 = vpop.f32.mrf.mxu1 }
 0x75c   :  { %20478 = vst [vmem:[#allocation121_spill] sm:$0xff] %v18642_v48 }
 0x75e   :  { %v18646_v62 = vpop.f32.mrf.mxu1 }
 0x75f   :  { %20480 = vst [vmem:[#allocation112_spill] sm:$0xff] %v18646_v62  ;;  %v5633_v62 = vadd.f32 %v14145_v21, %v5520_v41 }
 0x760   :  { %v18650_v31 = vpop.f32.mrf.mxu1 }
 0x761   :  { %20481 = vst [vmem:[#allocation118_spill] sm:$0xff] %v18650_v31  ;;  %v5513_v31 = vadd.f32 %v5512_v5, %v5389_v8 }
 0x762   :  { %v18644_v23 = vpop.f32.mrf.mxu0 }
 0x763   :  { %20479 = vst [vmem:[#allocation122_spill] sm:$0xff] %v18644_v23  ;;  %v5506_v23 = vadd.f32 %v14104_v1, %v5383_v13  ;;  %v5625_v27 = vadd.f32 %v5624_v56, %v5513_v31  ;;  %v20490_v39 = vld [vmem:[#allocation121_spill] sm:$0xff] }
 0x764   :  { %v18648_v40 = vpop.f32.mrf.mxu0 }
 0x765   :  { %v5764_v7 = vadd.f32 %v5763_v22, %v5625_v27  ;;  %v5617_v36 = vadd.f32 %v18616_v4, %v5506_v23  ;;  %v6176_v22 = vadd.f32 %v18630_v54, %v6002_v16  ;;  %v6307_v4 = vadd.f32 %v14335_v30, %v6182_v50  ;;  %v20484_v16 = vld [vmem:[#allocation113_spill] sm:$0xff] }
 0x766   :  { %v20493_v50 = vld [vmem:[#allocation112_spill] sm:$0xff] }
 0x767   :  { %v18652_v37 = vpop.f32.mrf.mxu0  ;;  %v5758_v1 = vadd.f32 %v18622_v53, %v5617_v36  ;;  %v6300_v27 = vadd.f32 %v6299_v35, %v6176_v22  ;;  %v6396_v53 = vadd.f32 %v18634_v11, %v6286_v25 }
 0x768   :  { %20482 = vst [vmem:[#allocation114_spill] sm:$0xff] %v18652_v37  ;;  %v5770_v37 = vadd.f32 %v14183_v61, %v5633_v62  ;;  %v5869_v61 = vadd.f32 %v18626_v32, %v5764_v7  ;;  %v7452_v32 = vrot.slane %v5857_v3, 7 }
 0x769   :  { %v18654_v42 = vpop.f32.mrf.mxu0  ;;  %v5863_v47 = vadd.f32 %v18618_v63, %v5758_v1  ;;  %v6539_v54 = vadd.f32 %v18648_v40, %v6396_v53 }
 0x76a   :  { %20483 = vst [vmem:[#allocation116_spill] sm:$0xff] %v18654_v42  ;;  %v5875_v5 = vadd.f32 %v18624_v12, %v5770_v37  ;;  %v7454_v13 = vrot.slane %v5869_v61, 7  ;;  %v20495_v61 = vld [vmem:[#allocation27_spill] sm:$0xff] }
 0x76b   :  { %v6644_v8 = vadd.f32 %v20490_v39, %v6539_v54 }
 0x76c   :  { %v7455_v14 = vrot.slane %v5875_v5, 7 }
 0x76e   :  { %v7459_v37 = vsel %vm2180_vm2, %v7455_v14, %v7452_v32 }
 0x771   :  { %v20491_v41 = vld [vmem:[#allocation116_spill] sm:$0xff] }
 0x77d   :  { %v14522_v46 = vpop.f32.mrf.mxu1 }
 0x77f   :  { %v6950_v28 = vpop.f32.mrf.mxu1 }
 0x782   :  { %v14525_v6 = vpop.f32.mrf.mxu1 }
 0x784   :  { %v6962_v34 = vpop.f32.mrf.mxu1 }
 0x786   :  { %v14484_v55 = vpop.f32.mrf.mxu0 }
 0x787   :  { %v6957_v0 = vadd.f32 %v14522_v46, %v14484_v55  ;;  %v20487_v46 = vld [vmem:[#allocation114_spill] sm:$0xff] }
 0x788   :  { %v6769_v20 = vpop.f32.mrf.mxu0 }
 0x789   :  { %v6951_v18 = vadd.f32 %v6950_v28, %v6769_v20  ;;  %v20488_v28 = vld [vmem:[#allocation115_spill] sm:$0xff] }
 0x78a   :  { %v6412_v55 = vadd.f32 %v20488_v28, %v6300_v27  ;;  %v11579_v27 = vld [vmem:[%s19830_s6] ss:$0 sm:$0xff] }
 0x78b   :  { %v14487_v17 = vpop.f32.mrf.mxu0 }
 0x78c   :  { %v6969_v15 = vadd.f32 %v14525_v6, %v14487_v17 }
 0x78d   :  { %v6789_v10 = vpop.f32.mrf.mxu0 }
 0x78e   :  { %v6963_v29 = vadd.f32 %v6962_v34, %v6789_v10  ;;  %v20489_v34 = vld [vmem:[#allocation122_spill] sm:$0xff]  ;;  %v7453_v10 = vrot.slane %v5863_v47, 7 }
 0x7a1   :  { %v14598_v44 = vpop.f32.mrf.mxu1 }
 0x7a3   :  { %v7182_v2 = vpop.f32.mrf.mxu1 }
 0x7a6   :  { %v14601_v42 = vpop.f32.mrf.mxu1 }
 0x7a8   :  { %v7198_v51 = vpop.f32.mrf.mxu1 }
 0x7aa   :  { %v14560_v26 = vpop.f32.mrf.mxu0 }
 0x7ab   :  { %v7080_v33 = vadd.f32 %v14560_v26, %v6957_v0  ;;  %v6293_v26 = vadd.f32 %v14332_v43, %v6170_v19  ;;  %v6420_v43 = vadd.f32 %v20484_v16, %v6307_v4  ;;  %v7457_v4 = vsel %vm2180_vm2, %v7453_v10, %v7454_v13 }
 0x7ac   :  { %v7072_v48 = vpop.f32.mrf.mxu0 }
 0x7ad   :  { %v7073_v56 = vadd.f32 %v7072_v48, %v6951_v18  ;;  %v7191_v49 = vadd.f32 %v14598_v44, %v7080_v33  ;;  %v20485_v48 = vld [vmem:[#allocation111_spill] sm:$0xff]  ;;  %v6557_v63 = vadd.f32 %v20487_v46, %v6420_v43  ;;  %v7458_v18 = vsel %vm2180_vm2, %v7452_v32, %v7453_v10  ;;  %v20492_v33 = vld [vmem:[#allocation17_spill] sm:$0xff] }
 0x7ae   :  { %v6404_v23 = vadd.f32 %v20485_v48, %v6293_v26  ;;  %v7460_v5 = vmul.f32 %v7459_v37, %v20492_v33  ;;  %v20500_v32 = vld [vmem:[#allocation29_spill] sm:$0xff]  ;;  %v20501_v48 = vld [vmem:[#allocation22_spill] sm:$0xff] }
 0x7af   :  { %v14563_v52 = vpop.f32.mrf.mxu0  ;;  %v7183_v24 = vadd.f32 %v7182_v2, %v7073_v56  ;;  %v6551_v2 = vadd.f32 %v20491_v41, %v6412_v55 }
 0x7b0   :  { %v7094_v12 = vadd.f32 %v14563_v52, %v6969_v15  ;;  %v6545_v17 = vadd.f32 %v20489_v34, %v6404_v23  ;;  %v7464_v3 = vadd.f32 %v7460_v5, %v6644_v8 }
 0x7b1   :  { %v7086_v59 = vpop.f32.mrf.mxu0 }
 0x7b2   :  { %v7087_v57 = vadd.f32 %v7086_v59, %v6963_v29  ;;  %v7207_v31 = vadd.f32 %v14601_v42, %v7094_v12  ;;  %v7456_v42 = vsel %vm2180_vm2, %v7454_v13, %v7455_v14  ;;  %v20496_v59 = vld [vmem:[#allocation18_spill] sm:$0xff]  ;;  %v20497_v29 = vld [vmem:[#allocation28_spill] sm:$0xff]  ;;  %v7462_v13 = vmul.f32 %v7457_v4, %v20500_v32  ;;  %v20508_v4 = vld [vmem:[#allocation21_spill] sm:$0xff] }
 0x7b3   :  { %v7463_v22 = vmul.f32 %v7456_v42, %v20495_v61  ;;  %v7461_v12 = vmul.f32 %v7458_v18, %v20497_v29  ;;  %v20506_v61 = vld [vmem:[#allocation16_spill] sm:$0xff]  ;;  %v20511_v29 = vld [vmem:[#allocation31_spill] sm:$0xff]  ;;  %v20523_v32 = vld [vmem:[#allocation62_spill] sm:$0xff] }
 0x7b4   :  { %v7199_v9 = vadd.f32 %v7198_v51, %v7087_v57  ;;  %v6662_v51 = vadd.f32 %v20493_v50, %v6557_v63  ;;  %v20499_v57 = vld [vmem:[#allocation26_spill] sm:$0xff] }
 0x7c5   :  { %v14674_v21 = vpop.f32.mrf.mxu1 }
 0x7c7   :  { %v7430_v0 = vpop.f32.mrf.mxu1 }
 0x7c9   :  { %v14677_v6 = vpop.f32.mrf.mxu1 }
 0x7cb   :  { %v7442_v25 = vpop.f32.mrf.mxu1 }
 0x7cc   :  { %v14636_v60 = vpop.f32.mrf.mxu0 }
 0x7cd   :  { %v7332_v58 = vadd.f32 %v14636_v60, %v7191_v49  ;;  %v20498_v49 = vld [vmem:[#allocation118_spill] sm:$0xff]  ;;  %v7467_v60 = vadd.f32 %v7463_v22, %v6662_v51  ;;  %v20507_v22 = vld [vmem:[#allocation13_spill] sm:$0xff] }
 0x7ce   :  { %v7325_v30 = vpop.f32.mrf.mxu0  ;;  %v6656_v14 = vadd.f32 %v20498_v49, %v6551_v2  ;;  %v20513_v49 = vld [vmem:[#allocation14_spill] sm:$0xff] }
 0x7cf   :  { %v7437_v62 = vadd.f32 %v14674_v21, %v7332_v58  ;;  %v7326_v35 = vadd.f32 %v7325_v30, %v7183_v24  ;;  %v20494_v21 = vld [vmem:[#allocation117_spill] sm:$0xff] }
 0x7d0   :  { %v14639_v20 = vpop.f32.mrf.mxu0  ;;  %v6650_v1 = vadd.f32 %v20494_v21, %v6545_v17 }
 0x7d1   :  { %v7431_v40 = vadd.f32 %v7430_v0, %v7326_v35  ;;  %v7344_v44 = vadd.f32 %v14639_v20, %v7207_v31  ;;  %v7469_v7 = vrot.slane %v7437_v62, 1  ;;  %v20502_v62 = vld [vmem:[#allocation19_spill] sm:$0xff]  ;;  %v7466_v31 = vadd.f32 %v7462_v13, %v6656_v14  ;;  %v20514_v14 = vld [vmem:[#allocation30_spill] sm:$0xff]  ;;  %v20524_v13 = vld [vmem:[#allocation49_spill] sm:$0xff] }
 0x7d2   :  { %v7337_v38 = vpop.f32.mrf.mxu0  ;;  %v7465_v24 = vadd.f32 %v7461_v12, %v6650_v1  ;;  %v20512_v12 = vld [vmem:[#allocation33_spill] sm:$0xff] }
 0x7d3   :  { %v7468_v45 = vrot.slane %v7431_v40, 1  ;;  %v7449_v52 = vadd.f32 %v14677_v6, %v7344_v44  ;;  %v7338_v36 = vadd.f32 %v7337_v38, %v7199_v9 }
 0x7d5   :  { %v7474_v19 = vsel %vm2217_vm3, %v7468_v45, %v7469_v7  ;;  %v7471_v15 = vrot.slane %v7449_v52, 1  ;;  %v7443_v56 = vadd.f32 %v7442_v25, %v7338_v36  ;;  %v20503_v25 = vld [vmem:[#allocation38_spill] sm:$0xff] }
 0x7d6   :  { %v7476_v26 = vmul.f32 %v7474_v19, %v20496_v59  ;;  %v20509_v59 = vld [vmem:[#allocation23_spill] sm:$0xff] }
 0x7d7   :  { %v7475_v53 = vsel %vm2217_vm3, %v7471_v15, %v7468_v45  ;;  %v7470_v0 = vrot.slane %v7443_v56, 1  ;;  %v20505_v56 = vld [vmem:[#allocation40_spill] sm:$0xff] }
 0x7d8   :  { %v7480_v47 = vadd.f32 %v7476_v26, %v7464_v3  ;;  %v7479_v58 = vmul.f32 %v7475_v53, %v20499_v57  ;;  %v20510_v26 = vld [vmem:[#allocation20_spill] sm:$0xff]  ;;  %v20520_v57 = vld [vmem:[#allocation41_spill] sm:$0xff] }
 0x7d9   :  { %v7472_v54 = vsel %vm2217_vm3, %v7470_v0, %v7471_v15  ;;  %v7473_v16 = vsel %vm2217_vm3, %v7469_v7, %v7470_v0  ;;  %v20504_v15 = vld [vmem:[#allocation39_spill] sm:$0xff]  ;;  %v20516_v53 = vld [vmem:[#allocation36_spill] sm:$0xff]  ;;  %v20517_v0 = vld [vmem:[#allocation37_spill] sm:$0xff] }
 0x7da   :  { %v7491_v43 = vadd.f32 %v11579_v27, %v7480_v47  ;;  %v7483_v30 = vadd.f32 %v7479_v58, %v7467_v60  ;;  %v7477_v23 = vmul.f32 %v7473_v16, %v20501_v48  ;;  %v7478_v35 = vmul.f32 %v7472_v54, %v20502_v62  ;;  %v20518_v60 = vld [vmem:[#allocation47_spill] sm:$0xff]  ;;  %v20519_v47 = vld [vmem:[#allocation48_spill] sm:$0xff]  ;;  %v20521_v58 = vld [vmem:[#allocation58_spill] sm:$0xff] }
 0x7db   :  { %v20525_v54 = vld [vmem:[#allocation66_spill] sm:$0xff]  ;;  %v20526_v16 = vld [vmem:[#allocation51_spill] sm:$0xff]  ;;  %v20529_v48 = vld [vmem:[#allocation77_spill] sm:$0xff] }
 0x7dc   :  { %vm7495_vm8 = vcmp.ge.f32.partialorder %v7491_v43, 0.0  ;;  %v7499_v37 = vmul.f32 0.01, %v7491_v43  ;;  %v7494_v46 = vadd.f32 %v11579_v27, %v7483_v30  ;;  %v7481_v63 = vadd.f32 %v7477_v23, %v7465_v24  ;;  %v20522_v24 = vld [vmem:[#allocation42_spill] sm:$0xff]  ;;  %v20530_v23 = vld [vmem:[#allocation57_spill] sm:$0xff] }
 0x7dd   :  { %v7482_v28 = vadd.f32 %v7478_v35, %v7466_v31  ;;  %v20528_v30 = vld [vmem:[#allocation54_spill] sm:$0xff]  ;;  %v20532_v35 = vld [vmem:[#allocation61_spill] sm:$0xff] }
 0x7de   :  { %v18705_v55 = vsel %vm7495_vm8, %v7491_v43, %v7499_v37  ;;  %vm7498_vm9 = vcmp.ge.f32.partialorder %v7494_v46, 0.0  ;;  %v7502_v6 = vmul.f32 0.01, %v7494_v46  ;;  %v7492_v20 = vadd.f32 %v11579_v27, %v7481_v63  ;;  %v20527_v43 = vld [vmem:[#allocation70_spill] sm:$0xff]  ;;  %v20534_v37 = vld [vmem:[#allocation64_spill] sm:$0xff] }
 0x7df   :  { %v7493_v34 = vadd.f32 %v11579_v27, %v7482_v28  ;;  %v18710_v40 = vand.u32 4294901760, %v18705_v55  ;;  %v20515_v27 = vld [vmem:[#allocation12_spill] sm:$0xff]  ;;  %v20531_v62 = vld [vmem:[#allocation78_spill] sm:$0xff] }
 0x7e0   :  { %v18707_v11 = vsel %vm7498_vm9, %v7494_v46, %v7502_v6  ;;  %vm7496_vm10 = vcmp.ge.f32.partialorder %v7492_v20, 0.0  ;;  %v7500_v17 = vmul.f32 0.01, %v7492_v20  ;;  %v20533_v31 = vld [vmem:[#allocation82_spill] sm:$0xff]  ;;  %v20536_v63 = vld [vmem:[#allocation68_spill] sm:$0xff]  ;;  %v20538_v6 = vld [vmem:[#allocation73_spill] sm:$0xff] }
 0x7e1   :  { %v18713_v44 = vand.u32 4294901760, %v18707_v11  ;;  %vm7497_vm11 = vcmp.ge.f32.partialorder %v7493_v34, 0.0  ;;  %v7501_v9 = vmul.f32 0.01, %v7493_v34  ;;  %v7665_v7 = vsub.f32 %v18705_v55, %v18710_v40  ;;  %v20535_v46 = vld [vmem:[#allocation86_spill] sm:$0xff] }
 0x7e2   :  { %v18715_v10 = vsel %vm7496_vm10, %v7492_v20, %v7500_v17  ;;  %v20537_v28 = vld [vmem:[#allocation90_spill] sm:$0xff]  ;;  %v20539_v20 = vld [vmem:[#allocation97_spill] sm:$0xff] }
 0x7e3   :  { %v18717_v39 = vsel %vm7497_vm11, %v7493_v34, %v7501_v9  ;;  %v18720_v8 = vand.u32 4294901760, %v18715_v10  ;;  %14678 = vmatprep.subr.mxu0 %v18713_v44  ;;  %v7644_v42 = vsub.f32 %v18707_v11, %v18713_v44  ;;  %v7666_v5 = vand.u32 4294901760, %v7665_v7  ;;  %v20540_v34 = vld [vmem:[#allocation76_spill] sm:$0xff]  ;;  %v20541_v17 = vld [vmem:[#allocation98_spill] sm:$0xff] }
 0x7e4   :  { %v18726_v41 = vand.u32 4294901760, %v18717_v39  ;;  %14679 = vmatpush3.msra.mxu0 %v18713_v44  ;;  %v20544_v9 = vld [vmem:[#allocation84_spill] sm:$0xff] }
 0x7e5   :  { %v7645_v2 = vand.u32 4294901760, %v7644_v42  ;;  %v7658_v38 = vsub.f32 %v18715_v10, %v18720_v8  ;;  %v7667_v1 = vsub.f32 %v7665_v7, %v7666_v5 }
 0x7e6   :  { %14680 = vmatprep.subr.mxu0 %v18726_v41  ;;  %v7651_v45 = vsub.f32 %v18717_v39, %v18726_v41 }
 0x7e7   :  { %14681 = vmatpush3.msra.mxu0 %v18726_v41  ;;  %v7646_v52 = vsub.f32 %v7644_v42, %v7645_v2  ;;  %v7659_v36 = vand.u32 4294901760, %v7658_v38  ;;  %v7668_v3 = vand.u32 4294901760, %v7667_v1 }
 0x7e8   :  { %14682 = vmatprep.subr.mxu0 %v18720_v8  ;;  %v7652_v18 = vand.u32 4294901760, %v7651_v45 }
 0x7e9   :  { %14683 = vmatpush3.msra.mxu0 %v18720_v8  ;;  %v7647_v33 = vand.u32 4294901760, %v7646_v52  ;;  %v7660_v51 = vsub.f32 %v7658_v38, %v7659_v36 }
 0x7ea   :  { %14684 = vmatprep.subr.mxu0 %v18710_v40  ;;  %v7653_v50 = vsub.f32 %v7651_v45, %v7652_v18 }
 0x7eb   :  { %14685 = vmatpush3.msra.mxu0 %v18710_v40  ;;  %14692 = vmatprep.subr.mxu1 %v7647_v33  ;;  %v7661_v19 = vand.u32 4294901760, %v7660_v51 }
 0x7ec   :  { %14706 = vmatprep.subr.mxu0 %v7644_v42  ;;  %14687 = vmatmul.mubr.f32.vlgmr.msra.gmra.mxu0 %v20503_v25  ;;  %v7654_v21 = vand.u32 4294901760, %v7653_v50 }
 0x7ed   :  { %14693 = vmatpush3.msra.mxu1 %v7647_v33  ;;  %14707 = vmatpush3.msra.mxu0 %v7644_v42  ;;  %v20546_v42 = vld [vmem:[#allocation88_spill] sm:$0xff] }
 0x7ee   :  { %14694 = vmatprep.subr.mxu1 %v7654_v21  ;;  %14708 = vmatprep.subr.mxu0 %v7651_v45 }
 0x7ef   :  { %14695 = vmatpush3.msra.mxu1 %v7654_v21  ;;  %14709 = vmatpush3.msra.mxu0 %v7651_v45 }
 0x7f0   :  { %14689 = vmatprep.mubr.f32.mxu0 %v20504_v15  ;;  %14696 = vmatprep.subr.mxu1 %v7661_v19 }
 0x7f1   :  { %14710 = vmatprep.subr.mxu0 %v7658_v38  ;;  %14690 = vmatmul.mubr.f32.gmra.mxu0 %v20505_v56 }
 0x7f2   :  { %14697 = vmatpush3.msra.mxu1 %v7661_v19  ;;  %14711 = vmatpush3.msra.mxu0 %v7658_v38  ;;  %v20549_v38 = vld [vmem:[#allocation96_spill] sm:$0xff] }
 0x7f3   :  { %14698 = vmatprep.subr.mxu1 %v7668_v3  ;;  %14712 = vmatprep.subr.mxu0 %v7665_v7 }
 0x7f4   :  { %14699 = vmatpush3.msra.mxu1 %v7668_v3  ;;  %14713 = vmatpush3.msra.mxu0 %v7665_v7  ;;  %v20550_v7 = vld [vmem:[#allocation43_spill] sm:$0xff] }
 0x7f5   :  { %14701 = vmatmul.mubr.f32.vlgmr.msra.gmra.mxu1 %v20506_v61  ;;  %14714 = vmatprep.mubr.f32.mxu0 %v20507_v22 }
 0x7f6   :  { %14720 = vmatprep.subr.mxu1 %v18713_v44  ;;  %14734 = vmatprep.subr.mxu0 %v7645_v2 }
 0x7f7   :  { %14715 = vmatmul.mubr.f32.vlgmr.msra.gmra.mxu0 %v20508_v4  ;;  %14721 = vmatpush3.msra.mxu1 %v18713_v44 }
 0x7f8   :  { %14735 = vmatpush3.msra.mxu0 %v7645_v2  ;;  %14722 = vmatprep.subr.mxu1 %v18726_v41  ;;  %v20548_v2 = vld [vmem:[#allocation93_spill] sm:$0xff] }
 0x7f9   :  { %14736 = vmatprep.subr.mxu0 %v7652_v18  ;;  %14703 = vmatprep.mubr.f32.mxu1 %v20509_v59 }
 0x7fa   :  { %14723 = vmatpush3.msra.mxu1 %v18726_v41  ;;  %14737 = vmatpush3.msra.mxu0 %v7652_v18 }
 0x7fb   :  { %14704 = vmatmul.mubr.f32.gmra.mxu1 %v20510_v26  ;;  %14724 = vmatprep.subr.mxu1 %v18720_v8 }
 0x7fc   :  { %14738 = vmatprep.subr.mxu0 %v7659_v36  ;;  %14717 = vmatprep.mubr.f32.mxu0 %v20511_v29 }
 0x7fd   :  { %14725 = vmatpush3.msra.mxu1 %v18720_v8  ;;  %14739 = vmatpush3.msra.mxu0 %v7659_v36 }
 0x7fe   :  { %14718 = vmatmul.mubr.f32.gmra.mxu0 %v20512_v12  ;;  %14726 = vmatprep.subr.mxu1 %v18710_v40 }
 0x7ff   :  { %14740 = vmatprep.subr.mxu0 %v7666_v5  ;;  %14727 = vmatpush3.msra.mxu1 %v18710_v40 }
 0x800   :  { %14728 = vmatprep.mubr.f32.mxu1 %v20513_v49  ;;  %14741 = vmatpush3.msra.mxu0 %v7666_v5 }
 0x801   :  { %14729 = vmatmul.mubr.f32.vlgmr.msra.gmra.mxu1 %v20514_v14  ;;  %14748 = vmatprep.subr.mxu1 %v18713_v44 }
 0x802   :  { %14742 = vmatprep.mubr.f32.mxu0 %v20515_v27  ;;  %14749 = vmatpush3.msra.mxu1 %v18713_v44  ;;  %v20543_v44 = vld [vmem:[#allocation101_spill] sm:$0xff] }
 0x803   :  { %14743 = vmatmul.mubr.f32.vlgmr.msra.gmra.mxu0 %v20506_v61  ;;  %14750 = vmatprep.subr.mxu1 %v18726_v41 }
 0x804   :  { %14731 = vmatprep.mubr.f32.mxu1 %v20516_v53  ;;  %14751 = vmatpush3.msra.mxu1 %v18726_v41  ;;  %v20547_v41 = vld [vmem:[#allocation104_spill] sm:$0xff] }
 0x805   :  { %14732 = vmatmul.mubr.f32.gmra.mxu1 %v20517_v0  ;;  %14752 = vmatprep.subr.mxu1 %v18720_v8 }
 0x806   :  { %14745 = vmatprep.mubr.f32.mxu0 %v20509_v59  ;;  %14753 = vmatpush3.msra.mxu1 %v18720_v8  ;;  %v20545_v8 = vld [vmem:[#allocation103_spill] sm:$0xff] }
 0x807   :  { %14746 = vmatmul.mubr.f32.gmra.mxu0 %v20510_v26  ;;  %14754 = vmatprep.subr.mxu1 %v18710_v40 }
 0x808   :  { %14755 = vmatpush3.msra.mxu1 %v18710_v40  ;;  %14756 = vmatprep.mubr.f32.mxu1 %v20515_v27  ;;  %v20542_v40 = vld [vmem:[#allocation81_spill] sm:$0xff] }
 0x809   :  { %14757 = vmatmul.mubr.f32.vlgmr.msra.gmra.mxu1 %v20506_v61  ;;  %14800 = vmatprep.subr.mxu1 %v20518_v60 }
 0x80a   :  { %14759 = vmatprep.mubr.f32.mxu1 %v20509_v59  ;;  %14801 = vmatpush3.msra.mxu1 %v20518_v60 }
 0x80b   :  { %14802 = vmatprep.subr.mxu1 %v20519_v47  ;;  %14762 = vmatprep.subr.mxu0 %v20520_v57 }
 0x80c   :  { %14803 = vmatpush3.msra.mxu1 %v20519_v47  ;;  %14763 = vmatpush3.msra.mxu0 %v20520_v57 }
 0x80d   :  { %14760 = vmatmul.mubr.f32.gmra.mxu1 %v20510_v26  ;;  %14804 = vmatprep.subr.mxu1 %v20521_v58 }
 0x80e   :  { %14805 = vmatpush3.msra.mxu1 %v20521_v58  ;;  %14764 = vmatprep.subr.mxu0 %v20522_v24 }
 0x80f   :  { %14806 = vmatprep.subr.mxu1 %v20523_v32  ;;  %14765 = vmatpush3.msra.mxu0 %v20522_v24 }
 0x810   :  { %14807 = vmatpush3.msra.mxu1 %v20523_v32  ;;  %14766 = vmatprep.subr.mxu0 %v20524_v13 }
 0x811   :  { %14808 = vmatprep.subr.mxu1 %v20525_v54  ;;  %14767 = vmatpush3.msra.mxu0 %v20524_v13 }
 0x812   :  { %14809 = vmatpush3.msra.mxu1 %v20525_v54  ;;  %14768 = vmatprep.subr.mxu0 %v20526_v16 }
 0x813   :  { %14810 = vmatprep.subr.mxu1 %v20527_v43  ;;  %14769 = vmatpush3.msra.mxu0 %v20526_v16 }
 0x814   :  { %14811 = vmatpush3.msra.mxu1 %v20527_v43  ;;  %14770 = vmatprep.subr.mxu0 %v20528_v30 }
 0x815   :  { %14812 = vmatprep.subr.mxu1 %v20529_v48  ;;  %14771 = vmatpush3.msra.mxu0 %v20528_v30 }
 0x816   :  { %14813 = vmatpush3.msra.mxu1 %v20529_v48  ;;  %14772 = vmatprep.subr.mxu0 %v20530_v23 }
 0x817   :  { %14814 = vmatprep.subr.mxu1 %v20531_v62  ;;  %14773 = vmatpush3.msra.mxu0 %v20530_v23 }
 0x818   :  { %14815 = vmatpush3.msra.mxu1 %v20531_v62  ;;  %14774 = vmatprep.subr.mxu0 %v20532_v35 }
 0x819   :  { %14816 = vmatprep.subr.mxu1 %v20533_v31  ;;  %14775 = vmatpush3.msra.mxu0 %v20532_v35 }
 0x81a   :  { %14817 = vmatpush3.msra.mxu1 %v20533_v31  ;;  %14776 = vmatprep.subr.mxu0 %v20534_v37 }
 0x81b   :  { %14818 = vmatprep.subr.mxu1 %v20535_v46  ;;  %14777 = vmatpush3.msra.mxu0 %v20534_v37 }
 0x81c   :  { %14819 = vmatpush3.msra.mxu1 %v20535_v46  ;;  %14778 = vmatprep.subr.mxu0 %v20536_v63 }
 0x81d   :  { %14820 = vmatprep.subr.mxu1 %v20537_v28  ;;  %14779 = vmatpush3.msra.mxu0 %v20536_v63 }
 0x81e   :  { %14821 = vmatpush3.msra.mxu1 %v20537_v28  ;;  %14780 = vmatprep.subr.mxu0 %v20538_v6 }
 0x81f   :  { %14822 = vmatprep.subr.mxu1 %v20539_v20  ;;  %14781 = vmatpush3.msra.mxu0 %v20538_v6 }
 0x820   :  { %14823 = vmatpush3.msra.mxu1 %v20539_v20  ;;  %14782 = vmatprep.subr.mxu0 %v20540_v34 }
 0x821   :  { %14824 = vmatprep.subr.mxu1 %v20541_v17  ;;  %14783 = vmatpush3.msra.mxu0 %v20540_v34 }
 0x822   :  { %14825 = vmatpush3.msra.mxu1 %v20541_v17  ;;  %14784 = vmatprep.subr.mxu0 %v20542_v40 }
 0x823   :  { %14826 = vmatprep.subr.mxu1 %v20543_v44  ;;  %14785 = vmatpush3.msra.mxu0 %v20542_v40 }
 0x824   :  { %14827 = vmatpush3.msra.mxu1 %v20543_v44  ;;  %14786 = vmatprep.subr.mxu0 %v20544_v9 }
 0x825   :  { %14828 = vmatprep.subr.mxu1 %v20545_v8  ;;  %14787 = vmatpush3.msra.mxu0 %v20544_v9 }
 0x826   :  { %14829 = vmatpush3.msra.mxu1 %v20545_v8  ;;  %14788 = vmatprep.subr.mxu0 %v20546_v42 }
 0x827   :  { %14830 = vmatprep.subr.mxu1 %v20547_v41  ;;  %14789 = vmatpush3.msra.mxu0 %v20546_v42 }
 0x828   :  { %14831 = vmatpush3.msra.mxu1 %v20547_v41  ;;  %14790 = vmatprep.subr.mxu0 %v20548_v2 }
 0x829   :  { %14876 = vmatprep.subr.mxu1 %v20520_v57  ;;  %14791 = vmatpush3.msra.mxu0 %v20548_v2 }
 0x82a   :  { %14792 = vmatprep.subr.mxu0 %v20549_v38 }
 0x82b   :  { %14793 = vmatpush3.msra.mxu0 %v20549_v38 }
 0x82c   :  { %14838 = vmatprep.subr.mxu0 %v20550_v7 }
 0x8ac   :  { %v14688_v45 = vpop.f32.mrf.mxu0 }
 0x8ae   :  { %v7584_v52 = vpop.f32.mrf.mxu0 }
 0x8b1   :  { %v14691_v36 = vpop.f32.mrf.mxu0 }
 0x8b3   :  { %v7604_v18 = vpop.f32.mrf.mxu0 }
 0x8b5   :  { %v14702_v33 = vpop.f32.mrf.mxu1 }
 0x8b6   :  { %v7712_v19 = vadd.f32 %v14702_v33, %v14688_v45 }
 0x8b7   :  { %v7705_v5 = vpop.f32.mrf.mxu1  ;;  %v14716_v50 = vpop.f32.mrf.mxu0 }
 0x8b8   :  { %v7706_v41 = vadd.f32 %v7705_v5, %v7584_v52  ;;  %v7811_v17 = vadd.f32 %v14716_v50, %v7712_v19 }
 0x8b9   :  { %v7803_v51 = vpop.f32.mrf.mxu0 }
 0x8ba   :  { %v7804_v31 = vadd.f32 %v7803_v51, %v7706_v41 }
 0x8bb   :  { %v14705_v21 = vpop.f32.mrf.mxu1 }
 0x8bc   :  { %v7724_v20 = vadd.f32 %v14705_v21, %v14691_v36 }
 0x8bd   :  { %v7717_v1 = vpop.f32.mrf.mxu1 }
 0x8be   :  { %v14719_v3 = vpop.f32.mrf.mxu0  ;;  %v7718_v62 = vadd.f32 %v7717_v1, %v7604_v18 }
 0x8bf   :  { %v7825_v32 = vadd.f32 %v14719_v3, %v7724_v20 }
 0x8c0   :  { %v7817_v8 = vpop.f32.mrf.mxu0 }
 0x8c1   :  { %v14730_v44 = vpop.f32.mrf.mxu1  ;;  %v7818_v0 = vadd.f32 %v7817_v8, %v7718_v62 }
 0x8c2   :  { %v7910_v48 = vadd.f32 %v14730_v44, %v7811_v17 }
 0x8c3   :  { %v7901_v28 = vpop.f32.mrf.mxu1  ;;  %v14744_v46 = vpop.f32.mrf.mxu0 }
 0x8c4   :  { %v7902_v58 = vadd.f32 %v7901_v28, %v7804_v31  ;;  %v8015_v53 = vadd.f32 %v14744_v46, %v7910_v48 }
 0x8c5   :  { %v14733_v43 = vpop.f32.mrf.mxu1  ;;  %v8008_v54 = vpop.f32.mrf.mxu0 }
 0x8c6   :  { %v7926_v45 = vadd.f32 %v14733_v43, %v7825_v32  ;;  %v8009_v52 = vadd.f32 %v8008_v54, %v7902_v58 }
 0x8c7   :  { %v7917_v47 = vpop.f32.mrf.mxu1  ;;  %v14747_v60 = vpop.f32.mrf.mxu0 }
 0x8c8   :  { %v7918_v5 = vadd.f32 %v7917_v47, %v7818_v0  ;;  %v8027_v21 = vadd.f32 %v14747_v60, %v7926_v45 }
 0x8c9   :  { %v14758_v33 = vpop.f32.mrf.mxu1  ;;  %v8020_v50 = vpop.f32.mrf.mxu0 }
 0x8ca   :  { %v8108_v14 = vadd.f32 %v14758_v33, %v8015_v53  ;;  %v8021_v44 = vadd.f32 %v8020_v50, %v7918_v5  ;;  %v20551_v33 = vld [vmem:[#allocation44_spill] sm:$0xff]  ;;  %v20552_v5 = vld [vmem:[#allocation50_spill] sm:$0xff]  ;;  %v20553_v50 = vld [vmem:[#allocation53_spill] sm:$0xff] }
 0x8cb   :  { %v8101_v36 = vpop.f32.mrf.mxu1 }
 0x8cc   :  { %v18845_v19 = vand.u32 4294901760, %v8108_v14  ;;  %v8102_v41 = vadd.f32 %v8101_v36, %v8009_v52  ;;  %v20554_v36 = vld [vmem:[#allocation56_spill] sm:$0xff] }
 0x8cd   :  { %v14761_v17 = vpop.f32.mrf.mxu1 }
 0x8ce   :  { %v18848_v20 = vsub.f32 %v8108_v14, %v18845_v19  ;;  %v18850_v31 = vand.u32 4294901760, %v8102_v41  ;;  %v8120_v62 = vadd.f32 %v14761_v17, %v8027_v21  ;;  %v20555_v21 = vld [vmem:[#allocation60_spill] sm:$0xff]  ;;  %v20557_v17 = vld [vmem:[#allocation67_spill] sm:$0xff] }
 0x8cf   :  { %v8113_v48 = vpop.f32.mrf.mxu1 }
 0x8d0   :  { %v8216_v32 = vand.u32 4294901760, %v18848_v20  ;;  %v8205_v0 = vsub.f32 %v8102_v41, %v18850_v31  ;;  %v18854_v53 = vand.u32 4294901760, %v8120_v62  ;;  %v8114_v47 = vadd.f32 %v8113_v48, %v8021_v44  ;;  %14832 = vmatprep.mubr.f32.mxu1 %v18850_v31  ;;  %v20556_v41 = vld [vmem:[#allocation65_spill] sm:$0xff]  ;;  %v20558_v44 = vld [vmem:[#allocation72_spill] sm:$0xff] }
 0x8d1   :  { %14833 = vmatmul.mubr.f32.vlgmr.msra.gmra.mxu1 %v18845_v19  ;;  %v20560_v48 = vld [vmem:[#allocation80_spill] sm:$0xff] }
 0x8d2   :  { %v18859_v60 = vsub.f32 %v8120_v62, %v18854_v53  ;;  %v18861_v14 = vand.u32 4294901760, %v8114_v47  ;;  %14877 = vmatpush3.msra.mxu1 %v20520_v57  ;;  %v8206_v58 = vand.u32 4294901760, %v8205_v0  ;;  %v8217_v54 = vsub.f32 %v18848_v20, %v8216_v32  ;;  %v20559_v62 = vld [vmem:[#allocation75_spill] sm:$0xff] }
 0x8d3   :  { %14878 = vmatprep.subr.mxu1 %v20522_v24 }
 0x8d4   :  { %v8236_v43 = vand.u32 4294901760, %v18859_v60  ;;  %v18870_v46 = vsub.f32 %v8114_v47, %v18861_v14  ;;  %14879 = vmatpush3.msra.mxu1 %v20522_v24  ;;  %14835 = vmatprep.mubr.f32.mxu1 %v18861_v14  ;;  %v8207_v28 = vsub.f32 %v8205_v0, %v8206_v58  ;;  %v8218_v51 = vand.u32 4294901760, %v8217_v54  ;;  %v20562_v47 = vld [vmem:[#allocation87_spill] sm:$0xff] }
 0x8d5   :  { %14880 = vmatprep.subr.mxu1 %v20524_v13  ;;  %14836 = vmatmul.mubr.f32.gmra.mxu1 %v18854_v53  ;;  %v20564_v54 = vld [vmem:[#allocation95_spill] sm:$0xff] }
 0x8d6   :  { %14881 = vmatpush3.msra.mxu1 %v20524_v13  ;;  %14908 = vmatprep.mubr.f32.mxu1 %v8206_v58  ;;  %v8208_v8 = vand.u32 4294901760, %v8207_v28  ;;  %v8226_v18 = vand.u32 4294901760, %v18870_v46  ;;  %v8237_v1 = vsub.f32 %v18859_v60, %v8236_v43  ;;  %v20563_v58 = vld [vmem:[#allocation92_spill] sm:$0xff]  ;;  %v20566_v28 = vld [vmem:[#allocation45_spill] sm:$0xff] }
 0x8d7   :  { %14882 = vmatprep.subr.mxu1 %v20526_v16 }
 0x8d8   :  { %14883 = vmatpush3.msra.mxu1 %v20526_v16  ;;  %14794 = vmatprep.mubr.f32.mxu0 %v8208_v8  ;;  %v8227_v3 = vsub.f32 %v18870_v46, %v8226_v18  ;;  %v8238_v52 = vand.u32 4294901760, %v8237_v1  ;;  %v20570_v8 = vld [vmem:[#allocation59_spill] sm:$0xff] }
 0x8d9   :  { %14884 = vmatprep.subr.mxu1 %v20528_v30  ;;  %14795 = vmatmul.mubr.f32.vlgmr.msra.gmra.mxu0 %v8218_v51  ;;  %v20574_v51 = vld [vmem:[#allocation74_spill] sm:$0xff]  ;;  %v20575_v1 = vld [vmem:[#allocation79_spill] sm:$0xff] }
 0x8da   :  { %14839 = vmatpush3.msra.mxu0 %v20550_v7  ;;  %14885 = vmatpush3.msra.mxu1 %v20528_v30  ;;  %v8228_v45 = vand.u32 4294901760, %v8227_v3  ;;  %v20576_v3 = vld [vmem:[#allocation83_spill] sm:$0xff] }
 0x8db   :  { %14840 = vmatprep.subr.mxu0 %v20551_v33  ;;  %14886 = vmatprep.subr.mxu1 %v20530_v23 }
 0x8dc   :  { %14841 = vmatpush3.msra.mxu0 %v20551_v33  ;;  %14887 = vmatpush3.msra.mxu1 %v20530_v23 }
 0x8dd   :  { %14797 = vmatprep.mubr.f32.mxu0 %v8228_v45  ;;  %14842 = vmatprep.subr.mxu0 %v20552_v5  ;;  %v20577_v45 = vld [vmem:[#allocation89_spill] sm:$0xff] }
 0x8de   :  { %14888 = vmatprep.subr.mxu1 %v20532_v35  ;;  %14798 = vmatmul.mubr.f32.gmra.mxu0 %v8238_v52  ;;  %v20578_v52 = vld [vmem:[#allocation91_spill] sm:$0xff] }
 0x8df   :  { %14843 = vmatpush3.msra.mxu0 %v20552_v5  ;;  %14889 = vmatpush3.msra.mxu1 %v20532_v35 }
 0x8e0   :  { %14844 = vmatprep.subr.mxu0 %v20553_v50  ;;  %14870 = vmatprep.mubr.f32.mxu0 %v8205_v0  ;;  %v20561_v0 = vld [vmem:[#allocation85_spill] sm:$0xff] }
 0x8e1   :  { %14890 = vmatprep.subr.mxu1 %v20534_v37  ;;  %14845 = vmatpush3.msra.mxu0 %v20553_v50 }
 0x8e2   :  { %14891 = vmatpush3.msra.mxu1 %v20534_v37  ;;  %14846 = vmatprep.subr.mxu0 %v20554_v36 }
 0x8e3   :  { %14892 = vmatprep.subr.mxu1 %v20536_v63  ;;  %14847 = vmatpush3.msra.mxu0 %v20554_v36 }
 0x8e4   :  { %14893 = vmatpush3.msra.mxu1 %v20536_v63  ;;  %14848 = vmatprep.subr.mxu0 %v20555_v21 }
 0x8e5   :  { %14894 = vmatprep.subr.mxu1 %v20538_v6  ;;  %14849 = vmatpush3.msra.mxu0 %v20555_v21 }
 0x8e6   :  { %14895 = vmatpush3.msra.mxu1 %v20538_v6  ;;  %14850 = vmatprep.subr.mxu0 %v20556_v41 }
 0x8e7   :  { %14896 = vmatprep.subr.mxu1 %v20540_v34  ;;  %14851 = vmatpush3.msra.mxu0 %v20556_v41 }
 0x8e8   :  { %14897 = vmatpush3.msra.mxu1 %v20540_v34  ;;  %14852 = vmatprep.subr.mxu0 %v20557_v17 }
 0x8e9   :  { %14898 = vmatprep.subr.mxu1 %v20542_v40  ;;  %14853 = vmatpush3.msra.mxu0 %v20557_v17 }
 0x8ea   :  { %14899 = vmatpush3.msra.mxu1 %v20542_v40  ;;  %14854 = vmatprep.subr.mxu0 %v20558_v44 }
 0x8eb   :  { %14900 = vmatprep.subr.mxu1 %v20544_v9  ;;  %14855 = vmatpush3.msra.mxu0 %v20558_v44 }
 0x8ec   :  { %14901 = vmatpush3.msra.mxu1 %v20544_v9  ;;  %14856 = vmatprep.subr.mxu0 %v20559_v62 }
 0x8ed   :  { %14902 = vmatprep.subr.mxu1 %v20546_v42  ;;  %14857 = vmatpush3.msra.mxu0 %v20559_v62 }
 0x8ee   :  { %14903 = vmatpush3.msra.mxu1 %v20546_v42  ;;  %14858 = vmatprep.subr.mxu0 %v20560_v48 }
 0x8ef   :  { %14904 = vmatprep.subr.mxu1 %v20548_v2  ;;  %14859 = vmatpush3.msra.mxu0 %v20560_v48 }
 0x8f0   :  { %14905 = vmatpush3.msra.mxu1 %v20548_v2  ;;  %14860 = vmatprep.subr.mxu0 %v20561_v0 }
 0x8f1   :  { %14906 = vmatprep.subr.mxu1 %v20549_v38  ;;  %14861 = vmatpush3.msra.mxu0 %v20561_v0 }
 0x8f2   :  { %14907 = vmatpush3.msra.mxu1 %v20549_v38  ;;  %14862 = vmatprep.subr.mxu0 %v20562_v47 }
 0x8f3   :  { %14909 = vmatmul.mubr.f32.vlgmr.msra.gmra.mxu1 %v8216_v32  ;;  %14952 = vmatprep.subr.mxu1 %v20520_v57  ;;  %v20565_v32 = vld [vmem:[#allocation100_spill] sm:$0xff] }
 0x8f4   :  { %14863 = vmatpush3.msra.mxu0 %v20562_v47  ;;  %14911 = vmatprep.mubr.f32.mxu1 %v8226_v18  ;;  %v20573_v18 = vld [vmem:[#allocation71_spill] sm:$0xff] }
 0x8f5   :  { %14953 = vmatpush3.msra.mxu1 %v20520_v57  ;;  %14864 = vmatprep.subr.mxu0 %v20563_v58 }
 0x8f6   :  { %14954 = vmatprep.subr.mxu1 %v20522_v24  ;;  %14865 = vmatpush3.msra.mxu0 %v20563_v58 }
 0x8f7   :  { %14955 = vmatpush3.msra.mxu1 %v20522_v24  ;;  %14866 = vmatprep.subr.mxu0 %v20564_v54 }
 0x8f8   :  { %14912 = vmatmul.mubr.f32.gmra.mxu1 %v8236_v43  ;;  %14956 = vmatprep.subr.mxu1 %v20524_v13  ;;  %v20567_v43 = vld [vmem:[#allocation46_spill] sm:$0xff] }
 0x8f9   :  { %14867 = vmatpush3.msra.mxu0 %v20564_v54  ;;  %14957 = vmatpush3.msra.mxu1 %v20524_v13 }
 0x8fa   :  { %14984 = vmatprep.mubr.f32.mxu1 %v18850_v31  ;;  %14868 = vmatprep.subr.mxu0 %v20565_v32 }
 0x8fb   :  { %14958 = vmatprep.subr.mxu1 %v20526_v16  ;;  %14869 = vmatpush3.msra.mxu0 %v20565_v32 }
 0x8fc   :  { %14959 = vmatpush3.msra.mxu1 %v20526_v16  ;;  %14871 = vmatmul.mubr.f32.vlgmr.msra.gmra.mxu0 %v18848_v20  ;;  %v20568_v20 = vld [vmem:[#allocation52_spill] sm:$0xff] }
 0x8fd   :  { %14914 = vmatprep.subr.mxu0 %v20566_v28  ;;  %14960 = vmatprep.subr.mxu1 %v20528_v30 }
 0x8fe   :  { %14873 = vmatprep.mubr.f32.mxu0 %v18870_v46  ;;  %14915 = vmatpush3.msra.mxu0 %v20566_v28  ;;  %v20569_v46 = vld [vmem:[#allocation55_spill] sm:$0xff] }
 0x8ff   :  { %14961 = vmatpush3.msra.mxu1 %v20528_v30  ;;  %14916 = vmatprep.subr.mxu0 %v20567_v43 }
 0x900   :  { %14962 = vmatprep.subr.mxu1 %v20530_v23  ;;  %14917 = vmatpush3.msra.mxu0 %v20567_v43 }
 0x901   :  { %14963 = vmatpush3.msra.mxu1 %v20530_v23  ;;  %14874 = vmatmul.mubr.f32.gmra.mxu0 %v18859_v60  ;;  %v20571_v60 = vld [vmem:[#allocation63_spill] sm:$0xff] }
 0x902   :  { %14918 = vmatprep.subr.mxu0 %v20568_v20  ;;  %14964 = vmatprep.subr.mxu1 %v20532_v35 }
 0x903   :  { %14919 = vmatpush3.msra.mxu0 %v20568_v20  ;;  %14946 = vmatprep.mubr.f32.mxu0 %v18850_v31  ;;  %v20572_v31 = vld [vmem:[#allocation69_spill] sm:$0xff] }
 0x904   :  { %14965 = vmatpush3.msra.mxu1 %v20532_v35  ;;  %14920 = vmatprep.subr.mxu0 %v20569_v46 }
 0x905   :  { %14966 = vmatprep.subr.mxu1 %v20534_v37  ;;  %14921 = vmatpush3.msra.mxu0 %v20569_v46 }
 0x906   :  { %14967 = vmatpush3.msra.mxu1 %v20534_v37  ;;  %14922 = vmatprep.subr.mxu0 %v20570_v8 }
 0x907   :  { %14968 = vmatprep.subr.mxu1 %v20536_v63  ;;  %14923 = vmatpush3.msra.mxu0 %v20570_v8 }
 0x908   :  { %14969 = vmatpush3.msra.mxu1 %v20536_v63  ;;  %14924 = vmatprep.subr.mxu0 %v20571_v60 }
 0x909   :  { %14970 = vmatprep.subr.mxu1 %v20538_v6  ;;  %14925 = vmatpush3.msra.mxu0 %v20571_v60 }
 0x90a   :  { %14971 = vmatpush3.msra.mxu1 %v20538_v6  ;;  %14926 = vmatprep.subr.mxu0 %v20572_v31 }
 0x90b   :  { %14972 = vmatprep.subr.mxu1 %v20540_v34  ;;  %14927 = vmatpush3.msra.mxu0 %v20572_v31 }
 0x90c   :  { %14973 = vmatpush3.msra.mxu1 %v20540_v34  ;;  %14928 = vmatprep.subr.mxu0 %v20573_v18 }
 0x90d   :  { %14974 = vmatprep.subr.mxu1 %v20542_v40  ;;  %14929 = vmatpush3.msra.mxu0 %v20573_v18 }
 0x90e   :  { %14975 = vmatpush3.msra.mxu1 %v20542_v40  ;;  %14930 = vmatprep.subr.mxu0 %v20574_v51 }
 0x90f   :  { %14976 = vmatprep.subr.mxu1 %v20544_v9  ;;  %14931 = vmatpush3.msra.mxu0 %v20574_v51 }
 0x910   :  { %14977 = vmatpush3.msra.mxu1 %v20544_v9  ;;  %14932 = vmatprep.subr.mxu0 %v20575_v1 }
 0x911   :  { %14978 = vmatprep.subr.mxu1 %v20546_v42  ;;  %14933 = vmatpush3.msra.mxu0 %v20575_v1  ;;  %v20579_v1 = vld [vmem:[#allocation94_spill] sm:$0xff] }
 0x912   :  { %14979 = vmatpush3.msra.mxu1 %v20546_v42  ;;  %14934 = vmatprep.subr.mxu0 %v20576_v3 }
 0x913   :  { %14980 = vmatprep.subr.mxu1 %v20548_v2  ;;  %14935 = vmatpush3.msra.mxu0 %v20576_v3  ;;  %v20580_v3 = vld [vmem:[#allocation99_spill] sm:$0xff] }
 0x914   :  { %14981 = vmatpush3.msra.mxu1 %v20548_v2  ;;  %14936 = vmatprep.subr.mxu0 %v20577_v45 }
 0x915   :  { %14982 = vmatprep.subr.mxu1 %v20549_v38  ;;  %14937 = vmatpush3.msra.mxu0 %v20577_v45  ;;  %v20581_v45 = vld [vmem:[#allocation102_spill] sm:$0xff] }
 0x916   :  { %14983 = vmatpush3.msra.mxu1 %v20549_v38  ;;  %14938 = vmatprep.subr.mxu0 %v20578_v52 }
 0x917   :  { %14985 = vmatmul.mubr.f32.vlgmr.msra.gmra.mxu1 %v18845_v19  ;;  %14939 = vmatpush3.msra.mxu0 %v20578_v52  ;;  %v20582_v52 = vld [vmem:[#allocation15_spill] sm:$0xff] }
 0x918   :  { %14987 = vmatprep.mubr.f32.mxu1 %v18861_v14  ;;  %14940 = vmatprep.subr.mxu0 %v20579_v1 }
 0x919   :  { %14941 = vmatpush3.msra.mxu0 %v20579_v1 }
 0x91a   :  { %14942 = vmatprep.subr.mxu0 %v20580_v3 }
 0x91b   :  { %14988 = vmatmul.mubr.f32.gmra.mxu1 %v18854_v53  ;;  %14943 = vmatpush3.msra.mxu0 %v20580_v3 }
 0x91c   :  { %14944 = vmatprep.subr.mxu0 %v20581_v45  ;;  %15012 = vmatprep.mubr.f32.mxu1 %v20515_v27 }
 0x91d   :  { %14945 = vmatpush3.msra.mxu0 %v20581_v45 }
 0x91e   :  { %14947 = vmatmul.mubr.f32.vlgmr.msra.gmra.mxu0 %v18845_v19 }
 0x91f   :  { %14949 = vmatprep.mubr.f32.mxu0 %v18861_v14 }
 0x922   :  { %14950 = vmatmul.mubr.f32.gmra.mxu0 %v18854_v53 }
 0x923   :  { %14998 = vmatprep.mubr.f32.mxu0 %v20582_v52 }
 0x991   :  { %v14834_v1 = vpop.f32.mrf.mxu1 }
 0x993   :  { %v8391_v51 = vpop.f32.mrf.mxu1 }
 0x995   :  { %v14837_v31 = vpop.f32.mrf.mxu1 }
 0x997   :  { %v8403_v3 = vpop.f32.mrf.mxu1 }
 0x999   :  { %v14796_v18 = vpop.f32.mrf.mxu0 }
 0x99a   :  { %v8398_v19 = vadd.f32 %v14834_v1, %v14796_v18 }
 0x99b   :  { %v8210_v60 = vpop.f32.mrf.mxu0 }
 0x99c   :  { %v8392_v58 = vadd.f32 %v8391_v51, %v8210_v60 }
 0x99e   :  { %v14799_v8 = vpop.f32.mrf.mxu0 }
 0x99f   :  { %v8410_v52 = vadd.f32 %v14837_v31, %v14799_v8 }
 0x9a0   :  { %v8230_v20 = vpop.f32.mrf.mxu0 }
 0x9a1   :  { %v8404_v62 = vadd.f32 %v8403_v3, %v8230_v20 }
 0x9b3   :  { %v14910_v46 = vpop.f32.mrf.mxu1 }
 0x9b5   :  { %v8623_v43 = vpop.f32.mrf.mxu1 }
 0x9b8   :  { %v14913_v45 = vpop.f32.mrf.mxu1 }
 0x9ba   :  { %v8639_v54 = vpop.f32.mrf.mxu1 }
 0x9bc   :  { %v14872_v28 = vpop.f32.mrf.mxu0 }
 0x9bd   :  { %v8521_v53 = vadd.f32 %v14872_v28, %v8398_v19 }
 0x9be   :  { %v8513_v32 = vpop.f32.mrf.mxu0 }
 0x9bf   :  { %v8514_v0 = vadd.f32 %v8513_v32, %v8392_v58  ;;  %v8632_v17 = vadd.f32 %v14910_v46, %v8521_v53 }
 0x9c1   :  { %v14875_v14 = vpop.f32.mrf.mxu0  ;;  %v8624_v5 = vadd.f32 %v8623_v43, %v8514_v0 }
 0x9c2   :  { %v8535_v44 = vadd.f32 %v14875_v14, %v8410_v52 }
 0x9c3   :  { %v8527_v48 = vpop.f32.mrf.mxu0 }
 0x9c4   :  { %v8528_v36 = vadd.f32 %v8527_v48, %v8404_v62  ;;  %v8648_v18 = vadd.f32 %v14913_v45, %v8535_v44 }
 0x9c6   :  { %v8640_v32 = vadd.f32 %v8639_v54, %v8528_v36 }
 0x9d7   :  { %v14986_v47 = vpop.f32.mrf.mxu1 }
 0x9d9   :  { %v8871_v41 = vpop.f32.mrf.mxu1 }
 0x9db   :  { %v14989_v1 = vpop.f32.mrf.mxu1 }
 0x9de   :  { %v14948_v21 = vpop.f32.mrf.mxu0 }
 0x9df   :  { %v8773_v50 = vadd.f32 %v14948_v21, %v8632_v17 }
 0x9e0   :  { %v8766_v33 = vpop.f32.mrf.mxu0 }
 0x9e1   :  { %v8878_v7 = vadd.f32 %v14986_v47, %v8773_v50  ;;  %v8767_v38 = vadd.f32 %v8766_v33, %v8624_v5  ;;  %v8883_v50 = vpop.f32.mrf.mxu1 }
 0x9e2   :  { %v14951_v2 = vpop.f32.mrf.mxu0 }
 0x9e3   :  { %v19025_v28 = vsub.f32 %v18715_v10, %v8878_v7  ;;  %v8872_v8 = vadd.f32 %v8871_v41, %v8767_v38  ;;  %v8785_v58 = vadd.f32 %v14951_v2, %v8648_v18  ;;  %v20595_v18 = vld [vmem:[#allocation86_spill] sm:$0xff] }
 0x9e4   :  { %v8778_v20 = vpop.f32.mrf.mxu0 }
 0x9e5   :  { %v8898_v46 = vmul.f32 %v19025_v28, %v19025_v28  ;;  %v19030_v62 = vsub.f32 %v18705_v55, %v8872_v8  ;;  %v8890_v21 = vadd.f32 %v14989_v1, %v8785_v58  ;;  %v8779_v17 = vadd.f32 %v8778_v20, %v8640_v32  ;;  %v20596_v1 = vld [vmem:[#allocation90_spill] sm:$0xff]  ;;  %v20597_v8 = vld [vmem:[#allocation97_spill] sm:$0xff]  ;;  %v20600_v20 = vld [vmem:[#allocation103_spill] sm:$0xff] }
 0x9e6   :  { %v20598_v58 = vld [vmem:[#allocation98_spill] sm:$0xff]  ;;  %v20599_v32 = vld [vmem:[#allocation101_spill] sm:$0xff] }
 0x9e7   :  { %v8897_v33 = vmul.f32 %v19030_v62, %v19030_v62  ;;  %v19035_v5 = vsub.f32 %v18707_v11, %v8890_v21  ;;  %v8884_v10 = vadd.f32 %v8883_v50, %v8779_v17  ;;  %v19037_v38 = vand.u32 4294901760, %v8898_v46  ;;  %v20602_v21 = vld [vmem:[#allocation93_spill] sm:$0xff]  ;;  %v20603_v17 = vld [vmem:[#allocation96_spill] sm:$0xff]  ;;  %v20604_v50 = vld [vmem:[#allocation43_spill] sm:$0xff] }
 0x9e9   :  { %v8900_v2 = vmul.f32 %v19035_v5, %v19035_v5  ;;  %v19042_v7 = vsub.f32 %v18717_v39, %v8884_v10  ;;  %v19044_v55 = vand.u32 4294901760, %v8897_v33  ;;  %v9050_v44 = vsub.f32 %v8898_v46, %v19037_v38  ;;  %v20601_v46 = vld [vmem:[#allocation104_spill] sm:$0xff] }
 0x9eb   :  { %v19046_v36 = vand.u32 4294901760, %v8900_v2  ;;  %v8899_v41 = vmul.f32 %v19042_v7, %v19042_v7  ;;  %v9057_v0 = vsub.f32 %v8897_v33, %v19044_v55  ;;  %v9051_v54 = vand.u32 4294901760, %v9050_v44 }
 0x9ed   :  { %v9036_v11 = vsub.f32 %v8900_v2, %v19046_v36  ;;  %v19052_v48 = vand.u32 4294901760, %v8899_v41  ;;  %14990 = vmatprep.subr.mxu0 %v19046_v36  ;;  %v9058_v31 = vand.u32 4294901760, %v9057_v0  ;;  %v9052_v45 = vsub.f32 %v9050_v44, %v9051_v54 }
 0x9ee   :  { %14991 = vmatpush3.msra.mxu0 %v19046_v36 }
 0x9ef   :  { %v9043_v39 = vsub.f32 %v8899_v41, %v19052_v48  ;;  %14992 = vmatprep.subr.mxu0 %v19052_v48  ;;  %v9037_v47 = vand.u32 4294901760, %v9036_v11  ;;  %v9059_v14 = vsub.f32 %v9057_v0, %v9058_v31  ;;  %v9053_v53 = vand.u32 4294901760, %v9052_v45 }
 0x9f0   :  { %14993 = vmatpush3.msra.mxu0 %v19052_v48 }
 0x9f1   :  { %14994 = vmatprep.subr.mxu0 %v19037_v38  ;;  %v9038_v43 = vsub.f32 %v9036_v11, %v9037_v47  ;;  %v9044_v60 = vand.u32 4294901760, %v9043_v39  ;;  %v9060_v52 = vand.u32 4294901760, %v9059_v14 }
 0x9f2   :  { %14995 = vmatpush3.msra.mxu0 %v19037_v38 }
 0x9f3   :  { %14996 = vmatprep.subr.mxu0 %v19044_v55  ;;  %v9039_v51 = vand.u32 4294901760, %v9038_v43  ;;  %v9045_v3 = vsub.f32 %v9043_v39, %v9044_v60 }
 0x9f4   :  { %14997 = vmatpush3.msra.mxu0 %v19044_v55 }
 0x9f5   :  { %15004 = vmatprep.subr.mxu1 %v9039_v51  ;;  %15018 = vmatprep.subr.mxu0 %v9036_v11  ;;  %v9046_v19 = vand.u32 4294901760, %v9045_v3 }
 0x9f6   :  { %14999 = vmatmul.mubr.f32.vlgmr.msra.gmra.mxu0 %v20503_v25  ;;  %15005 = vmatpush3.msra.mxu1 %v9039_v51  ;;  %v20583_v25 = vld [vmem:[#allocation30_spill] sm:$0xff] }
 0x9f7   :  { %15019 = vmatpush3.msra.mxu0 %v9036_v11  ;;  %15006 = vmatprep.subr.mxu1 %v9046_v19 }
 0x9f8   :  { %15020 = vmatprep.subr.mxu0 %v9043_v39  ;;  %15007 = vmatpush3.msra.mxu1 %v9046_v19 }
 0x9f9   :  { %15021 = vmatpush3.msra.mxu0 %v9043_v39  ;;  %15001 = vmatprep.mubr.f32.mxu0 %v20504_v15  ;;  %v20584_v15 = vld [vmem:[#allocation36_spill] sm:$0xff] }
 0x9fa   :  { %15008 = vmatprep.subr.mxu1 %v9053_v53  ;;  %15022 = vmatprep.subr.mxu0 %v9050_v44 }
 0x9fb   :  { %15002 = vmatmul.mubr.f32.gmra.mxu0 %v20505_v56  ;;  %15009 = vmatpush3.msra.mxu1 %v9053_v53  ;;  %v20585_v56 = vld [vmem:[#allocation37_spill] sm:$0xff] }
 0x9fc   :  { %15023 = vmatpush3.msra.mxu0 %v9050_v44  ;;  %15010 = vmatprep.subr.mxu1 %v9060_v52 }
 0x9fd   :  { %15024 = vmatprep.subr.mxu0 %v9057_v0  ;;  %15011 = vmatpush3.msra.mxu1 %v9060_v52 }
 0x9fe   :  { %15025 = vmatpush3.msra.mxu0 %v9057_v0  ;;  %15013 = vmatmul.mubr.f32.vlgmr.msra.gmra.mxu1 %v20506_v61 }
 0x9ff   :  { %15026 = vmatprep.mubr.f32.mxu0 %v20507_v22  ;;  %15032 = vmatprep.subr.mxu1 %v19046_v36  ;;  %v20586_v22 = vld [vmem:[#allocation47_spill] sm:$0xff] }
 0xa00   :  { %15046 = vmatprep.subr.mxu0 %v9037_v47  ;;  %15027 = vmatmul.mubr.f32.vlgmr.msra.gmra.mxu0 %v20508_v4  ;;  %v20587_v4 = vld [vmem:[#allocation48_spill] sm:$0xff] }
 0xa01   :  { %15033 = vmatpush3.msra.mxu1 %v19046_v36  ;;  %15047 = vmatpush3.msra.mxu0 %v9037_v47 }
 0xa02   :  { %15034 = vmatprep.subr.mxu1 %v19052_v48  ;;  %15048 = vmatprep.subr.mxu0 %v9044_v60 }
 0xa03   :  { %15015 = vmatprep.mubr.f32.mxu1 %v20509_v59  ;;  %15035 = vmatpush3.msra.mxu1 %v19052_v48 }
 0xa04   :  { %15049 = vmatpush3.msra.mxu0 %v9044_v60  ;;  %15016 = vmatmul.mubr.f32.gmra.mxu1 %v20510_v26 }
 0xa05   :  { %15036 = vmatprep.subr.mxu1 %v19037_v38  ;;  %15050 = vmatprep.subr.mxu0 %v9051_v54 }
 0xa06   :  { %15029 = vmatprep.mubr.f32.mxu0 %v20511_v29  ;;  %15037 = vmatpush3.msra.mxu1 %v19037_v38  ;;  %v20588_v29 = vld [vmem:[#allocation58_spill] sm:$0xff] }
 0xa07   :  { %15051 = vmatpush3.msra.mxu0 %v9051_v54  ;;  %15038 = vmatprep.subr.mxu1 %v19044_v55 }
 0xa08   :  { %15030 = vmatmul.mubr.f32.gmra.mxu0 %v20512_v12  ;;  %15052 = vmatprep.subr.mxu0 %v9058_v31  ;;  %v20592_v12 = vld [vmem:[#allocation77_spill] sm:$0xff] }
 0xa09   :  { %15039 = vmatpush3.msra.mxu1 %v19044_v55  ;;  %15040 = vmatprep.mubr.f32.mxu1 %v20513_v49  ;;  %v20593_v49 = vld [vmem:[#allocation78_spill] sm:$0xff] }
 0xa0a   :  { %15053 = vmatpush3.msra.mxu0 %v9058_v31  ;;  %15041 = vmatmul.mubr.f32.vlgmr.msra.gmra.mxu1 %v20583_v25 }
 0xa0b   :  { %15060 = vmatprep.subr.mxu1 %v19046_v36  ;;  %15054 = vmatprep.mubr.f32.mxu0 %v20515_v27 }
 0xa0c   :  { %15061 = vmatpush3.msra.mxu1 %v19046_v36  ;;  %15055 = vmatmul.mubr.f32.vlgmr.msra.gmra.mxu0 %v20506_v61 }
 0xa0d   :  { %15062 = vmatprep.subr.mxu1 %v19052_v48  ;;  %15043 = vmatprep.mubr.f32.mxu1 %v20584_v15 }
 0xa0e   :  { %15063 = vmatpush3.msra.mxu1 %v19052_v48  ;;  %15057 = vmatprep.mubr.f32.mxu0 %v20509_v59 }
 0xa0f   :  { %15044 = vmatmul.mubr.f32.gmra.mxu1 %v20585_v56  ;;  %15064 = vmatprep.subr.mxu1 %v19037_v38 }
 0xa10   :  { %15065 = vmatpush3.msra.mxu1 %v19037_v38  ;;  %15058 = vmatmul.mubr.f32.gmra.mxu0 %v20510_v26 }
 0xa11   :  { %15066 = vmatprep.subr.mxu1 %v19044_v55  ;;  %15068 = vmatprep.mubr.f32.mxu1 %v20515_v27  ;;  %v20594_v27 = vld [vmem:[#allocation82_spill] sm:$0xff] }
 0xa12   :  { %15067 = vmatpush3.msra.mxu1 %v19044_v55  ;;  %15074 = vmatprep.subr.mxu0 %v20520_v57 }
 0xa13   :  { %15069 = vmatmul.mubr.f32.vlgmr.msra.gmra.mxu1 %v20506_v61  ;;  %15112 = vmatprep.subr.mxu1 %v20586_v22  ;;  %v20589_v61 = vld [vmem:[#allocation62_spill] sm:$0xff] }
 0xa14   :  { %15071 = vmatprep.mubr.f32.mxu1 %v20509_v59  ;;  %15113 = vmatpush3.msra.mxu1 %v20586_v22  ;;  %v20590_v59 = vld [vmem:[#allocation66_spill] sm:$0xff] }
 0xa15   :  { %15114 = vmatprep.subr.mxu1 %v20587_v4  ;;  %15075 = vmatpush3.msra.mxu0 %v20520_v57 }
 0xa16   :  { %15115 = vmatpush3.msra.mxu1 %v20587_v4  ;;  %15076 = vmatprep.subr.mxu0 %v20522_v24 }
 0xa17   :  { %15072 = vmatmul.mubr.f32.gmra.mxu1 %v20510_v26  ;;  %15116 = vmatprep.subr.mxu1 %v20588_v29  ;;  %v20591_v26 = vld [vmem:[#allocation70_spill] sm:$0xff] }
 0xa18   :  { %15117 = vmatpush3.msra.mxu1 %v20588_v29  ;;  %15077 = vmatpush3.msra.mxu0 %v20522_v24 }
 0xa19   :  { %15118 = vmatprep.subr.mxu1 %v20589_v61  ;;  %15078 = vmatprep.subr.mxu0 %v20524_v13 }
 0xa1a   :  { %15119 = vmatpush3.msra.mxu1 %v20589_v61  ;;  %15079 = vmatpush3.msra.mxu0 %v20524_v13 }
 0xa1b   :  { %15120 = vmatprep.subr.mxu1 %v20590_v59  ;;  %15080 = vmatprep.subr.mxu0 %v20526_v16 }
 0xa1c   :  { %15121 = vmatpush3.msra.mxu1 %v20590_v59  ;;  %15081 = vmatpush3.msra.mxu0 %v20526_v16 }
 0xa1d   :  { %15122 = vmatprep.subr.mxu1 %v20591_v26  ;;  %15082 = vmatprep.subr.mxu0 %v20528_v30 }
 0xa1e   :  { %15123 = vmatpush3.msra.mxu1 %v20591_v26  ;;  %15083 = vmatpush3.msra.mxu0 %v20528_v30 }
 0xa1f   :  { %15124 = vmatprep.subr.mxu1 %v20592_v12  ;;  %15084 = vmatprep.subr.mxu0 %v20530_v23 }
 0xa20   :  { %15125 = vmatpush3.msra.mxu1 %v20592_v12  ;;  %15085 = vmatpush3.msra.mxu0 %v20530_v23 }
 0xa21   :  { %15126 = vmatprep.subr.mxu1 %v20593_v49  ;;  %15086 = vmatprep.subr.mxu0 %v20532_v35 }
 0xa22   :  { %15127 = vmatpush3.msra.mxu1 %v20593_v49  ;;  %15087 = vmatpush3.msra.mxu0 %v20532_v35 }
 0xa23   :  { %15128 = vmatprep.subr.mxu1 %v20594_v27  ;;  %15088 = vmatprep.subr.mxu0 %v20534_v37 }
 0xa24   :  { %15129 = vmatpush3.msra.mxu1 %v20594_v27  ;;  %15089 = vmatpush3.msra.mxu0 %v20534_v37 }
 0xa25   :  { %15130 = vmatprep.subr.mxu1 %v20595_v18  ;;  %15090 = vmatprep.subr.mxu0 %v20536_v63 }
 0xa26   :  { %15131 = vmatpush3.msra.mxu1 %v20595_v18  ;;  %15091 = vmatpush3.msra.mxu0 %v20536_v63 }
 0xa27   :  { %15132 = vmatprep.subr.mxu1 %v20596_v1  ;;  %15092 = vmatprep.subr.mxu0 %v20538_v6 }
 0xa28   :  { %15133 = vmatpush3.msra.mxu1 %v20596_v1  ;;  %15093 = vmatpush3.msra.mxu0 %v20538_v6 }
 0xa29   :  { %15134 = vmatprep.subr.mxu1 %v20597_v8  ;;  %15094 = vmatprep.subr.mxu0 %v20540_v34 }
 0xa2a   :  { %15135 = vmatpush3.msra.mxu1 %v20597_v8  ;;  %15095 = vmatpush3.msra.mxu0 %v20540_v34 }
 0xa2b   :  { %15136 = vmatprep.subr.mxu1 %v20598_v58  ;;  %15096 = vmatprep.subr.mxu0 %v20542_v40 }
 0xa2c   :  { %15137 = vmatpush3.msra.mxu1 %v20598_v58  ;;  %15097 = vmatpush3.msra.mxu0 %v20542_v40 }
 0xa2d   :  { %15138 = vmatprep.subr.mxu1 %v20599_v32  ;;  %15098 = vmatprep.subr.mxu0 %v20544_v9 }
 0xa2e   :  { %15139 = vmatpush3.msra.mxu1 %v20599_v32  ;;  %15099 = vmatpush3.msra.mxu0 %v20544_v9 }
 0xa2f   :  { %15140 = vmatprep.subr.mxu1 %v20600_v20  ;;  %15100 = vmatprep.subr.mxu0 %v20546_v42 }
 0xa30   :  { %15141 = vmatpush3.msra.mxu1 %v20600_v20  ;;  %15101 = vmatpush3.msra.mxu0 %v20546_v42 }
 0xa31   :  { %15142 = vmatprep.subr.mxu1 %v20601_v46  ;;  %15102 = vmatprep.subr.mxu0 %v20602_v21 }
 0xa32   :  { %15143 = vmatpush3.msra.mxu1 %v20601_v46  ;;  %15103 = vmatpush3.msra.mxu0 %v20602_v21 }
 0xa33   :  { %15188 = vmatprep.subr.mxu1 %v20520_v57  ;;  %15104 = vmatprep.subr.mxu0 %v20603_v17 }
 0xa34   :  { %15105 = vmatpush3.msra.mxu0 %v20603_v17 }
 0xa35   :  { %15150 = vmatprep.subr.mxu0 %v20604_v50 }
 0xab6   :  { %v15000_v33 = vpop.f32.mrf.mxu0 }
 0xab8   :  { %v8976_v10 = vpop.f32.mrf.mxu0 }
 0xabb   :  { %v15003_v38 = vpop.f32.mrf.mxu0 }
 0xabd   :  { %v8996_v2 = vpop.f32.mrf.mxu0 }
 0xabe   :  { %v15014_v55 = vpop.f32.mrf.mxu1 }
 0xabf   :  { %v9104_v0 = vadd.f32 %v15014_v55, %v15000_v33 }
 0xac0   :  { %v9097_v36 = vpop.f32.mrf.mxu1  ;;  %v15028_v41 = vpop.f32.mrf.mxu0 }
 0xac1   :  { %v9098_v47 = vadd.f32 %v9097_v36, %v8976_v10  ;;  %v9203_v60 = vadd.f32 %v15028_v41, %v9104_v0 }
 0xac2   :  { %v9195_v11 = vpop.f32.mrf.mxu0 }
 0xac3   :  { %v9196_v45 = vadd.f32 %v9195_v11, %v9098_v47 }
 0xac4   :  { %v15017_v44 = vpop.f32.mrf.mxu1 }
 0xac5   :  { %v9116_v31 = vadd.f32 %v15017_v44, %v15003_v38 }
 0xac6   :  { %v9109_v48 = vpop.f32.mrf.mxu1 }
 0xac7   :  { %v9110_v19 = vadd.f32 %v9109_v48, %v8996_v2 }
 0xac8   :  { %v15031_v39 = vpop.f32.mrf.mxu0 }
 0xac9   :  { %v9217_v25 = vadd.f32 %v15031_v39, %v9116_v31 }
 0xaca   :  { %v9209_v54 = vpop.f32.mrf.mxu0  ;;  %v15042_v43 = vpop.f32.mrf.mxu1 }
 0xacb   :  { %v9302_v14 = vadd.f32 %v15042_v43, %v9203_v60  ;;  %v9210_v4 = vadd.f32 %v9209_v54, %v9110_v19  ;;  %v20605_v19 = vld [vmem:[#allocation44_spill] sm:$0xff] }
 0xacc   :  { %v9293_v51 = vpop.f32.mrf.mxu1  ;;  %v15056_v3 = vpop.f32.mrf.mxu0 }
 0xacd   :  { %v9294_v15 = vadd.f32 %v9293_v51, %v9196_v45  ;;  %v9407_v29 = vadd.f32 %v15056_v3, %v9302_v14 }
 0xace   :  { %v9400_v53 = vpop.f32.mrf.mxu0 }
 0xacf   :  { %v15045_v52 = vpop.f32.mrf.mxu1  ;;  %v9401_v26 = vadd.f32 %v9400_v53, %v9294_v15  ;;  %v20606_v53 = vld [vmem:[#allocation50_spill] sm:$0xff]  ;;  %v20610_v15 = vld [vmem:[#allocation65_spill] sm:$0xff] }
 0xad0   :  { %v15059_v22 = vpop.f32.mrf.mxu0  ;;  %v9318_v61 = vadd.f32 %v15045_v52, %v9217_v25  ;;  %v20608_v52 = vld [vmem:[#allocation56_spill] sm:$0xff] }
 0xad1   :  { %v9309_v56 = vpop.f32.mrf.mxu1  ;;  %v20609_v25 = vld [vmem:[#allocation60_spill] sm:$0xff] }
 0xad2   :  { %v9310_v12 = vadd.f32 %v9309_v56, %v9210_v4  ;;  %v9412_v27 = vpop.f32.mrf.mxu0  ;;  %v9419_v1 = vadd.f32 %v15059_v22, %v9318_v61  ;;  %v20611_v56 = vld [vmem:[#allocation67_spill] sm:$0xff]  ;;  %v20612_v22 = vld [vmem:[#allocation72_spill] sm:$0xff]  ;;  %v20615_v61 = vld [vmem:[#allocation85_spill] sm:$0xff] }
 0xad3   :  { %v15070_v59 = vpop.f32.mrf.mxu1  ;;  %v20613_v4 = vld [vmem:[#allocation75_spill] sm:$0xff] }
 0xad4   :  { %v9500_v49 = vadd.f32 %v15070_v59, %v9407_v29  ;;  %v9413_v20 = vadd.f32 %v9412_v27, %v9310_v12  ;;  %v20614_v29 = vld [vmem:[#allocation80_spill] sm:$0xff]  ;;  %v20616_v59 = vld [vmem:[#allocation87_spill] sm:$0xff]  ;;  %v20635_v27 = vld [vmem:[#allocation102_spill] sm:$0xff] }
 0xad5   :  { %v9493_v18 = vpop.f32.mrf.mxu1  ;;  %v20618_v12 = vld [vmem:[#allocation95_spill] sm:$0xff] }
 0xad6   :  { %v19168_v8 = vand.u32 4294901760, %v9500_v49  ;;  %v9494_v58 = vadd.f32 %v9493_v18, %v9401_v26  ;;  %v20617_v26 = vld [vmem:[#allocation92_spill] sm:$0xff] }
 0xad7   :  { %v15073_v32 = vpop.f32.mrf.mxu1 }
 0xad8   :  { %v19171_v46 = vsub.f32 %v9500_v49, %v19168_v8  ;;  %v19173_v33 = vand.u32 4294901760, %v9494_v58  ;;  %v9512_v10 = vadd.f32 %v15073_v32, %v9419_v1  ;;  %v20625_v49 = vld [vmem:[#allocation63_spill] sm:$0xff] }
 0xad9   :  { %v9505_v38 = vpop.f32.mrf.mxu1 }
 0xada   :  { %v9608_v2 = vand.u32 4294901760, %v19171_v46  ;;  %v9597_v55 = vsub.f32 %v9494_v58, %v19173_v33  ;;  %v19177_v36 = vand.u32 4294901760, %v9512_v10  ;;  %v9506_v41 = vadd.f32 %v9505_v38, %v9413_v20  ;;  %15144 = vmatprep.mubr.f32.mxu1 %v19173_v33 }
 0xadb   :  { %15145 = vmatmul.mubr.f32.vlgmr.msra.gmra.mxu1 %v19168_v8 }
 0xadc   :  { %v19182_v44 = vsub.f32 %v9512_v10, %v19177_v36  ;;  %v19184_v11 = vand.u32 4294901760, %v9506_v41  ;;  %15189 = vmatpush3.msra.mxu1 %v20520_v57  ;;  %v9598_v48 = vand.u32 4294901760, %v9597_v55  ;;  %v9609_v0 = vsub.f32 %v19171_v46, %v9608_v2 }
 0xadd   :  { %15190 = vmatprep.subr.mxu1 %v20522_v24 }
 0xade   :  { %v9628_v39 = vand.u32 4294901760, %v19182_v44  ;;  %v19193_v47 = vsub.f32 %v9506_v41, %v19184_v11  ;;  %15191 = vmatpush3.msra.mxu1 %v20522_v24  ;;  %15147 = vmatprep.mubr.f32.mxu1 %v19184_v11  ;;  %v9599_v54 = vsub.f32 %v9597_v55, %v9598_v48  ;;  %v9610_v31 = vand.u32 4294901760, %v9609_v0 }
 0xadf   :  { %15192 = vmatprep.subr.mxu1 %v20524_v13  ;;  %15148 = vmatmul.mubr.f32.gmra.mxu1 %v19177_v36 }
 0xae0   :  { %15193 = vmatpush3.msra.mxu1 %v20524_v13  ;;  %15220 = vmatprep.mubr.f32.mxu1 %v9598_v48  ;;  %v9600_v43 = vand.u32 4294901760, %v9599_v54  ;;  %v9618_v60 = vand.u32 4294901760, %v19193_v47  ;;  %v9629_v51 = vsub.f32 %v19182_v44, %v9628_v39 }
 0xae1   :  { %15194 = vmatprep.subr.mxu1 %v20526_v16 }
 0xae2   :  { %15195 = vmatpush3.msra.mxu1 %v20526_v16  ;;  %15106 = vmatprep.mubr.f32.mxu0 %v9600_v43  ;;  %v9619_v3 = vsub.f32 %v19193_v47, %v9618_v60  ;;  %v9630_v14 = vand.u32 4294901760, %v9629_v51 }
 0xae3   :  { %15196 = vmatprep.subr.mxu1 %v20528_v30  ;;  %15107 = vmatmul.mubr.f32.vlgmr.msra.gmra.mxu0 %v9610_v31 }
 0xae4   :  { %15151 = vmatpush3.msra.mxu0 %v20604_v50  ;;  %15197 = vmatpush3.msra.mxu1 %v20528_v30  ;;  %v9620_v45 = vand.u32 4294901760, %v9619_v3  ;;  %v20607_v50 = vld [vmem:[#allocation53_spill] sm:$0xff] }
 0xae5   :  { %15152 = vmatprep.subr.mxu0 %v20605_v19  ;;  %15198 = vmatprep.subr.mxu1 %v20530_v23 }
 0xae6   :  { %15153 = vmatpush3.msra.mxu0 %v20605_v19  ;;  %15199 = vmatpush3.msra.mxu1 %v20530_v23 }
 0xae7   :  { %15109 = vmatprep.mubr.f32.mxu0 %v9620_v45  ;;  %15154 = vmatprep.subr.mxu0 %v20606_v53 }
 0xae8   :  { %15200 = vmatprep.subr.mxu1 %v20532_v35  ;;  %15110 = vmatmul.mubr.f32.gmra.mxu0 %v9630_v14 }
 0xae9   :  { %15155 = vmatpush3.msra.mxu0 %v20606_v53  ;;  %15201 = vmatpush3.msra.mxu1 %v20532_v35 }
 0xaea   :  { %15156 = vmatprep.subr.mxu0 %v20607_v50  ;;  %15182 = vmatprep.mubr.f32.mxu0 %v9597_v55 }
 0xaeb   :  { %15202 = vmatprep.subr.mxu1 %v20534_v37  ;;  %15157 = vmatpush3.msra.mxu0 %v20607_v50 }
 0xaec   :  { %15203 = vmatpush3.msra.mxu1 %v20534_v37  ;;  %15158 = vmatprep.subr.mxu0 %v20608_v52 }
 0xaed   :  { %15204 = vmatprep.subr.mxu1 %v20536_v63  ;;  %15159 = vmatpush3.msra.mxu0 %v20608_v52 }
 0xaee   :  { %15205 = vmatpush3.msra.mxu1 %v20536_v63  ;;  %15160 = vmatprep.subr.mxu0 %v20609_v25 }
 0xaef   :  { %15206 = vmatprep.subr.mxu1 %v20538_v6  ;;  %15161 = vmatpush3.msra.mxu0 %v20609_v25 }
 0xaf0   :  { %15207 = vmatpush3.msra.mxu1 %v20538_v6  ;;  %15162 = vmatprep.subr.mxu0 %v20610_v15 }
 0xaf1   :  { %15208 = vmatprep.subr.mxu1 %v20540_v34  ;;  %15163 = vmatpush3.msra.mxu0 %v20610_v15 }
 0xaf2   :  { %15209 = vmatpush3.msra.mxu1 %v20540_v34  ;;  %15164 = vmatprep.subr.mxu0 %v20611_v56 }
 0xaf3   :  { %15210 = vmatprep.subr.mxu1 %v20542_v40  ;;  %15165 = vmatpush3.msra.mxu0 %v20611_v56 }
 0xaf4   :  { %15211 = vmatpush3.msra.mxu1 %v20542_v40  ;;  %15166 = vmatprep.subr.mxu0 %v20612_v22 }
 0xaf5   :  { %15212 = vmatprep.subr.mxu1 %v20544_v9  ;;  %15167 = vmatpush3.msra.mxu0 %v20612_v22 }
 0xaf6   :  { %15213 = vmatpush3.msra.mxu1 %v20544_v9  ;;  %15168 = vmatprep.subr.mxu0 %v20613_v4 }
 0xaf7   :  { %15214 = vmatprep.subr.mxu1 %v20546_v42  ;;  %15169 = vmatpush3.msra.mxu0 %v20613_v4 }
 0xaf8   :  { %15215 = vmatpush3.msra.mxu1 %v20546_v42  ;;  %15170 = vmatprep.subr.mxu0 %v20614_v29 }
 0xaf9   :  { %15216 = vmatprep.subr.mxu1 %v20602_v21  ;;  %15171 = vmatpush3.msra.mxu0 %v20614_v29 }
 0xafa   :  { %15217 = vmatpush3.msra.mxu1 %v20602_v21  ;;  %15172 = vmatprep.subr.mxu0 %v20615_v61 }
 0xafb   :  { %15218 = vmatprep.subr.mxu1 %v20603_v17  ;;  %15173 = vmatpush3.msra.mxu0 %v20615_v61 }
 0xafc   :  { %15219 = vmatpush3.msra.mxu1 %v20603_v17  ;;  %15174 = vmatprep.subr.mxu0 %v20616_v59 }
 0xafd   :  { %15221 = vmatmul.mubr.f32.vlgmr.msra.gmra.mxu1 %v9608_v2  ;;  %15264 = vmatprep.subr.mxu1 %v20520_v57 }
 0xafe   :  { %15175 = vmatpush3.msra.mxu0 %v20616_v59  ;;  %15223 = vmatprep.mubr.f32.mxu1 %v9618_v60 }
 0xaff   :  { %15265 = vmatpush3.msra.mxu1 %v20520_v57  ;;  %15176 = vmatprep.subr.mxu0 %v20617_v26  ;;  %v20619_v57 = vld [vmem:[#allocation100_spill] sm:$0xff] }
 0xb00   :  { %15266 = vmatprep.subr.mxu1 %v20522_v24  ;;  %15177 = vmatpush3.msra.mxu0 %v20617_v26 }
 0xb01   :  { %15267 = vmatpush3.msra.mxu1 %v20522_v24  ;;  %15178 = vmatprep.subr.mxu0 %v20618_v12  ;;  %v20620_v24 = vld [vmem:[#allocation45_spill] sm:$0xff] }
 0xb02   :  { %15224 = vmatmul.mubr.f32.gmra.mxu1 %v9628_v39  ;;  %15268 = vmatprep.subr.mxu1 %v20524_v13 }
 0xb03   :  { %15179 = vmatpush3.msra.mxu0 %v20618_v12  ;;  %15269 = vmatpush3.msra.mxu1 %v20524_v13  ;;  %v20621_v13 = vld [vmem:[#allocation46_spill] sm:$0xff] }
 0xb04   :  { %15296 = vmatprep.mubr.f32.mxu1 %v19173_v33  ;;  %15180 = vmatprep.subr.mxu0 %v20619_v57 }
 0xb05   :  { %15270 = vmatprep.subr.mxu1 %v20526_v16  ;;  %15181 = vmatpush3.msra.mxu0 %v20619_v57 }
 0xb06   :  { %15271 = vmatpush3.msra.mxu1 %v20526_v16  ;;  %15183 = vmatmul.mubr.f32.vlgmr.msra.gmra.mxu0 %v19171_v46  ;;  %v20622_v16 = vld [vmem:[#allocation52_spill] sm:$0xff] }
 0xb07   :  { %15226 = vmatprep.subr.mxu0 %v20620_v24  ;;  %15272 = vmatprep.subr.mxu1 %v20528_v30 }
 0xb08   :  { %15185 = vmatprep.mubr.f32.mxu0 %v19193_v47  ;;  %15227 = vmatpush3.msra.mxu0 %v20620_v24 }
 0xb09   :  { %15273 = vmatpush3.msra.mxu1 %v20528_v30  ;;  %15228 = vmatprep.subr.mxu0 %v20621_v13  ;;  %v20623_v30 = vld [vmem:[#allocation55_spill] sm:$0xff] }
 0xb0a   :  { %15274 = vmatprep.subr.mxu1 %v20530_v23  ;;  %15229 = vmatpush3.msra.mxu0 %v20621_v13 }
 0xb0b   :  { %15275 = vmatpush3.msra.mxu1 %v20530_v23  ;;  %15186 = vmatmul.mubr.f32.gmra.mxu0 %v19182_v44  ;;  %v20624_v23 = vld [vmem:[#allocation59_spill] sm:$0xff] }
 0xb0c   :  { %15230 = vmatprep.subr.mxu0 %v20622_v16  ;;  %15276 = vmatprep.subr.mxu1 %v20532_v35 }
 0xb0d   :  { %15231 = vmatpush3.msra.mxu0 %v20622_v16  ;;  %15258 = vmatprep.mubr.f32.mxu0 %v19173_v33 }
 0xb0e   :  { %15277 = vmatpush3.msra.mxu1 %v20532_v35  ;;  %15232 = vmatprep.subr.mxu0 %v20623_v30  ;;  %v20626_v35 = vld [vmem:[#allocation69_spill] sm:$0xff] }
 0xb0f   :  { %15278 = vmatprep.subr.mxu1 %v20534_v37  ;;  %15233 = vmatpush3.msra.mxu0 %v20623_v30 }
 0xb10   :  { %15279 = vmatpush3.msra.mxu1 %v20534_v37  ;;  %15234 = vmatprep.subr.mxu0 %v20624_v23  ;;  %v20627_v37 = vld [vmem:[#allocation71_spill] sm:$0xff] }
 0xb11   :  { %15280 = vmatprep.subr.mxu1 %v20536_v63  ;;  %15235 = vmatpush3.msra.mxu0 %v20624_v23 }
 0xb12   :  { %15281 = vmatpush3.msra.mxu1 %v20536_v63  ;;  %15236 = vmatprep.subr.mxu0 %v20625_v49  ;;  %v20628_v63 = vld [vmem:[#allocation74_spill] sm:$0xff] }
 0xb13   :  { %15282 = vmatprep.subr.mxu1 %v20538_v6  ;;  %15237 = vmatpush3.msra.mxu0 %v20625_v49 }
 0xb14   :  { %15283 = vmatpush3.msra.mxu1 %v20538_v6  ;;  %15238 = vmatprep.subr.mxu0 %v20626_v35  ;;  %v20629_v6 = vld [vmem:[#allocation79_spill] sm:$0xff] }
 0xb15   :  { %15284 = vmatprep.subr.mxu1 %v20540_v34  ;;  %15239 = vmatpush3.msra.mxu0 %v20626_v35 }
 0xb16   :  { %15285 = vmatpush3.msra.mxu1 %v20540_v34  ;;  %15240 = vmatprep.subr.mxu0 %v20627_v37  ;;  %v20630_v34 = vld [vmem:[#allocation83_spill] sm:$0xff] }
 0xb17   :  { %15286 = vmatprep.subr.mxu1 %v20542_v40  ;;  %15241 = vmatpush3.msra.mxu0 %v20627_v37 }
 0xb18   :  { %15287 = vmatpush3.msra.mxu1 %v20542_v40  ;;  %15242 = vmatprep.subr.mxu0 %v20628_v63  ;;  %v20631_v40 = vld [vmem:[#allocation89_spill] sm:$0xff] }
 0xb19   :  { %15288 = vmatprep.subr.mxu1 %v20544_v9  ;;  %15243 = vmatpush3.msra.mxu0 %v20628_v63 }
 0xb1a   :  { %15289 = vmatpush3.msra.mxu1 %v20544_v9  ;;  %15244 = vmatprep.subr.mxu0 %v20629_v6  ;;  %v20632_v9 = vld [vmem:[#allocation91_spill] sm:$0xff] }
 0xb1b   :  { %15290 = vmatprep.subr.mxu1 %v20546_v42  ;;  %15245 = vmatpush3.msra.mxu0 %v20629_v6 }
 0xb1c   :  { %15291 = vmatpush3.msra.mxu1 %v20546_v42  ;;  %15246 = vmatprep.subr.mxu0 %v20630_v34  ;;  %v20633_v42 = vld [vmem:[#allocation94_spill] sm:$0xff] }
 0xb1d   :  { %15292 = vmatprep.subr.mxu1 %v20602_v21  ;;  %15247 = vmatpush3.msra.mxu0 %v20630_v34 }
 0xb1e   :  { %15293 = vmatpush3.msra.mxu1 %v20602_v21  ;;  %15248 = vmatprep.subr.mxu0 %v20631_v40  ;;  %v20634_v21 = vld [vmem:[#allocation99_spill] sm:$0xff] }
 0xb1f   :  { %15294 = vmatprep.subr.mxu1 %v20603_v17  ;;  %15249 = vmatpush3.msra.mxu0 %v20631_v40  ;;  %v10314_v40 = vld [vmem:[%s19837_s13 + $0x8] sm:$0x3f] }
 0xb20   :  { %15295 = vmatpush3.msra.mxu1 %v20603_v17  ;;  %15250 = vmatprep.subr.mxu0 %v20632_v9  ;;  %v10313_v17 = vld [vmem:[%s19837_s13] sm:$0xff] }
 0xb21   :  { %15297 = vmatmul.mubr.f32.vlgmr.msra.gmra.mxu1 %v19168_v8  ;;  %15251 = vmatpush3.msra.mxu0 %v20632_v9  ;;  %v10316_v18 = vsel %vm2275_vm1, %v10313_v17, 0  ;;  %v10319_v9 = vsel %vm2275_vm1, %v10314_v40, 0 }
 0xb22   :  { %15299 = vmatprep.mubr.f32.mxu1 %v19184_v11  ;;  %15252 = vmatprep.subr.mxu0 %v20633_v42  ;;  %v19349_v1 = vand.u32 4294901760, %v10316_v18 }
 0xb23   :  { %15253 = vmatpush3.msra.mxu0 %v20633_v42 }
 0xb24   :  { %15254 = vmatprep.subr.mxu0 %v20634_v21  ;;  %v19352_v58 = vsub.f32 %v10316_v18, %v19349_v1  ;;  %v11581_v18 = vld [vmem:[%s19832_s8] ss:$0 sm:$0xff] }
 0xb25   :  { %15300 = vmatmul.mubr.f32.gmra.mxu1 %v19177_v36  ;;  %15255 = vmatpush3.msra.mxu0 %v20634_v21  ;;  %v11580_v21 = vld [vmem:[%s19831_s7] ss:$0 sm:$0xff] }
 0xb26   :  { %15256 = vmatprep.subr.mxu0 %v20635_v27  ;;  %15321 = vmatprep.mubr.f32.mxu1 %v19349_v1  ;;  %v10392_v32 = vand.u32 4294901760, %v19352_v58 }
 0xb27   :  { %15257 = vmatpush3.msra.mxu0 %v20635_v27 }
 0xb28   :  { %15259 = vmatmul.mubr.f32.vlgmr.msra.gmra.mxu0 %v19168_v8  ;;  %v10393_v8 = vsub.f32 %v19352_v58, %v10392_v32 }
 0xb29   :  { %15261 = vmatprep.mubr.f32.mxu0 %v19184_v11 }
 0xb2a   :  { %v10394_v20 = vand.u32 4294901760, %v10393_v8  ;;  %v19370_v8 = vand.u32 4294901760, %v10319_v9 }
 0xb2c   :  { %15262 = vmatmul.mubr.f32.gmra.mxu0 %v19177_v36 }
 0xb2d   :  { %15310 = vmatprep.mubr.f32.mxu0 %v10394_v20 }
 0xb9b   :  { %v15146_v46 = vpop.f32.mrf.mxu1 }
 0xb9d   :  { %v9783_v33 = vpop.f32.mrf.mxu1 }
 0xb9f   :  { %v15149_v38 = vpop.f32.mrf.mxu1 }
 0xba1   :  { %v9795_v55 = vpop.f32.mrf.mxu1 }
 0xba3   :  { %v15108_v10 = vpop.f32.mrf.mxu0 }
 0xba4   :  { %v9613_v0 = vadd.f32 1e-05, %v15108_v10 }
 0xba5   :  { %v9602_v2 = vpop.f32.mrf.mxu0 }
 0xba6   :  { %v9603_v54 = vadd.f32 1e-05, %v9602_v2  ;;  %v9790_v60 = vadd.f32 %v15146_v46, %v9613_v0 }
 0xba8   :  { %v15111_v36 = vpop.f32.mrf.mxu0  ;;  %v9784_v19 = vadd.f32 %v9783_v33, %v9603_v54 }
 0xba9   :  { %v9633_v43 = vadd.f32 1e-05, %v15111_v36  ;;  %v19375_v36 = vsub.f32 %v10319_v9, %v19370_v8 }
 0xbaa   :  { %v9622_v44 = vpop.f32.mrf.mxu0 }
 0xbab   :  { %v9623_v3 = vadd.f32 1e-05, %v9622_v44  ;;  %v9802_v50 = vadd.f32 %v15149_v38, %v9633_v43 }
 0xbad   :  { %v9796_v15 = vadd.f32 %v9795_v55, %v9623_v3 }
 0xbbd   :  { %v15222_v41 = vpop.f32.mrf.mxu1 }
 0xbbf   :  { %v10015_v11 = vpop.f32.mrf.mxu1 }
 0xbc2   :  { %v15225_v39 = vpop.f32.mrf.mxu1 }
 0xbc4   :  { %v10031_v31 = vpop.f32.mrf.mxu1 }
 0xbc6   :  { %v15184_v48 = vpop.f32.mrf.mxu0 }
 0xbc7   :  { %v9913_v45 = vadd.f32 %v15184_v48, %v9790_v60 }
 0xbc8   :  { %v9905_v47 = vpop.f32.mrf.mxu0 }
 0xbc9   :  { %v9906_v53 = vadd.f32 %v9905_v47, %v9784_v19  ;;  %v10024_v56 = vadd.f32 %v15222_v41, %v9913_v45 }
 0xbcb   :  { %v15187_v51 = vpop.f32.mrf.mxu0  ;;  %v10016_v59 = vadd.f32 %v10015_v11, %v9906_v53 }
 0xbcc   :  { %v9927_v25 = vadd.f32 %v15187_v51, %v9802_v50 }
 0xbcd   :  { %v9919_v52 = vpop.f32.mrf.mxu0 }
 0xbce   :  { %v9920_v29 = vadd.f32 %v9919_v52, %v9796_v15  ;;  %v10040_v24 = vadd.f32 %v15225_v39, %v9927_v25 }
 0xbd0   :  { %v10032_v49 = vadd.f32 %v10031_v31, %v9920_v29 }
 0xbe1   :  { %v15298_v14 = vpop.f32.mrf.mxu1 }
 0xbe3   :  { %v10263_v22 = vpop.f32.mrf.mxu1 }
 0xbe5   :  { %v15301_v13 = vpop.f32.mrf.mxu1 }
 0xbe7   :  { %v10275_v6 = vpop.f32.mrf.mxu1 }
 0xbe8   :  { %v15260_v4 = vpop.f32.mrf.mxu0 }
 0xbe9   :  { %v10165_v61 = vadd.f32 %v15260_v4, %v10024_v56 }
 0xbea   :  { %v10158_v26 = vpop.f32.mrf.mxu0 }
 0xbeb   :  { %v10270_v12 = vadd.f32 %v15298_v14, %v10165_v61  ;;  %v10159_v57 = vadd.f32 %v10158_v26, %v10016_v59  ;;  %v10864_v61 = vld [vmem:[%s19838_s14 + $0x78] sm:$0xff]  ;;  %v10863_v59 = vld [vmem:[%s19838_s14 + $0x70] sm:$0xff] }
 0xbec   :  { %v15263_v16 = vpop.f32.mrf.mxu0  ;;  %v19408_v26 = vand.u32 4294901760, %v10864_v61 }
 0xbed   :  { %15595 = vrsqrt.f32 %v10270_v12  ;;  %v10264_v30 = vadd.f32 %v10263_v22, %v10159_v57  ;;  %v10177_v23 = vadd.f32 %v15263_v16, %v10040_v24  ;;  %v10862_v12 = vld [vmem:[%s19838_s14 + $0x68] sm:$0xff]  ;;  %v19416_v57 = vand.u32 4294901760, %v10863_v59  ;;  %v10861_v24 = vld [vmem:[%s19838_s14 + $0x60] sm:$0xff] }
 0xbee   :  { %v10170_v35 = vpop.f32.mrf.mxu0  ;;  %v19426_v16 = vand.u32 4294901760, %v10862_v12 }
 0xbef   :  { %15597 = vrsqrt.f32 %v10264_v30  ;;  %v10282_v37 = vadd.f32 %v15301_v13, %v10177_v23  ;;  %v10171_v63 = vadd.f32 %v10170_v35, %v10032_v49  ;;  %v19424_v13 = vsub.f32 %v10864_v61, %v19408_v26 }
 0xbf0   :  { %v19431_v30 = vsub.f32 %v10863_v59, %v19416_v57  ;;  %v19433_v23 = vand.u32 4294901760, %v10861_v24  ;;  %v19441_v35 = vsub.f32 %v10862_v12, %v19426_v16 }
 0xbf1   :  { %15599 = vrsqrt.f32 %v10282_v37  ;;  %v10276_v34 = vadd.f32 %v10275_v6, %v10171_v63  ;;  %v19438_v49 = vand.u32 4294901760, %v19424_v13 }
 0xbf2   :  { %v19448_v37 = vand.u32 4294901760, %v19431_v30  ;;  %v19451_v63 = vsub.f32 %v10861_v24, %v19433_v23 }
 0xbf3   :  { %15601 = vrsqrt.f32 %v10276_v34  ;;  %v10970_v6 = vsub.f32 %v19424_v13, %v19438_v49 }
 0xbf4   :  { %v19469_v34 = vand.u32 4294901760, %v19451_v63 }
 0xbf5   :  { %v10971_v40 = vand.u32 4294901760, %v10970_v6  ;;  %v10851_v6 = vld [vmem:[%s19838_s14 + $0x10] sm:$0xff] }
 0xbfa   :  { %v15596_v42 = vpop.eup %15595 }
 0xbfb   :  { %v10290_v27 = vmul.f32 %v15596_v42, %v19025_v28  ;;  %v10991_v42 = vsub.f32 %v19451_v63, %v19469_v34 }
 0xbfc   :  { %v15598_v17 = vpop.eup %15597 }
 0xbfd   :  { %v10300_v20 = vmul.f32 %v11580_v21, %v10290_v27  ;;  %v10289_v46 = vmul.f32 %v15598_v17, %v19030_v62  ;;  %v10402_v62 = vand.u32 4294901760, %v19375_v36  ;;  %v10992_v27 = vand.u32 4294901760, %v10991_v42  ;;  %v10860_v17 = vld [vmem:[%s19838_s14 + $0x58] sm:$0xff] }
 0xbfe   :  { %v15600_v33 = vpop.eup %15599  ;;  %v19618_v42 = vand.u32 4294901760, %v10851_v6 }
 0xbff   :  { %v10310_v10 = vadd.f32 %v11581_v18, %v10300_v20  ;;  %v10299_v38 = vmul.f32 %v11580_v21, %v10289_v46  ;;  %v10292_v2 = vmul.f32 %v15600_v33, %v19035_v5  ;;  %v10858_v33 = vld [vmem:[%s19838_s14 + $0x48] sm:$0xff] }
 0xc00   :  { %v15602_v55 = vpop.eup %15601 }
 0xc01   :  { %v19377_v28 = vand.u32 4294901760, %v10310_v10  ;;  %v10309_v41 = vadd.f32 %v11581_v18, %v10299_v38  ;;  %v10302_v44 = vmul.f32 %v11580_v21, %v10292_v2  ;;  %v10291_v11 = vmul.f32 %v15602_v55, %v19042_v7  ;;  %v10857_v55 = vld [vmem:[%s19838_s14 + $0x40] sm:$0xff] }
 0xc02   :  { %v10403_v7 = vsub.f32 %v19375_v36, %v10402_v62  ;;  %v19513_v2 = vand.u32 4294901760, %v10858_v33 }
 0xc03   :  { %v19380_v48 = vand.u32 4294901760, %v10309_v41  ;;  %v10312_v0 = vadd.f32 %v11581_v18, %v10302_v44  ;;  %v10301_v39 = vmul.f32 %v11580_v21, %v10291_v11  ;;  %v10450_v5 = vsub.f32 %v10310_v10, %v19377_v28  ;;  %v10856_v11 = vld [vmem:[%s19838_s14 + $0x38] sm:$0xff] }
 0xc04   :  { %v10404_v50 = vand.u32 4294901760, %v10403_v7  ;;  %v19528_v44 = vand.u32 4294901760, %v10857_v55 }
 0xc05   :  { %v19383_v47 = vand.u32 4294901760, %v10312_v0  ;;  %v10311_v54 = vadd.f32 %v11581_v18, %v10301_v39  ;;  %v10457_v31 = vsub.f32 %v10309_v41, %v19380_v48  ;;  %v10451_v45 = vand.u32 4294901760, %v10450_v5 }
 0xc06   :  { %v19492_v18 = vand.u32 4294901760, %v10860_v17  ;;  %v19526_v41 = vsub.f32 %v10858_v33, %v19513_v2 }
 0xc07   :  { %v19386_v43 = vand.u32 4294901760, %v10311_v54  ;;  %15302 = vmatprep.subr.mxu0 %v19383_v47  ;;  %v10436_v60 = vsub.f32 %v10312_v0, %v19383_v47  ;;  %v10458_v53 = vand.u32 4294901760, %v10457_v31  ;;  %v10452_v15 = vsub.f32 %v10450_v5, %v10451_v45 }
 0xc08   :  { %15303 = vmatpush3.msra.mxu0 %v19383_v47  ;;  %v19498_v20 = vsub.f32 %v10860_v17, %v19492_v18  ;;  %v19538_v39 = vand.u32 4294901760, %v19526_v41 }
 0xc09   :  { %15304 = vmatprep.subr.mxu0 %v19386_v43  ;;  %v10437_v51 = vand.u32 4294901760, %v10436_v60  ;;  %v10443_v3 = vsub.f32 %v10311_v54, %v19386_v43  ;;  %v10459_v22 = vsub.f32 %v10457_v31, %v10458_v53  ;;  %v10453_v4 = vand.u32 4294901760, %v10452_v15  ;;  %v10855_v54 = vld [vmem:[%s19838_s14 + $0x30] sm:$0xff] }
 0xc0a   :  { %15305 = vmatpush3.msra.mxu0 %v19386_v43  ;;  %v19508_v10 = vand.u32 4294901760, %v19498_v20 }
 0xc0b   :  { %15306 = vmatprep.subr.mxu0 %v19377_v28  ;;  %v10438_v19 = vsub.f32 %v10436_v60, %v10437_v51  ;;  %v10444_v14 = vand.u32 4294901760, %v10443_v3  ;;  %v10460_v29 = vand.u32 4294901760, %v10459_v22 }
 0xc0c   :  { %15307 = vmatpush3.msra.mxu0 %v19377_v28 }
 0xc0d   :  { %15308 = vmatprep.subr.mxu0 %v19380_v48  ;;  %v10439_v52 = vand.u32 4294901760, %v10438_v19  ;;  %v10445_v25 = vsub.f32 %v10443_v3, %v10444_v14 }
 0xc0e   :  { %15309 = vmatpush3.msra.mxu0 %v19380_v48 }
 0xc0f   :  { %15313 = vmatprep.subr.mxu1 %v10439_v52  ;;  %15324 = vmatprep.subr.mxu0 %v10436_v60  ;;  %v10446_v56 = vand.u32 4294901760, %v10445_v25 }
 0xc10   :  { %15311 = vmatmul.mubr.f32.vlgmr.msra.gmra.mxu0 %v10404_v50  ;;  %15314 = vmatpush3.msra.mxu1 %v10439_v52  ;;  %v10853_v50 = vld [vmem:[%s19838_s14 + $0x20] sm:$0xff] }
 0xc11   :  { %15325 = vmatpush3.msra.mxu0 %v10436_v60  ;;  %15315 = vmatprep.subr.mxu1 %v10446_v56 }
 0xc12   :  { %15326 = vmatprep.subr.mxu0 %v10443_v3  ;;  %15316 = vmatpush3.msra.mxu1 %v10446_v56  ;;  %v19585_v56 = vand.u32 4294901760, %v10853_v50 }
 0xc13   :  { %15327 = vmatpush3.msra.mxu0 %v10443_v3  ;;  %15317 = vmatprep.subr.mxu1 %v10453_v4 }
 0xc14   :  { %15328 = vmatprep.subr.mxu0 %v10450_v5  ;;  %15318 = vmatpush3.msra.mxu1 %v10453_v4  ;;  %v10852_v4 = vld [vmem:[%s19838_s14 + $0x18] sm:$0xff]  ;;  %v19600_v59 = vsub.f32 %v10853_v50, %v19585_v56 }
 0xc15   :  { %15329 = vmatpush3.msra.mxu0 %v10450_v5  ;;  %15319 = vmatprep.subr.mxu1 %v10460_v29  ;;  %v19602_v12 = vand.u32 4294901760, %v10852_v4 }
 0xc16   :  { %15330 = vmatprep.subr.mxu0 %v10457_v31  ;;  %15320 = vmatpush3.msra.mxu1 %v10460_v29 }
 0xc17   :  { %15331 = vmatpush3.msra.mxu0 %v10457_v31  ;;  %15322 = vmatmul.mubr.f32.vlgmr.msra.gmra.mxu1 %v19370_v8  ;;  %v19555_v31 = vand.u32 4294901760, %v10855_v54 }
 0xc18   :  { %15332 = vmatprep.mubr.f32.mxu0 %v19352_v58  ;;  %15335 = vmatprep.subr.mxu1 %v19383_v47  ;;  %v19460_v58 = vand.u32 4294901760, %v19441_v35 }
 0xc19   :  { %15346 = vmatprep.subr.mxu0 %v10437_v51  ;;  %15333 = vmatmul.mubr.f32.vlgmr.msra.gmra.mxu0 %v19375_v36  ;;  %v10998_v36 = vsub.f32 %v19498_v20, %v19508_v10  ;;  %v19567_v19 = vsub.f32 %v10855_v54, %v19555_v31 }
 0xc1a   :  { %15336 = vmatpush3.msra.mxu1 %v19383_v47  ;;  %15347 = vmatpush3.msra.mxu0 %v10437_v51  ;;  %v10984_v9 = vsub.f32 %v19441_v35, %v19460_v58  ;;  %v10854_v51 = vld [vmem:[%s19838_s14 + $0x28] sm:$0xff] }
 0xc1b   :  { %15337 = vmatprep.subr.mxu1 %v19386_v43  ;;  %15348 = vmatprep.subr.mxu0 %v10444_v14  ;;  %v19580_v25 = vand.u32 4294901760, %v19567_v19 }
 0xc1c   :  { %15338 = vmatpush3.msra.mxu1 %v19386_v43  ;;  %15349 = vmatpush3.msra.mxu0 %v10444_v14  ;;  %v10985_v21 = vand.u32 4294901760, %v10984_v9  ;;  %v19569_v14 = vand.u32 4294901760, %v10854_v51  ;;  %v19612_v9 = vand.u32 4294901760, %v19600_v59 }
 0xc1d   :  { %15339 = vmatprep.subr.mxu1 %v19377_v28  ;;  %15350 = vmatprep.subr.mxu0 %v10451_v45  ;;  %20636 = vst [vmem:[#allocation119_spill] sm:$0xff] %v19580_v25  ;;  %v11033_v29 = vsub.f32 %v19567_v19, %v19580_v25 }
 0xc1e   :  { %15340 = vmatpush3.msra.mxu1 %v19377_v28  ;;  %15351 = vmatpush3.msra.mxu0 %v10451_v45  ;;  %v19583_v15 = vsub.f32 %v10854_v51, %v19569_v14  ;;  %20638 = vst [vmem:[#allocation34_spill] sm:$0xff] %v19612_v9  ;;  %v11047_v17 = vsub.f32 %v19600_v59, %v19612_v9 }
 0xc1f   :  { %15341 = vmatprep.subr.mxu1 %v19380_v48  ;;  %15352 = vmatprep.subr.mxu0 %v10458_v53 }
 0xc20   :  { %15342 = vmatpush3.msra.mxu1 %v19380_v48  ;;  %15343 = vmatprep.mubr.f32.mxu1 %v10392_v32  ;;  %v10977_v32 = vsub.f32 %v19431_v30, %v19448_v37  ;;  %v19597_v61 = vand.u32 4294901760, %v19583_v15 }
 0xc21   :  { %15353 = vmatpush3.msra.mxu0 %v10458_v53  ;;  %15344 = vmatmul.mubr.f32.vlgmr.msra.gmra.mxu1 %v10402_v62  ;;  %v19541_v62 = vsub.f32 %v10857_v55, %v19528_v44  ;;  %v19633_v55 = vsub.f32 %v10851_v6, %v19618_v42 }
 0xc22   :  { %15357 = vmatprep.subr.mxu1 %v19383_v47  ;;  %15354 = vmatprep.mubr.f32.mxu0 %v19349_v1  ;;  %20637 = vst [vmem:[#allocation120_spill] sm:$0xff] %v19597_v61 }
 0xc23   :  { %15358 = vmatpush3.msra.mxu1 %v19383_v47  ;;  %15355 = vmatmul.mubr.f32.vlgmr.msra.gmra.mxu0 %v19370_v8  ;;  %v19544_v47 = vand.u32 4294901760, %v10856_v11  ;;  %v19553_v60 = vand.u32 4294901760, %v19541_v62 }
 0xc24   :  { %15359 = vmatprep.subr.mxu1 %v19386_v43  ;;  %15365 = vmatprep.mubr.f32.mxu1 %v19349_v1  ;;  %v10978_v1 = vand.u32 4294901760, %v10977_v32  ;;  %v11034_v32 = vand.u32 4294901760, %v11033_v29 }
 0xc25   :  { %15360 = vmatpush3.msra.mxu1 %v19386_v43  ;;  %15368 = vmatprep.subr.mxu0 %v19408_v26  ;;  %v11012_v43 = vsub.f32 %v19526_v41, %v19538_v39  ;;  %v19558_v7 = vsub.f32 %v10856_v11, %v19544_v47  ;;  %v11019_v45 = vsub.f32 %v19541_v62, %v19553_v60  ;;  %v11048_v11 = vand.u32 4294901760, %v11047_v17 }
 0xc26   :  { %15361 = vmatprep.subr.mxu1 %v19377_v28  ;;  %15369 = vmatpush3.msra.mxu0 %v19408_v26 }
 0xc27   :  { %15362 = vmatpush3.msra.mxu1 %v19377_v28  ;;  %15370 = vmatprep.subr.mxu0 %v19416_v57  ;;  %v11013_v3 = vand.u32 4294901760, %v11012_v43  ;;  %v19573_v53 = vand.u32 4294901760, %v19558_v7  ;;  %v11020_v52 = vand.u32 4294901760, %v11019_v45 }
 0xc28   :  { %15363 = vmatprep.subr.mxu1 %v19380_v48  ;;  %15371 = vmatpush3.msra.mxu0 %v19416_v57 }
 0xc29   :  { %15364 = vmatpush3.msra.mxu1 %v19380_v48  ;;  %15372 = vmatprep.subr.mxu0 %v19426_v16  ;;  %v10999_v48 = vand.u32 4294901760, %v10998_v36  ;;  %v11026_v22 = vsub.f32 %v19558_v7, %v19573_v53  ;;  %v10849_v36 = vld [vmem:[%s19838_s14] sm:$0xff] }
 0xc2a   :  { %15366 = vmatmul.mubr.f32.vlgmr.msra.gmra.mxu1 %v19370_v8  ;;  %15403 = vmatprep.subr.mxu1 %v10971_v40  ;;  %v10859_v8 = vld [vmem:[%s19838_s14 + $0x50] sm:$0xff]  ;;  %v19644_v54 = vand.u32 4294901760, %v10849_v36 }
 0xc2b   :  { %15404 = vmatpush3.msra.mxu1 %v10971_v40  ;;  %15373 = vmatpush3.msra.mxu0 %v19426_v16  ;;  %v19500_v46 = vand.u32 4294901760, %v10859_v8  ;;  %v11027_v24 = vand.u32 4294901760, %v11026_v22  ;;  %v11040_v40 = vsub.f32 %v19583_v15, %v19597_v61 }
 0xc2c   :  { %15405 = vmatprep.subr.mxu1 %v10978_v1  ;;  %15374 = vmatprep.subr.mxu0 %v19433_v23 }
 0xc2d   :  { %15406 = vmatpush3.msra.mxu1 %v10978_v1  ;;  %15375 = vmatpush3.msra.mxu0 %v19433_v23  ;;  %v19511_v38 = vsub.f32 %v10859_v8, %v19500_v46  ;;  %v19615_v1 = vsub.f32 %v10852_v4, %v19602_v12 }
 0xc2e   :  { %15407 = vmatprep.subr.mxu1 %v10985_v21  ;;  %15376 = vmatprep.subr.mxu0 %v19492_v18 }
 0xc2f   :  { %15408 = vmatpush3.msra.mxu1 %v10985_v21  ;;  %15377 = vmatpush3.msra.mxu0 %v19492_v18  ;;  %v19523_v28 = vand.u32 4294901760, %v19511_v38  ;;  %v10850_v21 = vld [vmem:[%s19838_s14 + $0x8] sm:$0xff]  ;;  %v19627_v8 = vand.u32 4294901760, %v19615_v1 }
 0xc30   :  { %15409 = vmatprep.subr.mxu1 %v10992_v27  ;;  %15378 = vmatprep.subr.mxu0 %v19500_v46  ;;  %v19629_v33 = vand.u32 4294901760, %v10850_v21 }
 0xc31   :  { %15410 = vmatpush3.msra.mxu1 %v10992_v27  ;;  %15379 = vmatpush3.msra.mxu0 %v19500_v46  ;;  %v11005_v0 = vsub.f32 %v19511_v38, %v19523_v28  ;;  %v11041_v27 = vand.u32 4294901760, %v11040_v40  ;;  %20639 = vst [vmem:[#allocation24_spill] sm:$0xff] %v19627_v8 }
 0xc32   :  { %15380 = vmatprep.subr.mxu0 %v19513_v2  ;;  %15411 = vmatprep.subr.mxu1 %v10999_v48 }
 0xc33   :  { %15381 = vmatpush3.msra.mxu0 %v19513_v2  ;;  %v11006_v5 = vand.u32 4294901760, %v11005_v0  ;;  %15412 = vmatpush3.msra.mxu1 %v10999_v48  ;;  %v11054_v48 = vsub.f32 %v19615_v1, %v19627_v8  ;;  %v19642_v0 = vsub.f32 %v10850_v21, %v19629_v33 }
 0xc34   :  { %15382 = vmatprep.subr.mxu0 %v19528_v44 }
 0xc35   :  { %15383 = vmatpush3.msra.mxu0 %v19528_v44  ;;  %15413 = vmatprep.subr.mxu1 %v11006_v5  ;;  %v11055_v43 = vand.u32 4294901760, %v11054_v48  ;;  %v19652_v51 = vand.u32 4294901760, %v19642_v0 }
 0xc36   :  { %15384 = vmatprep.subr.mxu0 %v19544_v47  ;;  %15414 = vmatpush3.msra.mxu1 %v11006_v5  ;;  %v19648_v5 = vand.u32 4294901760, %v19633_v55 }
 0xc37   :  { %15385 = vmatpush3.msra.mxu0 %v19544_v47  ;;  %15415 = vmatprep.subr.mxu1 %v11013_v3  ;;  %20641 = vst [vmem:[#allocation32_spill] sm:$0xff] %v19652_v51  ;;  %v11068_v50 = vsub.f32 %v19642_v0, %v19652_v51 }
 0xc38   :  { %15386 = vmatprep.subr.mxu0 %v19555_v31  ;;  %15416 = vmatpush3.msra.mxu1 %v11013_v3  ;;  %20640 = vst [vmem:[#allocation123_spill] sm:$0xff] %v19648_v5  ;;  %v19655_v3 = vsub.f32 %v10849_v36, %v19644_v54  ;;  %v11061_v45 = vsub.f32 %v19633_v55, %v19648_v5 }
 0xc39   :  { %15387 = vmatpush3.msra.mxu0 %v19555_v31  ;;  %15417 = vmatprep.subr.mxu1 %v11020_v52  ;;  %v11069_v4 = vand.u32 4294901760, %v11068_v50 }
 0xc3a   :  { %15388 = vmatprep.subr.mxu0 %v19569_v14  ;;  %15418 = vmatpush3.msra.mxu1 %v11020_v52  ;;  %v19664_v52 = vand.u32 4294901760, %v19655_v3  ;;  %v11062_v22 = vand.u32 4294901760, %v11061_v45 }
 0xc3b   :  { %15389 = vmatpush3.msra.mxu0 %v19569_v14  ;;  %15419 = vmatprep.subr.mxu1 %v11027_v24 }
 0xc3c   :  { %15390 = vmatprep.subr.mxu0 %v19585_v56  ;;  %15420 = vmatpush3.msra.mxu1 %v11027_v24  ;;  %20642 = vst [vmem:[#allocation35_spill] sm:$0xff] %v19664_v52  ;;  %v11075_v29 = vsub.f32 %v19655_v3, %v19664_v52 }
 0xc3d   :  { %15391 = vmatpush3.msra.mxu0 %v19585_v56  ;;  %15421 = vmatprep.subr.mxu1 %v11034_v32 }
 0xc3e   :  { %15392 = vmatprep.subr.mxu0 %v19602_v12  ;;  %15422 = vmatpush3.msra.mxu1 %v11034_v32  ;;  %v11076_v24 = vand.u32 4294901760, %v11075_v29 }
 0xc3f   :  { %15393 = vmatpush3.msra.mxu0 %v19602_v12  ;;  %15423 = vmatprep.subr.mxu1 %v11041_v27 }
 0xc40   :  { %15394 = vmatprep.subr.mxu0 %v19618_v42  ;;  %15424 = vmatpush3.msra.mxu1 %v11041_v27 }
 0xc41   :  { %15395 = vmatpush3.msra.mxu0 %v19618_v42  ;;  %15425 = vmatprep.subr.mxu1 %v11048_v11 }
 0xc42   :  { %15396 = vmatprep.subr.mxu0 %v19629_v33  ;;  %15426 = vmatpush3.msra.mxu1 %v11048_v11 }
 0xc43   :  { %15397 = vmatpush3.msra.mxu0 %v19629_v33  ;;  %15427 = vmatprep.subr.mxu1 %v11055_v43 }
 0xc44   :  { %15398 = vmatprep.subr.mxu0 %v19644_v54  ;;  %15428 = vmatpush3.msra.mxu1 %v11055_v43 }
 0xc45   :  { %15399 = vmatpush3.msra.mxu0 %v19644_v54  ;;  %15429 = vmatprep.subr.mxu1 %v11062_v22 }
 0xc46   :  { %15438 = vmatprep.subr.mxu0 %v19424_v13  ;;  %15430 = vmatpush3.msra.mxu1 %v11062_v22 }
 0xc47   :  { %15431 = vmatprep.subr.mxu1 %v11069_v4 }
 0xc48   :  { %15432 = vmatpush3.msra.mxu1 %v11069_v4 }
 0xc49   :  { %15433 = vmatprep.subr.mxu1 %v11076_v24 }
 0xc4a   :  { %15434 = vmatpush3.msra.mxu1 %v11076_v24 }
 0xc4b   :  { %15473 = vmatprep.subr.mxu1 %v19408_v26 }
 0xcd0   :  { %v15312_v6 = vpop.f32.mrf.mxu0 }
 0xcd2   :  { %v10396_v32 = vpop.f32.mrf.mxu0 }
 0xcd7   :  { %v15323_v40 = vpop.f32.mrf.mxu1 }
 0xcd8   :  { %v10504_v17 = vadd.f32 %v15323_v40, %v15312_v6 }
 0xcd9   :  { %v10497_v21 = vpop.f32.mrf.mxu1  ;;  %v15334_v27 = vpop.f32.mrf.mxu0 }
 0xcda   :  { %v10498_v36 = vadd.f32 %v10497_v21, %v10396_v32  ;;  %v10591_v43 = vadd.f32 %v15334_v27, %v10504_v17 }
 0xcdb   :  { %v10583_v48 = vpop.f32.mrf.mxu0 }
 0xcdc   :  { %v10584_v22 = vadd.f32 %v10583_v48, %v10498_v36 }
 0xce1   :  { %v15345_v11 = vpop.f32.mrf.mxu1 }
 0xce2   :  { %v10676_v29 = vadd.f32 %v15345_v11, %v10591_v43 }
 0xce3   :  { %v10667_v45 = vpop.f32.mrf.mxu1  ;;  %v15356_v50 = vpop.f32.mrf.mxu0 }
 0xce4   :  { %v10668_v52 = vadd.f32 %v10667_v45, %v10584_v22  ;;  %v10765_v51 = vadd.f32 %v15356_v50, %v10676_v29 }
 0xce5   :  { %v10758_v4 = vpop.f32.mrf.mxu0 }
 0xce6   :  { %v10759_v5 = vadd.f32 %v10758_v4, %v10668_v52 }
 0xcea   :  { %v15367_v24 = vpop.f32.mrf.mxu1 }
 0xceb   :  { %v10846_v8 = vadd.f32 %v15367_v24, %v10765_v51 }
 0xcec   :  { %v10839_v9 = vpop.f32.mrf.mxu1 }
 0xced   :  { %v19671_v61 = vand.u32 4294901760, %v10846_v8  ;;  %v10840_v25 = vadd.f32 %v10839_v9, %v10759_v5 }
 0xcef   :  { %v19674_v6 = vsub.f32 %v10846_v8, %v19671_v61  ;;  %v19676_v32 = vand.u32 4294901760, %v10840_v25 }
 0xcf1   :  { %v10958_v40 = vand.u32 4294901760, %v19674_v6  ;;  %v10947_v21 = vsub.f32 %v10840_v25, %v19676_v32  ;;  %15435 = vmatprep.mubr.f32.mxu1 %v19676_v32 }
 0xcf2   :  { %15436 = vmatmul.mubr.f32.vlgmr.msra.gmra.mxu1 %v19671_v61 }
 0xcf3   :  { %15474 = vmatpush3.msra.mxu1 %v19408_v26  ;;  %v10948_v51 = vand.u32 4294901760, %v10947_v21  ;;  %v10959_v9 = vsub.f32 %v19674_v6, %v10958_v40 }
 0xcf4   :  { %15475 = vmatprep.subr.mxu1 %v19416_v57 }
 0xcf5   :  { %15476 = vmatpush3.msra.mxu1 %v19416_v57  ;;  %15505 = vmatprep.mubr.f32.mxu1 %v10948_v51  ;;  %v10949_v8 = vsub.f32 %v10947_v21, %v10948_v51  ;;  %v10960_v5 = vand.u32 4294901760, %v10959_v9 }
 0xcf6   :  { %15477 = vmatprep.subr.mxu1 %v19426_v16 }
 0xcf7   :  { %15478 = vmatpush3.msra.mxu1 %v19426_v16  ;;  %v10950_v25 = vand.u32 4294901760, %v10949_v8 }
 0xcf8   :  { %15479 = vmatprep.subr.mxu1 %v19433_v23 }
 0xcf9   :  { %15480 = vmatpush3.msra.mxu1 %v19433_v23  ;;  %15400 = vmatprep.mubr.f32.mxu0 %v10950_v25 }
 0xcfa   :  { %15481 = vmatprep.subr.mxu1 %v19492_v18  ;;  %15401 = vmatmul.mubr.f32.vlgmr.msra.gmra.mxu0 %v10960_v5 }
 0xcfb   :  { %15439 = vmatpush3.msra.mxu0 %v19424_v13  ;;  %15482 = vmatpush3.msra.mxu1 %v19492_v18  ;;  %v20645_v13 = vld [vmem:[#allocation34_spill] sm:$0xff] }
 0xcfc   :  { %15440 = vmatprep.subr.mxu0 %v19431_v30  ;;  %15470 = vmatprep.mubr.f32.mxu0 %v10947_v21 }
 0xcfd   :  { %15483 = vmatprep.subr.mxu1 %v19500_v46  ;;  %15441 = vmatpush3.msra.mxu0 %v19431_v30  ;;  %v20647_v30 = vld [vmem:[#allocation123_spill] sm:$0xff] }
 0xcfe   :  { %15484 = vmatpush3.msra.mxu1 %v19500_v46  ;;  %15442 = vmatprep.subr.mxu0 %v19441_v35 }
 0xcff   :  { %15485 = vmatprep.subr.mxu1 %v19513_v2  ;;  %15443 = vmatpush3.msra.mxu0 %v19441_v35 }
 0xd00   :  { %15486 = vmatpush3.msra.mxu1 %v19513_v2  ;;  %15444 = vmatprep.subr.mxu0 %v19451_v63 }
 0xd01   :  { %15487 = vmatprep.subr.mxu1 %v19528_v44  ;;  %15445 = vmatpush3.msra.mxu0 %v19451_v63 }
 0xd02   :  { %15488 = vmatpush3.msra.mxu1 %v19528_v44  ;;  %15446 = vmatprep.subr.mxu0 %v19498_v20 }
 0xd03   :  { %15489 = vmatprep.subr.mxu1 %v19544_v47  ;;  %15447 = vmatpush3.msra.mxu0 %v19498_v20 }
 0xd04   :  { %15490 = vmatpush3.msra.mxu1 %v19544_v47  ;;  %15448 = vmatprep.subr.mxu0 %v19511_v38 }
 0xd05   :  { %15491 = vmatprep.subr.mxu1 %v19555_v31  ;;  %15449 = vmatpush3.msra.mxu0 %v19511_v38 }
 0xd06   :  { %15492 = vmatpush3.msra.mxu1 %v19555_v31  ;;  %15450 = vmatprep.subr.mxu0 %v19526_v41 }
 0xd07   :  { %15493 = vmatprep.subr.mxu1 %v19569_v14  ;;  %15451 = vmatpush3.msra.mxu0 %v19526_v41 }
 0xd08   :  { %15494 = vmatpush3.msra.mxu1 %v19569_v14  ;;  %15452 = vmatprep.subr.mxu0 %v19541_v62 }
 0xd09   :  { %15495 = vmatprep.subr.mxu1 %v19585_v56  ;;  %15453 = vmatpush3.msra.mxu0 %v19541_v62 }
 0xd0a   :  { %15496 = vmatpush3.msra.mxu1 %v19585_v56  ;;  %15454 = vmatprep.subr.mxu0 %v19558_v7 }
 0xd0b   :  { %15497 = vmatprep.subr.mxu1 %v19602_v12  ;;  %15455 = vmatpush3.msra.mxu0 %v19558_v7 }
 0xd0c   :  { %15498 = vmatpush3.msra.mxu1 %v19602_v12  ;;  %15456 = vmatprep.subr.mxu0 %v19567_v19 }
 0xd0d   :  { %15499 = vmatprep.subr.mxu1 %v19618_v42  ;;  %15457 = vmatpush3.msra.mxu0 %v19567_v19 }
 0xd0e   :  { %15500 = vmatpush3.msra.mxu1 %v19618_v42  ;;  %15458 = vmatprep.subr.mxu0 %v19583_v15 }
 0xd0f   :  { %15501 = vmatprep.subr.mxu1 %v19629_v33  ;;  %15459 = vmatpush3.msra.mxu0 %v19583_v15 }
 0xd10   :  { %15502 = vmatpush3.msra.mxu1 %v19629_v33  ;;  %15460 = vmatprep.subr.mxu0 %v19600_v59 }
 0xd11   :  { %15503 = vmatprep.subr.mxu1 %v19644_v54  ;;  %15461 = vmatpush3.msra.mxu0 %v19600_v59 }
 0xd12   :  { %15504 = vmatpush3.msra.mxu1 %v19644_v54  ;;  %15462 = vmatprep.subr.mxu0 %v19615_v1 }
 0xd13   :  { %15506 = vmatmul.mubr.f32.vlgmr.msra.gmra.mxu1 %v10958_v40  ;;  %15543 = vmatprep.subr.mxu1 %v19408_v26 }
 0xd14   :  { %15463 = vmatpush3.msra.mxu0 %v19615_v1  ;;  %15544 = vmatpush3.msra.mxu1 %v19408_v26  ;;  %v20643_v26 = vld [vmem:[#allocation119_spill] sm:$0xff] }
 0xd15   :  { %15575 = vmatprep.mubr.f32.mxu1 %v19676_v32  ;;  %15464 = vmatprep.subr.mxu0 %v19633_v55 }
 0xd16   :  { %15545 = vmatprep.subr.mxu1 %v19416_v57  ;;  %15465 = vmatpush3.msra.mxu0 %v19633_v55 }
 0xd17   :  { %15546 = vmatpush3.msra.mxu1 %v19416_v57  ;;  %15466 = vmatprep.subr.mxu0 %v19642_v0  ;;  %v20644_v57 = vld [vmem:[#allocation120_spill] sm:$0xff] }
 0xd18   :  { %15547 = vmatprep.subr.mxu1 %v19426_v16  ;;  %15467 = vmatpush3.msra.mxu0 %v19642_v0 }
 0xd19   :  { %15548 = vmatpush3.msra.mxu1 %v19426_v16  ;;  %15468 = vmatprep.subr.mxu0 %v19655_v3  ;;  %v20646_v16 = vld [vmem:[#allocation24_spill] sm:$0xff] }
 0xd1a   :  { %15549 = vmatprep.subr.mxu1 %v19433_v23  ;;  %15469 = vmatpush3.msra.mxu0 %v19655_v3 }
 0xd1b   :  { %15550 = vmatpush3.msra.mxu1 %v19433_v23  ;;  %15471 = vmatmul.mubr.f32.vlgmr.msra.gmra.mxu0 %v19674_v6  ;;  %v20648_v23 = vld [vmem:[#allocation32_spill] sm:$0xff] }
 0xd1c   :  { %15508 = vmatprep.subr.mxu0 %v19438_v49  ;;  %15551 = vmatprep.subr.mxu1 %v19492_v18 }
 0xd1d   :  { %15509 = vmatpush3.msra.mxu0 %v19438_v49  ;;  %15540 = vmatprep.mubr.f32.mxu0 %v19676_v32  ;;  %v20649_v49 = vld [vmem:[#allocation35_spill] sm:$0xff] }
 0xd1e   :  { %15552 = vmatpush3.msra.mxu1 %v19492_v18  ;;  %15510 = vmatprep.subr.mxu0 %v19448_v37 }
 0xd1f   :  { %15553 = vmatprep.subr.mxu1 %v19500_v46  ;;  %15511 = vmatpush3.msra.mxu0 %v19448_v37 }
 0xd20   :  { %15554 = vmatpush3.msra.mxu1 %v19500_v46  ;;  %15512 = vmatprep.subr.mxu0 %v19460_v58 }
 0xd21   :  { %15555 = vmatprep.subr.mxu1 %v19513_v2  ;;  %15513 = vmatpush3.msra.mxu0 %v19460_v58 }
 0xd22   :  { %15556 = vmatpush3.msra.mxu1 %v19513_v2  ;;  %15514 = vmatprep.subr.mxu0 %v19469_v34 }
 0xd23   :  { %15557 = vmatprep.subr.mxu1 %v19528_v44  ;;  %15515 = vmatpush3.msra.mxu0 %v19469_v34 }
 0xd24   :  { %15558 = vmatpush3.msra.mxu1 %v19528_v44  ;;  %15516 = vmatprep.subr.mxu0 %v19508_v10 }
 0xd25   :  { %15559 = vmatprep.subr.mxu1 %v19544_v47  ;;  %15517 = vmatpush3.msra.mxu0 %v19508_v10 }
 0xd26   :  { %15560 = vmatpush3.msra.mxu1 %v19544_v47  ;;  %15518 = vmatprep.subr.mxu0 %v19523_v28 }
 0xd27   :  { %15561 = vmatprep.subr.mxu1 %v19555_v31  ;;  %15519 = vmatpush3.msra.mxu0 %v19523_v28 }
 0xd28   :  { %15562 = vmatpush3.msra.mxu1 %v19555_v31  ;;  %15520 = vmatprep.subr.mxu0 %v19538_v39 }
 0xd29   :  { %15563 = vmatprep.subr.mxu1 %v19569_v14  ;;  %15521 = vmatpush3.msra.mxu0 %v19538_v39 }
 0xd2a   :  { %15564 = vmatpush3.msra.mxu1 %v19569_v14  ;;  %15522 = vmatprep.subr.mxu0 %v19553_v60 }
 0xd2b   :  { %15565 = vmatprep.subr.mxu1 %v19585_v56  ;;  %15523 = vmatpush3.msra.mxu0 %v19553_v60 }
 0xd2c   :  { %15566 = vmatpush3.msra.mxu1 %v19585_v56  ;;  %15524 = vmatprep.subr.mxu0 %v19573_v53 }
 0xd2d   :  { %15567 = vmatprep.subr.mxu1 %v19602_v12  ;;  %15525 = vmatpush3.msra.mxu0 %v19573_v53 }
 0xd2e   :  { %15568 = vmatpush3.msra.mxu1 %v19602_v12  ;;  %15526 = vmatprep.subr.mxu0 %v20643_v26 }
 0xd2f   :  { %15569 = vmatprep.subr.mxu1 %v19618_v42  ;;  %15527 = vmatpush3.msra.mxu0 %v20643_v26 }
 0xd30   :  { %15570 = vmatpush3.msra.mxu1 %v19618_v42  ;;  %15528 = vmatprep.subr.mxu0 %v20644_v57 }
 0xd31   :  { %15571 = vmatprep.subr.mxu1 %v19629_v33  ;;  %15529 = vmatpush3.msra.mxu0 %v20644_v57 }
 0xd32   :  { %15572 = vmatpush3.msra.mxu1 %v19629_v33  ;;  %15530 = vmatprep.subr.mxu0 %v20645_v13 }
 0xd33   :  { %15573 = vmatprep.subr.mxu1 %v19644_v54  ;;  %15531 = vmatpush3.msra.mxu0 %v20645_v13 }
 0xd34   :  { %15574 = vmatpush3.msra.mxu1 %v19644_v54  ;;  %15532 = vmatprep.subr.mxu0 %v20646_v16 }
 0xd35   :  { %15576 = vmatmul.mubr.f32.vlgmr.msra.gmra.mxu1 %v19671_v61  ;;  %15533 = vmatpush3.msra.mxu0 %v20646_v16 }
 0xd36   :  { %15534 = vmatprep.subr.mxu0 %v20647_v30 }
 0xd37   :  { %15535 = vmatpush3.msra.mxu0 %v20647_v30 }
 0xd38   :  { %15536 = vmatprep.subr.mxu0 %v20648_v23 }
 0xd39   :  { %15537 = vmatpush3.msra.mxu0 %v20648_v23 }
 0xd3a   :  { %15538 = vmatprep.subr.mxu0 %v20649_v49 }
 0xd3b   :  { %15539 = vmatpush3.msra.mxu0 %v20649_v49 }
 0xd3c   :  { %15541 = vmatmul.mubr.f32.vlgmr.msra.gmra.mxu0 %v19671_v61 }
 0xdb2   :  { %v15437_v37 = vpop.f32.mrf.mxu1 }
 0xdb4   :  { %v11113_v34 = vpop.f32.mrf.mxu1 }
 0xdba   :  { %v15402_v35 = vpop.f32.mrf.mxu0 }
 0xdbb   :  { %v11120_v18 = vadd.f32 %v15437_v37, %v15402_v35 }
 0xdbc   :  { %v10952_v63 = vpop.f32.mrf.mxu0 }
 0xdbd   :  { %v11114_v10 = vadd.f32 %v11113_v34, %v10952_v63 }
 0xdd3   :  { %v15507_v20 = vpop.f32.mrf.mxu1 }
 0xdd5   :  { %v11319_v28 = vpop.f32.mrf.mxu1 }
 0xddb   :  { %v15472_v58 = vpop.f32.mrf.mxu0 }
 0xddc   :  { %v11231_v38 = vadd.f32 %v15472_v58, %v11120_v18 }
 0xddd   :  { %v11223_v46 = vpop.f32.mrf.mxu0 }
 0xdde   :  { %v11224_v2 = vadd.f32 %v11223_v46, %v11114_v10  ;;  %v11328_v41 = vadd.f32 %v15507_v20, %v11231_v38 }
 0xde0   :  { %v11320_v47 = vadd.f32 %v11319_v28, %v11224_v2 }
 0xdf5   :  { %v15577_v44 = vpop.f32.mrf.mxu1 }
 0xdf7   :  { %v11539_v19 = vpop.f32.mrf.mxu1 }
 0xdfc   :  { %v15542_v39 = vpop.f32.mrf.mxu0 }
 0xdfd   :  { %v11453_v62 = vadd.f32 %v15542_v39, %v11328_v41 }
 0xdfe   :  { %v11446_v60 = vpop.f32.mrf.mxu0 }
 0xdff   :  { %v11546_v31 = vadd.f32 %v15577_v44, %v11453_v62  ;;  %v11447_v7 = vadd.f32 %v11446_v60, %v11320_v47 }
 0xe01   :  { %11552 = vst.msk [vmem:[%s19839_s15 + $0x8] sm:$0x3f] %vm11551_vm12, %v11546_v31  ;;  %v11540_v14 = vadd.f32 %v11539_v19, %v11447_v7 }
 0xe03   :  { %11550 = vst.msk [vmem:[%s19839_s15] sm:$0xff] %vm11549_vm13, %v11540_v14 }
 0xe04   :  { %11557 = vsyncpa [#allocation3], 1 }
 0xe05   :  { %11558 = vsyncpa [#allocation5], 1 }
 0xe06   :  { %11559 = vsyncpa [#allocation8], 1 }

</bundles_post_ra>
